<compile_context>
chip_gen: v6e
topology: v6e:2x2x1
jax: 0.10.0
libtpu: 0.0.40
codegen_flags: <defaults>
</compile_context>

<pallas_src>
import functools
import math

import jax
import jax.numpy as jnp
import numpy as np
from jax.experimental import pallas as pl
from jax.experimental.pallas import tpu as pltpu


# ----------------------------------------------------------------------------
# helpers
# ----------------------------------------------------------------------------
def _round_up(x, m):
    return ((x + m - 1) // m) * m


def _lane(d):
    return _round_up(max(int(d), 1), 128)


def _vmem_limit_bytes():
    """Generation-aware scoped-VMEM limit (~75% of physical VMEM)."""
    try:
        cap = int(pltpu.get_tpu_info().vmem_capacity_bytes)
    except Exception:                       # conservative fallback (v7x size)
        cap = 64 * 1024 * 1024
    return int(cap * 3 // 4)


def _padding_dims(L, region_size, region_num, min_region_num, min_region_ratio):
    """Static (trace-time) replica of CrossRegionAttntion.padding shape math."""
    H = W = int(math.ceil(math.sqrt(L)))
    if region_size is not None:
        _n = (-H) % region_size
        H, W = H + _n, W + _n
        rnum = H // region_size
        rsize = region_size
    else:
        _n = (-H) % region_num
        H, W = H + _n, W + _n
        rsize = H // region_num
        rnum = region_num
    add_length = H * W - L
    if add_length > L / (min_region_ratio + 1e-8) or L < min_region_num:
        H = W = int(math.ceil(math.sqrt(L)))
        _n = (-H) % 2
        H, W = H + _n, W + _n
        add_length = H * W - L
        rsize = H
        rnum = H // rsize
    return H, W, add_length, rnum, rsize


# ----------------------------------------------------------------------------
# Kernel 1: gating (logits, softmaxes, fused recomb weights) + qkv projection
# ----------------------------------------------------------------------------
def _gate_qkv_kernel(x_ref, phi_ref, wq_ref, bq_ref, wkv_ref, bkv_ref,
                     q_ref, kv_ref, w2_ref, *, P, K):
    tw = x_ref.shape[1]

    # --- gating logits: ONE MXU pass over all P*tw region tokens -------------
    xs = [x_ref[p] for p in range(P)]                      # P x (tw, C)
    xa = jnp.concatenate(xs, axis=0)                       # (P*tw, C)
    lgs_all = jnp.dot(xa, phi_ref[...],
                      preferred_element_type=jnp.float32)  # (P*tw, K) f32
    lgs = [lgs_all[p * tw:(p + 1) * tw] for p in range(P)]  # P x (tw, K)

    # group statistics over the P region tokens (elementwise across slices)
    lmax, lmin = lgs[0], lgs[0]
    for p in range(1, P):
        lmax = jnp.maximum(lmax, lgs[p])
        lmin = jnp.minimum(lmin, lgs[p])
    ce = [jnp.exp(lgs[p] - lmax) for p in range(P)]
    csum = ce[0]
    for p in range(1, P):
        csum = csum + ce[p]
    inv_csum = 1.0 / csum                                  # exact (perf review)
    inv_rng = 1.0 / (lmax - lmin + 1e-8)

    # per-token weights + combine-weighted slot summaries.  The P- and K-deep
    # contractions are far too shallow for the MXU -> unrolled VPU FMAs.
    acc = [None] * K
    for p in range(P):
        combine_p = ce[p] * inv_csum                       # softmax over P
        dmax = jnp.max(lgs[p], axis=-1, keepdims=True)
        de = jnp.exp(lgs[p] - dmax)
        dispatch_p = de / jnp.sum(de, axis=-1, keepdims=True)   # softmax over K
        dmm_p = (lgs[p] - lmin) * inv_rng                  # min-max over P
        w2_ref[p] = (dmm_p * dispatch_p).astype(w2_ref.dtype)   # (tw, K)
        xp = xs[p].astype(jnp.float32)                     # (tw, C)
        for k in range(K):
            upd = combine_p[:, k:k + 1] * xp
            acc[k] = upd if acc[k] is None else acc[k] + upd

    # --- fused qkv projection (scale pre-folded into wq/bq host-side) --------
    a = jnp.concatenate(acc, axis=0).astype(x_ref.dtype)   # (K*tw, C)
    qf = jnp.dot(a, wq_ref[...], preferred_element_type=jnp.float32) + bq_ref[...]
    kvf = jnp.dot(a, wkv_ref[...], preferred_element_type=jnp.float32) + bkv_ref[...]
    for k in range(K):
        q_ref[k] = qf[k * tw:(k + 1) * tw].astype(q_ref.dtype)
        kv_ref[k] = kvf[k * tw:(k + 1) * tw].astype(kv_ref.dtype)


def _gate_qkv(x_t, phi, wq, bq, wkv, bkv):
    P, nW, C = x_t.shape
    K = phi.shape[1]
    chd = wq.shape[1]
    in_sz = x_t.dtype.itemsize
    out_sz = wq.dtype.itemsize
    vlim = _vmem_limit_bytes()

    # honest, padded-shape VMEM accounting per region row (perf review)
    per_w = (2 * P * _lane(C) * in_sz                            # x block (2-buf)
             + 2 * K * (_lane(chd) + _lane(2 * chd)) * out_sz    # q + kv blocks
             + 2 * P * _lane(K) * 4                              # w2 block (padded)
             + 2 * P * _lane(C) * 4                              # concat + f32 copies
             + 4 * P * _lane(K) * 4                              # logits/exp temps
             + 2 * K * _lane(C) * 4                              # slot accumulators
             + K * (_lane(chd) + _lane(2 * chd)) * 4)            # qf / kvf temps
    budget = vlim // 2
    cap = max(8, (budget // per_w) // 8 * 8)
    tw = nW if cap >= nW else cap

    kern = functools.partial(_gate_qkv_kernel, P=P, K=K)
    return pl.pallas_call(
        kern,
        out_shape=(
            jax.ShapeDtypeStruct((K, nW, chd), wq.dtype),        # q (scaled)
            jax.ShapeDtypeStruct((K, nW, 2 * chd), wq.dtype),    # k, v
            jax.ShapeDtypeStruct((P, nW, K), jnp.float32),       # w2 = dmm*dispatch
        ),
        grid=(pl.cdiv(nW, tw),),
        in_specs=[
            pl.BlockSpec((P, tw, C), lambda i: (0, i, 0)),
            pl.BlockSpec((C, K), lambda i: (0, 0)),
            pl.BlockSpec((C, chd), lambda i: (0, 0)),
            pl.BlockSpec((1, chd), lambda i: (0, 0)),
            pl.BlockSpec((C, 2 * chd), lambda i: (0, 0)),
            pl.BlockSpec((1, 2 * chd), lambda i: (0, 0)),
        ],
        out_specs=(
            pl.BlockSpec((K, tw, chd), lambda i: (0, i, 0)),
            pl.BlockSpec((K, tw, 2 * chd), lambda i: (0, i, 0)),
            pl.BlockSpec((P, tw, K), lambda i: (0, i, 0)),
        ),
        compiler_params=pltpu.CompilerParams(
            dimension_semantics=("parallel",),
            vmem_limit_bytes=vlim),
    )(x_t, phi, wq, bq, wkv, bkv)


# ----------------------------------------------------------------------------
# Kernel 2: InnerAttention over the K slot tokens (seq = nW regions), with the
#           dispatch-weighted recombination fused into the epilogue.
# ----------------------------------------------------------------------------
def _attn_recomb_kernel(q_ref, kv_ref, w2_ref, wproj_ref, bproj_ref, y_ref,
                        *, num_heads, head_dim, P):
    K, tq, chd = q_ref.shape
    C = y_ref.shape[-1]
    mdt = q_ref.dtype

    q = q_ref[...]                                         # (K, tq, chd)
    kv = kv_ref[...]                                       # (K, nW, 2*chd), resident

    # per-head attention batched over the K slot tokens; projection accumulated
    # per head into an f32 value (no outs list / lane concat).
    out = jnp.zeros((K, tq, C), jnp.float32)
    for h in range(num_heads):
        lo = h * head_dim
        hi = lo + head_dim
        qh = q[:, :, lo:hi]                                # (K, tq, hd)
        kh = kv[:, :, lo:hi]                               # (K, nW, hd)
        vh = kv[:, :, chd + lo:chd + hi]                   # (K, nW, hd)
        s = jnp.einsum("kqd,kmd->kqm", qh, kh,
                       preferred_element_type=jnp.float32)  # (K, tq, nW)
        smax = jnp.max(s, axis=-1, keepdims=True)
        e = jnp.exp(s - smax)
        p = e / jnp.sum(e, axis=-1, keepdims=True)          # exact softmax (f32)
        ao = jnp.einsum("kqm,kmd->kqd", p.astype(mdt), vh,
                        preferred_element_type=jnp.float32)  # (K, tq, hd)
        wp = jnp.broadcast_to(wproj_ref[lo:hi, :], (K, head_dim, C))
        out = out + jnp.einsum("kqd,kdc->kqc", ao.astype(mdt), wp,
                               preferred_element_type=jnp.float32)
    out = out + bproj_ref[...]                              # (K, tq, C)

    # fused recombination: y[p, w, :] = sum_k w2[p, w, k] * out[k, w, :]
    for pi in range(P):
        w2p = w2_ref[pi]                                    # (tq, K) f32
        yp = w2p[:, 0:1] * out[0]
        for k in range(1, K):
            yp = yp + w2p[:, k:k + 1] * out[k]
        y_ref[pi] = yp.astype(y_ref.dtype)


def _attn_recomb(q, kv, w2, wproj, bproj, *, num_heads, head_dim):
    K, nW, chd = q.shape
    P = w2.shape[0]
    C = wproj.shape[1]
    sz = q.dtype.itemsize
    vlim = _vmem_limit_bytes()

    fixed = (2 * K * _round_up(nW, 8) * _lane(2 * chd) * sz      # resident k/v
             + _round_up(chd, 8) * _lane(C) * 4 + _lane(C) * 4)  # weights
    per_q = (2 * K * _lane(chd) * sz                             # q block
             + 2 * P * _lane(K) * 4                              # w2 block
             + 2 * P * _lane(C) * 4                              # y block
             + 3 * K * _lane(nW) * 4                             # score-sized temps
             + 3 * K * _lane(C) * 4)                             # output accumulator
    budget = int(vlim * 0.6)
    cap = max(8, ((budget - fixed) // per_q) // 8 * 8)
    tq = nW if cap >= nW else cap

    kern = functools.partial(_attn_recomb_kernel, num_heads=num_heads,
                             head_dim=head_dim, P=P)
    return pl.pallas_call(
        kern,
        out_shape=jax.ShapeDtypeStruct((P, nW, C), jnp.float32),
        grid=(pl.cdiv(nW, tq),),
        in_specs=[
            pl.BlockSpec((K, tq, chd), lambda i: (0, i, 0)),
            pl.BlockSpec((K, nW, 2 * chd), lambda i: (0, 0, 0)),   # resident
            pl.BlockSpec((P, tq, K), lambda i: (0, i, 0)),
            pl.BlockSpec((chd, C), lambda i: (0, 0)),
            pl.BlockSpec((1, C), lambda i: (0, 0)),
        ],
        out_specs=pl.BlockSpec((P, tq, C), lambda i: (0, i, 0)),
        compiler_params=pltpu.CompilerParams(
            dimension_semantics=("parallel",),
            vmem_limit_bytes=vlim),
    )(q, kv, w2, wproj, bproj)


# ----------------------------------------------------------------------------
# Full forward (glue in plain JAX)
# ----------------------------------------------------------------------------
def cross_region_attention(x, params, *, num_heads=8, head_dim=None,
                           region_size=None, region_num=8,
                           min_region_num=0, min_region_ratio=0.0,
                           matmul_dtype=jnp.bfloat16):
    B, L, C = x.shape
    if head_dim is None:
        head_dim = C // num_heads
    chd = num_heads * head_dim
    scale = head_dim ** -0.5
    mdt = jnp.dtype(matmul_dtype)

    H, W, add_length, _, rsize = _padding_dims(
        L, region_size, region_num, min_region_num, min_region_ratio)
    if add_length > 0:
        x = jnp.concatenate([x, jnp.zeros((B, add_length, C), x.dtype)], axis=1)

    nr = H // rsize
    P = rsize * rsize
    nW = B * nr * nr

    # region_partition in token-major layout: (P, nW, C), channels on lanes.
    xg = x.reshape(B, nr, rsize, nr, rsize, C)
    x_t = xg.transpose(2, 4, 0, 1, 3, 5).reshape(P, nW, C).astype(mdt)

    # split qkv weights; fold the attention scale into the Q projection.
    wqkv = params["wqkv"].astype(jnp.float32)
    bqkv = params["bqkv"].astype(jnp.float32)
    wq = (wqkv[:, :chd] * scale).astype(mdt)
    bq = (bqkv[:chd] * scale).reshape(1, chd)
    wkv = wqkv[:, chd:].astype(mdt)
    bkv = bqkv[chd:].reshape(1, 2 * chd)
    phi = params["phi"].astype(mdt)
    wproj = params["wproj"].astype(mdt)
    bproj = params["bproj"].astype(jnp.float32).reshape(1, C)

    # kernel 1: gating + fused recomb weights + fused qkv projection
    q, kv, w2 = _gate_qkv(x_t, phi, wq, bq, wkv, bkv)

    # kernel 2: InnerAttention (+ fused recombination epilogue)
    y = _attn_recomb(q, kv, w2, wproj, bproj,
                     num_heads=num_heads, head_dim=head_dim)     # (P, nW, C)

    # region_reverse from token-major layout
    y6 = y.reshape(rsize, rsize, B, nr, nr, C).transpose(2, 3, 0, 4, 1, 5)
    out = y6.reshape(B, H * W, C).astype(x.dtype)
    if add_length > 0:
        out = out[:, :-add_length]
    return out


# ----------------------------------------------------------------------------
# Pure-JAX reference (mirrors the PyTorch module) for correctness checks
# ----------------------------------------------------------------------------
def _inner_attention_ref(x, params, num_heads, head_dim, scale):
    B_, N, C = x.shape
    qkv = x @ params["wqkv"] + params["bqkv"]
    qkv = qkv.reshape(B_, N, 3, num_heads, head_dim).transpose(2, 0, 3, 1, 4)
    q, k, v = qkv[0], qkv[1], qkv[2]
    q = q * scale
    attn = jnp.einsum("bhnd,bhmd->bhnm", q, k)
    attn = jax.nn.softmax(attn, axis=-1)
    o = jnp.einsum("bhnm,bhmd->bhnd", attn, v)
    o = o.transpose(0, 2, 1, 3).reshape(B_, N, num_heads * head_dim)
    return o @ params["wproj"] + params["bproj"]


def reference_forward(x, params, *, num_heads=8, head_dim=None,
                      region_size=None, region_num=8,
                      min_region_num=0, min_region_ratio=0.0):
    B, L, C = x.shape
    if head_dim is None:
        head_dim = C // num_heads
    scale = head_dim ** -0.5
    H, W, add_length, _, rsize = _padding_dims(
        L, region_size, region_num, min_region_num, min_region_ratio)
    if add_length > 0:
        x = jnp.concatenate([x, jnp.zeros((B, add_length, C), x.dtype)], axis=1)
    xg = x.reshape(B, H, W, C)
    xr = (xg.reshape(B, H // rsize, rsize, W // rsize, rsize, C)
            .transpose(0, 1, 3, 2, 4, 5)
            .reshape(-1, rsize * rsize, C)).astype(jnp.float32)

    logits = jnp.einsum("wpc,cn->wpn", xr, params["phi"]).transpose(0, 2, 1)
    combine = jax.nn.softmax(logits, axis=-1)
    dispatch = jax.nn.softmax(logits, axis=1)
    lmin = logits.min(axis=-1, keepdims=True)
    lmax = logits.max(axis=-1, keepdims=True)
    dmm = (logits - lmin) / (lmax - lmin + 1e-8)

    attn_in = jnp.einsum("wpc,wnp->wnc", xr, combine).transpose(1, 0, 2)
    ao = _inner_attention_ref(attn_in, params, num_heads, head_dim,
                              scale).transpose(1, 0, 2)
    y = jnp.einsum("wnc,wnp->wnpc", ao, dmm)
    y = jnp.einsum("wnpc,wnp->wnpc", y, dispatch).sum(axis=1)

    yg = (y.reshape(B, H // rsize, W // rsize, rsize, rsize, C)
           .transpose(0, 1, 3, 2, 4, 5)
           .reshape(B, H, W, C))
    out = yg.reshape(B, H * W, C)
    if add_length > 0:
        out = out[:, :-add_length]
    return out


# ----------------------------------------------------------------------------
if __name__ == "__main__":
    B, L, C = 2, 256, 32          # -> H=W=16, region_size=2, 128 regions of 4 tokens
    num_heads = 8
    head_dim = C // num_heads
    crmsa_k = 3

    key = jax.random.PRNGKey(0)
    kx, k1, k2, k3, k4, k5 = jax.random.split(key, 6)
    x = jax.random.normal(kx, (B, L, C), jnp.float32)

    chd = num_heads * head_dim
    params = {
        "phi":   jax.random.normal(k1, (C, crmsa_k), jnp.float32) / math.sqrt(C),
        "wqkv":  jax.random.normal(k2, (C, 3 * chd), jnp.float32) / math.sqrt(C),
        "bqkv":  jax.random.normal(k3, (3 * chd,), jnp.float32) * 0.02,
        "wproj": jax.random.normal(k4, (chd, C), jnp.float32) / math.sqrt(chd),
        "bproj": jax.random.normal(k5, (C,), jnp.float32) * 0.02,
    }

    with jax.default_matmul_precision("highest"):
        ref = jax.block_until_ready(
            reference_forward(x, params, num_heads=num_heads,
                              head_dim=head_dim, region_num=8))

    # f32 MXU path (tighter correctness check)
    out32 = jax.block_until_ready(
        cross_region_attention(x, params, num_heads=num_heads, head_dim=head_dim,
                               region_num=8, matmul_dtype=jnp.float32))
    assert out32.shape == (B, L, C), out32.shape
    np.testing.assert_allclose(np.asarray(out32), np.asarray(ref),
                               rtol=5e-2, atol=5e-2)

    # bf16 MXU operands / f32 accumulation (per-generation perf guidance)
    out16 = jax.block_until_ready(
        cross_region_attention(x, params, num_heads=num_heads, head_dim=head_dim,
                               region_num=8, matmul_dtype=jnp.bfloat16))
    np.testing.assert_allclose(np.asarray(out16), np.asarray(ref),
                               rtol=1e-1, atol=1e-1)

    print("KERNEL_OK")
</pallas_src>

<mosaic_0001>
module attributes {stable_mosaic.version = 11 : i64} {
  func.func @_gate_qkv_kernel(%arg0: i32, %arg1: memref<4x128x32xf32, #tpu.memory_space<vmem>>, %arg2: memref<32x3xf32, #tpu.memory_space<vmem>>, %arg3: memref<32x32xf32, #tpu.memory_space<vmem>>, %arg4: memref<1x32xf32, #tpu.memory_space<vmem>>, %arg5: memref<32x64xf32, #tpu.memory_space<vmem>>, %arg6: memref<1x64xf32, #tpu.memory_space<vmem>>, %arg7: memref<3x128x32xf32, #tpu.memory_space<vmem>>, %arg8: memref<3x128x64xf32, #tpu.memory_space<vmem>>, %arg9: memref<4x128x3xf32, #tpu.memory_space<vmem>>) attributes {dimension_semantics = [#tpu.dimension_semantics<parallel>], iteration_bounds = array<i64: 1>, scalar_prefetch = 0 : i64, scratch_operands = 0 : i64, tpu.core_type = #tpu.core_type<tc>, window_params = [{transform_indices = @transform_0, window_bounds = array<i64: 4, 128, 32>}, {pipeline_mode = #tpu.pipeline_mode<synchronous>, transform_indices = @transform_1, window_bounds = array<i64: 32, 3>}, {pipeline_mode = #tpu.pipeline_mode<synchronous>, transform_indices = @transform_2, window_bounds = array<i64: 32, 32>}, {pipeline_mode = #tpu.pipeline_mode<synchronous>, transform_indices = @transform_3, window_bounds = array<i64: 1, 32>}, {pipeline_mode = #tpu.pipeline_mode<synchronous>, transform_indices = @transform_4, window_bounds = array<i64: 32, 64>}, {pipeline_mode = #tpu.pipeline_mode<synchronous>, transform_indices = @transform_5, window_bounds = array<i64: 1, 64>}, {transform_indices = @transform_6, window_bounds = array<i64: 3, 128, 32>}, {transform_indices = @transform_7, window_bounds = array<i64: 3, 128, 64>}, {transform_indices = @transform_8, window_bounds = array<i64: 4, 128, 3>}]} {
    %c0 = arith.constant 0 : index
    %c0_0 = arith.constant 0 : index
    %c0_1 = arith.constant 0 : index
    %0 = vector.load %arg1[%c0, %c0_0, %c0_1] : memref<4x128x32xf32, #tpu.memory_space<vmem>>, vector<1x128x32xf32>
    %1 = vector.shape_cast %0 : vector<1x128x32xf32> to vector<128x32xf32>
    %c1 = arith.constant 1 : index
    %c0_2 = arith.constant 0 : index
    %c0_3 = arith.constant 0 : index
    %2 = vector.load %arg1[%c1, %c0_2, %c0_3] : memref<4x128x32xf32, #tpu.memory_space<vmem>>, vector<1x128x32xf32>
    %3 = vector.shape_cast %2 : vector<1x128x32xf32> to vector<128x32xf32>
    %c2 = arith.constant 2 : index
    %c0_4 = arith.constant 0 : index
    %c0_5 = arith.constant 0 : index
    %4 = vector.load %arg1[%c2, %c0_4, %c0_5] : memref<4x128x32xf32, #tpu.memory_space<vmem>>, vector<1x128x32xf32>
    %5 = vector.shape_cast %4 : vector<1x128x32xf32> to vector<128x32xf32>
    %c3 = arith.constant 3 : index
    %c0_6 = arith.constant 0 : index
    %c0_7 = arith.constant 0 : index
    %6 = vector.load %arg1[%c3, %c0_6, %c0_7] : memref<4x128x32xf32, #tpu.memory_space<vmem>>, vector<1x128x32xf32>
    %7 = vector.shape_cast %6 : vector<1x128x32xf32> to vector<128x32xf32>
    %8 = tpu.concatenate %1, %3, %5, %7 in 0 : vector<128x32xf32>, vector<128x32xf32>, vector<128x32xf32>, vector<128x32xf32> -> vector<512x32xf32>
    %c0_8 = arith.constant 0 : index
    %c0_9 = arith.constant 0 : index
    %9 = vector.load %arg2[%c0_8, %c0_9] : memref<32x3xf32, #tpu.memory_space<vmem>>, vector<32x3xf32>
    %cst = arith.constant dense<0.000000e+00> : vector<512x3xf32>
    %10 = tpu.matmul %8, %9, %cst {dimension_numbers = #tpu.dot_dimension_numbers<[1], [0], [0], [1], [0, 0, 1, 1], [], []>} : vector<512x32xf32>, vector<32x3xf32>, vector<512x3xf32> -> vector<512x3xf32>
    %11 = vector.extract_strided_slice %10 {offsets = [0, 0], sizes = [128, 3], strides = [1, 1]} : vector<512x3xf32> to vector<128x3xf32>
    %12 = vector.extract_strided_slice %10 {offsets = [128, 0], sizes = [128, 3], strides = [1, 1]} : vector<512x3xf32> to vector<128x3xf32>
    %13 = vector.extract_strided_slice %10 {offsets = [256, 0], sizes = [128, 3], strides = [1, 1]} : vector<512x3xf32> to vector<128x3xf32>
    %14 = vector.extract_strided_slice %10 {offsets = [384, 0], sizes = [128, 3], strides = [1, 1]} : vector<512x3xf32> to vector<128x3xf32>
    %15 = arith.maximumf %11, %12 : vector<128x3xf32>
    %16 = arith.minimumf %11, %12 : vector<128x3xf32>
    %17 = arith.maximumf %15, %13 : vector<128x3xf32>
    %18 = arith.minimumf %16, %13 : vector<128x3xf32>
    %19 = arith.maximumf %17, %14 : vector<128x3xf32>
    %20 = arith.minimumf %18, %14 : vector<128x3xf32>
    %21 = arith.subf %11, %19 : vector<128x3xf32>
    %22 = math.exp %21 : vector<128x3xf32>
    %23 = arith.subf %12, %19 : vector<128x3xf32>
    %24 = math.exp %23 : vector<128x3xf32>
    %25 = arith.subf %13, %19 : vector<128x3xf32>
    %26 = math.exp %25 : vector<128x3xf32>
    %27 = arith.subf %14, %19 : vector<128x3xf32>
    %28 = math.exp %27 : vector<128x3xf32>
    %29 = arith.addf %22, %24 : vector<128x3xf32>
    %30 = arith.addf %29, %26 : vector<128x3xf32>
    %31 = arith.addf %30, %28 : vector<128x3xf32>
    %cst_10 = arith.constant 1.000000e+00 : f32
    %32 = vector.broadcast %cst_10 : f32 to vector<128x3xf32>
    %33 = arith.divf %32, %31 : vector<128x3xf32>
    %34 = arith.subf %19, %20 : vector<128x3xf32>
    %cst_11 = arith.constant 9.99999993E-9 : f32
    %35 = vector.broadcast %cst_11 : f32 to vector<128x3xf32>
    %36 = arith.addf %34, %35 : vector<128x3xf32>
    %cst_12 = arith.constant 1.000000e+00 : f32
    %37 = vector.broadcast %cst_12 : f32 to vector<128x3xf32>
    %38 = arith.divf %37, %36 : vector<128x3xf32>
    %39 = arith.mulf %22, %33 : vector<128x3xf32>
    %cst_13 = arith.constant dense<0xFF800000> : vector<128xf32>
    %40 = vector.multi_reduction <maximumf>, %11, %cst_13 [1] : vector<128x3xf32> to vector<128xf32>
    %41 = vector.shape_cast %40 : vector<128xf32> to vector<128x1xf32>
    %42 = vector.broadcast %41 : vector<128x1xf32> to vector<128x3xf32>
    %43 = arith.subf %11, %42 : vector<128x3xf32>
    %44 = math.exp %43 : vector<128x3xf32>
    %cst_14 = arith.constant dense<0.000000e+00> : vector<128xf32>
    %45 = vector.multi_reduction <add>, %44, %cst_14 [1] : vector<128x3xf32> to vector<128xf32>
    %46 = vector.shape_cast %45 : vector<128xf32> to vector<128x1xf32>
    %47 = vector.broadcast %46 : vector<128x1xf32> to vector<128x3xf32>
    %48 = arith.divf %44, %47 : vector<128x3xf32>
    %49 = arith.subf %11, %20 : vector<128x3xf32>
    %50 = arith.mulf %49, %38 : vector<128x3xf32>
    %51 = arith.mulf %50, %48 : vector<128x3xf32>
    %c0_15 = arith.constant 0 : index
    %c0_16 = arith.constant 0 : index
    %c0_17 = arith.constant 0 : index
    %52 = vector.load %arg9[%c0_15, %c0_16, %c0_17] : memref<4x128x3xf32, #tpu.memory_space<vmem>>, vector<1x128x3xf32>
    %53 = vector.shape_cast %52 : vector<1x128x3xf32> to vector<128x3xf32>
    %54 = vector.shape_cast %51 : vector<128x3xf32> to vector<1x128x3xf32>
    tpu.vector_store %arg9[%c0_15, %c0_16, %c0_17], %54 {strides = array<i32>} : memref<4x128x3xf32, #tpu.memory_space<vmem>>, vector<1x128x3xf32>,
    %55 = vector.extract_strided_slice %39 {offsets = [0, 0], sizes = [128, 1], strides = [1, 1]} : vector<128x3xf32> to vector<128x1xf32>
    %56 = vector.broadcast %55 : vector<128x1xf32> to vector<128x32xf32>
    %57 = arith.mulf %56, %1 : vector<128x32xf32>
    %58 = vector.extract_strided_slice %39 {offsets = [0, 1], sizes = [128, 1], strides = [1, 1]} : vector<128x3xf32> to vector<128x1xf32>
    %59 = vector.broadcast %58 : vector<128x1xf32> to vector<128x32xf32>
    %60 = arith.mulf %59, %1 : vector<128x32xf32>
    %61 = vector.extract_strided_slice %39 {offsets = [0, 2], sizes = [128, 1], strides = [1, 1]} : vector<128x3xf32> to vector<128x1xf32>
    %62 = vector.broadcast %61 : vector<128x1xf32> to vector<128x32xf32>
    %63 = arith.mulf %62, %1 : vector<128x32xf32>
    %64 = arith.mulf %24, %33 : vector<128x3xf32>
    %cst_18 = arith.constant dense<0xFF800000> : vector<128xf32>
    %65 = vector.multi_reduction <maximumf>, %12, %cst_18 [1] : vector<128x3xf32> to vector<128xf32>
    %66 = vector.shape_cast %65 : vector<128xf32> to vector<128x1xf32>
    %67 = vector.broadcast %66 : vector<128x1xf32> to vector<128x3xf32>
    %68 = arith.subf %12, %67 : vector<128x3xf32>
    %69 = math.exp %68 : vector<128x3xf32>
    %cst_19 = arith.constant dense<0.000000e+00> : vector<128xf32>
    %70 = vector.multi_reduction <add>, %69, %cst_19 [1] : vector<128x3xf32> to vector<128xf32>
    %71 = vector.shape_cast %70 : vector<128xf32> to vector<128x1xf32>
    %72 = vector.broadcast %71 : vector<128x1xf32> to vector<128x3xf32>
    %73 = arith.divf %69, %72 : vector<128x3xf32>
    %74 = arith.subf %12, %20 : vector<128x3xf32>
    %75 = arith.mulf %74, %38 : vector<128x3xf32>
    %76 = arith.mulf %75, %73 : vector<128x3xf32>
    %c1_20 = arith.constant 1 : index
    %c0_21 = arith.constant 0 : index
    %c0_22 = arith.constant 0 : index
    %77 = vector.load %arg9[%c1_20, %c0_21, %c0_22] : memref<4x128x3xf32, #tpu.memory_space<vmem>>, vector<1x128x3xf32>
    %78 = vector.shape_cast %77 : vector<1x128x3xf32> to vector<128x3xf32>
    %79 = vector.shape_cast %76 : vector<128x3xf32> to vector<1x128x3xf32>
    tpu.vector_store %arg9[%c1_20, %c0_21, %c0_22], %79 {strides = array<i32>} : memref<4x128x3xf32, #tpu.memory_space<vmem>>, vector<1x128x3xf32>,
    %80 = vector.extract_strided_slice %64 {offsets = [0, 0], sizes = [128, 1], strides = [1, 1]} : vector<128x3xf32> to vector<128x1xf32>
    %81 = vector.broadcast %80 : vector<128x1xf32> to vector<128x32xf32>
    %82 = arith.mulf %81, %3 : vector<128x32xf32>
    %83 = arith.addf %57, %82 : vector<128x32xf32>
    %84 = vector.extract_strided_slice %64 {offsets = [0, 1], sizes = [128, 1], strides = [1, 1]} : vector<128x3xf32> to vector<128x1xf32>
    %85 = vector.broadcast %84 : vector<128x1xf32> to vector<128x32xf32>
    %86 = arith.mulf %85, %3 : vector<128x32xf32>
    %87 = arith.addf %60, %86 : vector<128x32xf32>
    %88 = vector.extract_strided_slice %64 {offsets = [0, 2], sizes = [128, 1], strides = [1, 1]} : vector<128x3xf32> to vector<128x1xf32>
    %89 = vector.broadcast %88 : vector<128x1xf32> to vector<128x32xf32>
    %90 = arith.mulf %89, %3 : vector<128x32xf32>
    %91 = arith.addf %63, %90 : vector<128x32xf32>
    %92 = arith.mulf %26, %33 : vector<128x3xf32>
    %cst_23 = arith.constant dense<0xFF800000> : vector<128xf32>
    %93 = vector.multi_reduction <maximumf>, %13, %cst_23 [1] : vector<128x3xf32> to vector<128xf32>
    %94 = vector.shape_cast %93 : vector<128xf32> to vector<128x1xf32>
    %95 = vector.broadcast %94 : vector<128x1xf32> to vector<128x3xf32>
    %96 = arith.subf %13, %95 : vector<128x3xf32>
    %97 = math.exp %96 : vector<128x3xf32>
    %cst_24 = arith.constant dense<0.000000e+00> : vector<128xf32>
    %98 = vector.multi_reduction <add>, %97, %cst_24 [1] : vector<128x3xf32> to vector<128xf32>
    %99 = vector.shape_cast %98 : vector<128xf32> to vector<128x1xf32>
    %100 = vector.broadcast %99 : vector<128x1xf32> to vector<128x3xf32>
    %101 = arith.divf %97, %100 : vector<128x3xf32>
    %102 = arith.subf %13, %20 : vector<128x3xf32>
    %103 = arith.mulf %102, %38 : vector<128x3xf32>
    %104 = arith.mulf %103, %101 : vector<128x3xf32>
    %c2_25 = arith.constant 2 : index
    %c0_26 = arith.constant 0 : index
    %c0_27 = arith.constant 0 : index
    %105 = vector.load %arg9[%c2_25, %c0_26, %c0_27] : memref<4x128x3xf32, #tpu.memory_space<vmem>>, vector<1x128x3xf32>
    %106 = vector.shape_cast %105 : vector<1x128x3xf32> to vector<128x3xf32>
    %107 = vector.shape_cast %104 : vector<128x3xf32> to vector<1x128x3xf32>
    tpu.vector_store %arg9[%c2_25, %c0_26, %c0_27], %107 {strides = array<i32>} : memref<4x128x3xf32, #tpu.memory_space<vmem>>, vector<1x128x3xf32>,
    %108 = vector.extract_strided_slice %92 {offsets = [0, 0], sizes = [128, 1], strides = [1, 1]} : vector<128x3xf32> to vector<128x1xf32>
    %109 = vector.broadcast %108 : vector<128x1xf32> to vector<128x32xf32>
    %110 = arith.mulf %109, %5 : vector<128x32xf32>
    %111 = arith.addf %83, %110 : vector<128x32xf32>
    %112 = vector.extract_strided_slice %92 {offsets = [0, 1], sizes = [128, 1], strides = [1, 1]} : vector<128x3xf32> to vector<128x1xf32>
    %113 = vector.broadcast %112 : vector<128x1xf32> to vector<128x32xf32>
    %114 = arith.mulf %113, %5 : vector<128x32xf32>
    %115 = arith.addf %87, %114 : vector<128x32xf32>
    %116 = vector.extract_strided_slice %92 {offsets = [0, 2], sizes = [128, 1], strides = [1, 1]} : vector<128x3xf32> to vector<128x1xf32>
    %117 = vector.broadcast %116 : vector<128x1xf32> to vector<128x32xf32>
    %118 = arith.mulf %117, %5 : vector<128x32xf32>
    %119 = arith.addf %91, %118 : vector<128x32xf32>
    %120 = arith.mulf %28, %33 : vector<128x3xf32>
    %cst_28 = arith.constant dense<0xFF800000> : vector<128xf32>
    %121 = vector.multi_reduction <maximumf>, %14, %cst_28 [1] : vector<128x3xf32> to vector<128xf32>
    %122 = vector.shape_cast %121 : vector<128xf32> to vector<128x1xf32>
    %123 = vector.broadcast %122 : vector<128x1xf32> to vector<128x3xf32>
    %124 = arith.subf %14, %123 : vector<128x3xf32>
    %125 = math.exp %124 : vector<128x3xf32>
    %cst_29 = arith.constant dense<0.000000e+00> : vector<128xf32>
    %126 = vector.multi_reduction <add>, %125, %cst_29 [1] : vector<128x3xf32> to vector<128xf32>
    %127 = vector.shape_cast %126 : vector<128xf32> to vector<128x1xf32>
    %128 = vector.broadcast %127 : vector<128x1xf32> to vector<128x3xf32>
    %129 = arith.divf %125, %128 : vector<128x3xf32>
    %130 = arith.subf %14, %20 : vector<128x3xf32>
    %131 = arith.mulf %130, %38 : vector<128x3xf32>
    %132 = arith.mulf %131, %129 : vector<128x3xf32>
    %c3_30 = arith.constant 3 : index
    %c0_31 = arith.constant 0 : index
    %c0_32 = arith.constant 0 : index
    %133 = vector.load %arg9[%c3_30, %c0_31, %c0_32] : memref<4x128x3xf32, #tpu.memory_space<vmem>>, vector<1x128x3xf32>
    %134 = vector.shape_cast %133 : vector<1x128x3xf32> to vector<128x3xf32>
    %135 = vector.shape_cast %132 : vector<128x3xf32> to vector<1x128x3xf32>
    tpu.vector_store %arg9[%c3_30, %c0_31, %c0_32], %135 {strides = array<i32>} : memref<4x128x3xf32, #tpu.memory_space<vmem>>, vector<1x128x3xf32>,
    %136 = vector.extract_strided_slice %120 {offsets = [0, 0], sizes = [128, 1], strides = [1, 1]} : vector<128x3xf32> to vector<128x1xf32>
    %137 = vector.broadcast %136 : vector<128x1xf32> to vector<128x32xf32>
    %138 = arith.mulf %137, %7 : vector<128x32xf32>
    %139 = arith.addf %111, %138 : vector<128x32xf32>
    %140 = vector.extract_strided_slice %120 {offsets = [0, 1], sizes = [128, 1], strides = [1, 1]} : vector<128x3xf32> to vector<128x1xf32>
    %141 = vector.broadcast %140 : vector<128x1xf32> to vector<128x32xf32>
    %142 = arith.mulf %141, %7 : vector<128x32xf32>
    %143 = arith.addf %115, %142 : vector<128x32xf32>
    %144 = vector.extract_strided_slice %120 {offsets = [0, 2], sizes = [128, 1], strides = [1, 1]} : vector<128x3xf32> to vector<128x1xf32>
    %145 = vector.broadcast %144 : vector<128x1xf32> to vector<128x32xf32>
    %146 = arith.mulf %145, %7 : vector<128x32xf32>
    %147 = arith.addf %119, %146 : vector<128x32xf32>
    %148 = tpu.concatenate %139, %143, %147 in 0 : vector<128x32xf32>, vector<128x32xf32>, vector<128x32xf32> -> vector<384x32xf32>
    %c0_33 = arith.constant 0 : index
    %c0_34 = arith.constant 0 : index
    %149 = vector.load %arg3[%c0_33, %c0_34] : memref<32x32xf32, #tpu.memory_space<vmem>>, vector<32x32xf32>
    %cst_35 = arith.constant dense<0.000000e+00> : vector<384x32xf32>
    %150 = tpu.matmul %148, %149, %cst_35 {dimension_numbers = #tpu.dot_dimension_numbers<[1], [0], [0], [1], [0, 0, 1, 1], [], []>} : vector<384x32xf32>, vector<32x32xf32>, vector<384x32xf32> -> vector<384x32xf32>
    %c0_36 = arith.constant 0 : index
    %c0_37 = arith.constant 0 : index
    %151 = vector.load %arg4[%c0_36, %c0_37] : memref<1x32xf32, #tpu.memory_space<vmem>>, vector<1x32xf32>
    %152 = vector.broadcast %151 : vector<1x32xf32> to vector<384x32xf32>
    %153 = arith.addf %150, %152 : vector<384x32xf32>
    %c0_38 = arith.constant 0 : index
    %c0_39 = arith.constant 0 : index
    %154 = vector.load %arg5[%c0_38, %c0_39] : memref<32x64xf32, #tpu.memory_space<vmem>>, vector<32x64xf32>
    %cst_40 = arith.constant dense<0.000000e+00> : vector<384x64xf32>
    %155 = tpu.matmul %148, %154, %cst_40 {dimension_numbers = #tpu.dot_dimension_numbers<[1], [0], [0], [1], [0, 0, 1, 1], [], []>} : vector<384x32xf32>, vector<32x64xf32>, vector<384x64xf32> -> vector<384x64xf32>
    %c0_41 = arith.constant 0 : index
    %c0_42 = arith.constant 0 : index
    %156 = vector.load %arg6[%c0_41, %c0_42] : memref<1x64xf32, #tpu.memory_space<vmem>>, vector<1x64xf32>
    %157 = vector.broadcast %156 : vector<1x64xf32> to vector<384x64xf32>
    %158 = arith.addf %155, %157 : vector<384x64xf32>
    %159 = vector.extract_strided_slice %153 {offsets = [0, 0], sizes = [128, 32], strides = [1, 1]} : vector<384x32xf32> to vector<128x32xf32>
    %c0_43 = arith.constant 0 : index
    %c0_44 = arith.constant 0 : index
    %c0_45 = arith.constant 0 : index
    %160 = vector.load %arg7[%c0_43, %c0_44, %c0_45] : memref<3x128x32xf32, #tpu.memory_space<vmem>>, vector<1x128x32xf32>
    %161 = vector.shape_cast %160 : vector<1x128x32xf32> to vector<128x32xf32>
    %162 = vector.shape_cast %159 : vector<128x32xf32> to vector<1x128x32xf32>
    tpu.vector_store %arg7[%c0_43, %c0_44, %c0_45], %162 {strides = array<i32>} : memref<3x128x32xf32, #tpu.memory_space<vmem>>, vector<1x128x32xf32>,
    %163 = vector.extract_strided_slice %158 {offsets = [0, 0], sizes = [128, 64], strides = [1, 1]} : vector<384x64xf32> to vector<128x64xf32>
    %c0_46 = arith.constant 0 : index
    %c0_47 = arith.constant 0 : index
    %c0_48 = arith.constant 0 : index
    %164 = vector.load %arg8[%c0_46, %c0_47, %c0_48] : memref<3x128x64xf32, #tpu.memory_space<vmem>>, vector<1x128x64xf32>
    %165 = vector.shape_cast %164 : vector<1x128x64xf32> to vector<128x64xf32>
    %166 = vector.shape_cast %163 : vector<128x64xf32> to vector<1x128x64xf32>
    tpu.vector_store %arg8[%c0_46, %c0_47, %c0_48], %166 {strides = array<i32>} : memref<3x128x64xf32, #tpu.memory_space<vmem>>, vector<1x128x64xf32>,
    %167 = vector.extract_strided_slice %153 {offsets = [128, 0], sizes = [128, 32], strides = [1, 1]} : vector<384x32xf32> to vector<128x32xf32>
    %c1_49 = arith.constant 1 : index
    %c0_50 = arith.constant 0 : index
    %c0_51 = arith.constant 0 : index
    %168 = vector.load %arg7[%c1_49, %c0_50, %c0_51] : memref<3x128x32xf32, #tpu.memory_space<vmem>>, vector<1x128x32xf32>
    %169 = vector.shape_cast %168 : vector<1x128x32xf32> to vector<128x32xf32>
    %170 = vector.shape_cast %167 : vector<128x32xf32> to vector<1x128x32xf32>
    tpu.vector_store %arg7[%c1_49, %c0_50, %c0_51], %170 {strides = array<i32>} : memref<3x128x32xf32, #tpu.memory_space<vmem>>, vector<1x128x32xf32>,
    %171 = vector.extract_strided_slice %158 {offsets = [128, 0], sizes = [128, 64], strides = [1, 1]} : vector<384x64xf32> to vector<128x64xf32>
    %c1_52 = arith.constant 1 : index
    %c0_53 = arith.constant 0 : index
    %c0_54 = arith.constant 0 : index
    %172 = vector.load %arg8[%c1_52, %c0_53, %c0_54] : memref<3x128x64xf32, #tpu.memory_space<vmem>>, vector<1x128x64xf32>
    %173 = vector.shape_cast %172 : vector<1x128x64xf32> to vector<128x64xf32>
    %174 = vector.shape_cast %171 : vector<128x64xf32> to vector<1x128x64xf32>
    tpu.vector_store %arg8[%c1_52, %c0_53, %c0_54], %174 {strides = array<i32>} : memref<3x128x64xf32, #tpu.memory_space<vmem>>, vector<1x128x64xf32>,
    %175 = vector.extract_strided_slice %153 {offsets = [256, 0], sizes = [128, 32], strides = [1, 1]} : vector<384x32xf32> to vector<128x32xf32>
    %c2_55 = arith.constant 2 : index
    %c0_56 = arith.constant 0 : index
    %c0_57 = arith.constant 0 : index
    %176 = vector.load %arg7[%c2_55, %c0_56, %c0_57] : memref<3x128x32xf32, #tpu.memory_space<vmem>>, vector<1x128x32xf32>
    %177 = vector.shape_cast %176 : vector<1x128x32xf32> to vector<128x32xf32>
    %178 = vector.shape_cast %175 : vector<128x32xf32> to vector<1x128x32xf32>
    tpu.vector_store %arg7[%c2_55, %c0_56, %c0_57], %178 {strides = array<i32>} : memref<3x128x32xf32, #tpu.memory_space<vmem>>, vector<1x128x32xf32>,
    %179 = vector.extract_strided_slice %158 {offsets = [256, 0], sizes = [128, 64], strides = [1, 1]} : vector<384x64xf32> to vector<128x64xf32>
    %c2_58 = arith.constant 2 : index
    %c0_59 = arith.constant 0 : index
    %c0_60 = arith.constant 0 : index
    %180 = vector.load %arg8[%c2_58, %c0_59, %c0_60] : memref<3x128x64xf32, #tpu.memory_space<vmem>>, vector<1x128x64xf32>
    %181 = vector.shape_cast %180 : vector<1x128x64xf32> to vector<128x64xf32>
    %182 = vector.shape_cast %179 : vector<128x64xf32> to vector<1x128x64xf32>
    tpu.vector_store %arg8[%c2_58, %c0_59, %c0_60], %182 {strides = array<i32>} : memref<3x128x64xf32, #tpu.memory_space<vmem>>, vector<1x128x64xf32>,
    return
  }
  func.func @transform_0(%arg0: i32) -> (i32, i32, i32) {
    %c0_i32 = arith.constant 0 : i32
    %c0_i32_0 = arith.constant 0 : i32
    %c0_i32_1 = arith.constant 0 : i32
    return %c0_i32, %arg0, %c0_i32_0 : i32, i32, i32
  }
  func.func @transform_1(%arg0: i32) -> (i32, i32) {
    %c0_i32 = arith.constant 0 : i32
    %c0_i32_0 = arith.constant 0 : i32
    %c0_i32_1 = arith.constant 0 : i32
    return %c0_i32, %c0_i32_0 : i32, i32
  }
  func.func @transform_2(%arg0: i32) -> (i32, i32) {
    %c0_i32 = arith.constant 0 : i32
    %c0_i32_0 = arith.constant 0 : i32
    %c0_i32_1 = arith.constant 0 : i32
    return %c0_i32, %c0_i32_0 : i32, i32
  }
  func.func @transform_3(%arg0: i32) -> (i32, i32) {
    %c0_i32 = arith.constant 0 : i32
    %c0_i32_0 = arith.constant 0 : i32
    %c0_i32_1 = arith.constant 0 : i32
    return %c0_i32, %c0_i32_0 : i32, i32
  }
  func.func @transform_4(%arg0: i32) -> (i32, i32) {
    %c0_i32 = arith.constant 0 : i32
    %c0_i32_0 = arith.constant 0 : i32
    %c0_i32_1 = arith.constant 0 : i32
    return %c0_i32, %c0_i32_0 : i32, i32
  }
  func.func @transform_5(%arg0: i32) -> (i32, i32) {
    %c0_i32 = arith.constant 0 : i32
    %c0_i32_0 = arith.constant 0 : i32
    %c0_i32_1 = arith.constant 0 : i32
    return %c0_i32, %c0_i32_0 : i32, i32
  }
  func.func @transform_6(%arg0: i32) -> (i32, i32, i32) {
    %c0_i32 = arith.constant 0 : i32
    %c0_i32_0 = arith.constant 0 : i32
    %c0_i32_1 = arith.constant 0 : i32
    return %c0_i32, %arg0, %c0_i32_0 : i32, i32, i32
  }
  func.func @transform_7(%arg0: i32) -> (i32, i32, i32) {
    %c0_i32 = arith.constant 0 : i32
    %c0_i32_0 = arith.constant 0 : i32
    %c0_i32_1 = arith.constant 0 : i32
    return %c0_i32, %arg0, %c0_i32_0 : i32, i32, i32
  }
  func.func @transform_8(%arg0: i32) -> (i32, i32, i32) {
    %c0_i32 = arith.constant 0 : i32
    %c0_i32_0 = arith.constant 0 : i32
    %c0_i32_1 = arith.constant 0 : i32
    return %c0_i32, %arg0, %c0_i32_0 : i32, i32, i32
  }
}

</mosaic_0001>

<bundles_post_ra>
// kernel: tpu_custom_call.1
= control target key start
LH: loop header
LB: loop body
LE: loop exit
PB: predicated region body
PF: predicated region fallthrough
CT: control target
= control target key end

     0   :  { %vm97_vm0 = vcmask 261120   ;;  %vm1123_vm1 = vcmask 23552   ;;  %vm4095_vm2 = vcmask 523264   ;;  %s9829_s1 = inlined_call_operand.vmem [shape: f32[32,3], index: 1, kind: input, shape index: {}]   ;;  %s9830_s0 = inlined_call_operand.vmem [shape: f32[4,128,32], index: 0, kind: input, shape index: {}]   ;;  %s9831_s8 = inlined_call_operand.vmem [shape: f32[4,128,3], index: 8, kind: output, shape index: {2}]   ;;  %s9832_s2 = inlined_call_operand.vmem [shape: f32[32,32], index: 2, kind: input, shape index: {}]   ;;  %s9833_s4 = inlined_call_operand.vmem [shape: f32[32,64], index: 4, kind: input, shape index: {}]   ;;  %s9834_s3 = inlined_call_operand.vmem [shape: f32[1,32], index: 3, kind: input, shape index: {}]   ;;  %s9835_s6 = inlined_call_operand.vmem [shape: f32[3,128,32], index: 6, kind: output, shape index: {0}]   ;;  %s9836_s5 = inlined_call_operand.vmem [shape: f32[1,64], index: 5, kind: input, shape index: {}]   ;;  %s9837_s7 = inlined_call_operand.vmem [shape: f32[3,128,64], index: 7, kind: output, shape index: {1}]  }
   0x1   :  { %v96_v0 = vld [vmem:[%s9829_s1 + $0x18] sm:$0xff]  ;;  %v95_v1 = vld [vmem:[%s9829_s1 + $0x10] sm:$0xff]  ;;  %v26_v2 = vld [vmem:[%s9830_s0] sm:$0xff] }
   0x2   :  { %4686 = vmatprep.subr.mxu0 %v96_v0  ;;  %v94_v3 = vld [vmem:[%s9829_s1 + $0x8] sm:$0xff]  ;;  %4694 = vmatprep.mubr.msk.f32.mxu0 %vm97_vm0, %v26_v2  ;;  %v93_v4 = vld [vmem:[%s9829_s1] sm:$0xff]  ;;  %v28_v6 = vld [vmem:[%s9830_s0 + $0x10] sm:$0xff] }
   0x3   :  { %4687 = vmatpush3.msra.mxu0 %v96_v0  ;;  %v27_v5 = vld [vmem:[%s9830_s0 + $0x8] sm:$0xff]  ;;  %v29_v7 = vld [vmem:[%s9830_s0 + $0x18] sm:$0xff]  ;;  %v30_v8 = vld [vmem:[%s9830_s0 + $0x20] sm:$0xff] }
   0x4   :  { %4688 = vmatprep.subr.mxu0 %v95_v1  ;;  %v31_v9 = vld [vmem:[%s9830_s0 + $0x28] sm:$0xff]  ;;  %v32_v10 = vld [vmem:[%s9830_s0 + $0x30] sm:$0xff]  ;;  %v33_v11 = vld [vmem:[%s9830_s0 + $0x38] sm:$0xff] }
   0x5   :  { %4689 = vmatpush3.msra.mxu0 %v95_v1  ;;  %v34_v12 = vld [vmem:[%s9830_s0 + $0x40] sm:$0xff]  ;;  %v35_v13 = vld [vmem:[%s9830_s0 + $0x48] sm:$0xff]  ;;  %v36_v14 = vld [vmem:[%s9830_s0 + $0x50] sm:$0xff] }
   0x6   :  { %4690 = vmatprep.subr.mxu0 %v94_v3  ;;  %v37_v15 = vld [vmem:[%s9830_s0 + $0x58] sm:$0xff]  ;;  %v38_v16 = vld [vmem:[%s9830_s0 + $0x60] sm:$0xff]  ;;  %v39_v17 = vld [vmem:[%s9830_s0 + $0x68] sm:$0xff] }
   0x7   :  { %4691 = vmatpush3.msra.mxu0 %v94_v3  ;;  %v40_v18 = vld [vmem:[%s9830_s0 + $0x70] sm:$0xff]  ;;  %v41_v19 = vld [vmem:[%s9830_s0 + $0x78] sm:$0xff]  ;;  %v4192_v20 = vld [vmem:[%s9830_s0 + $0x80] sm:$0xff] }
   0x8   :  { %4692 = vmatprep.subr.mxu0 %v93_v4  ;;  %v4193_v21 = vld [vmem:[%s9830_s0 + $0x88] sm:$0xff]  ;;  %v4194_v22 = vld [vmem:[%s9830_s0 + $0x90] sm:$0xff]  ;;  %v4195_v23 = vld [vmem:[%s9830_s0 + $0x98] sm:$0xff] }
   0x9   :  { %4693 = vmatpush3.msra.mxu0 %v93_v4  ;;  %v4196_v24 = vld [vmem:[%s9830_s0 + $0xa0] sm:$0xff]  ;;  %v4197_v25 = vld [vmem:[%s9830_s0 + $0xa8] sm:$0xff]  ;;  %v4198_v26 = vld [vmem:[%s9830_s0 + $0xb0] sm:$0xff] }
   0xa   :  { %4695 = vmatmul.mubr.msk.f32.vlgmr.msra.gmra.mxu0 %vm97_vm0, %v27_v5  ;;  %v4199_v27 = vld [vmem:[%s9830_s0 + $0xb8] sm:$0xff]  ;;  %v4200_v28 = vld [vmem:[%s9830_s0 + $0xc0] sm:$0xff]  ;;  %v4201_v29 = vld [vmem:[%s9830_s0 + $0xc8] sm:$0xff] }
   0xb   :  { %4697 = vmatprep.mubr.msk.f32.mxu0 %vm97_vm0, %v28_v6  ;;  %v4202_v30 = vld [vmem:[%s9830_s0 + $0xd0] sm:$0xff]  ;;  %v4203_v31 = vld [vmem:[%s9830_s0 + $0xd8] sm:$0xff]  ;;  %v4204_v32 = vld [vmem:[%s9830_s0 + $0xe0] sm:$0xff] }
   0xc   :  { %v4205_v33 = vld [vmem:[%s9830_s0 + $0xe8] sm:$0xff]  ;;  %v4206_v34 = vld [vmem:[%s9830_s0 + $0xf0] sm:$0xff]  ;;  %v4207_v35 = vld [vmem:[%s9830_s0 + $0xf8] sm:$0xff] }
   0xd   :  { %v4208_v36 = vld [vmem:[%s9830_s0 + $0x100] sm:$0xff]  ;;  %v4209_v37 = vld [vmem:[%s9830_s0 + $0x108] sm:$0xff]  ;;  %v4210_v38 = vld [vmem:[%s9830_s0 + $0x110] sm:$0xff] }
   0xe   :  { %4698 = vmatmul.mubr.msk.f32.gmra.mxu0 %vm97_vm0, %v29_v7  ;;  %v4211_v39 = vld [vmem:[%s9830_s0 + $0x118] sm:$0xff]  ;;  %v4212_v40 = vld [vmem:[%s9830_s0 + $0x120] sm:$0xff]  ;;  %v4213_v41 = vld [vmem:[%s9830_s0 + $0x128] sm:$0xff] }
   0xf   :  { %4700 = vmatprep.mubr.msk.f32.mxu0 %vm97_vm0, %v30_v8  ;;  %v4214_v42 = vld [vmem:[%s9830_s0 + $0x130] sm:$0xff]  ;;  %v4215_v43 = vld [vmem:[%s9830_s0 + $0x138] sm:$0xff]  ;;  %v4216_v44 = vld [vmem:[%s9830_s0 + $0x140] sm:$0xff] }
  0x10   :  { %v4217_v45 = vld [vmem:[%s9830_s0 + $0x148] sm:$0xff]  ;;  %v4218_v46 = vld [vmem:[%s9830_s0 + $0x150] sm:$0xff]  ;;  %v4219_v47 = vld [vmem:[%s9830_s0 + $0x158] sm:$0xff] }
  0x11   :  { %v4220_v48 = vld [vmem:[%s9830_s0 + $0x160] sm:$0xff]  ;;  %v4221_v49 = vld [vmem:[%s9830_s0 + $0x168] sm:$0xff]  ;;  %v4222_v50 = vld [vmem:[%s9830_s0 + $0x170] sm:$0xff] }
  0x12   :  { %4701 = vmatmul.mubr.msk.f32.gmra.mxu0 %vm97_vm0, %v31_v9  ;;  %v4223_v51 = vld [vmem:[%s9830_s0 + $0x178] sm:$0xff]  ;;  %v4224_v52 = vld [vmem:[%s9830_s0 + $0x180] sm:$0xff]  ;;  %v4225_v53 = vld [vmem:[%s9830_s0 + $0x188] sm:$0xff] }
  0x13   :  { %4703 = vmatprep.mubr.msk.f32.mxu0 %vm97_vm0, %v32_v10  ;;  %v4226_v54 = vld [vmem:[%s9830_s0 + $0x190] sm:$0xff]  ;;  %v4227_v55 = vld [vmem:[%s9830_s0 + $0x198] sm:$0xff]  ;;  %v4228_v56 = vld [vmem:[%s9830_s0 + $0x1a0] sm:$0xff] }
  0x14   :  { %v4229_v57 = vld [vmem:[%s9830_s0 + $0x1a8] sm:$0xff]  ;;  %v4230_v58 = vld [vmem:[%s9830_s0 + $0x1b0] sm:$0xff]  ;;  %v4231_v59 = vld [vmem:[%s9830_s0 + $0x1b8] sm:$0xff] }
  0x15   :  { %v4232_v60 = vld [vmem:[%s9830_s0 + $0x1c0] sm:$0xff]  ;;  %v4233_v61 = vld [vmem:[%s9830_s0 + $0x1c8] sm:$0xff]  ;;  %v4234_v62 = vld [vmem:[%s9830_s0 + $0x1d0] sm:$0xff] }
  0x16   :  { %4704 = vmatmul.mubr.msk.f32.gmra.mxu0 %vm97_vm0, %v33_v11  ;;  %v4235_v63 = vld [vmem:[%s9830_s0 + $0x1d8] sm:$0xff]  ;;  %v4236_v0 = vld [vmem:[%s9830_s0 + $0x1e0] sm:$0xff]  ;;  %v4237_v1 = vld [vmem:[%s9830_s0 + $0x1e8] sm:$0xff] }
  0x17   :  { %4706 = vmatprep.mubr.msk.f32.mxu0 %vm97_vm0, %v34_v12  ;;  %v4238_v2 = vld [vmem:[%s9830_s0 + $0x1f0] sm:$0xff]  ;;  %v4239_v3 = vld [vmem:[%s9830_s0 + $0x1f8] sm:$0xff] }
  0x1a   :  { %4707 = vmatmul.mubr.msk.f32.gmra.mxu0 %vm97_vm0, %v35_v13 }
  0x1b   :  { %4709 = vmatprep.mubr.msk.f32.mxu0 %vm97_vm0, %v36_v14 }
  0x1e   :  { %4710 = vmatmul.mubr.msk.f32.gmra.mxu0 %vm97_vm0, %v37_v15 }
  0x1f   :  { %4712 = vmatprep.mubr.msk.f32.mxu0 %vm97_vm0, %v38_v16 }
  0x22   :  { %4713 = vmatmul.mubr.msk.f32.gmra.mxu0 %vm97_vm0, %v39_v17 }
  0x23   :  { %4715 = vmatprep.mubr.msk.f32.mxu0 %vm97_vm0, %v40_v18 }
  0x26   :  { %4716 = vmatmul.mubr.msk.f32.gmra.mxu0 %vm97_vm0, %v41_v19 }
  0x27   :  { %4718 = vmatprep.mubr.msk.f32.mxu0 %vm97_vm0, %v4192_v20 }
  0x2a   :  { %4719 = vmatmul.mubr.msk.f32.gmra.mxu0 %vm97_vm0, %v4193_v21 }
  0x2b   :  { %4721 = vmatprep.mubr.msk.f32.mxu0 %vm97_vm0, %v4194_v22 }
  0x2e   :  { %4722 = vmatmul.mubr.msk.f32.gmra.mxu0 %vm97_vm0, %v4195_v23 }
  0x2f   :  { %4724 = vmatprep.mubr.msk.f32.mxu0 %vm97_vm0, %v4196_v24 }
  0x32   :  { %4725 = vmatmul.mubr.msk.f32.gmra.mxu0 %vm97_vm0, %v4197_v25 }
  0x33   :  { %4727 = vmatprep.mubr.msk.f32.mxu0 %vm97_vm0, %v4198_v26 }
  0x36   :  { %4728 = vmatmul.mubr.msk.f32.gmra.mxu0 %vm97_vm0, %v4199_v27 }
  0x37   :  { %4730 = vmatprep.mubr.msk.f32.mxu0 %vm97_vm0, %v4200_v28 }
  0x3a   :  { %4731 = vmatmul.mubr.msk.f32.gmra.mxu0 %vm97_vm0, %v4201_v29 }
  0x3b   :  { %4733 = vmatprep.mubr.msk.f32.mxu0 %vm97_vm0, %v4202_v30 }
  0x3e   :  { %4734 = vmatmul.mubr.msk.f32.gmra.mxu0 %vm97_vm0, %v4203_v31 }
  0x3f   :  { %4736 = vmatprep.mubr.msk.f32.mxu0 %vm97_vm0, %v4204_v32 }
  0x42   :  { %4737 = vmatmul.mubr.msk.f32.gmra.mxu0 %vm97_vm0, %v4205_v33 }
  0x43   :  { %4739 = vmatprep.mubr.msk.f32.mxu0 %vm97_vm0, %v4206_v34 }
  0x46   :  { %4740 = vmatmul.mubr.msk.f32.gmra.mxu0 %vm97_vm0, %v4207_v35 }
  0x47   :  { %4742 = vmatprep.mubr.msk.f32.mxu0 %vm97_vm0, %v4208_v36 }
  0x4a   :  { %4743 = vmatmul.mubr.msk.f32.gmra.mxu0 %vm97_vm0, %v4209_v37 }
  0x4b   :  { %4745 = vmatprep.mubr.msk.f32.mxu0 %vm97_vm0, %v4210_v38 }
  0x4e   :  { %4746 = vmatmul.mubr.msk.f32.gmra.mxu0 %vm97_vm0, %v4211_v39 }
  0x4f   :  { %4748 = vmatprep.mubr.msk.f32.mxu0 %vm97_vm0, %v4212_v40 }
  0x52   :  { %4749 = vmatmul.mubr.msk.f32.gmra.mxu0 %vm97_vm0, %v4213_v41 }
  0x53   :  { %4751 = vmatprep.mubr.msk.f32.mxu0 %vm97_vm0, %v4214_v42 }
  0x56   :  { %4752 = vmatmul.mubr.msk.f32.gmra.mxu0 %vm97_vm0, %v4215_v43 }
  0x57   :  { %4754 = vmatprep.mubr.msk.f32.mxu0 %vm97_vm0, %v4216_v44 }
  0x5a   :  { %4755 = vmatmul.mubr.msk.f32.gmra.mxu0 %vm97_vm0, %v4217_v45 }
  0x5b   :  { %4757 = vmatprep.mubr.msk.f32.mxu0 %vm97_vm0, %v4218_v46 }
  0x5e   :  { %4758 = vmatmul.mubr.msk.f32.gmra.mxu0 %vm97_vm0, %v4219_v47  ;;  %v9838_v47 = vmov 0  }
  0x5f   :  { %4760 = vmatprep.mubr.msk.f32.mxu0 %vm97_vm0, %v4220_v48  ;;  %4961 = vset.pattern.permute.xlu1 %v9838_v47 }
  0x62   :  { %4761 = vmatmul.mubr.msk.f32.gmra.mxu0 %vm97_vm0, %v4221_v49 }
  0x63   :  { %4763 = vmatprep.mubr.msk.f32.mxu0 %vm97_vm0, %v4222_v50 }
  0x66   :  { %4764 = vmatmul.mubr.msk.f32.gmra.mxu0 %vm97_vm0, %v4223_v51 }
  0x67   :  { %4766 = vmatprep.mubr.msk.f32.mxu0 %vm97_vm0, %v4224_v52 }
  0x6a   :  { %4767 = vmatmul.mubr.msk.f32.gmra.mxu0 %vm97_vm0, %v4225_v53 }
  0x6b   :  { %4769 = vmatprep.mubr.msk.f32.mxu0 %vm97_vm0, %v4226_v54 }
  0x6e   :  { %4770 = vmatmul.mubr.msk.f32.gmra.mxu0 %vm97_vm0, %v4227_v55 }
  0x6f   :  { %4772 = vmatprep.mubr.msk.f32.mxu0 %vm97_vm0, %v4228_v56 }
  0x72   :  { %4773 = vmatmul.mubr.msk.f32.gmra.mxu0 %vm97_vm0, %v4229_v57 }
  0x73   :  { %4775 = vmatprep.mubr.msk.f32.mxu0 %vm97_vm0, %v4230_v58 }
  0x76   :  { %4776 = vmatmul.mubr.msk.f32.gmra.mxu0 %vm97_vm0, %v4231_v59 }
  0x77   :  { %4778 = vmatprep.mubr.msk.f32.mxu0 %vm97_vm0, %v4232_v60 }
  0x7a   :  { %4779 = vmatmul.mubr.msk.f32.gmra.mxu0 %vm97_vm0, %v4233_v61 }
  0x7b   :  { %4781 = vmatprep.mubr.msk.f32.mxu0 %vm97_vm0, %v4234_v62 }
  0x7e   :  { %4782 = vmatmul.mubr.msk.f32.gmra.mxu0 %vm97_vm0, %v4235_v63 }
  0x7f   :  { %4784 = vmatprep.mubr.msk.f32.mxu0 %vm97_vm0, %v4236_v0 }
  0x82   :  { %4785 = vmatmul.mubr.msk.f32.gmra.mxu0 %vm97_vm0, %v4237_v1 }
  0x83   :  { %4787 = vmatprep.mubr.msk.f32.mxu0 %vm97_vm0, %v4238_v2 }
  0x86   :  { %4788 = vmatmul.mubr.msk.f32.gmra.mxu0 %vm97_vm0, %v4239_v3 }
  0xca   :  { %v5847_v4 = vpop.f32.mrf.mxu0 }
  0xcb   :  { %10236 = vst [vmem:[#allocation2_spill] sm:$0xff] %v5847_v4  ;;  %v1127_v5 = vsel %vm1123_vm1, %v5847_v4, -inf }
  0xcc   :  { %1128 = vmax.xlane.f32.xlu0 %v1127_v5  ;;  %v5851_v6 = vpop.f32.mrf.mxu0 }
  0xcd   :  { %10237 = vst [vmem:[#allocation3_spill] sm:$0xff] %v5851_v6  ;;  %v1124_v8 = vsel %vm1123_vm1, %v5851_v6, -inf }
  0xce   :  { %v5853_v7 = vpop.f32.mrf.mxu0 }
  0xcf   :  { %10238 = vst [vmem:[#allocation4_spill] sm:$0xff] %v5853_v7  ;;  %v1133_v9 = vsel %vm1123_vm1, %v5853_v7, -inf }
  0xd0   :  { %1125 = vmax.xlane.f32.xlu0 %v1124_v8  ;;  %1134 = vmax.xlane.f32.xlu1 %v1133_v9  ;;  %v5859_v10 = vpop.f32.mrf.mxu0 }
  0xd1   :  { %10239 = vst [vmem:[#allocation5_spill] sm:$0xff] %v5859_v10  ;;  %v1130_v12 = vsel %vm1123_vm1, %v5859_v10, -inf }
  0xd2   :  { %v5861_v11 = vpop.f32.mrf.mxu0 }
  0xd3   :  { %10240 = vst [vmem:[#allocation6_spill] sm:$0xff] %v5861_v11  ;;  %v1139_v16 = vsel %vm1123_vm1, %v5861_v11, -inf }
  0xd4   :  { %1131 = vmax.xlane.f32.xlu1 %v1130_v12  ;;  %v5865_v13 = vpop.f32.mrf.mxu0 }
  0xd5   :  { %10241 = vst [vmem:[#allocation7_spill] sm:$0xff] %v5865_v13  ;;  %v1136_v14 = vsel %vm1123_vm1, %v5865_v13, -inf }
  0xd6   :  { %1137 = vmax.xlane.f32.xlu0 %v1136_v14  ;;  %v5869_v15 = vpop.f32.mrf.mxu0 }
  0xd7   :  { %10242 = vst [vmem:[#allocation8_spill] sm:$0xff] %v5869_v15  ;;  %v1145_v20 = vsel %vm1123_vm1, %v5869_v15, -inf }
  0xd8   :  { %1140 = vmax.xlane.f32.xlu1 %v1139_v16  ;;  %v5873_v17 = vpop.f32.mrf.mxu0 }
  0xd9   :  { %10243 = vst [vmem:[#allocation9_spill] sm:$0xff] %v5873_v17  ;;  %v1142_v18 = vsel %vm1123_vm1, %v5873_v17, -inf }
  0xda   :  { %1143 = vmax.xlane.f32.xlu0 %v1142_v18  ;;  %v5877_v19 = vpop.f32.mrf.mxu0 }
  0xdb   :  { %10244 = vst [vmem:[#allocation10_spill] sm:$0xff] %v5877_v19  ;;  %v1151_v24 = vsel %vm1123_vm1, %v5877_v19, -inf }
  0xdc   :  { %1146 = vmax.xlane.f32.xlu1 %v1145_v20  ;;  %v5881_v21 = vpop.f32.mrf.mxu0 }
  0xdd   :  { %10245 = vst [vmem:[#allocation11_spill] sm:$0xff] %v5881_v21  ;;  %v1148_v22 = vsel %vm1123_vm1, %v5881_v21, -inf }
  0xde   :  { %1149 = vmax.xlane.f32.xlu0 %v1148_v22  ;;  %v5885_v23 = vpop.f32.mrf.mxu0 }
  0xdf   :  { %10246 = vst [vmem:[#allocation12_spill] sm:$0xff] %v5885_v23  ;;  %v1157_v28 = vsel %vm1123_vm1, %v5885_v23, -inf }
  0xe0   :  { %1152 = vmax.xlane.f32.xlu1 %v1151_v24  ;;  %v5889_v25 = vpop.f32.mrf.mxu0 }
  0xe1   :  { %10247 = vst [vmem:[#allocation13_spill] sm:$0xff] %v5889_v25  ;;  %v1154_v26 = vsel %vm1123_vm1, %v5889_v25, -inf }
  0xe2   :  { %1155 = vmax.xlane.f32.xlu0 %v1154_v26  ;;  %v5893_v27 = vpop.f32.mrf.mxu0 }
  0xe3   :  { %10248 = vst [vmem:[#allocation14_spill] sm:$0xff] %v5893_v27  ;;  %v1163_v32 = vsel %vm1123_vm1, %v5893_v27, -inf }
  0xe4   :  { %1158 = vmax.xlane.f32.xlu1 %v1157_v28  ;;  %v5897_v29 = vpop.f32.mrf.mxu0 }
  0xe5   :  { %10249 = vst [vmem:[#allocation15_spill] sm:$0xff] %v5897_v29  ;;  %v1160_v30 = vsel %vm1123_vm1, %v5897_v29, -inf }
  0xe6   :  { %1161 = vmax.xlane.f32.xlu0 %v1160_v30  ;;  %v5901_v31 = vpop.f32.mrf.mxu0 }
  0xe7   :  { %10250 = vst [vmem:[#allocation16_spill] sm:$0xff] %v5901_v31  ;;  %v1169_v36 = vsel %vm1123_vm1, %v5901_v31, -inf }
  0xe8   :  { %1164 = vmax.xlane.f32.xlu1 %v1163_v32  ;;  %v5905_v33 = vpop.f32.mrf.mxu0 }
  0xe9   :  { %10251 = vst [vmem:[#allocation17_spill] sm:$0xff] %v5905_v33  ;;  %v1166_v34 = vsel %vm1123_vm1, %v5905_v33, -inf }
  0xea   :  { %1167 = vmax.xlane.f32.xlu0 %v1166_v34  ;;  %v5909_v35 = vpop.f32.mrf.mxu0 }
  0xeb   :  { %10252 = vst [vmem:[#allocation18_spill] sm:$0xff] %v5909_v35  ;;  %v1639_v38 = vsel %vm1123_vm1, %v5909_v35, -inf }
  0xec   :  { %1170 = vmax.xlane.f32.xlu1 %v1169_v36  ;;  %v5913_v37 = vpop.f32.mrf.mxu0 }
  0xed   :  { %10253 = vst [vmem:[#allocation19_spill] sm:$0xff] %v5913_v37  ;;  %v1636_v40 = vsel %vm1123_vm1, %v5913_v37, -inf }
  0xee   :  { %1640 = vmax.xlane.f32.xlu0 %v1639_v38  ;;  %v5917_v39 = vpop.f32.mrf.mxu0 }
  0xef   :  { %10254 = vst [vmem:[#allocation20_spill] sm:$0xff] %v5917_v39  ;;  %v1645_v44 = vsel %vm1123_vm1, %v5917_v39, -inf }
  0xf0   :  { %1637 = vmax.xlane.f32.xlu1 %v1636_v40  ;;  %v5921_v41 = vpop.f32.mrf.mxu0 }
  0xf1   :  { %10255 = vst [vmem:[#allocation21_spill] sm:$0xff] %v5921_v41  ;;  %v1642_v42 = vsel %vm1123_vm1, %v5921_v41, -inf }
  0xf2   :  { %1643 = vmax.xlane.f32.xlu0 %v1642_v42  ;;  %v5925_v43 = vpop.f32.mrf.mxu0 }
  0xf3   :  { %10256 = vst [vmem:[#allocation22_spill] sm:$0xff] %v5925_v43  ;;  %v1651_v49 = vsel %vm1123_vm1, %v5925_v43, -inf }
  0xf4   :  { %1646 = vmax.xlane.f32.xlu1 %v1645_v44  ;;  %v5929_v45 = vpop.f32.mrf.mxu0 }
  0xf5   :  { %10257 = vst [vmem:[#allocation23_spill] sm:$0xff] %v5929_v45  ;;  %v1648_v46 = vsel %vm1123_vm1, %v5929_v45, -inf }
  0xf6   :  { %1649 = vmax.xlane.f32.xlu0 %v1648_v46  ;;  %v5934_v48 = vpop.f32.mrf.mxu0 }
  0xf7   :  { %10258 = vst [vmem:[#allocation24_spill] sm:$0xff] %v5934_v48  ;;  %v1657_v53 = vsel %vm1123_vm1, %v5934_v48, -inf }
  0xf8   :  { %1652 = vmax.xlane.f32.xlu1 %v1651_v49  ;;  %v5938_v50 = vpop.f32.mrf.mxu0 }
  0xf9   :  { %10259 = vst [vmem:[#allocation25_spill] sm:$0xff] %v5938_v50  ;;  %v1654_v51 = vsel %vm1123_vm1, %v5938_v50, -inf }
  0xfa   :  { %1655 = vmax.xlane.f32.xlu0 %v1654_v51  ;;  %v5942_v52 = vpop.f32.mrf.mxu0  ;;  %v9840_v51 = vmov 1  }
  0xfb   :  { %10260 = vst [vmem:[#allocation26_spill] sm:$0xff] %v5942_v52  ;;  %v1663_v57 = vsel %vm1123_vm1, %v5942_v52, -inf  ;;  %4992 = vset.pattern.permute.xlu0 %v9840_v51 }
  0xfc   :  { %1658 = vmax.xlane.f32.xlu1 %v1657_v53  ;;  %v5946_v54 = vpop.f32.mrf.mxu0 }
  0xfd   :  { %10261 = vst [vmem:[#allocation27_spill] sm:$0xff] %v5946_v54  ;;  %v1660_v55 = vsel %vm1123_vm1, %v5946_v54, -inf }
  0xfe   :  { %1661 = vmax.xlane.f32.xlu0 %v1660_v55  ;;  %v5950_v56 = vpop.f32.mrf.mxu0 }
  0xff   :  { %10262 = vst [vmem:[#allocation28_spill] sm:$0xff] %v5950_v56  ;;  %v1669_v61 = vsel %vm1123_vm1, %v5950_v56, -inf }
 0x100   :  { %1664 = vmax.xlane.f32.xlu1 %v1663_v57  ;;  %v5954_v58 = vpop.f32.mrf.mxu0 }
 0x101   :  { %10263 = vst [vmem:[#allocation29_spill] sm:$0xff] %v5954_v58  ;;  %v1666_v59 = vsel %vm1123_vm1, %v5954_v58, -inf }
 0x102   :  { %1667 = vmax.xlane.f32.xlu0 %v1666_v59  ;;  %v5958_v60 = vpop.f32.mrf.mxu0 }
 0x103   :  { %10264 = vst [vmem:[#allocation30_spill] sm:$0xff] %v5958_v60  ;;  %v1675_v1 = vsel %vm1123_vm1, %v5958_v60, -inf }
 0x104   :  { %1670 = vmax.xlane.f32.xlu1 %v1669_v61  ;;  %v5962_v62 = vpop.f32.mrf.mxu0 }
 0x105   :  { %10265 = vst [vmem:[#allocation31_spill] sm:$0xff] %v5962_v62  ;;  %v1672_v63 = vsel %vm1123_vm1, %v5962_v62, -inf }
 0x106   :  { %1673 = vmax.xlane.f32.xlu0 %v1672_v63  ;;  %v5966_v0 = vpop.f32.mrf.mxu0 }
 0x107   :  { %10266 = vst [vmem:[#allocation32_spill] sm:$0xff] %v5966_v0  ;;  %v1681_v8 = vsel %vm1123_vm1, %v5966_v0, -inf }
 0x108   :  { %1676 = vmax.xlane.f32.xlu1 %v1675_v1  ;;  %v5970_v2 = vpop.f32.mrf.mxu0 }
 0x109   :  { %10267 = vst [vmem:[#allocation33_spill] sm:$0xff] %v5970_v2  ;;  %v1678_v3 = vsel %vm1123_vm1, %v5970_v2, -inf }
 0x10a   :  { %1679 = vmax.xlane.f32.xlu0 %v1678_v3  ;;  %v5974_v5 = vpop.f32.mrf.mxu0 }
 0x10b   :  { %10268 = vst [vmem:[#allocation34_spill] sm:$0xff] %v5974_v5  ;;  %v2200_v12 = vsel %vm1123_vm1, %v5974_v5, -inf }
 0x10c   :  { %1682 = vmax.xlane.f32.xlu1 %v1681_v8  ;;  %v5978_v9 = vpop.f32.mrf.mxu0 }
 0x10d   :  { %10269 = vst [vmem:[#allocation35_spill] sm:$0xff] %v5978_v9  ;;  %v2197_v16 = vsel %vm1123_vm1, %v5978_v9, -inf }
 0x10e   :  { %2201 = vmax.xlane.f32.xlu0 %v2200_v12  ;;  %v5982_v14 = vpop.f32.mrf.mxu0 }
 0x10f   :  { %10270 = vst [vmem:[#allocation36_spill] sm:$0xff] %v5982_v14  ;;  %v2206_v20 = vsel %vm1123_vm1, %v5982_v14, -inf }
 0x110   :  { %2198 = vmax.xlane.f32.xlu1 %v2197_v16  ;;  %v5986_v18 = vpop.f32.mrf.mxu0 }
 0x111   :  { %10271 = vst [vmem:[#allocation37_spill] sm:$0xff] %v5986_v18  ;;  %v2203_v26 = vsel %vm1123_vm1, %v5986_v18, -inf }
 0x112   :  { %2207 = vmax.xlane.f32.xlu0 %v2206_v20  ;;  %v5990_v22 = vpop.f32.mrf.mxu0 }
 0x113   :  { %10272 = vst [vmem:[#allocation38_spill] sm:$0xff] %v5990_v22  ;;  %v2212_v34 = vsel %vm1123_vm1, %v5990_v22, -inf }
 0x114   :  { %v5992_v24 = vpop.f32.mrf.mxu0 }
 0x115   :  { %10273 = vst [vmem:[#allocation39_spill] sm:$0xff] %v5992_v24  ;;  %v2209_v28 = vsel %vm1123_vm1, %v5992_v24, -inf }
 0x116   :  { %2204 = vmax.xlane.f32.xlu0 %v2203_v26  ;;  %2210 = vmax.xlane.f32.xlu1 %v2209_v28  ;;  %v5998_v30 = vpop.f32.mrf.mxu0  ;;  %v676_v28 = vmax.f32 %v5847_v4, %v5909_v35 }
 0x117   :  { %10274 = vst [vmem:[#allocation40_spill] sm:$0xff] %v5998_v30  ;;  %v2218_v42 = vsel %vm1123_vm1, %v5998_v30, -inf }
 0x118   :  { %v6000_v32 = vpop.f32.mrf.mxu0 }
 0x119   :  { %10275 = vst [vmem:[#allocation41_spill] sm:$0xff] %v6000_v32  ;;  %v2215_v36 = vsel %vm1123_vm1, %v6000_v32, -inf }
 0x11a   :  { %2213 = vmax.xlane.f32.xlu0 %v2212_v34  ;;  %2216 = vmax.xlane.f32.xlu1 %v2215_v36  ;;  %v6006_v38 = vpop.f32.mrf.mxu0  ;;  %v708_v34 = vmax.f32 %v676_v28, %v5974_v5  ;;  %v675_v36 = vmax.f32 %v5851_v6, %v5913_v37  ;;  %v677_v28 = vmax.f32 %v5859_v10, %v5921_v41 }
 0x11b   :  { %10276 = vst [vmem:[#allocation42_spill] sm:$0xff] %v6006_v38  ;;  %v2224_v53 = vsel %vm1123_vm1, %v6006_v38, -inf }
 0x11c   :  { %v6008_v40 = vpop.f32.mrf.mxu0  ;;  %v709_v47 = vmax.f32 %v677_v28, %v5986_v18 }
 0x11d   :  { %10277 = vst [vmem:[#allocation43_spill] sm:$0xff] %v6008_v40  ;;  %v2221_v44 = vsel %vm1123_vm1, %v6008_v40, -inf }
 0x11e   :  { %2219 = vmax.xlane.f32.xlu0 %v2218_v42  ;;  %2222 = vmax.xlane.f32.xlu1 %v2221_v44  ;;  %v6014_v46 = vpop.f32.mrf.mxu0 }
 0x11f   :  { %10278 = vst [vmem:[#allocation44_spill] sm:$0xff] %v6014_v46  ;;  %v2230_v61 = vsel %vm1123_vm1, %v6014_v46, -inf }
 0x120   :  { %v6016_v49 = vpop.f32.mrf.mxu0 }
 0x121   :  { %10279 = vst [vmem:[#allocation45_spill] sm:$0xff] %v6016_v49  ;;  %v2227_v55 = vsel %vm1123_vm1, %v6016_v49, -inf }
 0x122   :  { %2225 = vmax.xlane.f32.xlu0 %v2224_v53  ;;  %2228 = vmax.xlane.f32.xlu1 %v2227_v55  ;;  %v6023_v57 = vpop.f32.mrf.mxu0  ;;  %v707_v53 = vmax.f32 %v675_v36, %v5978_v9  ;;  %v678_v55 = vmax.f32 %v5853_v7, %v5917_v39 }
 0x123   :  { %10280 = vst [vmem:[#allocation46_spill] sm:$0xff] %v6023_v57  ;;  %v2236_v8 = vsel %vm1123_vm1, %v6023_v57, -inf }
 0x124   :  { %v6025_v59 = vpop.f32.mrf.mxu0 }
 0x125   :  { %10281 = vst [vmem:[#allocation47_spill] sm:$0xff] %v6025_v59  ;;  %v2233_v63 = vsel %vm1123_vm1, %v6025_v59, -inf }
 0x126   :  { %2231 = vmax.xlane.f32.xlu0 %v2230_v61  ;;  %2234 = vmax.xlane.f32.xlu1 %v2233_v63  ;;  %v6031_v1 = vpop.f32.mrf.mxu0 }
 0x127   :  { %10282 = vst [vmem:[#allocation48_spill] sm:$0xff] %v6031_v1  ;;  %v2242_v16 = vsel %vm1123_vm1, %v6031_v1, -inf }
 0x128   :  { %v6033_v3 = vpop.f32.mrf.mxu0 }
 0x129   :  { %10283 = vst [vmem:[#allocation49_spill] sm:$0xff] %v6033_v3  ;;  %v2239_v12 = vsel %vm1123_vm1, %v6033_v3, -inf  ;;  %v682_v3 = vmax.f32 %v5869_v15, %v5934_v48 }
 0x12a   :  { %2237 = vmax.xlane.f32.xlu0 %v2236_v8  ;;  %2240 = vmax.xlane.f32.xlu1 %v2239_v12  ;;  %v6041_v20 = vpop.f32.mrf.mxu0  ;;  %v710_v12 = vmax.f32 %v678_v55, %v5982_v14 }
 0x12b   :  { %10284 = vst [vmem:[#allocation50_spill] sm:$0xff] %v6041_v20  ;;  %v6053_v44 = vmax.f32 %v708_v34, %v6041_v20 }
 0x12c   :  { %v6043_v26 = vpop.f32.mrf.mxu0 }
 0x12d   :  { %10285 = vst [vmem:[#allocation51_spill] sm:$0xff] %v6043_v26  ;;  %10287 = vst [vmem:[#allocation53_spill] sm:$0xff] %v6053_v44  ;;  %v6059_v61 = vmax.f32 %v707_v53, %v6043_v26  ;;  %v868_v34 = vsub.f32 %v5974_v5, %v6053_v44  ;;  %v916_v36 = vsub.f32 %v6041_v20, %v6053_v44 }
 0x12e   :  { %2243 = vmax.xlane.f32.xlu0 %v2242_v16  ;;  %v6050_v42 = vpop.f32.mrf.mxu0  ;;  %v820_v16 = vsub.f32 %v5909_v35, %v6053_v44 }
 0x12f   :  { %10286 = vst [vmem:[#allocation52_spill] sm:$0xff] %v6050_v42  ;;  %10288 = vst [vmem:[#allocation54_spill] sm:$0xff] %v6059_v61  ;;  %v6075_v53 = vmax.f32 %v710_v12, %v6050_v42  ;;  %v819_v55 = vsub.f32 %v5913_v37, %v6059_v61  ;;  %v867_v31 = vsub.f32 %v5978_v9, %v6059_v61  ;;  %v885_v20 = vmul.f32 1.442695, %v868_v34 }
 0x130   :  { %v6061_v63 = vpop.f32.mrf.mxu0  ;;  %v837_v1 = vmul.f32 1.442695, %v820_v16  ;;  %v915_v12 = vsub.f32 %v6043_v26, %v6059_v61  ;;  %v933_v27 = vmul.f32 1.442695, %v916_v36  ;;  %v679_v16 = vmax.f32 %v5865_v13, %v5929_v45 }
 0x131   :  { %10289 = vst [vmem:[#allocation55_spill] sm:$0xff] %v6061_v63  ;;  %10291 = vst [vmem:[#allocation57_spill] sm:$0xff] %v6075_v53  ;;  %v6091_v28 = vmax.f32 %v709_v47, %v6061_v63  ;;  %v835_v60 = vmul.f32 1.442695, %v819_v55  ;;  %v870_v34 = vsub.f32 %v5982_v14, %v6075_v53  ;;  %v883_v47 = vmul.f32 1.442695, %v867_v31 }
 0x132   :  { %v6080_v51 = vpop.f32.mrf.mxu0  ;;  %4999 = vpow2.f32 %v837_v1  ;;  %v931_v5 = vmul.f32 1.442695, %v915_v12 }
 0x133   :  { %10292 = vst [vmem:[#allocation58_spill] sm:$0xff] %v6080_v51  ;;  %10294 = vst [vmem:[#allocation60_spill] sm:$0xff] %v6091_v28  ;;  %5001 = vpow2.f32 %v885_v20  ;;  %v821_v55 = vsub.f32 %v5921_v41, %v6091_v28  ;;  %v869_v1 = vsub.f32 %v5986_v18, %v6091_v28 }
 0x134   :  { %v6102_v9 = vpop.f32.mrf.mxu0  ;;  %5003 = vpow2.f32 %v933_v27 }
 0x135   :  { %10295 = vst [vmem:[#allocation61_spill] sm:$0xff] %v6102_v9  ;;  %5005 = vpow2.f32 %v835_v60  ;;  %v839_v60 = vmul.f32 1.442695, %v821_v55 }
 0x136   :  { %v6125_v12 = vpop.f32.mrf.mxu0  ;;  %5007 = vpow2.f32 %v883_v47 }
 0x137   :  { %10298 = vst [vmem:[#allocation64_spill] sm:$0xff] %v6125_v12  ;;  %5009 = vpow2.f32 %v931_v5  ;;  %v681_v5 = vmax.f32 %v5873_v17, %v5938_v50 }
 0x155   :  { %v6063_v8 = vpop.xlane.xlu0 %1128 }
 0x156   :  { %10290 = vst [vmem:[#allocation56_spill] sm:$0xff] %v6063_v8  ;;  %v680_v8 = vmax.f32 %v5861_v11, %v5925_v43  ;;  %v714_v11 = vmax.f32 %v682_v3, %v5998_v30 }
 0x158   :  { %v712_v57 = vmax.f32 %v680_v8, %v5990_v22  ;;  %v918_v8 = vsub.f32 %v6050_v42, %v6075_v53 }
 0x159   :  { %v6082_v35 = vpop.xlane.xlu1 %1134  ;;  %v6093_v0 = vpop.xlane.xlu0 %1125 }
 0x15a   :  { %10293 = vst [vmem:[#allocation59_spill] sm:$0xff] %v6082_v35  ;;  %v822_v35 = vsub.f32 %v5917_v39, %v6075_v53  ;;  %v6109_v36 = vmax.f32 %v712_v57, %v6080_v51  ;;  %v711_v39 = vmax.f32 %v679_v16, %v5992_v24  ;;  %v889_v57 = vmul.f32 1.442695, %v870_v34 }
 0x15b   :  { %v917_v16 = vsub.f32 %v6061_v63, %v6091_v28  ;;  %v937_v27 = vmul.f32 1.442695, %v918_v8 }
 0x15c   :  { %10296 = vst [vmem:[#allocation62_spill] sm:$0xff] %v6109_v36  ;;  %v841_v31 = vmul.f32 1.442695, %v822_v35  ;;  %v6123_v20 = vmax.f32 %v711_v39, %v6102_v9  ;;  %v824_v35 = vsub.f32 %v5925_v43, %v6109_v36  ;;  %v872_v34 = vsub.f32 %v5990_v22, %v6109_v36 }
 0x15d   :  { %v6104_v26 = vpop.xlane.xlu1 %1131  ;;  %v887_v39 = vmul.f32 1.442695, %v869_v1  ;;  %v920_v18 = vsub.f32 %v6080_v51, %v6109_v36  ;;  %v935_v3 = vmul.f32 1.442695, %v917_v16  ;;  %v713_v51 = vmax.f32 %v681_v5, %v6000_v32 }
 0x15e   :  { %10297 = vst [vmem:[#allocation63_spill] sm:$0xff] %v6123_v20  ;;  %5011 = vpow2.f32 %v841_v31  ;;  %v823_v47 = vsub.f32 %v5929_v45, %v6123_v20  ;;  %v845_v8 = vmul.f32 1.442695, %v824_v35  ;;  %v871_v55 = vsub.f32 %v5992_v24, %v6123_v20  ;;  %v6165_v24 = vpop.eup %4999 }
 0x15f   :  { %v6114_v14 = vpop.xlane.xlu0 %1137  ;;  %5013 = vpow2.f32 %v889_v57  ;;  %v893_v1 = vmul.f32 1.442695, %v872_v34  ;;  %v6151_v57 = vpop.f32.mrf.mxu0  ;;  %v941_v43 = vmul.f32 1.442695, %v920_v18  ;;  %v684_v18 = vmax.f32 %v5877_v19, %v5942_v52 }
 0x160   :  { %5015 = vpow2.f32 %v937_v27  ;;  %10302 = vst [vmem:[#allocation68_spill] sm:$0xff] %v6151_v57  ;;  %v843_v35 = vmul.f32 1.442695, %v823_v47  ;;  %v891_v34 = vmul.f32 1.442695, %v871_v55  ;;  %v6173_v5 = vpop.eup %5001 }
 0x161   :  { %v6127_v42 = vpop.xlane.xlu1 %1140  ;;  %5017 = vpow2.f32 %v839_v60  ;;  %v6177_v55 = vpop.f32.mrf.mxu0 }
 0x162   :  { %10299 = vst [vmem:[#allocation65_spill] sm:$0xff] %v6127_v42  ;;  %v6139_v42 = vmax.f32 %v714_v11, %v6125_v12  ;;  %v919_v11 = vsub.f32 %v6102_v9, %v6123_v20  ;;  %5019 = vpow2.f32 %v887_v39  ;;  %v772_v9 = vsub.f32 %v5847_v4, %v6053_v44  ;;  %10304 = vst [vmem:[#allocation70_spill] sm:$0xff] %v6177_v55  ;;  %v6181_v44 = vpop.eup %5003 }
 0x163   :  { %v6134_v63 = vpop.xlane.xlu0 %1143  ;;  %5021 = vpow2.f32 %v935_v3  ;;  %v1172_v3 = vsub.f32 %v5851_v6, %v6093_v0  ;;  %10306 = vst [vmem:[#allocation72_spill] sm:$0xff] %v6181_v44  ;;  %v1174_v0 = vsub.f32 %v5859_v10, %v6104_v26  ;;  %v6186_v4 = vpop.eup %5005 }
 0x164   :  { %10300 = vst [vmem:[#allocation66_spill] sm:$0xff] %v6139_v42  ;;  %v826_v27 = vsub.f32 %v5934_v48, %v6139_v42  ;;  %v874_v60 = vsub.f32 %v5998_v30, %v6139_v42  ;;  %5023 = vpow2.f32 %v845_v8  ;;  %v939_v39 = vmul.f32 1.442695, %v919_v11 }
 0x165   :  { %v6147_v31 = vpop.xlane.xlu1 %1146  ;;  %5025 = vpow2.f32 %v893_v1  ;;  %v922_v8 = vsub.f32 %v6125_v12, %v6139_v42  ;;  %v716_v1 = vmax.f32 %v684_v18, %v6006_v38  ;;  %v6190_v12 = vpop.eup %5007 }
 0x166   :  { %10301 = vst [vmem:[#allocation67_spill] sm:$0xff] %v6147_v31  ;;  %v6161_v31 = vmax.f32 %v713_v51, %v6151_v57  ;;  %5027 = vpow2.f32 %v941_v43  ;;  %v849_v51 = vmul.f32 1.442695, %v826_v27  ;;  %v897_v11 = vmul.f32 1.442695, %v874_v60  ;;  %10307 = vst [vmem:[#allocation73_spill] sm:$0xff] %v6190_v12  ;;  %v6199_v26 = vpop.eup %5009 }
 0x167   :  { %v6153_v16 = vpop.xlane.xlu0 %1149  ;;  %5029 = vpow2.f32 %v843_v35  ;;  %v789_v27 = vmul.f32 1.442695, %v772_v9  ;;  %v6195_v18 = vmax.f32 %v716_v1, %v6177_v55  ;;  %v1188_v35 = vmul.f32 1.442695, %v1172_v3  ;;  %10309 = vst [vmem:[#allocation75_spill] sm:$0xff] %v6199_v26 }
 0x168   :  { %10303 = vst [vmem:[#allocation69_spill] sm:$0xff] %v6161_v31  ;;  %5031 = vpow2.f32 %v891_v34  ;;  %v825_v43 = vsub.f32 %v5938_v50, %v6161_v31  ;;  %v683_v34 = vmax.f32 %v5881_v21, %v5946_v54  ;;  %v945_v30 = vmul.f32 1.442695, %v922_v8 }
 0x169   :  { %v6179_v48 = vpop.xlane.xlu1 %1152  ;;  %5033 = vpow2.f32 %v939_v39  ;;  %10308 = vst [vmem:[#allocation74_spill] sm:$0xff] %v6195_v18  ;;  %v1176_v9 = vsub.f32 %v5865_v13, %v6114_v14  ;;  %v1192_v1 = vmul.f32 1.442695, %v1174_v0  ;;  %v771_v3 = vsub.f32 %v5851_v6, %v6059_v61 }
 0x16a   :  { %10305 = vst [vmem:[#allocation71_spill] sm:$0xff] %v6179_v48  ;;  %v873_v48 = vsub.f32 %v6000_v32, %v6161_v31  ;;  %5035 = vpow2.f32 %v849_v51  ;;  %v6207_v32 = vpop.f32.mrf.mxu0  ;;  %v715_v19 = vmax.f32 %v683_v34, %v6008_v40  ;;  %v847_v50 = vmul.f32 1.442695, %v825_v43 }
 0x16b   :  { %v6171_v47 = vpop.xlane.xlu0 %1155  ;;  %v6205_v39 = vpop.eup %5011  ;;  %5037 = vpow2.f32 %v897_v11  ;;  %10310 = vst [vmem:[#allocation76_spill] sm:$0xff] %v6207_v32  ;;  %v921_v51 = vsub.f32 %v6151_v57, %v6161_v31  ;;  %v686_v11 = vmax.f32 %v5885_v23, %v5950_v56  ;;  %v828_v61 = vsub.f32 %v5942_v52, %v6195_v18 }
 0x16c   :  { %v6211_v22 = vpop.eup %5013  ;;  %5039 = vpow2.f32 %v789_v27  ;;  %v895_v0 = vmul.f32 1.442695, %v873_v48  ;;  %v876_v43 = vsub.f32 %v6006_v38, %v6195_v18  ;;  %v6231_v27 = vmax.f32 %v715_v19, %v6207_v32  ;;  %v6235_v23 = vpop.f32.mrf.mxu0 }
 0x16d   :  { %10311 = vst [vmem:[#allocation77_spill] sm:$0xff] %v6211_v22  ;;  %v6216_v8 = vpop.xlane.xlu1 %1158  ;;  %v6218_v14 = vpop.eup %5015  ;;  %5041 = vpow2.f32 %v1188_v35  ;;  %10317 = vst [vmem:[#allocation83_spill] sm:$0xff] %v6235_v23  ;;  %v1178_v48 = vsub.f32 %v5873_v17, %v6134_v63  ;;  %v787_v35 = vmul.f32 1.442695, %v771_v3  ;;  %v774_v19 = vsub.f32 %v5853_v7, %v6075_v53 }
 0x16e   :  { %10312 = vst [vmem:[#allocation78_spill] sm:$0xff] %v6216_v8  ;;  %10313 = vst [vmem:[#allocation79_spill] sm:$0xff] %v6218_v14  ;;  %v6226_v34 = vpop.eup %5017  ;;  %5043 = vpow2.f32 %v945_v30  ;;  %v1196_v8 = vmul.f32 1.442695, %v1176_v9  ;;  %v718_v30 = vmax.f32 %v686_v11, %v6014_v46  ;;  %v943_v14 = vmul.f32 1.442695, %v921_v51 }
 0x16f   :  { %v6197_v60 = vpop.xlane.xlu0 %1161  ;;  %10314 = vst [vmem:[#allocation80_spill] sm:$0xff] %v6226_v34  ;;  %10315 = vst [vmem:[#allocation81_spill] sm:$0xff] %v6231_v27  ;;  %v6233_v57 = vpop.eup %5019  ;;  %5045 = vpow2.f32 %v1192_v1  ;;  %v853_v9 = vmul.f32 1.442695, %v828_v61  ;;  %v924_v1 = vsub.f32 %v6177_v55, %v6195_v18  ;;  %v901_v3 = vmul.f32 1.442695, %v876_v43 }
 0x170   :  { %10316 = vst [vmem:[#allocation82_spill] sm:$0xff] %v6233_v57  ;;  %v6239_v52 = vpop.eup %5021  ;;  %5047 = vpow2.f32 %v847_v50  ;;  %v827_v11 = vsub.f32 %v5946_v54, %v6231_v27  ;;  %v6255_v50 = vmax.f32 %v718_v30, %v6235_v23  ;;  %v6261_v61 = vpop.f32.mrf.mxu0  ;;  %v875_v43 = vsub.f32 %v6008_v40, %v6231_v27 }
 0x171   :  { %v6244_v38 = vpop.eup %5023  ;;  %5049 = vpow2.f32 %v895_v0  ;;  %v6257_v51 = vpop.xlane.xlu1 %1164  ;;  %10323 = vst [vmem:[#allocation89_spill] sm:$0xff] %v6261_v61  ;;  %v1200_v0 = vmul.f32 1.442695, %v1178_v48  ;;  %v793_v30 = vmul.f32 1.442695, %v774_v19  ;;  %v923_v48 = vsub.f32 %v6207_v32, %v6231_v27 }
 0x172   :  { %v6250_v63 = vpop.eup %5025  ;;  %10320 = vst [vmem:[#allocation86_spill] sm:$0xff] %v6255_v50  ;;  %5051 = vpow2.f32 %v1196_v8  ;;  %10321 = vst [vmem:[#allocation87_spill] sm:$0xff] %v6257_v51  ;;  %v685_v8 = vmax.f32 %v5889_v25, %v5954_v58  ;;  %v949_v51 = vmul.f32 1.442695, %v924_v1  ;;  %v830_v40 = vsub.f32 %v5950_v56, %v6255_v50 }
 0x173   :  { %v6224_v6 = vpop.xlane.xlu0 %1167  ;;  %10319 = vst [vmem:[#allocation85_spill] sm:$0xff] %v6250_v63  ;;  %v6259_v53 = vpop.eup %5027  ;;  %5053 = vpow2.f32 %v787_v35  ;;  %v1182_v1 = vsub.f32 %v5889_v25, %v6171_v47  ;;  %v878_v56 = vsub.f32 %v6014_v46, %v6255_v50  ;;  %v773_v47 = vsub.f32 %v5859_v10, %v6091_v28 }
 0x174   :  { %10322 = vst [vmem:[#allocation88_spill] sm:$0xff] %v6259_v53  ;;  %v6265_v55 = vpop.eup %5029  ;;  %5055 = vpow2.f32 %v943_v14  ;;  %v851_v14 = vmul.f32 1.442695, %v827_v11  ;;  %v717_v53 = vmax.f32 %v685_v8, %v6016_v49  ;;  %v6284_v63 = vpop.f32.mrf.mxu0  ;;  %v899_v11 = vmul.f32 1.442695, %v875_v43 }
 0x175   :  { %v6269_v7 = vpop.eup %5031  ;;  %5057 = vpow2.f32 %v853_v9  ;;  %10325 = vst [vmem:[#allocation91_spill] sm:$0xff] %v6284_v63  ;;  %v1184_v28 = vsub.f32 %v5897_v29, %v6197_v60  ;;  %v791_v60 = vmul.f32 1.442695, %v773_v47  ;;  %v1186_v47 = vsub.f32 %v5905_v33, %v6224_v6 }
 0x176   :  { %5059 = vpow2.f32 %v901_v3  ;;  %v687_v3 = vmax.f32 %v5897_v29, %v5962_v62 }
 0x177   :  { %v6248_v57 = vpop.xlane.xlu0 %1640  ;;  %5061 = vpow2.f32 %v1200_v0  ;;  %v947_v0 = vmul.f32 1.442695, %v923_v48 }
 0x178   :  { %10318 = vst [vmem:[#allocation84_spill] sm:$0xff] %v6248_v57  ;;  %v1180_v57 = vsub.f32 %v5881_v21, %v6153_v16  ;;  %v6277_v16 = vpop.eup %5033  ;;  %5063 = vpow2.f32 %v793_v30  ;;  %v719_v43 = vmax.f32 %v687_v3, %v6025_v59  ;;  %v857_v30 = vmul.f32 1.442695, %v830_v40 }
 0x179   :  { %10324 = vst [vmem:[#allocation90_spill] sm:$0xff] %v6277_v16  ;;  %v6281_v19 = vpop.eup %5035  ;;  %v6294_v16 = vpop.xlane.xlu1 %1170  ;;  %5065 = vpow2.f32 %v949_v51  ;;  %v926_v40 = vsub.f32 %v6235_v23, %v6255_v50 }
 0x17a   :  { %v1204_v9 = vmul.f32 1.442695, %v1180_v57  ;;  %v6288_v32 = vpop.eup %5037  ;;  %10327 = vst [vmem:[#allocation93_spill] sm:$0xff] %v6294_v16  ;;  %v6299_v57 = vmax.f32 %v717_v53, %v6261_v61  ;;  %5067 = vpow2.f32 %v851_v14  ;;  %v6312_v51 = vpop.f32.mrf.mxu0  ;;  %v1208_v53 = vmul.f32 1.442695, %v1182_v1 }
 0x17b   :  { %v6275_v35 = vpop.xlane.xlu0 %1643  ;;  %10326 = vst [vmem:[#allocation92_spill] sm:$0xff] %v6288_v32  ;;  %v6296_v8 = vpop.eup %5039  ;;  %10331 = vst [vmem:[#allocation97_spill] sm:$0xff] %v6312_v51  ;;  %v905_v14 = vmul.f32 1.442695, %v878_v56 }
 0x17c   :  { %10328 = vst [vmem:[#allocation94_spill] sm:$0xff] %v6299_v57  ;;  %v6305_v32 = vpop.eup %5041  ;;  %v964_v16 = vadd.f32 %v6296_v8, %v6165_v24  ;;  %5069 = vpow2.f32 %v1204_v9  ;;  %v829_v9 = vsub.f32 %v5954_v58, %v6299_v57  ;;  %v877_v56 = vsub.f32 %v6016_v49, %v6299_v57 }
 0x17d   :  { %10329 = vst [vmem:[#allocation95_spill] sm:$0xff] %v6305_v32  ;;  %v6310_v46 = vpop.eup %5043  ;;  %v1220_v48 = vsel %vm1123_vm1, %v6305_v32, 0.0  ;;  %5071 = vpow2.f32 %v899_v11 }
 0x17e   :  { %10330 = vst [vmem:[#allocation96_spill] sm:$0xff] %v6310_v46  ;;  %v6318_v10 = vpop.eup %5045  ;;  %v980_v3 = vadd.f32 %v6173_v5, %v964_v16  ;;  %1221 = vadd.xlane.f32.xlu0 %v1220_v48  ;;  %5073 = vpow2.f32 %v947_v0  ;;  %v6336_v16 = vmax.f32 %v719_v43, %v6312_v51  ;;  %v1638_v48 = vpop.xlane.xlu1 %1637  ;;  %v855_v49 = vmul.f32 1.442695, %v829_v9 }
 0x17f   :  { %v6303_v63 = vpop.xlane.xlu0 %1649  ;;  %10332 = vst [vmem:[#allocation98_spill] sm:$0xff] %v6318_v10  ;;  %v6323_v46 = vpop.eup %5047  ;;  %v1226_v1 = vsel %vm1123_vm1, %v6318_v10, 0.0  ;;  %5075 = vpow2.f32 %v857_v30  ;;  %v925_v30 = vsub.f32 %v6261_v61, %v6299_v57 }
 0x180   :  { %10333 = vst [vmem:[#allocation99_spill] sm:$0xff] %v6323_v46  ;;  %v6331_v11 = vpop.eup %5049  ;;  %10335 = vst [vmem:[#allocation101_spill] sm:$0xff] %v6336_v16  ;;  %v996_v0 = vadd.f32 %v6181_v44, %v980_v3  ;;  %5077 = vpow2.f32 %v1208_v53  ;;  %v1212_v46 = vmul.f32 1.442695, %v1184_v28  ;;  %v1684_v53 = vsub.f32 %v5913_v37, %v1638_v48 }
 0x181   :  { %10334 = vst [vmem:[#allocation100_spill] sm:$0xff] %v6331_v11  ;;  %v6339_v23 = vpop.eup %5051  ;;  %v953_v11 = vmul.f32 1.442695, %v926_v40  ;;  %v903_v40 = vmul.f32 1.442695, %v877_v56  ;;  %v831_v61 = vsub.f32 %v5962_v62, %v6336_v16  ;;  %v879_v9 = vsub.f32 %v6025_v59, %v6336_v16 }
 0x182   :  { %10336 = vst [vmem:[#allocation102_spill] sm:$0xff] %v6339_v23  ;;  %v6343_v10 = vpop.eup %5053  ;;  %5079 = vrcp.f32 %v996_v0  ;;  %1227 = vadd.xlane.f32.xlu0 %v1226_v1  ;;  %v1216_v1 = vmul.f32 1.442695, %v1186_v47  ;;  %v1232_v48 = vsel %vm1123_vm1, %v6339_v23, 0.0  ;;  %v951_v37 = vmul.f32 1.442695, %v925_v30 }
 0x183   :  { %v6329_v32 = vpop.xlane.xlu0 %1655  ;;  %v6347_v43 = vpop.eup %5055  ;;  %v963_v3 = vadd.f32 %v6343_v10, %v6186_v4  ;;  %5081 = vpow2.f32 %v791_v60  ;;  %v927_v44 = vsub.f32 %v6312_v51, %v6336_v16  ;;  %v859_v30 = vmul.f32 1.442695, %v831_v61  ;;  %v10343_v61 = vld [vmem:[#allocation6_spill] sm:$0xff] }
 0x184   :  { %v6354_v6 = vpop.eup %5057  ;;  %5083 = vpow2.f32 %v905_v14  ;;  %v1686_v23 = vsub.f32 %v5921_v41, %v6275_v35 }
 0x185   :  { %10337 = vst [vmem:[#allocation103_spill] sm:$0xff] %v6354_v6  ;;  %v6358_v0 = vpop.eup %5059  ;;  %5085 = vpow2.f32 %v1212_v46  ;;  %v979_v14 = vadd.f32 %v6190_v12, %v963_v3  ;;  %v1700_v46 = vmul.f32 1.442695, %v1684_v53 }
 0x186   :  { %10338 = vst [vmem:[#allocation104_spill] sm:$0xff] %v6358_v0  ;;  %v6364_v60 = vpop.eup %5061  ;;  %5087 = vpow2.f32 %v953_v11  ;;  %1233 = vadd.xlane.f32.xlu0 %v1232_v48  ;;  %v6371_v0 = vpop.f32.mrf.mxu0  ;;  %v689_v11 = vmax.f32 %v5905_v33, %v5970_v2  ;;  %v907_v48 = vmul.f32 1.442695, %v879_v9 }
 0x187   :  { %v6352_v28 = vpop.xlane.xlu0 %1661  ;;  %10339 = vst [vmem:[#allocation105_spill] sm:$0xff] %v6364_v60  ;;  %v6367_v56 = vpop.eup %5063  ;;  %5089 = vpow2.f32 %v855_v49  ;;  %10340 = vst [vmem:[#allocation106_spill] sm:$0xff] %v6371_v0  ;;  %v1238_v49 = vsel %vm1123_vm1, %v6364_v60, 0.0  ;;  %v995_v51 = vadd.f32 %v6199_v26, %v979_v14  ;;  %v10345_v14 = vld [vmem:[#allocation49_spill] sm:$0xff] }
 0x188   :  { %v6375_v59 = vpop.eup %5065  ;;  %5091 = vpow2.f32 %v903_v40  ;;  %v966_v12 = vadd.f32 %v6367_v56, %v6205_v39  ;;  %v776_v40 = vsub.f32 %v10343_v61, %v6109_v36  ;;  %v6394_v0 = vpop.f32.mrf.mxu0  ;;  %v721_v26 = vmax.f32 %v689_v11, %v10345_v14 }
 0x189   :  { %v6379_v3 = vpop.eup %5067  ;;  %5093 = vpow2.f32 %v1216_v1  ;;  %v955_v1 = vmul.f32 1.442695, %v927_v44  ;;  %10344 = vst [vmem:[#allocation109_spill] sm:$0xff] %v6394_v0  ;;  %v1704_v44 = vmul.f32 1.442695, %v1686_v23  ;;  %v1688_v61 = vsub.f32 %v5929_v45, %v6303_v63 }
 0x18a   :  { %10341 = vst [vmem:[#allocation107_spill] sm:$0xff] %v6379_v3  ;;  %v6385_v53 = vpop.eup %5069  ;;  %5095 = vpow2.f32 %v951_v37  ;;  %1239 = vadd.xlane.f32.xlu0 %v1238_v49  ;;  %v775_v37 = vsub.f32 %v5865_v13, %v6123_v20  ;;  %v778_v49 = vsub.f32 %v5869_v15, %v6139_v42  ;;  %v6414_v20 = vmax.f32 %v721_v26, %v6394_v0  ;;  %v10349_v26 = vld [vmem:[#allocation25_spill] sm:$0xff] }
 0x18b   :  { %v6373_v47 = vpop.xlane.xlu0 %1667  ;;  %10342 = vst [vmem:[#allocation108_spill] sm:$0xff] %v6385_v53  ;;  %v6392_v9 = vpop.eup %5071  ;;  %5097 = vpow2.f32 %v1700_v46  ;;  %v1244_v46 = vsel %vm1123_vm1, %v6385_v53, 0.0  ;;  %v982_v11 = vadd.f32 %v6211_v22, %v966_v12  ;;  %v1690_v53 = vsub.f32 %v10349_v26, %v6329_v32  ;;  %v10351_v32 = vld [vmem:[#allocation79_spill] sm:$0xff]  ;;  %v10354_v26 = vld [vmem:[#allocation10_spill] sm:$0xff] }
 0x18c   :  { %v6400_v35 = vpop.eup %5073  ;;  %5099 = vpow2.f32 %v859_v30  ;;  %10348 = vst [vmem:[#allocation112_spill] sm:$0xff] %v6414_v20  ;;  %v797_v30 = vmul.f32 1.442695, %v776_v40  ;;  %v777_v12 = vsub.f32 %v5873_v17, %v6161_v31  ;;  %v780_v45 = vsub.f32 %v10354_v26, %v6195_v18 }
 0x18d   :  { %v6405_v36 = vpop.eup %5075  ;;  %5101 = vpow2.f32 %v907_v48  ;;  %v795_v48 = vmul.f32 1.442695, %v775_v37  ;;  %v1708_v37 = vmul.f32 1.442695, %v1688_v61  ;;  %v10353_v61 = vld [vmem:[#allocation82_spill] sm:$0xff] }
 0x18e   :  { %10346 = vst [vmem:[#allocation110_spill] sm:$0xff] %v6405_v36  ;;  %v6411_v41 = vpop.eup %5077  ;;  %5103 = vrcp.f32 %v995_v51  ;;  %1245 = vadd.xlane.f32.xlu0 %v1244_v46  ;;  %v801_v51 = vmul.f32 1.442695, %v778_v49  ;;  %v998_v49 = vadd.f32 %v10351_v32, %v982_v11  ;;  %v1712_v22 = vmul.f32 1.442695, %v1690_v53 }
 0x18f   :  { %v6396_v60 = vpop.xlane.xlu0 %1673  ;;  %10347 = vst [vmem:[#allocation111_spill] sm:$0xff] %v6411_v41  ;;  %v6417_v42 = vpop.eup %5079  ;;  %5105 = vpow2.f32 %v955_v1  ;;  %v1250_v46 = vsel %vm1123_vm1, %v6411_v41, 0.0  ;;  %v1692_v11 = vsub.f32 %v5946_v54, %v6352_v28  ;;  %v9980_v53 = vmov 2   ;;  %v10393_v54 = vld [vmem:[#allocation104_spill] sm:$0xff] }
 0x190   :  { %v6421_v15 = vpop.eup %5081  ;;  %v6425_v63 = vmul.f32 %v6417_v42, %v6296_v8  ;;  %5107 = vpow2.f32 %v1704_v44  ;;  %v833_v8 = vsub.f32 %v5970_v2, %v6414_v20  ;;  %v6445_v31 = vmul.f32 %v6417_v42, %v6173_v5 }
 0x191   :  { %v6431_v40 = vpop.eup %5083  ;;  %v965_v1 = vadd.f32 %v6421_v15, %v6226_v34  ;;  %5109 = vpow2.f32 %v797_v30  ;;  %v799_v30 = vmul.f32 1.442695, %v777_v12  ;;  %v781_v28 = vsub.f32 %v5889_v25, %v6299_v57 }
 0x192   :  { %v6437_v13 = vpop.eup %5085  ;;  %1371 = vperm.xlu1 %4961, %v6425_v63   ;;  %1251 = vadd.xlane.f32.xlu0 %v1250_v46  ;;  %10352 = vst [vmem:[#allocation79_spill] sm:$0xff] %v6445_v31  ;;  %5111 = vpow2.f32 %v795_v48  ;;  %v779_v48 = vsub.f32 %v5881_v21, %v6231_v27  ;;  %v863_v26 = vmul.f32 1.442695, %v833_v8  ;;  %v805_v12 = vmul.f32 1.442695, %v780_v45 }
 0x193   :  { %v6419_v23 = vpop.xlane.xlu0 %1679  ;;  %10350 = vst [vmem:[#allocation113_spill] sm:$0xff] %v6437_v13  ;;  %v6447_v44 = vpop.eup %5087  ;;  %v981_v17 = vadd.f32 %v10353_v61, %v965_v1  ;;  %5113 = vpow2.f32 %v801_v51  ;;  %v1256_v1 = vsel %vm1123_vm1, %v6437_v13, 0.0  ;;  %v6485_v13 = vmul.f32 %v6417_v42, %v6165_v24 }
 0x194   :  { %v6454_v34 = vpop.eup %5089  ;;  %5115 = vpow2.f32 %v1708_v37  ;;  %v783_v37 = vsub.f32 %v5897_v29, %v6336_v16  ;;  %v803_v45 = vmul.f32 1.442695, %v779_v48  ;;  %v10362_v48 = vld [vmem:[#allocation12_spill] sm:$0xff]  ;;  %v10374_v29 = vld [vmem:[#allocation90_spill] sm:$0xff] }
 0x195   :  { %10355 = vst [vmem:[#allocation82_spill] sm:$0xff] %v6454_v34  ;;  %v6458_v5 = vpop.eup %5091  ;;  %v997_v46 = vadd.f32 %v6239_v52, %v981_v17  ;;  %5117 = vrcp.f32 %v998_v49  ;;  %v1694_v49 = vsub.f32 %v5954_v58, %v6373_v47  ;;  %10359 = vst [vmem:[#allocation117_spill] sm:$0xff] %v6485_v13 }
 0x196   :  { %v6465_v18 = vpop.eup %5093  ;;  %4962 = vset.pattern.permute.xlu1 %v9980_v53  ;;  %1257 = vadd.xlane.f32.xlu0 %v1256_v1  ;;  %v1716_v53 = vmul.f32 1.442695, %v1692_v11  ;;  %v785_v11 = vsub.f32 %v5905_v33, %v6414_v20  ;;  %v1696_v33 = vsub.f32 %v5962_v62, %v6396_v60 }
 0x197   :  { %v6450_v41 = vpop.xlane.xlu0 %2201  ;;  %10356 = vst [vmem:[#allocation114_spill] sm:$0xff] %v6465_v18  ;;  %v6470_v51 = vpop.eup %5095  ;;  %1545 = vperm.xlu1 %4962, %v6425_v63   ;;  %5119 = vrcp.f32 %v997_v46  ;;  %v1262_v46 = vsel %vm1123_vm1, %v6465_v18, 0.0  ;;  %v782_v18 = vsub.f32 %v10362_v48, %v6255_v50 }
 0x198   :  { %v6477_v8 = vpop.eup %5097  ;;  %5121 = vpow2.f32 %v1712_v22  ;;  %v807_v22 = vmul.f32 1.442695, %v781_v28  ;;  %v881_v28 = vsub.f32 %v10345_v14, %v6414_v20 }
 0x199   :  { %10357 = vst [vmem:[#allocation115_spill] sm:$0xff] %v6477_v8  ;;  %v6481_v1 = vpop.eup %5099  ;;  %5123 = vpow2.f32 %v799_v30  ;;  %v1732_v24 = vsel %vm1123_vm1, %v6477_v8, 0.0  ;;  %v811_v30 = vmul.f32 1.442695, %v783_v37  ;;  %v809_v60 = vmul.f32 1.442695, %v782_v18 }
 0x19a   :  { %10358 = vst [vmem:[#allocation116_spill] sm:$0xff] %v6481_v1  ;;  %v6489_v31 = vpop.eup %5101  ;;  %5125 = vpow2.f32 %v863_v26  ;;  %1263 = vadd.xlane.f32.xlu0 %v1262_v46  ;;  %v1720_v46 = vmul.f32 1.442695, %v1694_v49  ;;  %v911_v48 = vmul.f32 1.442695, %v881_v28 }
 0x19b   :  { %v6473_v17 = vpop.xlane.xlu0 %2207  ;;  %v6493_v47 = vpop.eup %5103  ;;  %2090 = vperm.xlu1 %4962, %v6485_v13   ;;  %5127 = vpow2.f32 %v805_v12  ;;  %v929_v12 = vsub.f32 %v6394_v0, %v6414_v20  ;;  %v10371_v0 = vld [vmem:[#allocation14_spill] sm:$0xff] }
 0x19c   :  { %10360 = vst [vmem:[#allocation118_spill] sm:$0xff] %v6493_v47  ;;  %v6502_v26 = vpop.eup %5105  ;;  %5129 = vpow2.f32 %v1716_v53  ;;  %v6514_v37 = vmul.f32 %v6493_v47, %v6343_v10  ;;  %v10365_v53 = vmov 1   ;;  %v1698_v10 = vsub.f32 %v5970_v2, %v6419_v23  ;;  %v10369_v23 = vld [vmem:[#allocation36_spill] sm:$0xff] }
 0x19d   :  { %5131 = vpow2.f32 %v803_v45  ;;  %v6508_v57 = vpop.eup %5107  ;;  %v959_v28 = vmul.f32 1.442695, %v929_v12 }
 0x19e   :  { %10363 = vst [vmem:[#allocation120_spill] sm:$0xff] %v6508_v57  ;;  %10364 = vst [vmem:[#allocation121_spill] sm:$0xff] %v6514_v37  ;;  %1733 = vadd.xlane.f32.xlu0 %v1732_v24  ;;  %5133 = vpow2.f32 %v807_v22  ;;  %v6516_v50 = vpop.eup %5109  ;;  %v1724_v22 = vmul.f32 1.442695, %v1696_v33  ;;  %v10366_v24 = vld [vmem:[#allocation34_spill] sm:$0xff]  ;;  %v2248_v33 = vsub.f32 %v10369_v23, %v6473_v17 }
 0x19f   :  { %v6498_v16 = vpop.xlane.xlu0 %2204  ;;  %4963 = vset.pattern.permute.xlu1 %v10365_v53  ;;  %5135 = vpow2.f32 %v811_v30  ;;  %v6519_v45 = vpop.eup %5111  ;;  %v2246_v20 = vsub.f32 %v10366_v24, %v6450_v41  ;;  %v968_v24 = vadd.f32 %v6516_v50, %v6244_v38  ;;  %v1728_v17 = vmul.f32 1.442695, %v1698_v10 }
 0x1a0   :  { %10361 = vst [vmem:[#allocation119_spill] sm:$0xff] %v6498_v16  ;;  %v815_v16 = vmul.f32 1.442695, %v785_v11  ;;  %1461 = vperm.xlu1 %4963, %v6514_v37   ;;  %5137 = vpow2.f32 %v1720_v46  ;;  %v6524_v8 = vpop.eup %5113  ;;  %v1738_v11 = vsel %vm1123_vm1, %v6508_v57, 0.0  ;;  %v967_v18 = vadd.f32 %v6519_v45, %v6265_v55  ;;  %v10370_v57 = vld [vmem:[#allocation30_spill] sm:$0xff] }
 0x1a1   :  { %v6532_v30 = vpop.eup %5115  ;;  %v6536_v46 = vmul.f32 %v6493_v47, %v6186_v4  ;;  %v688_v41 = vmax.f32 %v10371_v0, %v10370_v57  ;;  %v970_v23 = vadd.f32 %v6524_v8, %v6281_v19  ;;  %v2263_v27 = vmul.f32 1.442695, %v2246_v20 }
 0x1a2   :  { %10367 = vst [vmem:[#allocation122_spill] sm:$0xff] %v6532_v30  ;;  %1739 = vadd.xlane.f32.xlu0 %v1738_v11  ;;  %5139 = vpow2.f32 %v815_v16  ;;  %v6540_v37 = vpop.eup %5117  ;;  %v983_v14 = vadd.f32 %v6269_v7, %v967_v18  ;;  %v10372_v16 = vld [vmem:[#allocation38_spill] sm:$0xff]  ;;  %v1744_v18 = vsel %vm1123_vm1, %v6532_v30, 0.0  ;;  %v2267_v10 = vmul.f32 1.442695, %v2248_v33  ;;  %v10380_v30 = vld [vmem:[#allocation99_spill] sm:$0xff] }
 0x1a3   :  { %v2214_v49 = vpop.xlane.xlu0 %2213  ;;  %10368 = vst [vmem:[#allocation123_spill] sm:$0xff] %v6536_v46  ;;  %5141 = vpow2.f32 %v809_v60 }
 0x1a4   :  { %v6549_v4 = vpop.eup %5119  ;;  %5143 = vpow2.f32 %v911_v48  ;;  %1990 = vperm.xlu1 %4963, %v6536_v46   ;;  %v2250_v11 = vsub.f32 %v10372_v16, %v2214_v49  ;;  %v999_v60 = vadd.f32 %v10374_v29, %v983_v14  ;;  %v10376_v48 = vld [vmem:[#allocation46_spill] sm:$0xff]  ;;  %v6565_v49 = vmul.f32 %v6540_v37, %v6367_v56 }
 0x1a5   :  { %v6555_v2 = vpop.eup %5121  ;;  %5145 = vpow2.f32 %v1724_v22  ;;  %v720_v13 = vmax.f32 %v688_v41, %v10376_v48  ;;  %v10379_v22 = vld [vmem:[#allocation85_spill] sm:$0xff]  ;;  %v6574_v14 = vmul.f32 %v6549_v4, %v10353_v61  ;;  %v6582_v25 = vmul.f32 %v6549_v4, %v6239_v52 }
 0x1a6   :  { %10373 = vst [vmem:[#allocation14_spill] sm:$0xff] %v6555_v2  ;;  %v6560_v62 = vpop.eup %5123  ;;  %5147 = vpow2.f32 %v959_v28  ;;  %10377 = vst [vmem:[#allocation124_spill] sm:$0xff] %v6565_v49  ;;  %1745 = vadd.xlane.f32.xlu0 %v1744_v18  ;;  %v984_v16 = vadd.f32 %v10379_v22, %v968_v24  ;;  %v10383_v28 = vmov 0   ;;  %v2271_v56 = vmul.f32 1.442695, %v2250_v11  ;;  %v10384_v18 = vld [vmem:[#allocation92_spill] sm:$0xff] }
 0x1a7   :  { %v6547_v12 = vpop.xlane.xlu0 %2219  ;;  %10375 = vst [vmem:[#allocation90_spill] sm:$0xff] %v6560_v62  ;;  %v6567_v46 = vpop.eup %5125  ;;  %5149 = vrcp.f32 %v999_v60  ;;  %v969_v20 = vadd.f32 %v6560_v62, %v10380_v30  ;;  %10381 = vst [vmem:[#allocation85_spill] sm:$0xff] %v6574_v14  ;;  %v986_v33 = vadd.f32 %v10384_v18, %v970_v23  ;;  %v1750_v61 = vsel %vm1123_vm1, %v6555_v2, 0.0  ;;  %v10387_v14 = vld [vmem:[#allocation100_spill] sm:$0xff]  ;;  %v10389_v11 = vld [vmem:[#allocation91_spill] sm:$0xff] }
 0x1a8   :  { %10378 = vst [vmem:[#allocation125_spill] sm:$0xff] %v6567_v46  ;;  %v6576_v41 = vpop.eup %5127  ;;  %4964 = vset.pattern.permute.xlu1 %v10383_v28  ;;  %5151 = vpow2.f32 %v1728_v17  ;;  %10385 = vst [vmem:[#allocation92_spill] sm:$0xff] %v6582_v25  ;;  %v6597_v52 = vmax.f32 %v720_v13, %v10389_v11  ;;  %v10395_v13 = vld [vmem:[#allocation96_spill] sm:$0xff] }
 0x1a9   :  { %10382 = vst [vmem:[#allocation126_spill] sm:$0xff] %v6576_v41  ;;  %v6584_v24 = vpop.eup %5129  ;;  %1381 = vperm.xlu1 %4964, %v6565_v49   ;;  %5153 = vpow2.f32 %v2263_v27  ;;  %v985_v58 = vadd.f32 %v10387_v14, %v969_v20  ;;  %v972_v17 = vadd.f32 %v6576_v41, %v6354_v6  ;;  %v10392_v27 = vld [vmem:[#allocation88_spill] sm:$0xff] }
 0x1aa   :  { %10386 = vst [vmem:[#allocation127_spill] sm:$0xff] %v6584_v24  ;;  %v6594_v23 = vpop.eup %5131  ;;  %10390 = vst [vmem:[#allocation128_spill] sm:$0xff] %v6597_v52  ;;  %1751 = vadd.xlane.f32.xlu0 %v1750_v61  ;;  %5155 = vpow2.f32 %v2267_v10  ;;  %v1000_v21 = vadd.f32 %v10392_v27, %v984_v16  ;;  %v1756_v6 = vsel %vm1123_vm1, %v6584_v24, 0.0  ;;  %v1002_v61 = vadd.f32 %v10395_v13, %v986_v33 }
 0x1ab   :  { %v6589_v60 = vpop.xlane.xlu0 %2225  ;;  %10388 = vst [vmem:[#allocation100_spill] sm:$0xff] %v6594_v23  ;;  %v6599_v25 = vpop.eup %5133  ;;  %v1001_v2 = vadd.f32 %v6347_v43, %v985_v58  ;;  %v988_v30 = vadd.f32 %v10393_v54, %v972_v17  ;;  %v971_v20 = vadd.f32 %v6594_v23, %v6379_v3  ;;  %5157 = vpow2.f32 %v2271_v56  ;;  %v10397_v58 = vld [vmem:[#allocation40_spill] sm:$0xff] }
 0x1ac   :  { %10391 = vst [vmem:[#allocation129_spill] sm:$0xff] %v6599_v25  ;;  %v6606_v62 = vpop.eup %5135  ;;  %v973_v10 = vadd.f32 %v6599_v25, %v6454_v34  ;;  %v2252_v16 = vsub.f32 %v10397_v58, %v6547_v12  ;;  %v10398_v56 = vld [vmem:[#allocation32_spill] sm:$0xff]  ;;  %v832_v12 = vsub.f32 %v10370_v57, %v6597_v52 }
 0x1ad   :  { %10394 = vst [vmem:[#allocation88_spill] sm:$0xff] %v6606_v62  ;;  %v6613_v41 = vpop.eup %5137  ;;  %4965 = vset.pattern.permute.xlu1 %v10365_v53  ;;  %v1004_v17 = vadd.f32 %v6375_v59, %v988_v30  ;;  %v987_v3 = vadd.f32 %v6392_v9, %v971_v20  ;;  %v975_v24 = vadd.f32 %v6606_v62, %v6481_v1  ;;  %v10399_v23 = vld [vmem:[#allocation16_spill] sm:$0xff]  ;;  %5159 = vrcp.f32 %v1001_v2 }
 0x1ae   :  { %10396 = vst [vmem:[#allocation104_spill] sm:$0xff] %v6613_v41  ;;  %v690_v33 = vmax.f32 %v10399_v23, %v10398_v56  ;;  %1473 = vperm.xlu1 %4965, %v6565_v49   ;;  %1757 = vadd.xlane.f32.xlu0 %v1756_v6  ;;  %v989_v34 = vadd.f32 %v6458_v5, %v973_v10  ;;  %5161 = vrcp.f32 %v1000_v21  ;;  %v1762_v2 = vsel %vm1123_vm1, %v6613_v41, 0.0 }
 0x1af   :  { %v6626_v25 = vpop.eup %5139  ;;  %v2232_v30 = vpop.xlane.xlu0 %2231  ;;  %v1003_v20 = vadd.f32 %v6400_v35, %v987_v3  ;;  %v991_v58 = vadd.f32 %v6489_v31, %v975_v24  ;;  %v6636_v49 = vmul.f32 %v6540_v37, %v6205_v39  ;;  %5163 = vrcp.f32 %v1002_v61  ;;  %v10404_v39 = vld [vmem:[#allocation48_spill] sm:$0xff] }
 0x1b0   :  { %10400 = vst [vmem:[#allocation96_spill] sm:$0xff] %v6626_v25  ;;  %v6632_v1 = vpop.eup %5141  ;;  %v1005_v6 = vadd.f32 %v6470_v51, %v989_v34  ;;  %v2275_v21 = vmul.f32 1.442695, %v2252_v16  ;;  %5165 = vrcp.f32 %v1004_v17  ;;  %v977_v3 = vadd.f32 %v6626_v25, %v6567_v46  ;;  %v10405_v16 = vld [vmem:[#allocation42_spill] sm:$0xff] }
 0x1b1   :  { %10401 = vst [vmem:[#allocation130_spill] sm:$0xff] %v6632_v1  ;;  %10402 = vst [vmem:[#allocation131_spill] sm:$0xff] %v6636_v49  ;;  %v6641_v10 = vpop.eup %5143  ;;  %v974_v24 = vadd.f32 %v6632_v1, %v6405_v36  ;;  %v722_v62 = vmax.f32 %v690_v33, %v10404_v39  ;;  %v880_v41 = vsub.f32 %v10376_v48, %v6597_v52  ;;  %5167 = vrcp.f32 %v1003_v20  ;;  %v10406_v25 = vld [vmem:[#allocation106_spill] sm:$0xff] }
 0x1b2   :  { %v6647_v57 = vpop.eup %5145  ;;  %2002 = vperm.xlu1 %4965, %v6636_v49   ;;  %1763 = vadd.xlane.f32.xlu0 %v1762_v2  ;;  %v1007_v34 = vadd.f32 %v6502_v26, %v991_v58  ;;  %v2254_v17 = vsub.f32 %v10405_v16, %v6589_v60  ;;  %5169 = vrcp.f32 %v1005_v6  ;;  %v993_v36 = vadd.f32 %v6641_v10, %v977_v3 }
 0x1b3   :  { %10403 = vst [vmem:[#allocation132_spill] sm:$0xff] %v6647_v57  ;;  %v6654_v61 = vpop.eup %5147  ;;  %v861_v33 = vmul.f32 1.442695, %v832_v12  ;;  %v928_v46 = vsub.f32 %v10389_v11, %v6597_v52  ;;  %v6664_v49 = vmax.f32 %v722_v62, %v10406_v25  ;;  %v990_v20 = vadd.f32 %v6431_v40, %v974_v24  ;;  %v2238_v6 = vpop.xlane.xlu0 %2237  ;;  %v10410_v62 = vld [vmem:[#allocation44_spill] sm:$0xff] }
 0x1b4   :  { %v6659_v1 = vpop.eup %5149  ;;  %v6671_v2 = vmul.f32 %v6549_v4, %v6421_v15  ;;  %v1768_v60 = vsel %vm1123_vm1, %v6647_v57, 0.0  ;;  %5171 = vpow2.f32 %v2275_v21  ;;  %v1009_v12 = vadd.f32 %v6654_v61, %v993_v36 }
 0x1b5   :  { %10407 = vst [vmem:[#allocation48_spill] sm:$0xff] %v6664_v49  ;;  %v6667_v58 = vpop.eup %5151  ;;  %v909_v11 = vmul.f32 1.442695, %v880_v41  ;;  %v2256_v24 = vsub.f32 %v10410_v62, %v2232_v30  ;;  %5173 = vrcp.f32 %v1007_v34  ;;  %v1006_v16 = vadd.f32 %v6447_v44, %v990_v20 }
 0x1b6   :  { %10408 = vst [vmem:[#allocation133_spill] sm:$0xff] %v6667_v58  ;;  %v6676_v3 = vpop.eup %5153  ;;  %4966 = vset.pattern.permute.xlu1 %v10383_v28  ;;  %1769 = vadd.xlane.f32.xlu0 %v1768_v60  ;;  %v2279_v57 = vmul.f32 1.442695, %v2254_v17  ;;  %5175 = vrcp.f32 %v1009_v12  ;;  %v6686_v36 = vmul.f32 %v6659_v1, %v6269_v7  ;;  %v6690_v41 = vmul.f32 %v6659_v1, %v10374_v29 }
 0x1b7   :  { %10409 = vst [vmem:[#allocation134_spill] sm:$0xff] %v6676_v3  ;;  %v6681_v15 = vpop.eup %5155  ;;  %1376 = vperm.xlu1 %4966, %v6671_v2   ;;  %5177 = vpow2.f32 %v861_v33  ;;  %v834_v30 = vsub.f32 %v10398_v56, %v6664_v49  ;;  %v882_v21 = vsub.f32 %v10404_v39, %v6664_v49  ;;  %v957_v20 = vmul.f32 1.442695, %v928_v46  ;;  %v2244_v46 = vpop.xlane.xlu0 %2243 }
 0x1b8   :  { %10411 = vst [vmem:[#allocation44_spill] sm:$0xff] %v6686_v36  ;;  %10412 = vst [vmem:[#allocation135_spill] sm:$0xff] %v6690_v41  ;;  %v6696_v34 = vpop.eup %5157  ;;  %v1774_v17 = vsel %vm1123_vm1, %v6667_v58, 0.0  ;;  %v2258_v7 = vsub.f32 %v10376_v48, %v2238_v6  ;;  %5179 = vrcp.f32 %v1006_v16  ;;  %v930_v29 = vsub.f32 %v10406_v25, %v6664_v49 }
 0x1b9   :  { %10413 = vst [vmem:[#allocation136_spill] sm:$0xff] %v6696_v34  ;;  %5181 = vpow2.f32 %v909_v11  ;;  %v2283_v33 = vmul.f32 1.442695, %v2256_v24  ;;  %v784_v60 = vsub.f32 %v10371_v0, %v6597_v52  ;;  %v786_v58 = vsub.f32 %v10399_v23, %v6664_v49 }
 0x1ba   :  { %1775 = vadd.xlane.f32.xlu0 %v1774_v17  ;;  %v6705_v12 = vpop.eup %5159  ;;  %5183 = vpow2.f32 %v2279_v57  ;;  %v865_v11 = vmul.f32 1.442695, %v834_v30  ;;  %v913_v16 = vmul.f32 1.442695, %v882_v21  ;;  %v2296_v57 = vsel %vm1123_vm1, %v6676_v3, 0.0 }
 0x1bb   :  { %4967 = vset.pattern.permute.xlu1 %v10365_v53  ;;  %v6710_v6 = vpop.eup %5161  ;;  %v6715_v24 = vmul.f32 %v6705_v12, %v10387_v14  ;;  %v6719_v17 = vmul.f32 %v6705_v12, %v6347_v43  ;;  %5185 = vpow2.f32 %v957_v20  ;;  %v2287_v49 = vmul.f32 1.442695, %v2258_v7  ;;  %v10416_v43 = vld [vmem:[#allocation73_spill] sm:$0xff]  ;;  %v10418_v20 = vld [vmem:[#allocation72_spill] sm:$0xff] }
 0x1bc   :  { %1469 = vperm.xlu1 %4967, %v6671_v2   ;;  %v6721_v25 = vpop.eup %5163  ;;  %v813_v52 = vmul.f32 1.442695, %v784_v60  ;;  %v961_v21 = vmul.f32 1.442695, %v930_v29  ;;  %5187 = vpow2.f32 %v2283_v33  ;;  %v2260_v14 = vsub.f32 %v10404_v39, %v2244_v46  ;;  %v10420_v7 = vld [vmem:[#allocation77_spill] sm:$0xff] }
 0x1bd   :  { %10414 = vst [vmem:[#allocation137_spill] sm:$0xff] %v6715_v24  ;;  %10415 = vst [vmem:[#allocation138_spill] sm:$0xff] %v6719_v17  ;;  %v6725_v30 = vpop.eup %5165  ;;  %v817_v23 = vmul.f32 1.442695, %v786_v58  ;;  %v6732_v48 = vmul.f32 %v6493_v47, %v10416_v43  ;;  %v6736_v3 = vmul.f32 %v6417_v42, %v10418_v20  ;;  %v6740_v60 = vmul.f32 %v6540_v37, %v10420_v7  ;;  %v6810_v20 = vpop.xlane.xlu1 %1646 }
 0x1be   :  { %2297 = vadd.xlane.f32.xlu0 %v2296_v57  ;;  %v6728_v56 = vpop.eup %5167  ;;  %5189 = vpow2.f32 %v813_v52  ;;  %v10422_v33 = vmov 2   ;;  %v2302_v52 = vsel %vm1123_vm1, %v6681_v15, 0.0  ;;  %v2308_v46 = vsel %vm1123_vm1, %v6696_v34, 0.0  ;;  %10439 = vst [vmem:[#allocation153_spill] sm:$0xff] %v6810_v20 }
 0x1bf   :  { %10417 = vst [vmem:[#allocation73_spill] sm:$0xff] %v6732_v48  ;;  %10419 = vst [vmem:[#allocation72_spill] sm:$0xff] %v6736_v3  ;;  %v6742_v29 = vpop.eup %5169  ;;  %5191 = vpow2.f32 %v865_v11  ;;  %v6749_v58 = vmul.f32 %v6728_v56, %v6392_v9  ;;  %v6753_v42 = vmul.f32 %v6728_v56, %v6400_v35  ;;  %v2291_v43 = vmul.f32 1.442695, %v2260_v14  ;;  %v10491_v48 = vld [vmem:[#allocation99_spill] sm:$0xff] }
 0x1c0   :  { %10421 = vst [vmem:[#allocation77_spill] sm:$0xff] %v6740_v60  ;;  %4968 = vset.pattern.permute.xlu1 %v10422_v33  ;;  %5193 = vpow2.f32 %v2287_v49  ;;  %v6760_v11 = vmul.f32 %v6742_v29, %v6458_v5  ;;  %v6764_v57 = vmul.f32 %v6742_v29, %v6470_v51  ;;  %v6770_v35 = vmul.f32 %v6540_v37, %v10351_v32  ;;  %v10487_v60 = vld [vmem:[#allocation129_spill] sm:$0xff] }
 0x1c1   :  { %10423 = vst [vmem:[#allocation139_spill] sm:$0xff] %v6749_v58  ;;  %10424 = vst [vmem:[#allocation140_spill] sm:$0xff] %v6753_v42  ;;  %1549 = vperm.xlu1 %4968, %v6671_v2   ;;  %v6766_v9 = vpop.eup %5171  ;;  %5195 = vpow2.f32 %v817_v23  ;;  %v6774_v49 = vmul.f32 %v6710_v6, %v10379_v22  ;;  %v6780_v5 = vmul.f32 %v6710_v6, %v10392_v27  ;;  %v10434_v22 = vld [vmem:[#allocation80_spill] sm:$0xff] }
 0x1c2   :  { %10425 = vst [vmem:[#allocation141_spill] sm:$0xff] %v6760_v11  ;;  %10426 = vst [vmem:[#allocation142_spill] sm:$0xff] %v6764_v57  ;;  %2303 = vadd.xlane.f32.xlu0 %v2302_v52  ;;  %v6776_v2 = vpop.eup %5173  ;;  %v6784_v51 = vmul.f32 %v6721_v25, %v10384_v18  ;;  %v6788_v23 = vmul.f32 %v6721_v25, %v10395_v13  ;;  %v6792_v32 = vmul.f32 %v6725_v30, %v10393_v54 }
 0x1c3   :  { %10427 = vst [vmem:[#allocation143_spill] sm:$0xff] %v6766_v9  ;;  %10428 = vst [vmem:[#allocation144_spill] sm:$0xff] %v6770_v35  ;;  %v6794_v37 = vpop.eup %5175  ;;  %5197 = vpow2.f32 %v913_v16  ;;  %v6798_v14 = vmul.f32 %v6549_v4, %v10434_v22  ;;  %v6802_v27 = vmul.f32 %v6776_v2, %v6489_v31  ;;  %v6806_v18 = vmul.f32 %v6776_v2, %v6502_v26 }
 0x1c4   :  { %10429 = vst [vmem:[#allocation145_spill] sm:$0xff] %v6774_v49  ;;  %10430 = vst [vmem:[#allocation146_spill] sm:$0xff] %v6780_v5  ;;  %v6808_v13 = vpop.eup %5177  ;;  %v6815_v54 = vmul.f32 %v6794_v37, %v6641_v10  ;;  %v6819_v4 = vmul.f32 %v6794_v37, %v6654_v61  ;;  %5199 = vpow2.f32 %v961_v21  ;;  %v6826_v26 = vmul.f32 %v6725_v30, %v6375_v59  ;;  %v10483_v49 = vld [vmem:[#allocation55_spill] sm:$0xff] }
 0x1c5   :  { %10431 = vst [vmem:[#allocation147_spill] sm:$0xff] %v6784_v51  ;;  %10432 = vst [vmem:[#allocation148_spill] sm:$0xff] %v6788_v23  ;;  %4969 = vset.pattern.permute.xlu1 %v10365_v53  ;;  %v6821_v31 = vpop.eup %5179  ;;  %5201 = vpow2.f32 %v2291_v43  ;;  %v2314_v10 = vsel %vm1123_vm1, %v6766_v9, 0.0  ;;  %v6963_v3 = vmul.f32 %v6742_v29, %v10487_v60  ;;  %v10495_v60 = vld [vmem:[#allocation61_spill] sm:$0xff] }
 0x1c6   :  { %10433 = vst [vmem:[#allocation149_spill] sm:$0xff] %v6792_v32  ;;  %10435 = vst [vmem:[#allocation80_spill] sm:$0xff] %v6798_v14  ;;  %1998 = vperm.xlu1 %4969, %v6798_v14   ;;  %2309 = vadd.xlane.f32.xlu0 %v2308_v46  ;;  %v5182_v16 = vpop.eup %5181  ;;  %v6832_v7 = vmul.f32 %v6821_v31, %v6431_v40  ;;  %v6836_v61 = vmul.f32 %v6821_v31, %v6447_v44  ;;  %v6843_v46 = vpop.xlane.xlu1 %1652 }
 0x1c7   :  { %10436 = vst [vmem:[#allocation150_spill] sm:$0xff] %v6802_v27  ;;  %10437 = vst [vmem:[#allocation151_spill] sm:$0xff] %v6806_v18  ;;  %v6838_v21 = vpop.eup %5183 }
 0x1c8   :  { %10438 = vst [vmem:[#allocation152_spill] sm:$0xff] %v6808_v13  ;;  %10440 = vst [vmem:[#allocation154_spill] sm:$0xff] %v6815_v54  ;;  %v5186_v52 = vpop.eup %5185  ;;  %v2320_v40 = vsel %vm1123_vm1, %v6838_v21, 0.0 }
 0x1c9   :  { %10441 = vst [vmem:[#allocation155_spill] sm:$0xff] %v6819_v4  ;;  %10442 = vst [vmem:[#allocation156_spill] sm:$0xff] %v6826_v26  ;;  %v6841_v59 = vpop.eup %5187 }
 0x1ca   :  { %10443 = vst [vmem:[#allocation157_spill] sm:$0xff] %v6832_v7  ;;  %10444 = vst [vmem:[#allocation158_spill] sm:$0xff] %v6836_v61  ;;  %4970 = vset.pattern.permute.xlu1 %v10422_v33  ;;  %2315 = vadd.xlane.f32.xlu0 %v2314_v10  ;;  %v6858_v10 = vmul.f32 %v6710_v6, %v6516_v50  ;;  %v6868_v26 = vpop.xlane.xlu1 %1658 }
 0x1cb   :  { %10445 = vst [vmem:[#allocation159_spill] sm:$0xff] %v6838_v21  ;;  %10446 = vst [vmem:[#allocation160_spill] sm:$0xff] %v6841_v59  ;;  %2094 = vperm.xlu1 %4970, %v6798_v14   ;;  %v6848_v43 = vpop.eup %5189  ;;  %v2326_v14 = vsel %vm1123_vm1, %v6841_v59, 0.0  ;;  %v10520_v59 = vld [vmem:[#allocation117_spill] sm:$0xff] }
 0x1cc   :  { %10447 = vst [vmem:[#allocation161_spill] sm:$0xff] %v6843_v46  ;;  %10448 = vst [vmem:[#allocation162_spill] sm:$0xff] %v6848_v43  ;;  %v6850_v22 = vpop.eup %5191  ;;  %v976_v44 = vadd.f32 %v6848_v43, %v6808_v13  ;;  %v10493_v13 = vld [vmem:[#allocation25_spill] sm:$0xff] }
 0x1cd   :  { %10449 = vst [vmem:[#allocation163_spill] sm:$0xff] %v6850_v22  ;;  %v6854_v47 = vpop.eup %5193  ;;  %10451 = vst [vmem:[#allocation165_spill] sm:$0xff] %v6858_v10  ;;  %v10524_v21 = vld [vmem:[#allocation89_spill] sm:$0xff] }
 0x1ce   :  { %10450 = vst [vmem:[#allocation164_spill] sm:$0xff] %v6854_v47  ;;  %2321 = vadd.xlane.f32.xlu0 %v2320_v40  ;;  %v6860_v46 = vpop.eup %5195  ;;  %v992_v20 = vadd.f32 %v5182_v16, %v976_v44  ;;  %10453 = vst [vmem:[#allocation167_spill] sm:$0xff] %v6868_v26  ;;  %v2332_v23 = vsel %vm1123_vm1, %v6854_v47, 0.0  ;;  %v6876_v5 = vpop.xlane.xlu1 %1664 }
 0x1cf   :  { %10452 = vst [vmem:[#allocation166_spill] sm:$0xff] %v6860_v46  ;;  %4971 = vset.pattern.permute.xlu1 %v10383_v28  ;;  %v978_v61 = vadd.f32 %v6860_v46, %v6850_v22  ;;  %10455 = vst [vmem:[#allocation169_spill] sm:$0xff] %v6876_v5  ;;  %v10474_v5 = vld [vmem:[#allocation35_spill] sm:$0xff]  ;;  %v6973_v22 = vmul.f32 %v6705_v12, %v10491_v48 }
 0x1d0   :  { %1391 = vperm.xlu1 %4971, %v6858_v10   ;;  %v5198_v7 = vpop.eup %5197  ;;  %v1008_v32 = vadd.f32 %v5186_v52, %v992_v20 }
 0x1d1   :  { %v994_v50 = vadd.f32 %v5198_v7, %v978_v61  ;;  %v5200_v40 = vpop.eup %5199 }
 0x1d2   :  { %2327 = vadd.xlane.f32.xlu0 %v2326_v14  ;;  %5203 = vrcp.f32 %v1008_v32  ;;  %v6872_v51 = vpop.eup %5201  ;;  %v6880_v14 = vmul.f32 %v6710_v6, %v6244_v38  ;;  %v1111_v32 = vmul.f32 %v6659_v1, %v6519_v45  ;;  %v6887_v61 = vpop.xlane.xlu1 %1670 }
 0x1d3   :  { %10454 = vst [vmem:[#allocation168_spill] sm:$0xff] %v6872_v51  ;;  %v1010_v44 = vadd.f32 %v5200_v40, %v994_v50  ;;  %v2338_v20 = vsel %vm1123_vm1, %v6872_v51, 0.0  ;;  %10457 = vst [vmem:[#allocation171_spill] sm:$0xff] %v6887_v61  ;;  %v6918_v61 = vmul.f32 %v6721_v25, %v6524_v8  ;;  %v10471_v8 = vld [vmem:[#allocation19_spill] sm:$0xff] }
 0x1d4   :  { %4972 = vset.pattern.permute.xlu1 %v10365_v53  ;;  %10456 = vst [vmem:[#allocation170_spill] sm:$0xff] %v6880_v14 }
 0x1d5   :  { %1481 = vperm.xlu1 %4972, %v6858_v10   ;;  %5205 = vrcp.f32 %v1010_v44  ;;  %10467 = vst [vmem:[#allocation181_spill] sm:$0xff] %v6918_v61  ;;  %v10518_v10 = vld [vmem:[#allocation45_spill] sm:$0xff] }
 0x1d6   :  { %2333 = vadd.xlane.f32.xlu0 %v2332_v23  ;;  %v6901_v44 = vpop.xlane.xlu1 %1676 }
 0x1d7   :  { %10462 = vst [vmem:[#allocation176_spill] sm:$0xff] %v6901_v44  ;;  %v10473_v44 = vld [vmem:[#allocation90_spill] sm:$0xff] }
 0x1d9   :  { %2010 = vperm.xlu1 %4972, %v6880_v14  }
 0x1da   :  { %2339 = vadd.xlane.f32.xlu0 %v2338_v20 }
 0x1dd   :  { %4973 = vset.pattern.permute.xlu1 %v10383_v28 }
 0x1de   :  { %1386 = vperm.xlu1 %4973, %v1111_v32  }
 0x1df   :  { %v6890_v23 = vpop.eup %5203 }
 0x1e0   :  { %10458 = vst [vmem:[#allocation172_spill] sm:$0xff] %v6890_v23  ;;  %v6893_v50 = vmul.f32 %v6890_v23, %v5182_v16  ;;  %v6896_v38 = vmul.f32 %v6890_v23, %v5186_v52  ;;  %v6911_v16 = vmul.f32 %v6659_v1, %v6265_v55  ;;  %v6914_v52 = vpop.xlane.xlu1 %1682  ;;  %v6931_v1 = vmul.f32 %v6721_v25, %v6281_v19  ;;  %v10480_v19 = vld [vmem:[#allocation100_spill] sm:$0xff] }
 0x1e1   :  { %10466 = vst [vmem:[#allocation180_spill] sm:$0xff] %v6914_v52  ;;  %v10504_v23 = vld [vmem:[#allocation68_spill] sm:$0xff] }
 0x1e2   :  { %10459 = vst [vmem:[#allocation173_spill] sm:$0xff] %v6893_v50  ;;  %10460 = vst [vmem:[#allocation174_spill] sm:$0xff] %v6896_v38  ;;  %4974 = vset.pattern.permute.xlu1 %v10422_v33  ;;  %v6899_v6 = vpop.eup %5205  ;;  %v10481_v50 = vld [vmem:[#allocation37_spill] sm:$0xff] }
 0x1e3   :  { %10461 = vst [vmem:[#allocation175_spill] sm:$0xff] %v6899_v6  ;;  %1557 = vperm.xlu1 %4974, %v1111_v32   ;;  %v6904_v45 = vmul.f32 %v6899_v6, %v5198_v7  ;;  %v6907_v20 = vmul.f32 %v6899_v6, %v5200_v40  ;;  %10465 = vst [vmem:[#allocation179_spill] sm:$0xff] %v6911_v16  ;;  %v10472_v40 = vld [vmem:[#allocation3_spill] sm:$0xff] }
 0x1e4   :  { %v6922_v7 = vpop.xlane.xlu1 %2198  ;;  %10470 = vst [vmem:[#allocation184_spill] sm:$0xff] %v6931_v1  ;;  %v691_v52 = vmin.f32 %v10472_v40, %v10471_v8 }
 0x1e5   :  { %10463 = vst [vmem:[#allocation177_spill] sm:$0xff] %v6904_v45  ;;  %10464 = vst [vmem:[#allocation178_spill] sm:$0xff] %v6907_v20  ;;  %v10476_v20 = vld [vmem:[#allocation5_spill] sm:$0xff] }
 0x1e6   :  { %10468 = vst [vmem:[#allocation182_spill] sm:$0xff] %v6922_v7  ;;  %v1113_v7 = vmul.f32 %v6705_v12, %v10473_v44  ;;  %v723_v26 = vmin.f32 %v691_v52, %v10474_v5  ;;  %v10482_v52 = vld [vmem:[#allocation54_spill] sm:$0xff]  ;;  %10492 = vst [vmem:[#allocation5_spill] sm:$0xff] %v6973_v22 }
 0x1e7   :  { %2102 = vperm.xlu1 %4974, %v6911_v16  }
 0x1e8   :  { %v6927_v55 = vpop.xlane.xlu1 %2210 }
 0x1e9   :  { %10469 = vst [vmem:[#allocation183_spill] sm:$0xff] %v6927_v55  ;;  %v10477_v55 = vld [vmem:[#allocation51_spill] sm:$0xff] }
 0x1ea   :  { %v6942_v38 = vmin.f32 %v723_v26, %v10477_v55  ;;  %v10485_v26 = vld [vmem:[#allocation23_spill] sm:$0xff] }
 0x1eb   :  { %4975 = vset.pattern.permute.xlu1 %v10383_v28  ;;  %v10486_v55 = vld [vmem:[#allocation7_spill] sm:$0xff] }
 0x1ec   :  { %1401 = vperm.xlu1 %4975, %v6918_v61   ;;  %10478 = vst [vmem:[#allocation19_spill] sm:$0xff] %v6942_v38  ;;  %v6944_v25 = vpop.xlane.xlu1 %2216  ;;  %v1043_v5 = vsub.f32 %v10482_v52, %v6942_v38 }
 0x1ed   :  { %10479 = vst [vmem:[#allocation3_spill] sm:$0xff] %v6944_v25  ;;  %v695_v25 = vmin.f32 %v10486_v55, %v10485_v26 }
 0x1ee   :  { %v1059_v52 = vadd.f32 1e-08, %v1043_v5  ;;  %v10499_v5 = vld [vmem:[#allocation41_spill] sm:$0xff] }
 0x1f0   :  { %4976 = vset.pattern.permute.xlu1 %v10365_v53  ;;  %1465 = vperm.xlu0 %4992, %v6425_v63   ;;  %v10475_v63 = vld [vmem:[#allocation21_spill] sm:$0xff]  ;;  %5207 = vrcp.f32 %v1059_v52 }
 0x1f1   :  { %1489 = vperm.xlu1 %4976, %v6918_v61   ;;  %v693_v45 = vmin.f32 %v10476_v20, %v10475_v63  ;;  %v10511_v52 = vld [vmem:[#allocation29_spill] sm:$0xff] }
 0x1f3   :  { %v725_v44 = vmin.f32 %v693_v45, %v10481_v50  ;;  %v10489_v45 = vld [vmem:[#allocation39_spill] sm:$0xff] }
 0x1f4   :  { %1477 = vperm.xlu0 %4992, %v1111_v32   ;;  %v6949_v32 = vmul.f32 %v6728_v56, %v10480_v19  ;;  %v6965_v19 = vpop.xlane.xlu1 %2222  ;;  %v727_v50 = vmin.f32 %v695_v25, %v10489_v45  ;;  %v10501_v45 = vld [vmem:[#allocation11_spill] sm:$0xff] }
 0x1f5   :  { %2018 = vperm.xlu1 %4976, %v6931_v1   ;;  %v6956_v35 = vmin.f32 %v725_v44, %v10483_v49  ;;  %10488 = vst [vmem:[#allocation21_spill] sm:$0xff] %v6965_v19  ;;  %v10490_v44 = vld [vmem:[#allocation60_spill] sm:$0xff]  ;;  %v10494_v1 = vld [vmem:[#allocation9_spill] sm:$0xff] }
 0x1f6   :  { %v697_v14 = vmin.f32 %v10494_v1, %v10493_v13  ;;  %v6978_v6 = vmin.f32 %v727_v50, %v10495_v60  ;;  %v10497_v19 = vld [vmem:[#allocation88_spill] sm:$0xff]  ;;  %v10503_v50 = vld [vmem:[#allocation63_spill] sm:$0xff] }
 0x1f7   :  { %10484 = vst [vmem:[#allocation90_spill] sm:$0xff] %v6956_v35  ;;  %v1045_v49 = vsub.f32 %v10490_v44, %v6956_v35  ;;  %v10500_v44 = vld [vmem:[#allocation27_spill] sm:$0xff] }
 0x1f8   :  { %1485 = vperm.xlu0 %4992, %v1113_v7   ;;  %10496 = vst [vmem:[#allocation100_spill] sm:$0xff] %v6978_v6  ;;  %v729_v25 = vmin.f32 %v697_v14, %v10499_v5  ;;  %v699_v48 = vmin.f32 %v10501_v45, %v10500_v44  ;;  %v6989_v46 = vpop.xlane.xlu1 %2228  ;;  %v1047_v60 = vsub.f32 %v10503_v50, %v6978_v6  ;;  %v10508_v14 = vld [vmem:[#allocation96_spill] sm:$0xff] }
 0x1f9   :  { %4977 = vset.pattern.permute.xlu1 %v10383_v28  ;;  %v1061_v12 = vadd.f32 1e-08, %v1045_v49  ;;  %10502 = vst [vmem:[#allocation23_spill] sm:$0xff] %v6989_v46  ;;  %v7002_v5 = vmul.f32 %v6794_v37, %v10508_v14  ;;  %v10515_v14 = vld [vmem:[#allocation69_spill] sm:$0xff] }
 0x1fa   :  { %1396 = vperm.xlu1 %4977, %v1113_v7   ;;  %v6994_v43 = vmin.f32 %v729_v25, %v10504_v23  ;;  %v10512_v25 = vld [vmem:[#allocation13_spill] sm:$0xff]  ;;  %v10513_v23 = vld [vmem:[#allocation76_spill] sm:$0xff]  ;;  %v1063_v46 = vadd.f32 1e-08, %v1047_v60 }
 0x1fb   :  { %10509 = vst [vmem:[#allocation60_spill] sm:$0xff] %v7002_v5  ;;  %v701_v50 = vmin.f32 %v10512_v25, %v10511_v52 }
 0x1fc   :  { %1493 = vperm.xlu0 %4992, %v6949_v32   ;;  %10505 = vst [vmem:[#allocation7_spill] sm:$0xff] %v6994_v43  ;;  %v1049_v47 = vsub.f32 %v10515_v14, %v6994_v43 }
 0x1fe   :  { %4978 = vset.pattern.permute.xlu1 %v10422_v33 }
 0x1ff   :  { %1565 = vperm.xlu1 %4978, %v1113_v7   ;;  %v6982_v7 = vmul.f32 %v6776_v2, %v10497_v19  ;;  %v10506_v19 = vld [vmem:[#allocation126_spill] sm:$0xff] }
 0x200   :  { %1501 = vperm.xlu0 %4992, %v6963_v3   ;;  %v6998_v51 = vmul.f32 %v6725_v30, %v10506_v19 }
 0x201   :  { %10498 = vst [vmem:[#allocation54_spill] sm:$0xff] %v6982_v7 }
 0x202   :  { %10507 = vst [vmem:[#allocation129_spill] sm:$0xff] %v6998_v51 }
 0x203   :  { %2110 = vperm.xlu1 %4978, %v6973_v22  }
 0x204   :  { %1509 = vperm.xlu0 %4992, %v6982_v7   ;;  %v10510_v7 = vld [vmem:[#allocation43_spill] sm:$0xff] }
 0x205   :  { %v731_v61 = vmin.f32 %v699_v48, %v10510_v7  ;;  %v10516_v48 = vld [vmem:[#allocation103_spill] sm:$0xff] }
 0x206   :  { %v7017_v7 = vmul.f32 %v6725_v30, %v10516_v48  ;;  %v1065_v30 = vadd.f32 1e-08, %v1049_v47  ;;  %v7042_v47 = vpop.eup %5207 }
 0x207   :  { %4979 = vset.pattern.permute.xlu1 %v10365_v53  ;;  %v1222_v49 = vpop.xlane.xlu0 %1221  ;;  %v7011_v19 = vmin.f32 %v731_v61, %v10513_v23  ;;  %v10521_v61 = vld [vmem:[#allocation31_spill] sm:$0xff]  ;;  %v10523_v23 = vld [vmem:[#allocation81_spill] sm:$0xff]  ;;  %10531 = vst [vmem:[#allocation63_spill] sm:$0xff] %v7042_v47 }
 0x208   :  { %1497 = vperm.xlu1 %4979, %v6998_v51   ;;  %5209 = vrcp.f32 %v1222_v49  ;;  %1517 = vperm.xlu0 %4992, %v7002_v5   ;;  %10517 = vst [vmem:[#allocation25_spill] sm:$0xff] %v7017_v7  ;;  %v733_v51 = vmin.f32 %v701_v50, %v10518_v10  ;;  %v7020_v49 = vpop.xlane.xlu1 %2234  ;;  %v10526_v50 = vld [vmem:[#allocation47_spill] sm:$0xff] }
 0x209   :  { %10514 = vst [vmem:[#allocation99_spill] sm:$0xff] %v7011_v19  ;;  %5211 = vrcp.f32 %v1061_v12  ;;  %10519 = vst [vmem:[#allocation9_spill] sm:$0xff] %v7020_v49  ;;  %v10522_v12 = vld [vmem:[#allocation15_spill] sm:$0xff]  ;;  %v1051_v14 = vsub.f32 %v10523_v23, %v7011_v19 }
 0x20a   :  { %v703_v60 = vmin.f32 %v10522_v12, %v10521_v61  ;;  %v7029_v9 = vmin.f32 %v733_v51, %v10524_v21  ;;  %v10532_v51 = vld [vmem:[#allocation33_spill] sm:$0xff] }
 0x20b   :  { %v1228_v5 = vpop.xlane.xlu0 %1227  ;;  %v10534_v21 = vld [vmem:[#allocation49_spill] sm:$0xff] }
 0x20c   :  { %2026 = vperm.xlu1 %4979, %v7017_v7   ;;  %5213 = vrcp.f32 %v1228_v5  ;;  %1994 = vperm.xlu0 %4992, %v10520_v59   ;;  %10525 = vst [vmem:[#allocation88_spill] sm:$0xff] %v7029_v9  ;;  %v735_v48 = vmin.f32 %v703_v60, %v10526_v50  ;;  %v1067_v5 = vadd.f32 1e-08, %v1051_v14  ;;  %v10527_v59 = vld [vmem:[#allocation94_spill] sm:$0xff]  ;;  %v10528_v7 = vld [vmem:[#allocation97_spill] sm:$0xff]  ;;  %v7039_v23 = vpop.xlane.xlu1 %2240  ;;  %v1300_v14 = vsub.f32 %v10472_v40, %v6942_v38 }
 0x20d   :  { %5215 = vrcp.f32 %v1063_v46  ;;  %v1053_v10 = vsub.f32 %v10527_v59, %v7029_v9  ;;  %10530 = vst [vmem:[#allocation11_spill] sm:$0xff] %v7039_v23  ;;  %v10533_v46 = vld [vmem:[#allocation17_spill] sm:$0xff] }
 0x20e   :  { %v7037_v4 = vmin.f32 %v735_v48, %v10528_v7  ;;  %v705_v60 = vmin.f32 %v10533_v46, %v10532_v51  ;;  %v10535_v7 = vld [vmem:[#allocation101_spill] sm:$0xff] }
 0x20f   :  { %v1234_v49 = vpop.xlane.xlu0 %1233  ;;  %v1069_v48 = vadd.f32 1e-08, %v1053_v10  ;;  %v1316_v10 = vmul.f32 %v7042_v47, %v1300_v14 }
 0x210   :  { %4980 = vset.pattern.permute.xlu1 %v10383_v28  ;;  %5217 = vrcp.f32 %v1234_v49  ;;  %2006 = vperm.xlu0 %4992, %v6911_v16   ;;  %10529 = vst [vmem:[#allocation27_spill] sm:$0xff] %v7037_v4  ;;  %v737_v16 = vmin.f32 %v705_v60, %v10534_v21  ;;  %v1055_v23 = vsub.f32 %v10535_v7, %v7037_v4  ;;  %v7052_v50 = vpop.permute.xlu1 %1371  ;;  %v10539_v60 = vld [vmem:[#allocation107_spill] sm:$0xff] }
 0x211   :  { %1406 = vperm.xlu1 %4980, %v6949_v32   ;;  %5219 = vrcp.f32 %v1065_v30  ;;  %10536 = vst [vmem:[#allocation126_spill] sm:$0xff] %v7052_v50  ;;  %v10537_v30 = vld [vmem:[#allocation109_spill] sm:$0xff]  ;;  %v7061_v40 = vmul.f32 %v6728_v56, %v10539_v60  ;;  %v1302_v50 = vsub.f32 %v10476_v20, %v6956_v35  ;;  %v10543_v56 = vld [vmem:[#allocation112_spill] sm:$0xff] }
 0x212   :  { %v7056_v34 = vmin.f32 %v737_v16, %v10537_v30 }
 0x213   :  { %v1240_v49 = vpop.xlane.xlu0 %1239  ;;  %10540 = vst [vmem:[#allocation29_spill] sm:$0xff] %v7061_v40 }
 0x214   :  { %5221 = vrcp.f32 %v1240_v49  ;;  %2014 = vperm.xlu0 %4992, %v6973_v22   ;;  %10538 = vst [vmem:[#allocation96_spill] sm:$0xff] %v7056_v34  ;;  %v10541_v49 = vld [vmem:[#allocation95_spill] sm:$0xff]  ;;  %v1057_v60 = vsub.f32 %v10543_v56, %v7056_v34  ;;  %v1304_v56 = vsub.f32 %v10486_v55, %v6978_v6 }
 0x215   :  { %v5210_v59 = vpop.eup %5209  ;;  %5223 = vrcp.f32 %v1067_v5  ;;  %4981 = vset.pattern.permute.xlu1 %v10422_v33 }
 0x216   :  { %1573 = vperm.xlu1 %4981, %v6949_v32   ;;  %v1269_v22 = vmul.f32 %v5210_v59, %v10541_v49  ;;  %v7065_v5 = vpop.eup %5211  ;;  %v1071_v32 = vadd.f32 1e-08, %v1055_v23  ;;  %v10545_v59 = vld [vmem:[#allocation82_spill] sm:$0xff]  ;;  %v7085_v23 = vpop.permute.xlu1 %1545 }
 0x217   :  { %10542 = vst [vmem:[#allocation13_spill] sm:$0xff] %v7065_v5  ;;  %v1246_v7 = vpop.xlane.xlu0 %1245  ;;  %v1318_v20 = vmul.f32 %v7065_v5, %v1302_v50  ;;  %v7081_v49 = vmul.f32 %v6742_v29, %v10545_v59  ;;  %10547 = vst [vmem:[#allocation103_spill] sm:$0xff] %v7085_v23  ;;  %v10548_v29 = vld [vmem:[#allocation102_spill] sm:$0xff]  ;;  %v10555_v23 = vld [vmem:[#allocation56_spill] sm:$0xff] }
 0x218   :  { %v1332_v21 = vmul.f32 %v1316_v10, %v1269_v22  ;;  %5225 = vrcp.f32 %v1246_v7  ;;  %2022 = vperm.xlu0 %4992, %v7061_v40   ;;  %v10544_v22 = vld [vmem:[#allocation98_spill] sm:$0xff] }
 0x219   :  { %v5214_v16 = vpop.eup %5213  ;;  %5227 = vrcp.f32 %v1069_v48 }
 0x21a   :  { %2118 = vperm.xlu1 %4981, %v7061_v40   ;;  %1348 = vst.msk [vmem:[%s9831_s8] sm:$0xff] %vm1123_vm1, %v1332_v21  ;;  %v1273_v14 = vmul.f32 %v5214_v16, %v10544_v22  ;;  %v7083_v48 = vpop.eup %5215  ;;  %v1073_v16 = vadd.f32 1e-08, %v1057_v60  ;;  %v1306_v60 = vsub.f32 %v10494_v1, %v6994_v43 }
 0x21b   :  { %10546 = vst [vmem:[#allocation69_spill] sm:$0xff] %v7083_v48  ;;  %v1252_v10 = vpop.xlane.xlu0 %1251  ;;  %v1320_v22 = vmul.f32 %v7083_v48, %v1304_v56 }
 0x21c   :  { %v1334_v7 = vmul.f32 %v1318_v20, %v1273_v14  ;;  %5229 = vrcp.f32 %v1252_v10  ;;  %2030 = vperm.xlu0 %4992, %v7081_v49   ;;  %v10549_v14 = vld [vmem:[#allocation116_spill] sm:$0xff] }
 0x21d   :  { %v5218_v21 = vpop.eup %5217  ;;  %5231 = vrcp.f32 %v1071_v32  ;;  %v7099_v55 = vmul.f32 %v6776_v2, %v10549_v14  ;;  %v10553_v2 = vld [vmem:[#allocation105_spill] sm:$0xff] }
 0x21e   :  { %1350 = vst.msk [vmem:[%s9831_s8 + $0x10] sm:$0xff] %vm1123_vm1, %v1334_v7  ;;  %v1277_v50 = vmul.f32 %v5218_v21, %v10548_v29  ;;  %4982 = vset.pattern.permute.xlu1 %v10365_v53  ;;  %v7101_v20 = vpop.eup %5219  ;;  %v7106_v7 = vpop.permute.xlu1 %2090 }
 0x21f   :  { %10550 = vst [vmem:[#allocation31_spill] sm:$0xff] %v7101_v20  ;;  %v1258_v59 = vpop.xlane.xlu0 %1257  ;;  %10551 = vst [vmem:[#allocation15_spill] sm:$0xff] %v7106_v7  ;;  %v1322_v29 = vmul.f32 %v7101_v20, %v1306_v60  ;;  %v10556_v7 = vld [vmem:[#allocation2_spill] sm:$0xff] }
 0x220   :  { %v1336_v32 = vmul.f32 %v1320_v22, %v1277_v50  ;;  %5233 = vrcp.f32 %v1258_v59  ;;  %2038 = vperm.xlu0 %4992, %v7099_v55   ;;  %v10554_v50 = vld [vmem:[#allocation125_spill] sm:$0xff]  ;;  %v1308_v59 = vsub.f32 %v10501_v45, %v7011_v19 }
 0x221   :  { %v5222_v10 = vpop.eup %5221  ;;  %5235 = vrcp.f32 %v1073_v16  ;;  %v7118_v1 = vmul.f32 %v6794_v37, %v10554_v50  ;;  %v10558_v37 = vld [vmem:[#allocation108_spill] sm:$0xff] }
 0x222   :  { %v7108_v56 = vpop.eup %5223  ;;  %1352 = vst.msk [vmem:[%s9831_s8 + $0x20] sm:$0xff] %vm1123_vm1, %v1336_v32  ;;  %v1281_v21 = vmul.f32 %v5222_v10, %v10553_v2  ;;  %v1173_v32 = vsub.f32 %v10556_v7, %v10555_v23  ;;  %v7133_v2 = vpop.permute.xlu1 %1461  ;;  %v10560_v23 = vld [vmem:[#allocation79_spill] sm:$0xff] }
 0x223   :  { %10552 = vst [vmem:[#allocation81_spill] sm:$0xff] %v7108_v56  ;;  %v1264_v22 = vpop.xlane.xlu0 %1263  ;;  %v1324_v10 = vmul.f32 %v7108_v56, %v1308_v59  ;;  %10559 = vst [vmem:[#allocation33_spill] sm:$0xff] %v7133_v2 }
 0x224   :  { %v1338_v14 = vmul.f32 %v1322_v29, %v1281_v21  ;;  %5237 = vrcp.f32 %v1264_v22  ;;  %2046 = vperm.xlu0 %4992, %v7118_v1   ;;  %v1310_v29 = vsub.f32 %v10512_v25, %v7029_v9  ;;  %v1190_v22 = vmul.f32 1.442695, %v1173_v32 }
 0x225   :  { %v5226_v16 = vpop.eup %5225  ;;  %v1312_v25 = vsub.f32 %v10522_v12, %v7037_v4 }
 0x226   :  { %v7125_v40 = vpop.eup %5227  ;;  %1354 = vst.msk [vmem:[%s9831_s8 + $0x30] sm:$0xff] %vm1123_vm1, %v1338_v14  ;;  %v1285_v60 = vmul.f32 %v5226_v16, %v10558_v37  ;;  %v10562_v14 = vld [vmem:[#allocation111_spill] sm:$0xff] }
 0x227   :  { %10557 = vst [vmem:[#allocation94_spill] sm:$0xff] %v7125_v40  ;;  %v1734_v45 = vpop.xlane.xlu0 %1733  ;;  %v1326_v16 = vmul.f32 %v7125_v40, %v1310_v29 }
 0x228   :  { %v1340_v21 = vmul.f32 %v1324_v10, %v1285_v60  ;;  %5239 = vrcp.f32 %v1734_v45  ;;  %2555 = vperm.xlu0 %4992, %v10560_v23   ;;  %v10563_v10 = vld [vmem:[#allocation85_spill] sm:$0xff]  ;;  %v7149_v45 = vpop.permute.xlu1 %1990 }
 0x229   :  { %v5230_v50 = vpop.eup %5229  ;;  %10564 = vst [vmem:[#allocation101_spill] sm:$0xff] %v7149_v45 }
 0x22a   :  { %v7138_v30 = vpop.eup %5231  ;;  %1356 = vst.msk [vmem:[%s9831_s8 + $0x40] sm:$0xff] %vm1123_vm1, %v1340_v21  ;;  %v1289_v59 = vmul.f32 %v5230_v50, %v10562_v14  ;;  %v10565_v21 = vld [vmem:[#allocation113_spill] sm:$0xff] }
 0x22b   :  { %10561 = vst [vmem:[#allocation17_spill] sm:$0xff] %v7138_v30  ;;  %v1740_v37 = vpop.xlane.xlu0 %1739  ;;  %v1328_v29 = vmul.f32 %v7138_v30, %v1312_v25 }
 0x22c   :  { %v1342_v60 = vmul.f32 %v1326_v16, %v1289_v59  ;;  %5241 = vrcp.f32 %v1740_v37  ;;  %2559 = vperm.xlu0 %4992, %v10563_v10   ;;  %v1314_v16 = vsub.f32 %v10533_v46, %v7056_v34  ;;  %v1812_v46 = vsub.f32 %v10471_v8, %v6942_v38  ;;  %v10574_v38 = vld [vmem:[#allocation4_spill] sm:$0xff]  ;;  %v10575_v10 = vld [vmem:[#allocation50_spill] sm:$0xff] }
 0x22d   :  { %v5234_v32 = vpop.eup %5233  ;;  %5243 = vpow2.f32 %v1190_v22  ;;  %v10567_v22 = vld [vmem:[#allocation92_spill] sm:$0xff] }
 0x22e   :  { %1358 = vst.msk [vmem:[%s9831_s8 + $0x50] sm:$0xff] %vm1123_vm1, %v1342_v60  ;;  %v1293_v50 = vmul.f32 %v5234_v32, %v10565_v21  ;;  %v7157_v14 = vpop.eup %5235  ;;  %v10568_v60 = vld [vmem:[#allocation114_spill] sm:$0xff]  ;;  %v7168_v21 = vpop.permute.xlu1 %1381 }
 0x22f   :  { %10566 = vst [vmem:[#allocation107_spill] sm:$0xff] %v7157_v14  ;;  %v1746_v59 = vpop.xlane.xlu0 %1745  ;;  %v1330_v25 = vmul.f32 %v7157_v14, %v1314_v16  ;;  %10569 = vst [vmem:[#allocation95_spill] sm:$0xff] %v7168_v21 }
 0x230   :  { %v1344_v12 = vmul.f32 %v1328_v29, %v1293_v50  ;;  %5245 = vrcp.f32 %v1746_v59  ;;  %3120 = vperm.xlu0 %4992, %v10567_v22   ;;  %v10570_v59 = vld [vmem:[#allocation18_spill] sm:$0xff]  ;;  %v10573_v22 = vld [vmem:[#allocation20_spill] sm:$0xff] }
 0x231   :  { %v5238_v37 = vpop.eup %5237  ;;  %v692_v45 = vmin.f32 %v10556_v7, %v10570_v59 }
 0x232   :  { %1360 = vst.msk [vmem:[%s9831_s8 + $0x60] sm:$0xff] %vm1123_vm1, %v1344_v12  ;;  %v1297_v32 = vmul.f32 %v5238_v37, %v10568_v60  ;;  %v10571_v12 = vld [vmem:[#allocation115_spill] sm:$0xff]  ;;  %v1828_v37 = vmul.f32 %v7042_v47, %v1812_v46  ;;  %v10572_v60 = vld [vmem:[#allocation34_spill] sm:$0xff]  ;;  %v10580_v47 = vld [vmem:[#allocation53_spill] sm:$0xff] }
 0x233   :  { %v1752_v2 = vpop.xlane.xlu0 %1751 }
 0x234   :  { %v1346_v50 = vmul.f32 %v1330_v25, %v1297_v32  ;;  %5247 = vrcp.f32 %v1752_v2  ;;  %2567 = vperm.xlu0 %4992, %v6686_v36   ;;  %v724_v32 = vmin.f32 %v692_v45, %v10572_v60  ;;  %v1814_v2 = vsub.f32 %v10475_v63, %v6956_v35  ;;  %v10578_v63 = vld [vmem:[#allocation120_spill] sm:$0xff] }
 0x235   :  { %v5240_v29 = vpop.eup %5239  ;;  %v694_v36 = vmin.f32 %v10574_v38, %v10573_v22 }
 0x236   :  { %1362 = vst.msk [vmem:[%s9831_s8 + $0x70] sm:$0xff] %vm1123_vm1, %v1346_v50  ;;  %v1781_v16 = vmul.f32 %v5240_v29, %v10571_v12  ;;  %v7188_v50 = vmin.f32 %v724_v32, %v10575_v10  ;;  %v7190_v29 = vpop.permute.xlu1 %1473  ;;  %v1830_v12 = vmul.f32 %v7065_v5, %v1814_v2  ;;  %v1816_v32 = vsub.f32 %v10485_v26, %v6978_v6  ;;  %v10583_v2 = vld [vmem:[#allocation22_spill] sm:$0xff] }
 0x237   :  { %v1758_v25 = vpop.xlane.xlu0 %1757  ;;  %10577 = vst [vmem:[#allocation98_spill] sm:$0xff] %v7190_v29  ;;  %v10585_v26 = vld [vmem:[#allocation122_spill] sm:$0xff]  ;;  %v1818_v5 = vsub.f32 %v10493_v13, %v6994_v43 }
 0x238   :  { %v1844_v8 = vmul.f32 %v1828_v37, %v1781_v16  ;;  %5249 = vrcp.f32 %v1758_v25  ;;  %3128 = vperm.xlu0 %4992, %v6690_v41   ;;  %10576 = vst [vmem:[#allocation112_spill] sm:$0xff] %v7188_v50  ;;  %v10579_v16 = vld [vmem:[#allocation36_spill] sm:$0xff]  ;;  %v1044_v10 = vsub.f32 %v10580_v47, %v7188_v50  ;;  %v10593_v13 = vld [vmem:[#allocation14_spill] sm:$0xff] }
 0x239   :  { %v5242_v21 = vpop.eup %5241  ;;  %v726_v37 = vmin.f32 %v694_v36, %v10579_v16  ;;  %v10581_v41 = vld [vmem:[#allocation52_spill] sm:$0xff]  ;;  %v10584_v36 = vld [vmem:[#allocation6_spill] sm:$0xff] }
 0x23a   :  { %v7192_v46 = vpop.eup %5243  ;;  %4304 = vst.msk [vmem:[%s9831_s8 + $0x80] sm:$0xff] %vm1123_vm1, %v1844_v8  ;;  %v1785_v45 = vmul.f32 %v5242_v21, %v10578_v63  ;;  %v696_v63 = vmin.f32 %v10584_v36, %v10583_v2  ;;  %v7219_v47 = vpop.permute.xlu1 %2002 }
 0x23b   :  { %v1764_v25 = vpop.xlane.xlu0 %1763  ;;  %v7207_v8 = vmin.f32 %v726_v37, %v10581_v41  ;;  %v1223_v21 = vsel %vm1123_vm1, %v7192_v46, 0.0  ;;  %10586 = vst [vmem:[#allocation102_spill] sm:$0xff] %v7219_v47 }
 0x23c   :  { %v1846_v35 = vmul.f32 %v1830_v12, %v1785_v45  ;;  %5251 = vrcp.f32 %v1764_v25  ;;  %2575 = vperm.xlu0 %4992, %v6715_v24   ;;  %v1832_v12 = vmul.f32 %v7083_v48, %v1816_v32  ;;  %v10587_v25 = vld [vmem:[#allocation38_spill] sm:$0xff]  ;;  %v1060_v24 = vadd.f32 1e-08, %v1044_v10  ;;  %v10594_v10 = vld [vmem:[#allocation40_spill] sm:$0xff] }
 0x23d   :  { %v5246_v29 = vpop.eup %5245  ;;  %10582 = vst [vmem:[#allocation82_spill] sm:$0xff] %v7207_v8  ;;  %v728_v41 = vmin.f32 %v696_v63, %v10587_v25  ;;  %v10591_v48 = vld [vmem:[#allocation58_spill] sm:$0xff] }
 0x23e   :  { %1224 = vadd.xlane.f32.xlu1 %v1223_v21  ;;  %4306 = vst.msk [vmem:[%s9831_s8 + $0x90] sm:$0xff] %vm1123_vm1, %v1846_v35  ;;  %v1789_v45 = vmul.f32 %v5246_v29, %v10585_v26  ;;  %v10588_v35 = vld [vmem:[#allocation57_spill] sm:$0xff]  ;;  %v10589_v29 = vld [vmem:[#allocation24_spill] sm:$0xff]  ;;  %v7244_v22 = vpop.permute.xlu1 %1376 }
 0x23f   :  { %v1770_v37 = vpop.xlane.xlu0 %1769  ;;  %v1046_v2 = vsub.f32 %v10588_v35, %v7207_v8  ;;  %v10590_v26 = vld [vmem:[#allocation8_spill] sm:$0xff]  ;;  %v7230_v47 = vmin.f32 %v728_v41, %v10591_v48  ;;  %v1820_v35 = vsub.f32 %v10500_v44, %v7011_v19  ;;  %v10595_v48 = vld [vmem:[#allocation26_spill] sm:$0xff]  ;;  %10597 = vst [vmem:[#allocation105_spill] sm:$0xff] %v7244_v22  ;;  %v10601_v44 = vld [vmem:[#allocation127_spill] sm:$0xff]  ;;  %v1822_v22 = vsub.f32 %v10511_v52, %v7029_v9 }
 0x240   :  { %v1848_v6 = vmul.f32 %v1832_v12, %v1789_v45  ;;  %5253 = vrcp.f32 %v1770_v37  ;;  %3136 = vperm.xlu0 %4992, %v6719_v17   ;;  %v698_v32 = vmin.f32 %v10590_v26, %v10589_v29  ;;  %v1834_v45 = vmul.f32 %v7101_v20, %v1818_v5  ;;  %v10596_v17 = vld [vmem:[#allocation10_spill] sm:$0xff]  ;;  %v10608_v52 = vld [vmem:[#allocation104_spill] sm:$0xff] }
 0x241   :  { %v5248_v21 = vpop.eup %5247  ;;  %10592 = vst [vmem:[#allocation116_spill] sm:$0xff] %v7230_v47  ;;  %v700_v29 = vmin.f32 %v10596_v17, %v10595_v48  ;;  %v10598_v5 = vld [vmem:[#allocation62_spill] sm:$0xff]  ;;  %v10618_v9 = vld [vmem:[#allocation16_spill] sm:$0xff] }
 0x242   :  { %4308 = vst.msk [vmem:[%s9831_s8 + $0xa0] sm:$0xff] %vm1123_vm1, %v1848_v6  ;;  %v1793_v63 = vmul.f32 %v5248_v21, %v10593_v13  ;;  %v730_v37 = vmin.f32 %v698_v32, %v10594_v10  ;;  %v1062_v6 = vadd.f32 1e-08, %v1046_v2  ;;  %v1048_v21 = vsub.f32 %v10598_v5, %v7230_v47  ;;  %v10599_v13 = vld [vmem:[#allocation64_spill] sm:$0xff] }
 0x243   :  { %v1776_v12 = vpop.xlane.xlu0 %1775  ;;  %v10603_v5 = vld [vmem:[#allocation28_spill] sm:$0xff] }
 0x244   :  { %v1850_v43 = vmul.f32 %v1834_v45, %v1793_v63  ;;  %5255 = vrcp.f32 %v1776_v12  ;;  %2583 = vperm.xlu0 %4992, %v6749_v58   ;;  %v7249_v32 = vmin.f32 %v730_v37, %v10599_v13  ;;  %v1836_v45 = vmul.f32 %v7108_v56, %v1820_v35  ;;  %v10602_v12 = vld [vmem:[#allocation42_spill] sm:$0xff]  ;;  %v10604_v13 = vld [vmem:[#allocation12_spill] sm:$0xff] }
 0x245   :  { %v5250_v41 = vpop.eup %5249  ;;  %5257 = vrcp.f32 %v1060_v24  ;;  %v732_v24 = vmin.f32 %v700_v29, %v10602_v12  ;;  %v702_v20 = vmin.f32 %v10604_v13, %v10603_v5  ;;  %v10607_v35 = vld [vmem:[#allocation66_spill] sm:$0xff] }
 0x246   :  { %10600 = vst [vmem:[#allocation125_spill] sm:$0xff] %v7249_v32  ;;  %4310 = vst.msk [vmem:[%s9831_s8 + $0xb0] sm:$0xff] %vm1123_vm1, %v1850_v43  ;;  %v1797_v63 = vmul.f32 %v5250_v41, %v10601_v44  ;;  %v10605_v43 = vld [vmem:[#allocation70_spill] sm:$0xff]  ;;  %v1064_v41 = vadd.f32 1e-08, %v1048_v21  ;;  %v1050_v29 = vsub.f32 %v10607_v35, %v7249_v32  ;;  %v1824_v21 = vsub.f32 %v10521_v61, %v7037_v4  ;;  %v10615_v61 = vld [vmem:[#allocation132_spill] sm:$0xff] }
 0x247   :  { %v2298_v2 = vpop.xlane.xlu0 %2297  ;;  %v7264_v58 = vmin.f32 %v732_v24, %v10605_v43  ;;  %v10610_v43 = vld [vmem:[#allocation30_spill] sm:$0xff] }
 0x248   :  { %v1852_v19 = vmul.f32 %v1836_v45, %v1797_v63  ;;  %5259 = vrcp.f32 %v2298_v2  ;;  %3144 = vperm.xlu0 %4992, %v6753_v42   ;;  %v1838_v63 = vmul.f32 %v7125_v40, %v1822_v22  ;;  %v734_v45 = vmin.f32 %v702_v20, %v10410_v62  ;;  %v7275_v2 = vpop.permute.xlu1 %1469  ;;  %v10612_v22 = vld [vmem:[#allocation83_spill] sm:$0xff]  ;;  %v10614_v20 = vld [vmem:[#allocation130_spill] sm:$0xff] }
 0x249   :  { %v5252_v37 = vpop.eup %5251  ;;  %5261 = vrcp.f32 %v1062_v6  ;;  %10606 = vst [vmem:[#allocation56_spill] sm:$0xff] %v7264_v58  ;;  %10609 = vst [vmem:[#allocation2_spill] sm:$0xff] %v7275_v2  ;;  %v7289_v2 = vmul.f32 %v6821_v31, %v10614_v20  ;;  %v1826_v20 = vsub.f32 %v10532_v51, %v7056_v34  ;;  %v10623_v51 = vld [vmem:[#allocation91_spill] sm:$0xff]  ;;  %v10681_v34 = vld [vmem:[#allocation25_spill] sm:$0xff] }
 0x24a   :  { %4312 = vst.msk [vmem:[%s9831_s8 + $0xc0] sm:$0xff] %vm1123_vm1, %v1852_v19  ;;  %v1801_v44 = vmul.f32 %v5252_v37, %v10608_v52  ;;  %v704_v19 = vmin.f32 %v10371_v0, %v10610_v43  ;;  %v10611_v37 = vld [vmem:[#allocation74_spill] sm:$0xff]  ;;  %v7285_v40 = vmin.f32 %v734_v45, %v10612_v22 }
 0x24b   :  { %v2304_v6 = vpop.xlane.xlu0 %2303  ;;  %v1052_v52 = vsub.f32 %v10611_v37, %v7264_v58  ;;  %v10616_v45 = vld [vmem:[#allocation46_spill] sm:$0xff] }
 0x24c   :  { %v1854_v24 = vmul.f32 %v1838_v63, %v1801_v44  ;;  %5263 = vrcp.f32 %v2304_v6  ;;  %2591 = vperm.xlu0 %4992, %v6760_v11   ;;  %10613 = vst [vmem:[#allocation108_spill] sm:$0xff] %v7285_v40  ;;  %v1066_v44 = vadd.f32 1e-08, %v1050_v29  ;;  %v1840_v6 = vmul.f32 %v7138_v30, %v1824_v21  ;;  %v10617_v29 = vld [vmem:[#allocation32_spill] sm:$0xff]  ;;  %v10621_v30 = vld [vmem:[#allocation110_spill] sm:$0xff] }
 0x24d   :  { %v5254_v35 = vpop.eup %5253  ;;  %5265 = vrcp.f32 %v1064_v41  ;;  %v736_v22 = vmin.f32 %v704_v19, %v10616_v45  ;;  %v1068_v56 = vadd.f32 1e-08, %v1052_v52  ;;  %v7310_v19 = vmul.f32 %v6821_v31, %v10621_v30  ;;  %v10625_v52 = vld [vmem:[#allocation133_spill] sm:$0xff] }
 0x24e   :  { %4314 = vst.msk [vmem:[%s9831_s8 + $0xd0] sm:$0xff] %vm1123_vm1, %v1854_v24  ;;  %v1805_v63 = vmul.f32 %v5254_v35, %v10615_v61  ;;  %v706_v24 = vmin.f32 %v10618_v9, %v10617_v29  ;;  %v10619_v35 = vld [vmem:[#allocation86_spill] sm:$0xff]  ;;  %v7306_v61 = vpop.permute.xlu1 %1549 }
 0x24f   :  { %1505 = vperm.xlu1 %4982, %v7289_v2   ;;  %v2310_v37 = vpop.xlane.xlu0 %2309  ;;  %v1054_v21 = vsub.f32 %v10619_v35, %v7285_v40  ;;  %10620 = vst [vmem:[#allocation111_spill] sm:$0xff] %v7306_v61  ;;  %v1842_v35 = vmul.f32 %v7157_v14, %v1826_v20 }
 0x250   :  { %v1856_v4 = vmul.f32 %v1840_v6, %v1805_v63  ;;  %5267 = vrcp.f32 %v2310_v37  ;;  %3152 = vperm.xlu0 %4992, %v6764_v57   ;;  %v7315_v6 = vmin.f32 %v736_v22, %v10623_v51  ;;  %v738_v31 = vmin.f32 %v706_v24, %v10404_v39 }
 0x251   :  { %v5256_v41 = vpop.eup %5255  ;;  %5269 = vrcp.f32 %v1066_v44  ;;  %v2374_v44 = vsub.f32 %v10572_v60, %v7188_v50  ;;  %v1070_v51 = vadd.f32 1e-08, %v1054_v21  ;;  %v10630_v60 = vld [vmem:[#allocation134_spill] sm:$0xff] }
 0x252   :  { %v7312_v63 = vpop.eup %5257  ;;  %10624 = vst [vmem:[#allocation114_spill] sm:$0xff] %v7315_v6  ;;  %4316 = vst.msk [vmem:[%s9831_s8 + $0xe0] sm:$0xff] %vm1123_vm1, %v1856_v4  ;;  %v1809_v37 = vmul.f32 %v5256_v41, %v10625_v52  ;;  %v10627_v41 = vld [vmem:[#allocation128_spill] sm:$0xff]  ;;  %v10628_v52 = vld [vmem:[#allocation106_spill] sm:$0xff] }
 0x253   :  { %10622 = vst [vmem:[#allocation113_spill] sm:$0xff] %v7312_v63  ;;  %2034 = vperm.xlu1 %4982, %v7310_v19   ;;  %v2316_v61 = vpop.xlane.xlu0 %2315  ;;  %v1056_v20 = vsub.f32 %v10627_v41, %v7315_v6  ;;  %v7333_v14 = vmin.f32 %v738_v31, %v10628_v52 }
 0x254   :  { %v1858_v30 = vmul.f32 %v1842_v35, %v1809_v37  ;;  %5271 = vrcp.f32 %v2316_v61  ;;  %2599 = vperm.xlu0 %4992, %v6802_v27   ;;  %v2390_v61 = vmul.f32 %v7312_v63, %v2374_v44  ;;  %v7341_v37 = vpop.permute.xlu1 %1998  ;;  %v2376_v35 = vsub.f32 %v10579_v16, %v7207_v8 }
 0x255   :  { %v5260_v22 = vpop.eup %5259  ;;  %5273 = vrcp.f32 %v1068_v56  ;;  %10629 = vst [vmem:[#allocation115_spill] sm:$0xff] %v7333_v14  ;;  %10631 = vst [vmem:[#allocation34_spill] sm:$0xff] %v7341_v37 }
 0x256   :  { %v7328_v4 = vpop.eup %5261  ;;  %4318 = vst.msk [vmem:[%s9831_s8 + $0xf0] sm:$0xff] %vm1123_vm1, %v1858_v30  ;;  %v2344_v24 = vmul.f32 %v5260_v22, %v10630_v60  ;;  %v1072_v30 = vadd.f32 1e-08, %v1056_v20  ;;  %v10632_v22 = vld [vmem:[#allocation48_spill] sm:$0xff] }
 0x257   :  { %10626 = vst [vmem:[#allocation18_spill] sm:$0xff] %v7328_v4  ;;  %4983 = vset.pattern.permute.xlu1 %v10383_v28  ;;  %v2322_v56 = vpop.xlane.xlu0 %2321  ;;  %v1058_v44 = vsub.f32 %v10632_v22, %v7333_v14  ;;  %v2392_v60 = vmul.f32 %v7328_v4, %v2376_v35 }
 0x258   :  { %1416 = vperm.xlu1 %4983, %v6963_v3   ;;  %v2406_v21 = vmul.f32 %v2390_v61, %v2344_v24  ;;  %5275 = vrcp.f32 %v2322_v56  ;;  %3160 = vperm.xlu0 %4992, %v6806_v18   ;;  %v7362_v56 = vpop.permute.xlu1 %2094 }
 0x259   :  { %v5264_v31 = vpop.eup %5263  ;;  %5277 = vrcp.f32 %v1070_v51  ;;  %v2378_v51 = vsub.f32 %v10587_v25, %v7230_v47  ;;  %10634 = vst [vmem:[#allocation120_spill] sm:$0xff] %v7362_v56  ;;  %v10650_v56 = vld [vmem:[#allocation165_spill] sm:$0xff] }
 0x25a   :  { %4321 = vst.msk [vmem:[%s9831_s8 + $0x108] sm:$0xff] %vm1123_vm1, %v2406_v21  ;;  %v2348_v41 = vmul.f32 %v5264_v31, %v6681_v15  ;;  %v7356_v24 = vpop.eup %5265  ;;  %v1074_v15 = vadd.f32 1e-08, %v1058_v44  ;;  %v10635_v21 = vld [vmem:[#allocation136_spill] sm:$0xff] }
 0x25b   :  { %10633 = vst [vmem:[#allocation4_spill] sm:$0xff] %v7356_v24  ;;  %v2328_v16 = vpop.xlane.xlu0 %2327  ;;  %v2394_v31 = vmul.f32 %v7356_v24, %v2378_v51 }
 0x25c   :  { %4984 = vset.pattern.permute.xlu1 %v10422_v33  ;;  %v2408_v61 = vmul.f32 %v2392_v60, %v2348_v41  ;;  %5279 = vrcp.f32 %v2328_v16  ;;  %2607 = vperm.xlu0 %4992, %v6815_v54   ;;  %v2380_v60 = vsub.f32 %v10594_v10, %v7249_v32  ;;  %v10639_v16 = vld [vmem:[#allocation143_spill] sm:$0xff] }
 0x25d   :  { %v5268_v20 = vpop.eup %5267  ;;  %1581 = vperm.xlu1 %4984, %v6963_v3   ;;  %5281 = vrcp.f32 %v1072_v30  ;;  %v10637_v3 = vld [vmem:[#allocation155_spill] sm:$0xff] }
 0x25e   :  { %4323 = vst.msk [vmem:[%s9831_s8 + $0x118] sm:$0xff] %vm1123_vm1, %v2408_v61  ;;  %v2352_v35 = vmul.f32 %v5268_v20, %v10635_v21  ;;  %v7371_v25 = vpop.eup %5269  ;;  %v7385_v20 = vpop.permute.xlu1 %1391 }
 0x25f   :  { %10636 = vst [vmem:[#allocation36_spill] sm:$0xff] %v7371_v25  ;;  %v2334_v22 = vpop.xlane.xlu0 %2333  ;;  %v2396_v51 = vmul.f32 %v7371_v25, %v2380_v60  ;;  %10640 = vst [vmem:[#allocation6_spill] sm:$0xff] %v7385_v20  ;;  %v10646_v20 = vld [vmem:[#allocation160_spill] sm:$0xff] }
 0x260   :  { %v2410_v41 = vmul.f32 %v2394_v31, %v2352_v35  ;;  %5283 = vrcp.f32 %v2334_v22  ;;  %3168 = vperm.xlu0 %4992, %v10637_v3   ;;  %v2382_v35 = vsub.f32 %v10602_v12, %v7264_v58  ;;  %v10641_v31 = vld [vmem:[#allocation121_spill] sm:$0xff] }
 0x261   :  { %v5272_v30 = vpop.eup %5271  ;;  %2126 = vperm.xlu1 %4984, %v7081_v49   ;;  %5285 = vrcp.f32 %v1074_v15  ;;  %v10655_v3 = vld [vmem:[#allocation181_spill] sm:$0xff] }
 0x262   :  { %v7377_v44 = vpop.eup %5273  ;;  %4325 = vst.msk [vmem:[%s9831_s8 + $0x128] sm:$0xff] %vm1123_vm1, %v2410_v41  ;;  %v2356_v61 = vmul.f32 %v5272_v30, %v10639_v16  ;;  %v10643_v41 = vld [vmem:[#allocation159_spill] sm:$0xff]  ;;  %v2384_v16 = vsub.f32 %v10410_v62, %v7285_v40 }
 0x263   :  { %10638 = vst [vmem:[#allocation53_spill] sm:$0xff] %v7377_v44  ;;  %v2340_v10 = vpop.xlane.xlu0 %2339  ;;  %v2398_v30 = vmul.f32 %v7377_v44, %v2382_v35 }
 0x264   :  { %v2412_v21 = vmul.f32 %v2396_v51, %v2356_v61  ;;  %5287 = vrcp.f32 %v2340_v10  ;;  %4994 = vset.pattern.permute.xlu0 %v10422_v33  ;;  %v7402_v51 = vpop.permute.xlu1 %1481  ;;  %v10645_v10 = vld [vmem:[#allocation124_spill] sm:$0xff] }
 0x265   :  { %v5276_v15 = vpop.eup %5275  ;;  %1541 = vperm.xlu0 %4994, %v10641_v31   ;;  %4985 = vset.pattern.permute.xlu1 %v10365_v53  ;;  %10644 = vst [vmem:[#allocation38_spill] sm:$0xff] %v7402_v51 }
 0x266   :  { %v7392_v22 = vpop.eup %5277  ;;  %4327 = vst.msk [vmem:[%s9831_s8 + $0x138] sm:$0xff] %vm1123_vm1, %v2412_v21  ;;  %v2360_v60 = vmul.f32 %v5276_v15, %v10643_v41 }
 0x267   :  { %10642 = vst [vmem:[#allocation122_spill] sm:$0xff] %v7392_v22  ;;  %v2400_v15 = vmul.f32 %v7392_v22, %v2384_v16  ;;  %v10703_v22 = vld [vmem:[#allocation145_spill] sm:$0xff] }
 0x268   :  { %v2414_v12 = vmul.f32 %v2398_v30, %v2360_v60  ;;  %v10649_v60 = vld [vmem:[#allocation59_spill] sm:$0xff]  ;;  %v7428_v51 = vpop.permute.xlu1 %2010 }
 0x269   :  { %v5280_v61 = vpop.eup %5279  ;;  %1553 = vperm.xlu0 %4994, %v10645_v10   ;;  %v1175_v62 = vsub.f32 %v10574_v38, %v10649_v60  ;;  %v2386_v10 = vsub.f32 %v10616_v45, %v7315_v6  ;;  %10653 = vst [vmem:[#allocation40_spill] sm:$0xff] %v7428_v51 }
 0x26a   :  { %4329 = vst.msk [vmem:[%s9831_s8 + $0x148] sm:$0xff] %vm1123_vm1, %v2414_v12  ;;  %v2364_v21 = vmul.f32 %v5280_v61, %v10646_v20  ;;  %v7411_v41 = vpop.eup %5281  ;;  %v10651_v20 = vld [vmem:[#allocation164_spill] sm:$0xff] }
 0x26b   :  { %10647 = vst [vmem:[#allocation57_spill] sm:$0xff] %v7411_v41  ;;  %v7413_v35 = vpop.permute.xlu0 %1465  ;;  %v2402_v16 = vmul.f32 %v7411_v41, %v2386_v10  ;;  %v10701_v41 = vld [vmem:[#allocation65_spill] sm:$0xff] }
 0x26c   :  { %10648 = vst [vmem:[#allocation8_spill] sm:$0xff] %v7413_v35  ;;  %v2416_v30 = vmul.f32 %v2400_v15, %v2364_v21  ;;  %v1194_v15 = vmul.f32 1.442695, %v1175_v62 }
 0x26d   :  { %v5284_v52 = vpop.eup %5283  ;;  %1561 = vperm.xlu0 %4994, %v10650_v56   ;;  %v2388_v56 = vsub.f32 %v10404_v39, %v7333_v14  ;;  %v10697_v14 = vld [vmem:[#allocation77_spill] sm:$0xff] }
 0x26e   :  { %4331 = vst.msk [vmem:[%s9831_s8 + $0x158] sm:$0xff] %vm1123_vm1, %v2416_v30  ;;  %v2368_v12 = vmul.f32 %v5284_v52, %v10651_v20  ;;  %v7426_v61 = vpop.eup %5285  ;;  %v10656_v52 = vld [vmem:[#allocation168_spill] sm:$0xff]  ;;  %5289 = vpow2.f32 %v1194_v15 }
 0x26f   :  { %10652 = vst [vmem:[#allocation14_spill] sm:$0xff] %v7426_v61  ;;  %v7430_v21 = vpop.permute.xlu0 %1477  ;;  %v2404_v10 = vmul.f32 %v7426_v61, %v2388_v56  ;;  %v10663_v56 = vld [vmem:[#allocation172_spill] sm:$0xff]  ;;  %v10692_v61 = vld [vmem:[#allocation73_spill] sm:$0xff] }
 0x270   :  { %10654 = vst [vmem:[#allocation26_spill] sm:$0xff] %v7430_v21  ;;  %v2418_v45 = vmul.f32 %v2402_v16, %v2368_v12  ;;  %v7443_v12 = vpop.permute.xlu1 %1386  ;;  %v10659_v16 = vld [vmem:[#allocation129_spill] sm:$0xff] }
 0x271   :  { %v5288_v60 = vpop.eup %5287  ;;  %1569 = vperm.xlu0 %4994, %v10655_v3   ;;  %10658 = vst [vmem:[#allocation62_spill] sm:$0xff] %v7443_v12 }
 0x272   :  { %4333 = vst.msk [vmem:[%s9831_s8 + $0x168] sm:$0xff] %vm1123_vm1, %v2418_v45  ;;  %v2372_v30 = vmul.f32 %v5288_v60, %v10656_v52  ;;  %v10662_v45 = vld [vmem:[#allocation162_spill] sm:$0xff] }
 0x273   :  { %v7441_v20 = vpop.permute.xlu0 %1485  ;;  %v7457_v60 = vmul.f32 %v10663_v56, %v10662_v45 }
 0x274   :  { %10657 = vst [vmem:[#allocation10_spill] sm:$0xff] %v7441_v20  ;;  %v2420_v62 = vmul.f32 %v2404_v10, %v2372_v30  ;;  %v7453_v3 = vpop.permute.xlu1 %1557  ;;  %v10666_v30 = vld [vmem:[#allocation166_spill] sm:$0xff]  ;;  %v10667_v10 = vld [vmem:[#allocation175_spill] sm:$0xff] }
 0x275   :  { %1577 = vperm.xlu0 %4994, %v10659_v16   ;;  %10661 = vst [vmem:[#allocation42_spill] sm:$0xff] %v7453_v3  ;;  %v7466_v12 = vmul.f32 %v10667_v10, %v10666_v30  ;;  %v10673_v30 = vld [vmem:[#allocation131_spill] sm:$0xff] }
 0x276   :  { %4335 = vst.msk [vmem:[%s9831_s8 + $0x178] sm:$0xff] %vm1123_vm1, %v2420_v62 }
 0x277   :  { %v7450_v39 = vpop.permute.xlu0 %1493 }
 0x278   :  { %10660 = vst [vmem:[#allocation127_spill] sm:$0xff] %v7450_v39  ;;  %v7470_v39 = vpop.permute.xlu1 %2102 }
 0x279   :  { %1585 = vperm.xlu0 %4994, %v7289_v2   ;;  %10668 = vst [vmem:[#allocation66_spill] sm:$0xff] %v7470_v39  ;;  %v10676_v39 = vld [vmem:[#allocation170_spill] sm:$0xff] }
 0x27b   :  { %v7459_v15 = vpop.permute.xlu0 %1501  ;;  %v7468_v62 = vpop.eup %5289 }
 0x27c   :  { %10664 = vst [vmem:[#allocation28_spill] sm:$0xff] %v7459_v15  ;;  %v1229_v45 = vsel %vm1123_vm1, %v7468_v62, 0.0  ;;  %v10670_v15 = vld [vmem:[#allocation123_spill] sm:$0xff]  ;;  %v7478_v20 = vpop.permute.xlu1 %1401 }
 0x27d   :  { %1593 = vperm.xlu0 %4994, %v7457_v60   ;;  %10671 = vst [vmem:[#allocation74_spill] sm:$0xff] %v7478_v20 }
 0x27f   :  { %v7462_v52 = vpop.permute.xlu0 %1509 }
 0x280   :  { %10665 = vst [vmem:[#allocation12_spill] sm:$0xff] %v7462_v52  ;;  %v7485_v21 = vpop.permute.xlu1 %1489 }
 0x281   :  { %1601 = vperm.xlu0 %4994, %v7466_v12   ;;  %10675 = vst [vmem:[#allocation46_spill] sm:$0xff] %v7485_v21 }
 0x283   :  { %v7473_v3 = vpop.permute.xlu0 %1517 }
 0x284   :  { %10669 = vst [vmem:[#allocation104_spill] sm:$0xff] %v7473_v3  ;;  %v10678_v3 = vld [vmem:[#allocation184_spill] sm:$0xff]  ;;  %v7491_v37 = vpop.permute.xlu1 %2018 }
 0x285   :  { %1230 = vadd.xlane.f32.xlu1 %v1229_v45  ;;  %2086 = vperm.xlu0 %4994, %v10670_v15   ;;  %10679 = vst [vmem:[#allocation86_spill] sm:$0xff] %v7491_v37  ;;  %v10687_v37 = vld [vmem:[#allocation54_spill] sm:$0xff] }
 0x287   :  { %v7480_v52 = vpop.permute.xlu0 %1994 }
 0x288   :  { %10672 = vst [vmem:[#allocation130_spill] sm:$0xff] %v7480_v52  ;;  %v10683_v52 = vld [vmem:[#allocation152_spill] sm:$0xff]  ;;  %v7503_v21 = vpop.permute.xlu1 %1396 }
 0x289   :  { %2098 = vperm.xlu0 %4994, %v10673_v30   ;;  %10684 = vst [vmem:[#allocation128_spill] sm:$0xff] %v7503_v21 }
 0x28b   :  { %v7483_v51 = vpop.permute.xlu0 %2006 }
 0x28c   :  { %10674 = vst [vmem:[#allocation132_spill] sm:$0xff] %v7483_v51  ;;  %v7501_v51 = vmul.f32 %v10663_v56, %v10683_v52  ;;  %v10689_v56 = vld [vmem:[#allocation163_spill] sm:$0xff] }
 0x28d   :  { %2106 = vperm.xlu0 %4994, %v10676_v39   ;;  %v7518_v52 = vmul.f32 %v10667_v10, %v10689_v56 }
 0x28f   :  { %v7488_v35 = vpop.permute.xlu0 %2014 }
 0x290   :  { %10677 = vst [vmem:[#allocation16_spill] sm:$0xff] %v7488_v35 }
 0x291   :  { %2114 = vperm.xlu0 %4994, %v10678_v3  }
 0x293   :  { %v7493_v45 = vpop.permute.xlu0 %2022 }
 0x294   :  { %10680 = vst [vmem:[#allocation110_spill] sm:$0xff] %v7493_v45  ;;  %v7511_v45 = vpop.permute.xlu1 %1565 }
 0x295   :  { %2122 = vperm.xlu0 %4994, %v10681_v34   ;;  %10686 = vst [vmem:[#allocation48_spill] sm:$0xff] %v7511_v45 }
 0x296   :  { %1513 = vperm.xlu1 %4985, %v7457_v60  }
 0x297   :  { %v7497_v20 = vpop.permute.xlu0 %2030 }
 0x298   :  { %10682 = vst [vmem:[#allocation133_spill] sm:$0xff] %v7497_v20 }
 0x299   :  { %2130 = vperm.xlu0 %4994, %v7310_v19  }
 0x29a   :  { %2042 = vperm.xlu1 %4985, %v7501_v51  }
 0x29b   :  { %v7507_v35 = vpop.permute.xlu0 %2038 }
 0x29c   :  { %10685 = vst [vmem:[#allocation134_spill] sm:$0xff] %v7507_v35  ;;  %v7525_v35 = vpop.permute.xlu1 %2110 }
 0x29d   :  { %2138 = vperm.xlu0 %4994, %v7501_v51   ;;  %10691 = vst [vmem:[#allocation121_spill] sm:$0xff] %v7525_v35  ;;  %v10700_v35 = vld [vmem:[#allocation144_spill] sm:$0xff] }
 0x29e   :  { %4986 = vset.pattern.permute.xlu1 %v10383_v28 }
 0x29f   :  { %1426 = vperm.xlu1 %4986, %v10687_v37   ;;  %v7514_v20 = vpop.permute.xlu0 %2046 }
 0x2a0   :  { %10688 = vst [vmem:[#allocation136_spill] sm:$0xff] %v7514_v20  ;;  %v10694_v20 = vld [vmem:[#allocation72_spill] sm:$0xff]  ;;  %v7532_v10 = vpop.permute.xlu1 %1497 }
 0x2a1   :  { %2146 = vperm.xlu0 %4994, %v7518_v52   ;;  %10695 = vst [vmem:[#allocation124_spill] sm:$0xff] %v7532_v10 }
 0x2a3   :  { %4987 = vset.pattern.permute.xlu1 %v10422_v33  ;;  %v7522_v21 = vpop.permute.xlu0 %2555 }
 0x2a4   :  { %10690 = vst [vmem:[#allocation143_spill] sm:$0xff] %v7522_v21  ;;  %1589 = vperm.xlu1 %4987, %v10687_v37   ;;  %v7540_v37 = vpop.permute.xlu1 %2026 }
 0x2a5   :  { %2647 = vperm.xlu0 %4994, %v10692_v61   ;;  %10699 = vst [vmem:[#allocation165_spill] sm:$0xff] %v7540_v37 }
 0x2a7   :  { %v7528_v45 = vpop.permute.xlu0 %2559 }
 0x2a8   :  { %10693 = vst [vmem:[#allocation159_spill] sm:$0xff] %v7528_v45  ;;  %2134 = vperm.xlu1 %4987, %v7099_v55   ;;  %v1177_v45 = vsub.f32 %v10584_v36, %v10701_v41  ;;  %v7548_v40 = vpop.permute.xlu1 %1406  ;;  %v10711_v41 = vld [vmem:[#allocation148_spill] sm:$0xff] }
 0x2a9   :  { %3212 = vperm.xlu0 %4994, %v10694_v20   ;;  %10704 = vst [vmem:[#allocation181_spill] sm:$0xff] %v7548_v40  ;;  %v10714_v40 = vld [vmem:[#allocation149_spill] sm:$0xff] }
 0x2aa   :  { %v1198_v10 = vmul.f32 1.442695, %v1177_v45 }
 0x2ab   :  { %v7534_v56 = vpop.permute.xlu0 %3120 }
 0x2ac   :  { %10696 = vst [vmem:[#allocation160_spill] sm:$0xff] %v7534_v56  ;;  %4988 = vset.pattern.permute.xlu1 %v10365_v53  ;;  %v10706_v53 = vld [vmem:[#allocation146_spill] sm:$0xff]  ;;  %5291 = vpow2.f32 %v1198_v10  ;;  %v7555_v37 = vpop.permute.xlu1 %1573 }
 0x2ad   :  { %2659 = vperm.xlu0 %4994, %v10697_v14   ;;  %10708 = vst [vmem:[#allocation162_spill] sm:$0xff] %v7555_v37 }
 0x2af   :  { %v7538_v21 = vpop.permute.xlu0 %2567 }
 0x2b0   :  { %10698 = vst [vmem:[#allocation59_spill] sm:$0xff] %v7538_v21 }
 0x2b1   :  { %3220 = vperm.xlu0 %4994, %v10700_v35   ;;  %v10709_v35 = vld [vmem:[#allocation147_spill] sm:$0xff] }
 0x2b3   :  { %v7545_v6 = vpop.permute.xlu0 %3128 }
 0x2b4   :  { %10702 = vst [vmem:[#allocation164_spill] sm:$0xff] %v7545_v6  ;;  %v7561_v6 = vpop.permute.xlu1 %2118 }
 0x2b5   :  { %2667 = vperm.xlu0 %4994, %v10703_v22   ;;  %10712 = vst [vmem:[#allocation166_spill] sm:$0xff] %v7561_v6 }
 0x2b7   :  { %v7550_v56 = vpop.permute.xlu0 %2575 }
 0x2b8   :  { %10705 = vst [vmem:[#allocation168_spill] sm:$0xff] %v7550_v56 }
 0x2b9   :  { %3228 = vperm.xlu0 %4994, %v10706_v53   ;;  %v7568_v10 = vpop.eup %5291 }
 0x2ba   :  { %v1235_v37 = vsel %vm1123_vm1, %v7568_v10, 0.0 }
 0x2bb   :  { %v7553_v21 = vpop.permute.xlu0 %3136 }
 0x2bc   :  { %10707 = vst [vmem:[#allocation129_spill] sm:$0xff] %v7553_v21  ;;  %v10716_v21 = vld [vmem:[#allocation156_spill] sm:$0xff] }
 0x2bd   :  { %2675 = vperm.xlu0 %4994, %v10709_v35  }
 0x2bf   :  { %v7558_v44 = vpop.permute.xlu0 %2583 }
 0x2c0   :  { %10710 = vst [vmem:[#allocation172_spill] sm:$0xff] %v7558_v44 }
 0x2c1   :  { %3236 = vperm.xlu0 %4994, %v10711_v41   ;;  %v10718_v41 = vld [vmem:[#allocation157_spill] sm:$0xff] }
 0x2c3   :  { %v7563_v45 = vpop.permute.xlu0 %3144 }
 0x2c4   :  { %10713 = vst [vmem:[#allocation175_spill] sm:$0xff] %v7563_v45  ;;  %v10720_v45 = vld [vmem:[#allocation158_spill] sm:$0xff] }
 0x2c5   :  { %2683 = vperm.xlu0 %4994, %v10714_v40   ;;  %v10722_v40 = vld [vmem:[#allocation173_spill] sm:$0xff] }
 0x2c7   :  { %v1225_v56 = vpop.xlane.xlu1 %1224  ;;  %v7566_v22 = vpop.permute.xlu0 %2591 }
 0x2c8   :  { %10715 = vst [vmem:[#allocation123_spill] sm:$0xff] %v7566_v22  ;;  %5293 = vrcp.f32 %v1225_v56  ;;  %v1301_v22 = vsub.f32 %v10556_v7, %v7188_v50  ;;  %v10726_v7 = vld [vmem:[#allocation177_spill] sm:$0xff] }
 0x2c9   :  { %3244 = vperm.xlu0 %4994, %v10716_v21  }
 0x2ca   :  { %v1317_v21 = vmul.f32 %v7312_v63, %v1301_v22 }
 0x2cb   :  { %v7573_v44 = vpop.permute.xlu0 %3152 }
 0x2cc   :  { %10717 = vst [vmem:[#allocation131_spill] sm:$0xff] %v7573_v44  ;;  %1236 = vadd.xlane.f32.xlu1 %v1235_v37 }
 0x2cd   :  { %2691 = vperm.xlu0 %4994, %v10718_v41   ;;  %v10724_v41 = vld [vmem:[#allocation174_spill] sm:$0xff] }
 0x2cf   :  { %v7576_v6 = vpop.permute.xlu0 %2599 }
 0x2d0   :  { %10719 = vst [vmem:[#allocation170_spill] sm:$0xff] %v7576_v6 }
 0x2d1   :  { %3252 = vperm.xlu0 %4994, %v10720_v45   ;;  %v10751_v45 = vld [vmem:[#allocation24_spill] sm:$0xff] }
 0x2d3   :  { %v7579_v53 = vpop.permute.xlu0 %3160 }
 0x2d4   :  { %10721 = vst [vmem:[#allocation184_spill] sm:$0xff] %v7579_v53 }
 0x2d5   :  { %v5294_v56 = vpop.eup %5293  ;;  %2699 = vperm.xlu0 %4994, %v10722_v40  }
 0x2d6   :  { %v1271_v35 = vmul.f32 %v5294_v56, %v7192_v46  ;;  %v10728_v46 = vld [vmem:[#allocation178_spill] sm:$0xff] }
 0x2d7   :  { %v7586_v44 = vpop.permute.xlu0 %2607 }
 0x2d8   :  { %10723 = vst [vmem:[#allocation25_spill] sm:$0xff] %v7586_v44  ;;  %v1333_v37 = vmul.f32 %v1317_v21, %v1271_v35  ;;  %v10730_v35 = vld [vmem:[#allocation60_spill] sm:$0xff]  ;;  %v10735_v44 = vld [vmem:[#allocation71_spill] sm:$0xff] }
 0x2d9   :  { %3260 = vperm.xlu0 %4994, %v10724_v41  }
 0x2da   :  { %1349 = vst.msk [vmem:[%s9831_s8 + $0x8] sm:$0xff] %vm1123_vm1, %v1333_v37 }
 0x2db   :  { %v7593_v53 = vpop.permute.xlu0 %3168 }
 0x2dc   :  { %10725 = vst [vmem:[#allocation152_spill] sm:$0xff] %v7593_v53 }
 0x2dd   :  { %1521 = vperm.xlu1 %4988, %v7466_v12   ;;  %2707 = vperm.xlu0 %4994, %v10726_v7  }
 0x2e0   :  { %v7597_v6 = vpop.permute.xlu0 %1541 }
 0x2e1   :  { %10727 = vst [vmem:[#allocation54_spill] sm:$0xff] %v7597_v6  ;;  %2050 = vperm.xlu1 %4988, %v7518_v52   ;;  %3268 = vperm.xlu0 %4994, %v10728_v46  }
 0x2e4   :  { %v7601_v22 = vpop.permute.xlu0 %1553 }
 0x2e5   :  { %10729 = vst [vmem:[#allocation163_spill] sm:$0xff] %v7601_v22  ;;  %4989 = vset.pattern.permute.xlu1 %v10383_v28  ;;  %4996 = vset.pattern.permute.xlu0 %v10383_v28  ;;  %v7618_v22 = vpop.permute.xlu1 %1505 }
 0x2e6   :  { %1436 = vperm.xlu1 %4989, %v10730_v35   ;;  %1366 = vperm.xlu0 %4996, %v10641_v31   ;;  %10732 = vst [vmem:[#allocation77_spill] sm:$0xff] %v7618_v22 }
 0x2e8   :  { %v7607_v21 = vpop.permute.xlu0 %1561 }
 0x2e9   :  { %10731 = vst [vmem:[#allocation73_spill] sm:$0xff] %v7607_v21  ;;  %v10734_v21 = vld [vmem:[#allocation67_spill] sm:$0xff] }
 0x2ea   :  { %4990 = vset.pattern.permute.xlu1 %v10422_v33  ;;  %1411 = vperm.xlu0 %4996, %v10659_v16   ;;  %v7625_v16 = vpop.permute.xlu1 %2034 }
 0x2eb   :  { %1597 = vperm.xlu1 %4990, %v10730_v35   ;;  %10733 = vst [vmem:[#allocation65_spill] sm:$0xff] %v7625_v16 }
 0x2ec   :  { %v7612_v56 = vpop.permute.xlu0 %1569 }
 0x2ee   :  { %1421 = vperm.xlu0 %4996, %v7289_v2   ;;  %v1179_v2 = vsub.f32 %v10590_v26, %v10734_v21  ;;  %v7636_v22 = vpop.permute.xlu1 %1416 }
 0x2ef   :  { %2142 = vperm.xlu1 %4990, %v7118_v1   ;;  %10736 = vst [vmem:[#allocation60_spill] sm:$0xff] %v7636_v22 }
 0x2f0   :  { %v7616_v37 = vpop.permute.xlu0 %1577  ;;  %v1202_v53 = vmul.f32 1.442695, %v1179_v2 }
 0x2f2   :  { %1431 = vperm.xlu0 %4996, %v7457_v60   ;;  %v1181_v60 = vsub.f32 %v10596_v17, %v10735_v44  ;;  %5295 = vpow2.f32 %v1202_v53  ;;  %v10741_v44 = vld [vmem:[#allocation87_spill] sm:$0xff] }
 0x2f3   :  { %4991 = vset.pattern.permute.xlu1 %v10383_v28  ;;  %v10738_v28 = vld [vmem:[#allocation78_spill] sm:$0xff]  ;;  %v1185_v22 = vsub.f32 %v10371_v0, %v10741_v44 }
 0x2f4   :  { %v7622_v31 = vpop.permute.xlu0 %1585  ;;  %v1206_v16 = vmul.f32 1.442695, %v1181_v60  ;;  %v1183_v41 = vsub.f32 %v10604_v13, %v10738_v28  ;;  %v10743_v60 = vld [vmem:[#allocation93_spill] sm:$0xff] }
 0x2f5   :  { %v1214_v53 = vmul.f32 1.442695, %v1185_v22  ;;  %v1187_v28 = vsub.f32 %v10618_v9, %v10743_v60  ;;  %v10746_v60 = vld [vmem:[#allocation153_spill] sm:$0xff] }
 0x2f6   :  { %1441 = vperm.xlu0 %4996, %v7466_v12   ;;  %5297 = vpow2.f32 %v1206_v16  ;;  %v1210_v2 = vmul.f32 1.442695, %v1183_v41  ;;  %v10745_v16 = vld [vmem:[#allocation84_spill] sm:$0xff] }
 0x2f7   :  { %v1218_v41 = vmul.f32 1.442695, %v1187_v28  ;;  %v1685_v44 = vsub.f32 %v10570_v59, %v10745_v16 }
 0x2f8   :  { %v7627_v35 = vpop.permute.xlu0 %1593  ;;  %5299 = vpow2.f32 %v1210_v2 }
 0x2f9   :  { %5301 = vpow2.f32 %v1214_v53  ;;  %v1702_v2 = vmul.f32 1.442695, %v1685_v44 }
 0x2fa   :  { %1879 = vperm.xlu0 %4996, %v10670_v15   ;;  %v7644_v15 = vpop.permute.xlu1 %1581 }
 0x2fb   :  { %10739 = vst [vmem:[#allocation71_spill] sm:$0xff] %v7644_v15 }
 0x2fc   :  { %v7632_v6 = vpop.permute.xlu0 %1601 }
 0x2fe   :  { %1924 = vperm.xlu0 %4996, %v10681_v34  }
 0x300   :  { %v7639_v12 = vpop.permute.xlu0 %2086 }
 0x301   :  { %10737 = vst [vmem:[#allocation67_spill] sm:$0xff] %v7639_v12  ;;  %v7655_v12 = vpop.permute.xlu1 %2126 }
 0x302   :  { %1934 = vperm.xlu0 %4996, %v7310_v19   ;;  %10744 = vst [vmem:[#allocation93_spill] sm:$0xff] %v7655_v12  ;;  %v10747_v12 = vld [vmem:[#allocation20_spill] sm:$0xff] }
 0x304   :  { %v7646_v21 = vpop.permute.xlu0 %2098 }
 0x305   :  { %10740 = vst [vmem:[#allocation78_spill] sm:$0xff] %v7646_v21  ;;  %v10749_v21 = vld [vmem:[#allocation22_spill] sm:$0xff] }
 0x306   :  { %1944 = vperm.xlu0 %4996, %v7501_v51   ;;  %v7663_v51 = vpop.eup %5295 }
 0x307   :  { %v1241_v53 = vsel %vm1123_vm1, %v7663_v51, 0.0  ;;  %v7672_v28 = vpop.eup %5297 }
 0x308   :  { %v7651_v34 = vpop.permute.xlu0 %2106  ;;  %v7681_v44 = vpop.eup %5299 }
 0x309   :  { %10742 = vst [vmem:[#allocation87_spill] sm:$0xff] %v7651_v34 }
 0x30a   :  { %1954 = vperm.xlu0 %4996, %v7518_v52   ;;  %v1687_v52 = vsub.f32 %v10747_v12, %v10746_v60 }
 0x30c   :  { %v7658_v19 = vpop.permute.xlu0 %2114  ;;  %v1706_v34 = vmul.f32 1.442695, %v1687_v52  ;;  %v7690_v52 = vpop.eup %5301 }
 0x30e   :  { %v1231_v15 = vpop.xlane.xlu1 %1230  ;;  %2445 = vperm.xlu0 %4996, %v10560_v23  }
 0x30f   :  { %5303 = vrcp.f32 %v1231_v15  ;;  %v10748_v15 = vld [vmem:[#allocation161_spill] sm:$0xff] }
 0x310   :  { %v7665_v22 = vpop.permute.xlu0 %2122  ;;  %5305 = vpow2.f32 %v1218_v41  ;;  %v1689_v23 = vsub.f32 %v10749_v21, %v10748_v15  ;;  %v1247_v41 = vsel %vm1123_vm1, %v7672_v28, 0.0  ;;  %v1303_v15 = vsub.f32 %v10574_v38, %v7207_v8 }
 0x311   :  { %5307 = vpow2.f32 %v1702_v2  ;;  %v1253_v2 = vsel %vm1123_vm1, %v7681_v44, 0.0 }
 0x312   :  { %2490 = vperm.xlu0 %4996, %v6760_v11   ;;  %5309 = vpow2.f32 %v1706_v34  ;;  %v1710_v11 = vmul.f32 1.442695, %v1689_v23  ;;  %v1319_v34 = vmul.f32 %v7328_v4, %v1303_v15 }
 0x313   :  { %1242 = vadd.xlane.f32.xlu1 %v1241_v53  ;;  %v10750_v53 = vld [vmem:[#allocation167_spill] sm:$0xff] }
 0x314   :  { %v7674_v16 = vpop.permute.xlu0 %2130  ;;  %v1691_v40 = vsub.f32 %v10751_v45, %v10750_v53  ;;  %5311 = vpow2.f32 %v1710_v11  ;;  %v10752_v45 = vld [vmem:[#allocation169_spill] sm:$0xff] }
 0x315   :  { %v1693_v21 = vsub.f32 %v10595_v48, %v10752_v45  ;;  %v10755_v45 = vld [vmem:[#allocation135_spill] sm:$0xff] }
 0x316   :  { %2500 = vperm.xlu0 %4996, %v6802_v27   ;;  %v1714_v53 = vmul.f32 1.442695, %v1691_v40 }
 0x317   :  { %1248 = vadd.xlane.f32.xlu1 %v1247_v41  ;;  %v1718_v11 = vmul.f32 1.442695, %v1693_v21 }
 0x318   :  { %v7683_v60 = vpop.permute.xlu0 %2138  ;;  %5313 = vpow2.f32 %v1714_v53  ;;  %v10758_v53 = vld [vmem:[#allocation138_spill] sm:$0xff] }
 0x319   :  { %5315 = vpow2.f32 %v1718_v11 }
 0x31a   :  { %2510 = vperm.xlu0 %4996, %v6815_v54   ;;  %v1259_v54 = vsel %vm1123_vm1, %v7690_v52, 0.0 }
 0x31b   :  { %1254 = vadd.xlane.f32.xlu1 %v1253_v2 }
 0x31c   :  { %v5304_v27 = vpop.eup %5303  ;;  %v7694_v41 = vpop.permute.xlu0 %2146 }
 0x31d   :  { %v1275_v23 = vmul.f32 %v5304_v27, %v7468_v62  ;;  %v7703_v12 = vpop.eup %5305  ;;  %v10754_v27 = vld [vmem:[#allocation171_spill] sm:$0xff] }
 0x31e   :  { %3006 = vperm.xlu0 %4996, %v10694_v20   ;;  %v1695_v40 = vsub.f32 %v10603_v5, %v10754_v27  ;;  %v1265_v62 = vsel %vm1123_vm1, %v7703_v12, 0.0  ;;  %v7716_v15 = vpop.eup %5307  ;;  %v10763_v20 = vld [vmem:[#allocation35_spill] sm:$0xff] }
 0x31f   :  { %v1335_v38 = vmul.f32 %v1319_v34, %v1275_v23  ;;  %1260 = vadd.xlane.f32.xlu1 %v1259_v54  ;;  %v10757_v23 = vld [vmem:[#allocation176_spill] sm:$0xff]  ;;  %v1735_v21 = vsel %vm1123_vm1, %v7716_v15, 0.0  ;;  %v7725_v27 = vpop.eup %5309 }
 0x320   :  { %v7705_v2 = vpop.permute.xlu0 %2647  ;;  %v1722_v34 = vmul.f32 1.442695, %v1695_v40  ;;  %v1741_v11 = vsel %vm1123_vm1, %v7725_v27, 0.0 }
 0x321   :  { %10753 = vst [vmem:[#allocation84_spill] sm:$0xff] %v7705_v2  ;;  %1351 = vst.msk [vmem:[%s9831_s8 + $0x18] sm:$0xff] %vm1123_vm1, %v1335_v38  ;;  %v1697_v38 = vsub.f32 %v10610_v43, %v10757_v23  ;;  %v7734_v40 = vpop.eup %5311 }
 0x322   :  { %3021 = vperm.xlu0 %4996, %v10755_v45   ;;  %5317 = vpow2.f32 %v1722_v34  ;;  %v1747_v34 = vsel %vm1123_vm1, %v7734_v40, 0.0 }
 0x323   :  { %1266 = vadd.xlane.f32.xlu1 %v1265_v62  ;;  %v1726_v45 = vmul.f32 1.442695, %v1697_v38  ;;  %v10760_v62 = vld [vmem:[#allocation180_spill] sm:$0xff] }
 0x324   :  { %v7718_v54 = vpop.permute.xlu0 %3212 }
 0x325   :  { %10756 = vst [vmem:[#allocation153_spill] sm:$0xff] %v7718_v54  ;;  %v1699_v54 = vsub.f32 %v10617_v29, %v10760_v62  ;;  %5319 = vpow2.f32 %v1726_v45  ;;  %v7743_v38 = vpop.eup %5313  ;;  %v10766_v29 = vld [vmem:[#allocation37_spill] sm:$0xff] }
 0x326   :  { %3031 = vperm.xlu0 %4996, %v10758_v53   ;;  %v1753_v45 = vsel %vm1123_vm1, %v7743_v38, 0.0 }
 0x327   :  { %1736 = vadd.xlane.f32.xlu1 %v1735_v21  ;;  %v1730_v53 = vmul.f32 1.442695, %v1699_v54  ;;  %v10762_v21 = vld [vmem:[#allocation182_spill] sm:$0xff]  ;;  %v7752_v54 = vpop.eup %5315 }
 0x328   :  { %v7727_v2 = vpop.permute.xlu0 %2659 }
 0x329   :  { %10759 = vst [vmem:[#allocation161_spill] sm:$0xff] %v7727_v2  ;;  %v2245_v2 = vsub.f32 %v10763_v20, %v10762_v21  ;;  %5321 = vpow2.f32 %v1730_v53  ;;  %v10769_v20 = vld [vmem:[#allocation39_spill] sm:$0xff] }
 0x32a   :  { %3041 = vperm.xlu0 %4996, %v6753_v42  }
 0x32b   :  { %1742 = vadd.xlane.f32.xlu1 %v1741_v11  ;;  %v2261_v42 = vmul.f32 1.442695, %v2245_v2  ;;  %v10765_v11 = vld [vmem:[#allocation119_spill] sm:$0xff]  ;;  %v1759_v2 = vsel %vm1123_vm1, %v7752_v54, 0.0 }
 0x32c   :  { %v7736_v23 = vpop.permute.xlu0 %3220 }
 0x32d   :  { %10761 = vst [vmem:[#allocation167_spill] sm:$0xff] %v7736_v23  ;;  %v2247_v23 = vsub.f32 %v10766_v29, %v10765_v11  ;;  %5323 = vpow2.f32 %v2261_v42  ;;  %v5447_v11 = vld [vmem:[%s9830_s0 + $0xb8] sm:$0xff]  ;;  %v7767_v42 = vpop.permute.xlu1 %1513 }
 0x32e   :  { %3051 = vperm.xlu0 %4996, %v6764_v57   ;;  %10771 = vst [vmem:[#allocation180_spill] sm:$0xff] %v7767_v42  ;;  %v10773_v29 = vld [vmem:[#allocation41_spill] sm:$0xff] }
 0x32f   :  { %1748 = vadd.xlane.f32.xlu1 %v1747_v34  ;;  %v2265_v57 = vmul.f32 1.442695, %v2247_v23  ;;  %v10768_v34 = vld [vmem:[#allocation183_spill] sm:$0xff]  ;;  %v7761_v53 = vpop.eup %5317  ;;  %v5448_v23 = vld [vmem:[%s9830_s0 + $0x38] sm:$0xff] }
 0x330   :  { %v7745_v62 = vpop.permute.xlu0 %2667  ;;  %10770 = vst [vmem:[#allocation176_spill] sm:$0xff] %v7761_v53 }
 0x331   :  { %10764 = vst [vmem:[#allocation169_spill] sm:$0xff] %v7745_v62  ;;  %v2249_v62 = vsub.f32 %v10769_v20, %v10768_v34  ;;  %v1611_v34 = vmul.f32 %v5448_v23, %v7612_v56  ;;  %5325 = vpow2.f32 %v2265_v57  ;;  %v10772_v20 = vld [vmem:[#allocation3_spill] sm:$0xff] }
 0x332   :  { %3061 = vperm.xlu0 %4996, %v6806_v18   ;;  %v5449_v18 = vld [vmem:[%s9830_s0 + $0x138] sm:$0xff]  ;;  %v2251_v43 = vsub.f32 %v10773_v29, %v10772_v20  ;;  %v10776_v20 = vld [vmem:[#allocation43_spill] sm:$0xff] }
 0x333   :  { %1754 = vadd.xlane.f32.xlu1 %v1753_v45  ;;  %v2156_v45 = vmul.f32 %v5447_v11, %v7658_v19  ;;  %v1765_v19 = vsel %vm1123_vm1, %v7761_v53, 0.0  ;;  %v7781_v11 = vpop.eup %5319 }
 0x334   :  { %v7754_v21 = vpop.permute.xlu0 %3228  ;;  %10774 = vst [vmem:[#allocation182_spill] sm:$0xff] %v7781_v11  ;;  %v1771_v53 = vsel %vm1123_vm1, %v7781_v11, 0.0 }
 0x335   :  { %10767 = vst [vmem:[#allocation171_spill] sm:$0xff] %v7754_v21  ;;  %v2172_v42 = vadd.f32 %v2156_v45, %v1611_v34  ;;  %v7793_v45 = vpop.permute.xlu1 %2042 }
 0x336   :  { %2515 = vperm.xlu0 %4996, %v10726_v7   ;;  %v2269_v7 = vmul.f32 1.442695, %v2249_v62  ;;  %v2273_v62 = vmul.f32 1.442695, %v2251_v43  ;;  %10778 = vst [vmem:[#allocation183_spill] sm:$0xff] %v7793_v45 }
 0x337   :  { %1760 = vadd.xlane.f32.xlu1 %v1759_v2 }
 0x338   :  { %v2676_v21 = vpop.permute.xlu0 %2675  ;;  %5327 = vpow2.f32 %v2269_v7 }
 0x339   :  { %v2717_v2 = vmul.f32 %v5449_v18, %v2676_v21  ;;  %v5450_v18 = vld [vmem:[%s9830_s0 + $0x1b8] sm:$0xff]  ;;  %5329 = vpow2.f32 %v2273_v62 }
 0x33a   :  { %3076 = vperm.xlu0 %4996, %v10728_v46   ;;  %v10775_v21 = vld [vmem:[#allocation21_spill] sm:$0xff]  ;;  %v7791_v46 = vpop.eup %5321 }
 0x33b   :  { %1766 = vadd.xlane.f32.xlu1 %v1765_v19  ;;  %v2733_v23 = vadd.f32 %v2717_v2, %v2172_v42  ;;  %v2253_v29 = vsub.f32 %v10776_v20, %v10775_v21  ;;  %10777 = vst [vmem:[#allocation119_spill] sm:$0xff] %v7791_v46  ;;  %v7798_v42 = vld [vmem:[%s9830_s0 + $0xc8] sm:$0xff]  ;;  %v7820_v20 = vpop.permute.xlu1 %1426 }
 0x33c   :  { %v3237_v56 = vpop.permute.xlu0 %3236  ;;  %v2158_v43 = vmul.f32 %v7798_v42, %v7665_v22  ;;  %v7807_v2 = vld [vmem:[%s9830_s0 + $0x48] sm:$0xff]  ;;  %10782 = vst [vmem:[#allocation21_spill] sm:$0xff] %v7820_v20 }
 0x33d   :  { %v3278_v57 = vmul.f32 %v5450_v18, %v3237_v56  ;;  %v1613_v19 = vmul.f32 %v7807_v2, %v7616_v37  ;;  %v5453_v56 = vld [vmem:[%s9830_s0 + $0x148] sm:$0xff]  ;;  %v2277_v21 = vmul.f32 1.442695, %v2253_v29 }
 0x33e   :  { %4998 = vset.pattern.permute.xlu0 %v10422_v33  ;;  %v10780_v22 = vld [vmem:[#allocation23_spill] sm:$0xff] }
 0x33f   :  { %1772 = vadd.xlane.f32.xlu1 %v1771_v53  ;;  %v7802_v7 = vadd.f32 %v3278_v57, %v2733_v23  ;;  %v10781_v53 = vld [vmem:[#allocation45_spill] sm:$0xff]  ;;  %v1777_v57 = vsel %vm1123_vm1, %v7791_v46, 0.0  ;;  %v2174_v45 = vadd.f32 %v2158_v43, %v1613_v19  ;;  %5331 = vpow2.f32 %v2277_v21 }
 0x340   :  { %v2684_v34 = vpop.permute.xlu0 %2683  ;;  %v2255_v23 = vsub.f32 %v10781_v53, %v10780_v22  ;;  %v10784_v22 = vld [vmem:[#allocation47_spill] sm:$0xff]  ;;  %v7834_v43 = vld [vmem:[%s9830_s0 + $0xd8] sm:$0xff] }
 0x341   :  { %10779 = vst [vmem:[#allocation3_spill] sm:$0xff] %v7802_v7  ;;  %v2719_v18 = vmul.f32 %v5453_v56, %v2684_v34  ;;  %v7818_v7 = vpop.eup %5323  ;;  %v5454_v34 = vld [vmem:[%s9830_s0 + $0x1c8] sm:$0xff]  ;;  %v10783_v56 = vld [vmem:[#allocation9_spill] sm:$0xff] }
 0x342   :  { %v2281_v29 = vmul.f32 1.442695, %v2255_v23  ;;  %v2257_v53 = vsub.f32 %v10784_v22, %v10783_v56  ;;  %v2293_v46 = vsel %vm1123_vm1, %v7818_v7, 0.0  ;;  %v7829_v11 = vpop.eup %5325  ;;  %v5457_v23 = vld [vmem:[%s9830_s0 + $0x158] sm:$0xff] }
 0x343   :  { %1778 = vadd.xlane.f32.xlu1 %v1777_v57  ;;  %v2735_v37 = vadd.f32 %v2719_v18, %v2174_v45  ;;  %10785 = vst [vmem:[#allocation23_spill] sm:$0xff] %v7829_v11  ;;  %v2160_v45 = vmul.f32 %v7834_v43, %v7674_v16  ;;  %v7843_v18 = vld [vmem:[%s9830_s0 + $0x58] sm:$0xff]  ;;  %v10787_v16 = vld [vmem:[#allocation11_spill] sm:$0xff] }
 0x344   :  { %v3245_v33 = vpop.permute.xlu0 %3244  ;;  %v1615_v21 = vmul.f32 %v7843_v18, %v7622_v31  ;;  %5333 = vpow2.f32 %v2281_v29 }
 0x345   :  { %v3280_v62 = vmul.f32 %v5454_v34, %v3245_v33  ;;  %v2285_v34 = vmul.f32 1.442695, %v2257_v53  ;;  %v7854_v56 = vpop.eup %5327 }
 0x346   :  { %10789 = vst [vmem:[#allocation11_spill] sm:$0xff] %v7854_v56  ;;  %v2176_v20 = vadd.f32 %v2160_v45, %v1615_v21 }
 0x347   :  { %2294 = vadd.xlane.f32.xlu1 %v2293_v46  ;;  %v7838_v33 = vadd.f32 %v3280_v62, %v2735_v37  ;;  %v10788_v46 = vld [vmem:[#allocation49_spill] sm:$0xff]  ;;  %v2299_v62 = vsel %vm1123_vm1, %v7829_v11, 0.0  ;;  %5335 = vpow2.f32 %v2285_v34  ;;  %v7879_v34 = vld [vmem:[%s9830_s0 + $0x68] sm:$0xff] }
 0x348   :  { %v2692_v19 = vpop.permute.xlu0 %2691  ;;  %v2259_v37 = vsub.f32 %v10788_v46, %v10787_v16  ;;  %v7863_v16 = vpop.eup %5329 }
 0x349   :  { %10786 = vst [vmem:[#allocation9_spill] sm:$0xff] %v7838_v33  ;;  %v2721_v57 = vmul.f32 %v5457_v23, %v2692_v19  ;;  %v7856_v33 = vpop.permute.xlu1 %1589  ;;  %v5458_v19 = vld [vmem:[%s9830_s0 + $0x1d8] sm:$0xff]  ;;  %v2305_v23 = vsel %vm1123_vm1, %v7854_v56, 0.0  ;;  %10791 = vst [vmem:[#allocation186_spill] sm:$0xff] %v7863_v16 }
 0x34a   :  { %10790 = vst [vmem:[#allocation185_spill] sm:$0xff] %v7856_v33  ;;  %v2289_v53 = vmul.f32 1.442695, %v2259_v37  ;;  %v7868_v33 = vld [vmem:[%s9830_s0 + $0xe8] sm:$0xff]  ;;  %v1617_v37 = vmul.f32 %v7879_v34, %v7627_v35 }
 0x34b   :  { %2300 = vadd.xlane.f32.xlu1 %v2299_v62  ;;  %v2737_v22 = vadd.f32 %v2721_v57, %v2176_v20  ;;  %v2162_v20 = vmul.f32 %v7868_v33, %v7683_v60  ;;  %v5461_v62 = vld [vmem:[%s9830_s0 + $0x168] sm:$0xff]  ;;  %v2311_v60 = vsel %vm1123_vm1, %v7863_v16, 0.0 }
 0x34c   :  { %v3253_v31 = vpop.permute.xlu0 %3252  ;;  %5337 = vpow2.f32 %v2289_v53  ;;  %v5462_v35 = vld [vmem:[%s9830_s0 + $0x1e8] sm:$0xff] }
 0x34d   :  { %v3282_v29 = vmul.f32 %v5458_v19, %v3253_v31  ;;  %v7874_v57 = vpop.permute.xlu1 %2134  ;;  %v2178_v19 = vadd.f32 %v2162_v20, %v1617_v37 }
 0x34e   :  { %10793 = vst [vmem:[#allocation188_spill] sm:$0xff] %v7874_v57 }
 0x34f   :  { %2306 = vadd.xlane.f32.xlu1 %v2305_v23  ;;  %v7872_v45 = vadd.f32 %v3282_v29, %v2737_v22  ;;  %v7888_v22 = vpop.eup %5331 }
 0x350   :  { %v2700_v21 = vpop.permute.xlu0 %2699  ;;  %10794 = vst [vmem:[#allocation189_spill] sm:$0xff] %v7888_v22 }
 0x351   :  { %10792 = vst [vmem:[#allocation187_spill] sm:$0xff] %v7872_v45  ;;  %v2723_v31 = vmul.f32 %v5461_v62, %v2700_v21  ;;  %v2317_v21 = vsel %vm1123_vm1, %v7888_v22, 0.0  ;;  %v7895_v53 = vpop.eup %5333  ;;  %v7900_v62 = vld [vmem:[%s9830_s0 + $0xf8] sm:$0xff] }
 0x352   :  { %10795 = vst [vmem:[#allocation190_spill] sm:$0xff] %v7895_v53  ;;  %v2164_v20 = vmul.f32 %v7900_v62, %v7694_v41  ;;  %v7930_v22 = vld [vmem:[%s9830_s0 + $0x1f8] sm:$0xff] }
 0x353   :  { %2312 = vadd.xlane.f32.xlu1 %v2311_v60  ;;  %v2739_v45 = vadd.f32 %v2723_v31, %v2178_v19  ;;  %v10797_v60 = vld [vmem:[#allocation50_spill] sm:$0xff] }
 0x354   :  { %v3261_v29 = vpop.permute.xlu0 %3260  ;;  %v2761_v19 = vsel %vm1123_vm1, %v10797_v60, -inf  ;;  %v10799_v60 = vld [vmem:[#allocation55_spill] sm:$0xff] }
 0x355   :  { %v1237_v23 = vpop.xlane.xlu1 %1236  ;;  %v3284_v57 = vmul.f32 %v5462_v35, %v3261_v29  ;;  %v7911_v29 = vld [vmem:[%s9830_s0 + $0x78] sm:$0xff]  ;;  %v2764_v46 = vsel %vm1123_vm1, %v10799_v60, -inf }
 0x356   :  { %5339 = vrcp.f32 %v1237_v23  ;;  %v1619_v23 = vmul.f32 %v7911_v29, %v7632_v6  ;;  %v7918_v35 = vld [vmem:[%s9830_s0 + $0x178] sm:$0xff] }
 0x357   :  { %2318 = vadd.xlane.f32.xlu1 %v2317_v21  ;;  %v7904_v37 = vadd.f32 %v3284_v57, %v2739_v45  ;;  %v2323_v45 = vsel %vm1123_vm1, %v7895_v53, 0.0  ;;  %v7923_v57 = vpop.eup %5335 }
 0x358   :  { %v2708_v31 = vpop.permute.xlu0 %2707  ;;  %10798 = vst [vmem:[#allocation192_spill] sm:$0xff] %v7923_v57  ;;  %v2180_v21 = vadd.f32 %v2164_v20, %v1619_v23  ;;  %v10802_v23 = vld [vmem:[#allocation61_spill] sm:$0xff] }
 0x359   :  { %10796 = vst [vmem:[#allocation191_spill] sm:$0xff] %v7904_v37  ;;  %v2725_v41 = vmul.f32 %v7918_v35, %v2708_v31  ;;  %2762 = vmax.xlane.f32.xlu0 %v2761_v19  ;;  %v2329_v19 = vsel %vm1123_vm1, %v7923_v57, 0.0  ;;  %v7935_v53 = vpop.eup %5337  ;;  %v7984_v11 = vpop.permute.xlu1 %1521 }
 0x35a   :  { %10800 = vst [vmem:[#allocation193_spill] sm:$0xff] %v7935_v53 }
 0x35b   :  { %2324 = vadd.xlane.f32.xlu1 %v2323_v45  ;;  %v2741_v6 = vadd.f32 %v2725_v41, %v2180_v21  ;;  %v2770_v45 = vsel %vm1123_vm1, %v10802_v23, -inf  ;;  %v1305_v21 = vsub.f32 %v10584_v36, %v7230_v47  ;;  %v10804_v36 = vld [vmem:[#allocation76_spill] sm:$0xff] }
 0x35c   :  { %v3269_v37 = vpop.permute.xlu0 %3268 }
 0x35d   :  { %v3286_v31 = vmul.f32 %v7930_v22, %v3269_v37  ;;  %2765 = vmax.xlane.f32.xlu0 %v2764_v46  ;;  %v2335_v37 = vsel %vm1123_vm1, %v7935_v53, 0.0  ;;  %v1321_v60 = vmul.f32 %v7356_v24, %v1305_v21 }
 0x35f   :  { %2330 = vadd.xlane.f32.xlu1 %v2329_v19  ;;  %v7937_v20 = vadd.f32 %v3286_v31, %v2741_v6  ;;  %v10803_v19 = vld [vmem:[#allocation68_spill] sm:$0xff] }
 0x360   :  { %v2776_v6 = vsel %vm1123_vm1, %v10803_v19, -inf  ;;  %v10808_v19 = vld [vmem:[#allocation109_spill] sm:$0xff] }
 0x361   :  { %10801 = vst [vmem:[#allocation194_spill] sm:$0xff] %v7937_v20  ;;  %2771 = vmax.xlane.f32.xlu0 %v2770_v45  ;;  %v1367_v41 = vpop.permute.xlu0 %1366  ;;  %v2782_v45 = vsel %vm1123_vm1, %v10804_v36, -inf  ;;  %v10805_v20 = vld [vmem:[#allocation89_spill] sm:$0xff] }
 0x362   :  { %v2788_v21 = vsel %vm1123_vm1, %v10805_v20, -inf }
 0x363   :  { %v5340_v46 = vpop.eup %5339  ;;  %2336 = vadd.xlane.f32.xlu1 %v2335_v37 }
 0x364   :  { %v1279_v57 = vmul.f32 %v5340_v46, %v7568_v10  ;;  %v10806_v46 = vld [vmem:[#allocation97_spill] sm:$0xff] }
 0x365   :  { %2777 = vmax.xlane.f32.xlu0 %v2776_v6  ;;  %v1412_v31 = vpop.permute.xlu0 %1411  ;;  %v2794_v6 = vsel %vm1123_vm1, %v10806_v46, -inf  ;;  %v7971_v46 = vld [vmem:[%s9830_s0 + $0x80] sm:$0xff] }
 0x366   :  { %v1337_v23 = vmul.f32 %v1321_v60, %v1279_v57  ;;  %v10807_v57 = vld [vmem:[#allocation117_spill] sm:$0xff] }
 0x368   :  { %1353 = vst.msk [vmem:[%s9831_s8 + $0x28] sm:$0xff] %vm1123_vm1, %v1337_v23  ;;  %v2800_v23 = vsel %vm1123_vm1, %v10808_v19, -inf  ;;  %v1453_v19 = vmul.f32 %v7807_v2, %v1412_v31  ;;  %v7994_v31 = vpop.permute.xlu1 %2050 }
 0x369   :  { %2783 = vmax.xlane.f32.xlu0 %v2782_v45  ;;  %v1422_v37 = vpop.permute.xlu0 %1421  ;;  %v7965_v45 = vld [vmem:[%s9830_s0] sm:$0xff] }
 0x36a   :  { %10809 = vst [vmem:[#allocation117_spill] sm:$0xff] %v7965_v45 }
 0x36d   :  { %2789 = vmax.xlane.f32.xlu0 %v2788_v21  ;;  %v1432_v10 = vpop.permute.xlu0 %1431  ;;  %v1444_v21 = vmul.f32 %v7965_v45, %v1367_v41  ;;  %v1455_v45 = vmul.f32 %v7843_v18, %v1422_v37 }
 0x36e   :  { %v1457_v2 = vmul.f32 %v7879_v34, %v1432_v10 }
 0x371   :  { %2795 = vmax.xlane.f32.xlu0 %v2794_v6  ;;  %v1442_v60 = vpop.permute.xlu0 %1441 }
 0x374   :  { %1884 = vperm.xlu1 %4991, %v10807_v57   ;;  %v10810_v57 = vld [vmem:[#allocation80_spill] sm:$0xff] }
 0x375   :  { %2801 = vmax.xlane.f32.xlu0 %v2800_v23  ;;  %v1880_v53 = vpop.permute.xlu0 %1879 }
 0x376   :  { %v1957_v6 = vmul.f32 %v7971_v46, %v1880_v53  ;;  %v10813_v53 = vld [vmem:[#allocation179_spill] sm:$0xff] }
 0x378   :  { %1889 = vperm.xlu1 %4991, %v10810_v57   ;;  %v7975_v20 = vadd.f32 %v1957_v6, %v1444_v21 }
 0x379   :  { %v1925_v23 = vpop.permute.xlu0 %1924 }
 0x37a   :  { %10811 = vst [vmem:[#allocation80_spill] sm:$0xff] %v7975_v20  ;;  %v1966_v36 = vmul.f32 %v7798_v42, %v1925_v23 }
 0x37c   :  { %1894 = vperm.xlu1 %4991, %v10673_v30   ;;  %v7980_v16 = vadd.f32 %v1966_v36, %v1453_v19  ;;  %v10816_v36 = vld [vmem:[#allocation5_spill] sm:$0xff] }
 0x37d   :  { %v1935_v41 = vpop.permute.xlu0 %1934 }
 0x37e   :  { %10812 = vst [vmem:[#allocation195_spill] sm:$0xff] %v7980_v16  ;;  %v1968_v56 = vmul.f32 %v7834_v43, %v1935_v41  ;;  %v1459_v43 = vmul.f32 %v7911_v29, %v1442_v60  ;;  %v10932_v16 = vld [vmem:[#allocation143_spill] sm:$0xff] }
 0x380   :  { %1899 = vperm.xlu1 %4991, %v10813_v53   ;;  %v7987_v21 = vadd.f32 %v1968_v56, %v1455_v45  ;;  %v8001_v45 = vpop.permute.xlu1 %1436 }
 0x381   :  { %v1945_v6 = vpop.permute.xlu0 %1944  ;;  %10817 = vst [vmem:[#allocation5_spill] sm:$0xff] %v8001_v45 }
 0x382   :  { %10814 = vst [vmem:[#allocation179_spill] sm:$0xff] %v7987_v21  ;;  %v1970_v42 = vmul.f32 %v7868_v33, %v1945_v6 }
 0x384   :  { %1904 = vperm.xlu1 %4991, %v10676_v39   ;;  %v7992_v30 = vadd.f32 %v1970_v42, %v1457_v2  ;;  %v10818_v39 = vld [vmem:[#allocation29_spill] sm:$0xff]  ;;  %v8009_v10 = vpop.permute.xlu1 %1597 }
 0x385   :  { %v1955_v19 = vpop.permute.xlu0 %1954 }
 0x386   :  { %10815 = vst [vmem:[#allocation196_spill] sm:$0xff] %v7992_v30  ;;  %v1972_v18 = vmul.f32 %v7900_v62, %v1955_v19 }
 0x388   :  { %1909 = vperm.xlu1 %4991, %v10816_v36   ;;  %v1988_v56 = vadd.f32 %v1972_v18, %v1459_v43  ;;  %v8014_v29 = vpop.permute.xlu1 %2142  ;;  %v10824_v18 = vld [vmem:[#allocation44_spill] sm:$0xff] }
 0x389   :  { %v7999_v37 = vpop.permute.xlu0 %2445 }
 0x38c   :  { %1914 = vperm.xlu1 %4991, %v10678_v3  }
 0x38d   :  { %v8004_v33 = vpop.permute.xlu0 %2490 }
 0x390   :  { %1919 = vperm.xlu1 %4991, %v10818_v39  }
 0x391   :  { %v8007_v34 = vpop.permute.xlu0 %2500 }
 0x394   :  { %1929 = vperm.xlu1 %4991, %v7081_v49   ;;  %v10822_v49 = vld [vmem:[#allocation85_spill] sm:$0xff] }
 0x395   :  { %v8012_v62 = vpop.permute.xlu0 %2510 }
 0x396   :  { %10819 = vst [vmem:[#allocation29_spill] sm:$0xff] %v8012_v62 }
 0x398   :  { %1939 = vperm.xlu1 %4991, %v7099_v55  }
 0x399   :  { %v8017_v60 = vpop.permute.xlu0 %3006 }
 0x39c   :  { %1949 = vperm.xlu1 %4991, %v7118_v1   ;;  %v1243_v3 = vpop.xlane.xlu1 %1242  ;;  %v1307_v1 = vsub.f32 %v10590_v26, %v7249_v32  ;;  %v10825_v26 = vld [vmem:[#allocation53_spill] sm:$0xff] }
 0x39d   :  { %5341 = vrcp.f32 %v1243_v3  ;;  %v8020_v57 = vpop.permute.xlu0 %3021  ;;  %v1309_v3 = vsub.f32 %v10596_v17, %v7264_v58 }
 0x39e   :  { %10820 = vst [vmem:[#allocation197_spill] sm:$0xff] %v8020_v57  ;;  %v1323_v19 = vmul.f32 %v7371_v25, %v1307_v1  ;;  %v10826_v1 = vld [vmem:[#allocation145_spill] sm:$0xff] }
 0x3a0   :  { %2440 = vperm.xlu1 %4991, %v10692_v61   ;;  %v1249_v23 = vpop.xlane.xlu1 %1248 }
 0x3a1   :  { %5343 = vrcp.f32 %v1249_v23  ;;  %v8023_v41 = vpop.permute.xlu0 %3031 }
 0x3a2   :  { %10821 = vst [vmem:[#allocation198_spill] sm:$0xff] %v8023_v41  ;;  %v10935_v41 = vld [vmem:[#allocation155_spill] sm:$0xff] }
 0x3a4   :  { %2450 = vperm.xlu1 %4991, %v10822_v49   ;;  %v1255_v53 = vpop.xlane.xlu1 %1254 }
 0x3a5   :  { %5345 = vrcp.f32 %v1255_v53  ;;  %v8026_v6 = vpop.permute.xlu0 %3041 }
 0x3a6   :  { %10823 = vst [vmem:[#allocation85_spill] sm:$0xff] %v8026_v6 }
 0x3a8   :  { %2455 = vperm.xlu1 %4991, %v10697_v14   ;;  %v1261_v55 = vpop.xlane.xlu1 %1260 }
 0x3a9   :  { %5347 = vrcp.f32 %v1261_v55  ;;  %v8031_v2 = vpop.permute.xlu0 %3051  ;;  %v1325_v55 = vmul.f32 %v10825_v26, %v1309_v3 }
 0x3aa   :  { %v5342_v42 = vpop.eup %5341 }
 0x3ab   :  { %v1283_v43 = vmul.f32 %v5342_v42, %v7663_v51 }
 0x3ac   :  { %2460 = vperm.xlu1 %4991, %v10824_v18   ;;  %v1267_v36 = vpop.xlane.xlu1 %1266 }
 0x3ad   :  { %v1339_v39 = vmul.f32 %v1323_v19, %v1283_v43  ;;  %5349 = vrcp.f32 %v1267_v36  ;;  %v8038_v23 = vpop.permute.xlu0 %3061  ;;  %v10827_v43 = vld [vmem:[#allocation108_spill] sm:$0xff] }
 0x3ae   :  { %v5344_v53 = vpop.eup %5343  ;;  %v1311_v17 = vsub.f32 %v10604_v13, %v10827_v43  ;;  %v10830_v13 = vld [vmem:[#allocation114_spill] sm:$0xff] }
 0x3af   :  { %1355 = vst.msk [vmem:[%s9831_s8 + $0x38] sm:$0xff] %vm1123_vm1, %v1339_v39  ;;  %v1287_v51 = vmul.f32 %v5344_v53, %v7672_v28  ;;  %v10828_v39 = vld [vmem:[#allocation122_spill] sm:$0xff]  ;;  %v10829_v53 = vld [vmem:[#allocation137_spill] sm:$0xff] }
 0x3b0   :  { %2465 = vperm.xlu1 %4991, %v10826_v1   ;;  %v1737_v42 = vpop.xlane.xlu1 %1736  ;;  %v1327_v3 = vmul.f32 %v10828_v39, %v1311_v17  ;;  %v10832_v17 = vld [vmem:[#allocation147_spill] sm:$0xff] }
 0x3b1   :  { %v1341_v19 = vmul.f32 %v1325_v55, %v1287_v51  ;;  %5351 = vrcp.f32 %v1737_v42  ;;  %v2516_v36 = vpop.permute.xlu0 %2515  ;;  %v1313_v42 = vsub.f32 %v10371_v0, %v10830_v13 }
 0x3b2   :  { %v5346_v62 = vpop.eup %5345  ;;  %v2533_v30 = vmul.f32 %v7918_v35, %v2516_v36 }
 0x3b3   :  { %1357 = vst.msk [vmem:[%s9831_s8 + $0x48] sm:$0xff] %vm1123_vm1, %v1341_v19  ;;  %v1291_v28 = vmul.f32 %v5346_v62, %v7681_v44  ;;  %v10831_v19 = vld [vmem:[#allocation57_spill] sm:$0xff] }
 0x3b4   :  { %2470 = vperm.xlu1 %4991, %v10829_v53   ;;  %v1743_v55 = vpop.xlane.xlu1 %1742  ;;  %v2549_v51 = vadd.f32 %v2533_v30, %v1988_v56  ;;  %v1329_v44 = vmul.f32 %v10831_v19, %v1313_v42 }
 0x3b5   :  { %v1343_v45 = vmul.f32 %v1327_v3, %v1291_v28  ;;  %5353 = vrcp.f32 %v1743_v55  ;;  %v3077_v21 = vpop.permute.xlu0 %3076  ;;  %v10834_v3 = vld [vmem:[#allocation115_spill] sm:$0xff] }
 0x3b6   :  { %v5348_v35 = vpop.eup %5347  ;;  %v3094_v36 = vmul.f32 %v7930_v22, %v3077_v21  ;;  %v1315_v28 = vsub.f32 %v10618_v9, %v10834_v3  ;;  %v10835_v21 = vld [vmem:[#allocation14_spill] sm:$0xff]  ;;  %v10836_v55 = vld [vmem:[#allocation139_spill] sm:$0xff] }
 0x3b7   :  { %1359 = vst.msk [vmem:[%s9831_s8 + $0x58] sm:$0xff] %vm1123_vm1, %v1343_v45  ;;  %v1295_v62 = vmul.f32 %v5348_v35, %v7690_v52  ;;  %v1813_v35 = vsub.f32 %v10570_v59, %v7188_v50 }
 0x3b8   :  { %2475 = vperm.xlu1 %4991, %v10832_v17   ;;  %v1749_v30 = vpop.xlane.xlu1 %1748  ;;  %v8067_v56 = vadd.f32 %v3094_v36, %v2549_v51  ;;  %v1331_v45 = vmul.f32 %v10835_v21, %v1315_v28 }
 0x3b9   :  { %v1345_v0 = vmul.f32 %v1329_v44, %v1295_v62  ;;  %5355 = vrcp.f32 %v1749_v30  ;;  %v1829_v36 = vmul.f32 %v7312_v63, %v1813_v35  ;;  %v10837_v62 = vld [vmem:[#allocation149_spill] sm:$0xff] }
 0x3ba   :  { %10833 = vst [vmem:[#allocation44_spill] sm:$0xff] %v8067_v56  ;;  %v5350_v22 = vpop.eup %5349  ;;  %v10927_v63 = vld [vmem:[#allocation117_spill] sm:$0xff]  ;;  %v10928_v56 = vld [vmem:[#allocation154_spill] sm:$0xff] }
 0x3bb   :  { %1361 = vst.msk [vmem:[%s9831_s8 + $0x68] sm:$0xff] %vm1123_vm1, %v1345_v0  ;;  %v1299_v52 = vmul.f32 %v5350_v22, %v7703_v12  ;;  %v10838_v0 = vld [vmem:[#allocation20_spill] sm:$0xff] }
 0x3bc   :  { %2480 = vperm.xlu1 %4991, %v10836_v55   ;;  %v1755_v42 = vpop.xlane.xlu1 %1754  ;;  %v1815_v28 = vsub.f32 %v10838_v0, %v7207_v8  ;;  %v10842_v0 = vld [vmem:[#allocation24_spill] sm:$0xff]  ;;  %v10922_v8 = vld [vmem:[#allocation150_spill] sm:$0xff] }
 0x3bd   :  { %v1347_v51 = vmul.f32 %v1331_v45, %v1299_v52  ;;  %5357 = vrcp.f32 %v1755_v42  ;;  %v10839_v52 = vld [vmem:[#allocation157_spill] sm:$0xff] }
 0x3be   :  { %v5352_v9 = vpop.eup %5351  ;;  %v1831_v22 = vmul.f32 %v7328_v4, %v1815_v28  ;;  %v1819_v28 = vsub.f32 %v10842_v0, %v7249_v32  ;;  %v10918_v4 = vld [vmem:[#allocation141_spill] sm:$0xff] }
 0x3bf   :  { %1363 = vst.msk [vmem:[%s9831_s8 + $0x78] sm:$0xff] %vm1123_vm1, %v1347_v51  ;;  %v1783_v44 = vmul.f32 %v5352_v9, %v7716_v15  ;;  %v10840_v51 = vld [vmem:[#allocation22_spill] sm:$0xff] }
 0x3c0   :  { %2485 = vperm.xlu1 %4991, %v10837_v62   ;;  %v1761_v12 = vpop.xlane.xlu1 %1760  ;;  %v1817_v35 = vsub.f32 %v10840_v51, %v7230_v47  ;;  %v1821_v51 = vsub.f32 %v10595_v48, %v7264_v58  ;;  %v8354_v47 = vld [vmem:[%s9833_s4 + $0x18] sm:$0xff] }
 0x3c1   :  { %v1845_v30 = vmul.f32 %v1829_v36, %v1783_v44  ;;  %5359 = vrcp.f32 %v1761_v12  ;;  %v10841_v12 = vld [vmem:[#allocation173_spill] sm:$0xff] }
 0x3c2   :  { %v5354_v59 = vpop.eup %5353  ;;  %v1833_v36 = vmul.f32 %v7356_v24, %v1817_v35 }
 0x3c3   :  { %4305 = vst.msk [vmem:[%s9831_s8 + $0x88] sm:$0xff] %vm1123_vm1, %v1845_v30  ;;  %v1787_v45 = vmul.f32 %v5354_v59, %v7725_v27 }
 0x3c4   :  { %2495 = vperm.xlu1 %4991, %v10839_v52   ;;  %v1767_v15 = vpop.xlane.xlu1 %1766 }
 0x3c5   :  { %v1847_v42 = vmul.f32 %v1831_v22, %v1787_v45  ;;  %5361 = vrcp.f32 %v1767_v15  ;;  %v1835_v22 = vmul.f32 %v7371_v25, %v1819_v28  ;;  %v10843_v15 = vmov 1  }
 0x3c6   :  { %v5356_v9 = vpop.eup %5355  ;;  %v1823_v28 = vsub.f32 %v10603_v5, %v10827_v43  ;;  %v3304_v5 = vld [vmem:[%s9832_s2 + $0x8] sm:$0xff] }
 0x3c7   :  { %4307 = vst.msk [vmem:[%s9831_s8 + $0x98] sm:$0xff] %vm1123_vm1, %v1847_v42  ;;  %v1791_v44 = vmul.f32 %v5356_v9, %v7734_v40  ;;  %v3306_v9 = vld [vmem:[%s9832_s2 + $0x18] sm:$0xff]  ;;  %v8245_v43 = vld [vmem:[%s9830_s0 + $0x188] sm:$0xff] }
 0x3c8   :  { %2505 = vperm.xlu1 %4991, %v10841_v12   ;;  %v1773_v27 = vpop.xlane.xlu1 %1772  ;;  %4950 = vmatprep.subr.mxu1 %v3306_v9 }
 0x3c9   :  { %v1849_v30 = vmul.f32 %v1833_v36, %v1791_v44  ;;  %5363 = vrcp.f32 %v1773_v27  ;;  %v3305_v36 = vld [vmem:[%s9832_s2 + $0x10] sm:$0xff]  ;;  %v10844_v44 = vld [vmem:[#allocation75_spill] sm:$0xff]  ;;  %4790 = vmatprep.subr.mxu0 %v3306_v9  ;;  %4954 = vmatpush3.msra.mxu1 %v3306_v9 }
 0x3ca   :  { %v5358_v59 = vpop.eup %5357  ;;  %4791 = vmatpush3.msra.mxu0 %v3306_v9  ;;  %4951 = vmatprep.subr.mxu1 %v3305_v36  ;;  %v10848_v9 = vld [vmem:[#allocation72_spill] sm:$0xff] }
 0x3cb   :  { %4309 = vst.msk [vmem:[%s9831_s8 + $0xa8] sm:$0xff] %vm1123_vm1, %v1849_v30  ;;  %v1795_v45 = vmul.f32 %v5358_v59, %v7743_v38  ;;  %v1837_v38 = vmul.f32 %v10825_v26, %v1821_v51  ;;  %4955 = vmatpush3.msra.mxu1 %v3305_v36  ;;  %4792 = vmatprep.subr.mxu0 %v3305_v36  ;;  %v10847_v51 = vld [vmem:[#allocation30_spill] sm:$0xff]  ;;  %v10880_v26 = vld [vmem:[#allocation27_spill] sm:$0xff] }
 0x3cc   :  { %4993 = vset.pattern.permute.xlu1 %v10843_v15  ;;  %v1779_v40 = vpop.xlane.xlu1 %1778  ;;  %v3303_v15 = vld [vmem:[%s9832_s2] sm:$0xff]  ;;  %4793 = vmatpush3.msra.mxu0 %v3305_v36 }
 0x3cd   :  { %v1851_v42 = vmul.f32 %v1835_v22, %v1795_v45  ;;  %5365 = vrcp.f32 %v1779_v40  ;;  %2551 = vperm.xlu1 %4993, %v10692_v61   ;;  %v10845_v61 = vld [vmem:[#allocation118_spill] sm:$0xff]  ;;  %v10846_v22 = vld [vmem:[#allocation176_spill] sm:$0xff]  ;;  %4952 = vmatprep.subr.mxu1 %v3304_v5 }
 0x3ce   :  { %v5360_v35 = vpop.eup %5359  ;;  %v8131_v27 = vmul.f32 %v10845_v61, %v10844_v44  ;;  %4794 = vmatprep.subr.mxu0 %v3304_v5  ;;  %4956 = vmatpush3.msra.mxu1 %v3304_v5 }
 0x3cf   :  { %4311 = vst.msk [vmem:[%s9831_s8 + $0xb8] sm:$0xff] %vm1123_vm1, %v1851_v42  ;;  %v1799_v48 = vmul.f32 %v5360_v35, %v7752_v54  ;;  %v1839_v54 = vmul.f32 %v10828_v39, %v1823_v28  ;;  %v1825_v35 = vsub.f32 %v10847_v51, %v10830_v13  ;;  %4953 = vmatprep.subr.mxu1 %v3303_v15 }
 0x3d0   :  { %v2295_v30 = vpop.xlane.xlu1 %2294  ;;  %4795 = vmatpush3.msra.mxu0 %v3304_v5  ;;  %4957 = vmatpush3.msra.mxu1 %v3303_v15 }
 0x3d1   :  { %v1853_v0 = vmul.f32 %v1837_v38, %v1799_v48  ;;  %5367 = vrcp.f32 %v2295_v30  ;;  %3112 = vperm.xlu1 %4993, %v8131_v27   ;;  %v1841_v36 = vmul.f32 %v10831_v19, %v1825_v35  ;;  %v10849_v48 = vld [vmem:[#allocation182_spill] sm:$0xff]  ;;  %4796 = vmatprep.subr.mxu0 %v3303_v15  ;;  %v10854_v35 = vld [vmem:[#allocation144_spill] sm:$0xff] }
 0x3d2   :  { %v5362_v59 = vpop.eup %5361  ;;  %4797 = vmatpush3.msra.mxu0 %v3303_v15  ;;  %v10852_v15 = vld [vmem:[#allocation19_spill] sm:$0xff]  ;;  %4870 = vmatprep.subr.mxu1 %v8354_v47 }
 0x3d3   :  { %4313 = vst.msk [vmem:[%s9831_s8 + $0xc8] sm:$0xff] %vm1123_vm1, %v1853_v0  ;;  %v1803_v45 = vmul.f32 %v5362_v59, %v10846_v22  ;;  %v10850_v0 = vld [vmem:[#allocation32_spill] sm:$0xff]  ;;  %v10851_v22 = vld [vmem:[#allocation119_spill] sm:$0xff] }
 0x3d4   :  { %v2301_v40 = vpop.xlane.xlu1 %2300  ;;  %v1827_v28 = vsub.f32 %v10850_v0, %v10834_v3  ;;  %v10873_v3 = vld [vmem:[#allocation189_spill] sm:$0xff] }
 0x3d5   :  { %v1855_v42 = vmul.f32 %v1839_v54, %v1803_v45  ;;  %5369 = vrcp.f32 %v2301_v40  ;;  %3116 = vperm.xlu1 %4993, %v10848_v9  }
 0x3d6   :  { %v5364_v38 = vpop.eup %5363  ;;  %v1843_v54 = vmul.f32 %v10835_v21, %v1827_v28 }
 0x3d7   :  { %4315 = vst.msk [vmem:[%s9831_s8 + $0xd8] sm:$0xff] %vm1123_vm1, %v1855_v42  ;;  %v1807_v44 = vmul.f32 %v5364_v38, %v10849_v48  ;;  %v10853_v42 = vld [vmem:[#allocation35_spill] sm:$0xff] }
 0x3d8   :  { %v2307_v61 = vpop.xlane.xlu1 %2306  ;;  %v2373_v51 = vsub.f32 %v10853_v42, %v10852_v15  ;;  %v10861_v42 = vld [vmem:[#allocation39_spill] sm:$0xff]  ;;  %v10926_v15 = vld [vmem:[#allocation33_spill] sm:$0xff] }
 0x3d9   :  { %v1857_v30 = vmul.f32 %v1841_v36, %v1807_v44  ;;  %5371 = vrcp.f32 %v2307_v61  ;;  %2563 = vperm.xlu1 %4993, %v10697_v14   ;;  %v10855_v14 = vld [vmem:[#allocation63_spill] sm:$0xff]  ;;  %v10856_v61 = vld [vmem:[#allocation90_spill] sm:$0xff]  ;;  %v1524_v50 = vmul.f32 %v10927_v63, %v10926_v15 }
 0x3da   :  { %v5366_v59 = vpop.eup %5365  ;;  %v2389_v38 = vmul.f32 %v10855_v14, %v2373_v51 }
 0x3db   :  { %4317 = vst.msk [vmem:[%s9831_s8 + $0xe8] sm:$0xff] %vm1123_vm1, %v1857_v30  ;;  %v1811_v45 = vmul.f32 %v5366_v59, %v10851_v22  ;;  %v10857_v30 = vld [vmem:[#allocation37_spill] sm:$0xff]  ;;  %v10859_v22 = vld [vmem:[#allocation23_spill] sm:$0xff] }
 0x3dc   :  { %v2313_v5 = vpop.xlane.xlu1 %2312  ;;  %v2375_v0 = vsub.f32 %v10857_v30, %v10856_v61  ;;  %v10858_v59 = vld [vmem:[#allocation13_spill] sm:$0xff]  ;;  %v10924_v61 = vld [vmem:[#allocation151_spill] sm:$0xff] }
 0x3dd   :  { %v1859_v40 = vmul.f32 %v1843_v54, %v1811_v45  ;;  %5373 = vrcp.f32 %v2313_v5  ;;  %3124 = vperm.xlu1 %4993, %v10854_v35  }
 0x3de   :  { %v5368_v9 = vpop.eup %5367  ;;  %v2391_v54 = vmul.f32 %v10858_v59, %v2375_v0  ;;  %v10920_v59 = vld [vmem:[#allocation142_spill] sm:$0xff] }
 0x3df   :  { %4319 = vst.msk [vmem:[%s9831_s8 + $0xf8] sm:$0xff] %vm1123_vm1, %v1859_v40  ;;  %v2342_v36 = vmul.f32 %v5368_v9, %v7818_v7  ;;  %v10860_v40 = vld [vmem:[#allocation100_spill] sm:$0xff]  ;;  %v10862_v9 = vld [vmem:[#allocation146_spill] sm:$0xff] }
 0x3e0   :  { %v2319_v48 = vpop.xlane.xlu1 %2318  ;;  %v2377_v51 = vsub.f32 %v10861_v42, %v10860_v40  ;;  %v10868_v42 = vld [vmem:[#allocation186_spill] sm:$0xff]  ;;  %v10916_v40 = vld [vmem:[#allocation140_spill] sm:$0xff] }
 0x3e1   :  { %v2405_v44 = vmul.f32 %v2389_v38, %v2342_v36  ;;  %5375 = vrcp.f32 %v2319_v48  ;;  %2571 = vperm.xlu1 %4993, %v10826_v1   ;;  %v10863_v1 = vld [vmem:[#allocation69_spill] sm:$0xff]  ;;  %v10864_v48 = vld [vmem:[#allocation11_spill] sm:$0xff] }
 0x3e2   :  { %v5370_v28 = vpop.eup %5369  ;;  %v2393_v36 = vmul.f32 %v10863_v1, %v2377_v51 }
 0x3e3   :  { %4320 = vst.msk [vmem:[%s9831_s8 + $0x100] sm:$0xff] %vm1123_vm1, %v2405_v44  ;;  %v2346_v45 = vmul.f32 %v5370_v28, %v10859_v22  ;;  %v10865_v28 = vld [vmem:[#allocation7_spill] sm:$0xff] }
 0x3e4   :  { %v2325_v5 = vpop.xlane.xlu1 %2324 }
 0x3e5   :  { %v2407_v7 = vmul.f32 %v2391_v54, %v2346_v45  ;;  %5377 = vrcp.f32 %v2325_v5  ;;  %3132 = vperm.xlu1 %4993, %v10862_v9   ;;  %v10866_v54 = vld [vmem:[#allocation41_spill] sm:$0xff]  ;;  %v10867_v5 = vld [vmem:[#allocation31_spill] sm:$0xff] }
 0x3e6   :  { %v5372_v38 = vpop.eup %5371  ;;  %v2379_v22 = vsub.f32 %v10866_v54, %v10865_v28  ;;  %v10871_v54 = vld [vmem:[#allocation148_spill] sm:$0xff] }
 0x3e7   :  { %4322 = vst.msk [vmem:[%s9831_s8 + $0x110] sm:$0xff] %vm1123_vm1, %v2407_v7  ;;  %v2350_v44 = vmul.f32 %v5372_v38, %v10864_v48  ;;  %v10869_v48 = vld [vmem:[#allocation99_spill] sm:$0xff] }
 0x3e8   :  { %v2331_v30 = vpop.xlane.xlu1 %2330  ;;  %v2395_v7 = vmul.f32 %v10867_v5, %v2379_v22  ;;  %v8315_v5 = vld [vmem:[%s9830_s0 + $0x60] sm:$0xff] }
 0x3e9   :  { %v2409_v0 = vmul.f32 %v2393_v36, %v2350_v44  ;;  %5379 = vrcp.f32 %v2331_v30  ;;  %2579 = vperm.xlu1 %4993, %v10832_v17   ;;  %v10870_v36 = vld [vmem:[#allocation43_spill] sm:$0xff]  ;;  %v10872_v17 = vld [vmem:[#allocation81_spill] sm:$0xff] }
 0x3ea   :  { %v5374_v45 = vpop.eup %5373  ;;  %v2381_v44 = vsub.f32 %v10870_v36, %v10869_v48  ;;  %v10876_v36 = vld [vmem:[#allocation45_spill] sm:$0xff]  ;;  %v10882_v48 = vld [vmem:[#allocation156_spill] sm:$0xff] }
 0x3eb   :  { %4324 = vst.msk [vmem:[%s9831_s8 + $0x120] sm:$0xff] %vm1123_vm1, %v2409_v0  ;;  %v2354_v51 = vmul.f32 %v5374_v45, %v10868_v42  ;;  %v8214_v45 = vld [vmem:[%s9830_s0 + $0x8] sm:$0xff] }
 0x3ec   :  { %v2337_v21 = vpop.xlane.xlu1 %2336  ;;  %v2397_v0 = vmul.f32 %v10872_v17, %v2381_v44  ;;  %v10881_v17 = vld [vmem:[#allocation47_spill] sm:$0xff] }
 0x3ed   :  { %v2411_v38 = vmul.f32 %v2395_v7, %v2354_v51  ;;  %5381 = vrcp.f32 %v2337_v21  ;;  %3140 = vperm.xlu1 %4993, %v10871_v54   ;;  %v10874_v7 = vld [vmem:[#allocation126_spill] sm:$0xff]  ;;  %v10875_v51 = vld [vmem:[#allocation88_spill] sm:$0xff]  ;;  %v2385_v58 = vsub.f32 %v10881_v17, %v10880_v26  ;;  %v10888_v17 = vld [vmem:[#allocation49_spill] sm:$0xff] }
 0x3ee   :  { %v5376_v30 = vpop.eup %5375  ;;  %v1445_v21 = vmul.f32 %v8214_v45, %v10874_v7  ;;  %v2383_v13 = vsub.f32 %v10876_v36, %v10875_v51  ;;  %v10878_v36 = vld [vmem:[#allocation190_spill] sm:$0xff] }
 0x3ef   :  { %4326 = vst.msk [vmem:[%s9831_s8 + $0x130] sm:$0xff] %vm1123_vm1, %v2411_v38  ;;  %v2358_v22 = vmul.f32 %v5376_v30, %v10873_v3  ;;  %v8223_v38 = vld [vmem:[%s9830_s0 + $0x88] sm:$0xff] }
 0x3f0   :  { %v1885_v19 = vpop.permute.xlu1 %1884  ;;  %v8230_v30 = vld [vmem:[%s9830_s0 + $0x108] sm:$0xff] }
 0x3f1   :  { %v2413_v42 = vmul.f32 %v2397_v0, %v2358_v22  ;;  %v1958_v3 = vmul.f32 %v8223_v38, %v1885_v19  ;;  %2587 = vperm.xlu1 %4993, %v10837_v62   ;;  %v2519_v0 = vmul.f32 %v8230_v30, %v7999_v37  ;;  %v10877_v22 = vld [vmem:[#allocation94_spill] sm:$0xff]  ;;  %v3080_v37 = vmul.f32 %v8245_v43, %v8017_v60 }
 0x3f2   :  { %v5378_v44 = vpop.eup %5377  ;;  %v2399_v7 = vmul.f32 %v10877_v22, %v2383_v13 }
 0x3f3   :  { %4328 = vst.msk [vmem:[%s9831_s8 + $0x140] sm:$0xff] %vm1123_vm1, %v2413_v42  ;;  %v2362_v19 = vmul.f32 %v5378_v44, %v10878_v36  ;;  %v1974_v39 = vadd.f32 %v1958_v3, %v1445_v21  ;;  %v10883_v21 = vld [vmem:[#allocation17_spill] sm:$0xff]  ;;  %v10884_v44 = vld [vmem:[#allocation192_spill] sm:$0xff] }
 0x3f4   :  { %v8240_v62 = vpop.permute.xlu1 %1889  ;;  %v2401_v3 = vmul.f32 %v10883_v21, %v2385_v58  ;;  %v10890_v21 = vld [vmem:[#allocation193_spill] sm:$0xff] }
 0x3f5   :  { %10879 = vst [vmem:[#allocation145_spill] sm:$0xff] %v8240_v62  ;;  %v2415_v51 = vmul.f32 %v2399_v7, %v2362_v19  ;;  %v2535_v42 = vadd.f32 %v2519_v0, %v1974_v39  ;;  %3148 = vperm.xlu1 %4993, %v10882_v48   ;;  %v10887_v19 = vld [vmem:[#allocation96_spill] sm:$0xff] }
 0x3f6   :  { %v5380_v13 = vpop.eup %5379  ;;  %v2387_v39 = vsub.f32 %v10888_v17, %v10887_v19  ;;  %v10902_v19 = vld [vmem:[#allocation79_spill] sm:$0xff] }
 0x3f7   :  { %4330 = vst.msk [vmem:[%s9831_s8 + $0x150] sm:$0xff] %vm1123_vm1, %v2415_v51  ;;  %v2366_v36 = vmul.f32 %v5380_v13, %v10884_v44  ;;  %v8258_v22 = vadd.f32 %v3080_v37, %v2535_v42  ;;  %v10889_v51 = vld [vmem:[#allocation107_spill] sm:$0xff]  ;;  %v10892_v44 = vld [vmem:[#allocation158_spill] sm:$0xff] }
 0x3f8   :  { %v8260_v60 = vpop.permute.xlu1 %1894  ;;  %v2403_v58 = vmul.f32 %v10889_v51, %v2387_v39  ;;  %v10899_v39 = vld [vmem:[#allocation178_spill] sm:$0xff]  ;;  %v10901_v51 = vmov 2  }
 0x3f9   :  { %10885 = vst [vmem:[#allocation137_spill] sm:$0xff] %v8258_v22  ;;  %10886 = vst [vmem:[#allocation147_spill] sm:$0xff] %v8260_v60  ;;  %v2417_v7 = vmul.f32 %v2401_v3, %v2366_v36  ;;  %2595 = vperm.xlu1 %4993, %v10839_v52   ;;  %v10895_v36 = vld [vmem:[#allocation174_spill] sm:$0xff] }
 0x3fa   :  { %v5382_v0 = vpop.eup %5381 }
 0x3fb   :  { %4332 = vst.msk [vmem:[%s9831_s8 + $0x160] sm:$0xff] %vm1123_vm1, %v2417_v7  ;;  %v2370_v13 = vmul.f32 %v5382_v0, %v10890_v21  ;;  %v10897_v21 = vld [vmem:[#allocation177_spill] sm:$0xff] }
 0x3fc   :  { %v8271_v37 = vpop.permute.xlu1 %1899 }
 0x3fd   :  { %10891 = vst [vmem:[#allocation139_spill] sm:$0xff] %v8271_v37  ;;  %v2419_v42 = vmul.f32 %v2403_v58, %v2370_v13  ;;  %3156 = vperm.xlu1 %4993, %v10892_v44   ;;  %v8293_v58 = vld [vmem:[%s9830_s0 + $0x50] sm:$0xff] }
 0x3fe   :  { %v10900_v13 = vld [vmem:[#allocation60_spill] sm:$0xff] }
 0x3ff   :  { %4334 = vst.msk [vmem:[%s9831_s8 + $0x170] sm:$0xff] %vm1123_vm1, %v2419_v42  ;;  %v8300_v42 = vld [vmem:[%s9830_s0 + $0xd0] sm:$0xff] }
 0x400   :  { %v8278_v52 = vpop.permute.xlu1 %1904 }
 0x401   :  { %10893 = vst [vmem:[#allocation149_spill] sm:$0xff] %v8278_v52  ;;  %2603 = vperm.xlu1 %4993, %v10841_v12   ;;  %v1454_v12 = vmul.f32 %v8293_v58, %v10900_v13 }
 0x404   :  { %v8281_v3 = vpop.permute.xlu1 %1909 }
 0x405   :  { %10894 = vst [vmem:[#allocation20_spill] sm:$0xff] %v8281_v3  ;;  %3164 = vperm.xlu1 %4993, %v10895_v36   ;;  %v8579_v3 = vld [vmem:[%s9830_s0 + $0x1b0] sm:$0xff] }
 0x408   :  { %v8284_v7 = vpop.permute.xlu1 %1914 }
 0x409   :  { %10896 = vst [vmem:[#allocation157_spill] sm:$0xff] %v8284_v7  ;;  %2611 = vperm.xlu1 %4993, %v10897_v21  }
 0x40c   :  { %v8287_v17 = vpop.permute.xlu1 %1919 }
 0x40d   :  { %10898 = vst [vmem:[#allocation22_spill] sm:$0xff] %v8287_v17  ;;  %3172 = vperm.xlu1 %4993, %v10899_v39   ;;  %v8308_v39 = vld [vmem:[%s9830_s0 + $0x150] sm:$0xff] }
 0x40e   :  { %v2528_v26 = vmul.f32 %v8308_v39, %v8004_v33  ;;  %v8329_v33 = vld [vmem:[%s9830_s0 + $0xe0] sm:$0xff] }
 0x410   :  { %v1930_v0 = vpop.permute.xlu1 %1929 }
 0x411   :  { %v1967_v21 = vmul.f32 %v8300_v42, %v1930_v0  ;;  %4995 = vset.pattern.permute.xlu1 %v10901_v51  ;;  %v10903_v0 = vld [vmem:[#allocation21_spill] sm:$0xff] }
 0x412   :  { %2651 = vperm.xlu1 %4995, %v10902_v19   ;;  %v1456_v51 = vmul.f32 %v8315_v5, %v10903_v0  ;;  %v8322_v19 = vld [vmem:[%s9830_s0 + $0x1d0] sm:$0xff] }
 0x413   :  { %v1983_v13 = vadd.f32 %v1967_v21, %v1454_v12  ;;  %v3089_v32 = vmul.f32 %v8322_v19, %v8031_v2  ;;  %v8336_v21 = vld [vmem:[%s9830_s0 + $0x160] sm:$0xff] }
 0x414   :  { %v1940_v25 = vpop.permute.xlu1 %1939  ;;  %v2530_v0 = vmul.f32 %v8336_v21, %v8007_v34 }
 0x415   :  { %v2544_v28 = vadd.f32 %v2528_v26, %v1983_v13  ;;  %v1969_v12 = vmul.f32 %v8329_v33, %v1940_v25  ;;  %v8347_v13 = vld [vmem:[%s9830_s0 + $0x1e0] sm:$0xff] }
 0x416   :  { %3208 = vperm.xlu1 %4995, %v8131_v27   ;;  %v3091_v25 = vmul.f32 %v8347_v13, %v8038_v23  ;;  %v10910_v23 = vld [vmem:[#allocation135_spill] sm:$0xff] }
 0x417   :  { %v1985_v24 = vadd.f32 %v1969_v12, %v1456_v51  ;;  %v8340_v2 = vadd.f32 %v3089_v32, %v2544_v28  ;;  %v10907_v28 = vld [vmem:[#allocation92_spill] sm:$0xff] }
 0x418   :  { %v8342_v26 = vpop.permute.xlu1 %1949 }
 0x419   :  { %10904 = vst [vmem:[#allocation173_spill] sm:$0xff] %v8340_v2  ;;  %10905 = vst [vmem:[#allocation24_spill] sm:$0xff] %v8342_v26  ;;  %v2546_v1 = vadd.f32 %v2530_v0, %v1985_v24  ;;  %v10930_v2 = vld [vmem:[#allocation34_spill] sm:$0xff]  ;;  %v10931_v26 = vld [vmem:[#allocation8_spill] sm:$0xff] }
 0x41a   :  { %2655 = vperm.xlu1 %4995, %v10822_v49  }
 0x41b   :  { %v8358_v32 = vadd.f32 %v3091_v25, %v2546_v1  ;;  %v10913_v1 = vld [vmem:[#allocation138_spill] sm:$0xff] }
 0x41c   :  { %v8360_v34 = vpop.permute.xlu1 %2440 }
 0x41d   :  { %10906 = vst [vmem:[#allocation75_spill] sm:$0xff] %v8358_v32  ;;  %v10929_v32 = vld [vmem:[#allocation130_spill] sm:$0xff] }
 0x41e   :  { %3216 = vperm.xlu1 %4995, %v10907_v28  }
 0x420   :  { %v8363_v51 = vpop.permute.xlu1 %2450 }
 0x421   :  { %10908 = vst [vmem:[#allocation118_spill] sm:$0xff] %v8363_v51 }
 0x422   :  { %2663 = vperm.xlu1 %4995, %v10824_v18  }
 0x424   :  { %v8366_v24 = vpop.permute.xlu1 %2455 }
 0x425   :  { %10909 = vst [vmem:[#allocation176_spill] sm:$0xff] %v8366_v24 }
 0x426   :  { %3224 = vperm.xlu1 %4995, %v10910_v23  }
 0x428   :  { %v8369_v12 = vpop.permute.xlu1 %2460 }
 0x429   :  { %10911 = vst [vmem:[#allocation30_spill] sm:$0xff] %v8369_v12 }
 0x42a   :  { %2671 = vperm.xlu1 %4995, %v10829_v53  }
 0x42c   :  { %v8372_v49 = vpop.permute.xlu1 %2465 }
 0x42d   :  { %10912 = vst [vmem:[#allocation72_spill] sm:$0xff] %v8372_v49  ;;  %v8512_v49 = vld [vmem:[%s9830_s0 + $0x1a0] sm:$0xff] }
 0x42e   :  { %3232 = vperm.xlu1 %4995, %v10913_v1  }
 0x430   :  { %v8375_v0 = vpop.permute.xlu1 %2470 }
 0x431   :  { %10914 = vst [vmem:[#allocation182_spill] sm:$0xff] %v8375_v0 }
 0x432   :  { %2679 = vperm.xlu1 %4995, %v10836_v55   ;;  %v10925_v55 = vld [vmem:[#allocation101_spill] sm:$0xff] }
 0x433   :  { %v2053_v14 = vmul.f32 %v7971_v46, %v10925_v55  ;;  %v8409_v55 = vld [vmem:[%s9830_s0 + $0x90] sm:$0xff] }
 0x434   :  { %v8378_v25 = vpop.permute.xlu1 %2475  ;;  %v2055_v15 = vmul.f32 %v8409_v55, %v10930_v2  ;;  %v10933_v2 = vld [vmem:[#allocation2_spill] sm:$0xff] }
 0x435   :  { %10915 = vst [vmem:[#allocation32_spill] sm:$0xff] %v8378_v25  ;;  %v8443_v25 = vld [vmem:[%s9830_s0 + $0x190] sm:$0xff] }
 0x436   :  { %3240 = vperm.xlu1 %4995, %v10916_v40  }
 0x438   :  { %v8381_v18 = vpop.permute.xlu1 %2480 }
 0x439   :  { %10917 = vst [vmem:[#allocation119_spill] sm:$0xff] %v8381_v18 }
 0x43a   :  { %2687 = vperm.xlu1 %4995, %v10918_v4   ;;  %v8400_v4 = vld [vmem:[%s9830_s0 + $0x100] sm:$0xff] }
 0x43c   :  { %v8384_v23 = vpop.permute.xlu1 %2485 }
 0x43d   :  { %10919 = vst [vmem:[#allocation35_spill] sm:$0xff] %v8384_v23 }
 0x43e   :  { %3248 = vperm.xlu1 %4995, %v10920_v59  }
 0x440   :  { %v8387_v53 = vpop.permute.xlu1 %2495 }
 0x441   :  { %10921 = vst [vmem:[#allocation144_spill] sm:$0xff] %v8387_v53  ;;  %v1525_v53 = vmul.f32 %v8214_v45, %v10931_v26  ;;  %v10934_v26 = vld [vmem:[#allocation159_spill] sm:$0xff] }
 0x442   :  { %2695 = vperm.xlu1 %4995, %v10922_v8   ;;  %v2069_v8 = vadd.f32 %v2053_v14, %v1524_v50  ;;  %v8420_v50 = vld [vmem:[%s9830_s0 + $0x180] sm:$0xff] }
 0x444   :  { %v8390_v1 = vpop.permute.xlu1 %2505 }
 0x445   :  { %10923 = vst [vmem:[#allocation37_spill] sm:$0xff] %v8390_v1 }
 0x446   :  { %3256 = vperm.xlu1 %4995, %v10924_v61   ;;  %v2054_v61 = vmul.f32 %v8223_v38, %v10929_v32  ;;  %v8426_v32 = vld [vmem:[%s9830_s0 + $0x10] sm:$0xff] }
 0x447   :  { %v1526_v6 = vmul.f32 %v8426_v32, %v10933_v2  ;;  %v10937_v2 = vld [vmem:[#allocation160_spill] sm:$0xff] }
 0x448   :  { %v2552_v40 = vpop.permute.xlu1 %2551  ;;  %v3177_v18 = vmul.f32 %v8443_v25, %v10937_v2  ;;  %v8483_v2 = vld [vmem:[%s9830_s0 + $0x118] sm:$0xff] }
 0x449   :  { %v2614_v59 = vmul.f32 %v8400_v4, %v2552_v40  ;;  %v2615_v40 = vmul.f32 %v8230_v30, %v10932_v16  ;;  %v8433_v16 = vld [vmem:[%s9830_s0 + $0x110] sm:$0xff] }
 0x44a   :  { %2703 = vperm.xlu1 %4995, %v10928_v56   ;;  %v2616_v23 = vmul.f32 %v8433_v16, %v10934_v26 }
 0x44b   :  { %v2630_v14 = vadd.f32 %v2614_v59, %v2069_v8  ;;  %v2071_v8 = vadd.f32 %v2055_v15, %v1526_v6  ;;  %v8454_v6 = vld [vmem:[%s9830_s0 + $0x98] sm:$0xff] }
 0x44c   :  { %v3113_v1 = vpop.permute.xlu1 %3112 }
 0x44d   :  { %v3175_v56 = vmul.f32 %v8420_v50, %v3113_v1  ;;  %v2070_v1 = vadd.f32 %v2054_v61, %v1525_v53  ;;  %v2632_v26 = vadd.f32 %v2616_v23, %v2071_v8  ;;  %v10938_v53 = vmov 0   ;;  %v10939_v61 = vld [vmem:[#allocation102_spill] sm:$0xff]  ;;  %v10941_v23 = vld [vmem:[#allocation132_spill] sm:$0xff] }
 0x44e   :  { %3264 = vperm.xlu1 %4995, %v10935_v41   ;;  %v2056_v15 = vmul.f32 %v8454_v6, %v10939_v61  ;;  %v3765_v8 = vld [vmem:[%s9833_s4 + $0x10] sm:$0xff] }
 0x44f   :  { %v8438_v59 = vadd.f32 %v3175_v56, %v2630_v14  ;;  %v2631_v17 = vadd.f32 %v2615_v40, %v2070_v1  ;;  %v8468_v14 = vadd.f32 %v3177_v18, %v2632_v26  ;;  %v8491_v26 = vld [vmem:[%s9830_s0 + $0x20] sm:$0xff] }
 0x450   :  { %v3117_v7 = vpop.permute.xlu1 %3116 }
 0x451   :  { %10936 = vst [vmem:[#allocation23_spill] sm:$0xff] %v8438_v59  ;;  %v3176_v57 = vmul.f32 %v8245_v43, %v3117_v7  ;;  %4822 = vmatprep.mubr.msk.f32.mxu1 %vm97_vm0, %v8438_v59  ;;  %v8464_v7 = vld [vmem:[%s9830_s0 + $0xa0] sm:$0xff]  ;;  %10942 = vst [vmem:[#allocation146_spill] sm:$0xff] %v8468_v14 }
 0x452   :  { %4997 = vset.pattern.permute.xlu1 %v10938_v53  ;;  %v2057_v40 = vmul.f32 %v8464_v7, %v10941_v23  ;;  %v10944_v53 = vld [vmem:[#allocation26_spill] sm:$0xff] }
 0x453   :  { %v8458_v56 = vadd.f32 %v3176_v57, %v2631_v17  ;;  %3001 = vperm.xlu1 %4997, %v8131_v27   ;;  %v8476_v57 = vld [vmem:[%s9830_s0 + $0x18] sm:$0xff]  ;;  %v10943_v27 = vld [vmem:[#allocation98_spill] sm:$0xff]  ;;  %v1528_v61 = vmul.f32 %v8491_v26, %v10944_v53 }
 0x454   :  { %v2564_v1 = vpop.permute.xlu1 %2563  ;;  %v1527_v17 = vmul.f32 %v8476_v57, %v10943_v27  ;;  %v8498_v23 = vld [vmem:[%s9830_s0 + $0x120] sm:$0xff]  ;;  %v10945_v27 = vld [vmem:[#allocation59_spill] sm:$0xff] }
 0x455   :  { %10940 = vst [vmem:[#allocation39_spill] sm:$0xff] %v8458_v56  ;;  %v2617_v18 = vmul.f32 %v8483_v2, %v2564_v1  ;;  %4823 = vmatmul.mubr.msk.f32.vlgmr.msra.gmra.mxu1 %vm97_vm0, %v8458_v56  ;;  %v2618_v59 = vmul.f32 %v8498_v23, %v10945_v27  ;;  %v3764_v1 = vld [vmem:[%s9833_s4 + $0x8] sm:$0xff]  ;;  %v2073_v53 = vadd.f32 %v2057_v40, %v1528_v61  ;;  %v10946_v27 = vld [vmem:[#allocation164_spill] sm:$0xff] }
 0x456   :  { %4825 = vmatprep.mubr.msk.f32.mxu1 %vm97_vm0, %v8468_v14  ;;  %4871 = vmatpush3.msra.mxu1 %v8354_v47  ;;  %v2072_v56 = vadd.f32 %v2056_v15, %v1527_v17  ;;  %v3179_v0 = vmul.f32 %v8512_v49, %v10946_v27  ;;  %v3763_v47 = vld [vmem:[%s9833_s4] sm:$0xff]  ;;  %v8528_v17 = vld [vmem:[%s9830_s0 + $0xa8] sm:$0xff] }
 0x457   :  { %3011 = vperm.xlu1 %4997, %v10907_v28   ;;  %4872 = vmatprep.subr.mxu1 %v3765_v8  ;;  %v8522_v28 = vld [vmem:[%s9830_s0 + $0x198] sm:$0xff]  ;;  %v2634_v40 = vadd.f32 %v2618_v59, %v2073_v53  ;;  %v10949_v59 = vld [vmem:[#allocation16_spill] sm:$0xff]  ;;  %v10951_v53 = vld [vmem:[#allocation38_spill] sm:$0xff] }
 0x458   :  { %v3125_v14 = vpop.permute.xlu1 %3124  ;;  %4873 = vmatpush3.msra.mxu1 %v3765_v8  ;;  %v2633_v52 = vadd.f32 %v2617_v18, %v2072_v56  ;;  %v10947_v8 = vld [vmem:[#allocation40_spill] sm:$0xff] }
 0x459   :  { %v3178_v15 = vmul.f32 %v8522_v28, %v3125_v14  ;;  %4874 = vmatprep.subr.mxu1 %v3764_v1  ;;  %v2058_v61 = vmul.f32 %v8528_v17, %v10947_v8  ;;  %v8538_v56 = vld [vmem:[%s9830_s0 + $0xb0] sm:$0xff]  ;;  %v8542_v18 = vadd.f32 %v3179_v0, %v2634_v40 }
 0x45a   :  { %4875 = vmatpush3.msra.mxu1 %v3764_v1  ;;  %v2059_v14 = vmul.f32 %v8538_v56, %v10949_v59  ;;  %v8562_v0 = vld [vmem:[%s9830_s0 + $0x30] sm:$0xff] }
 0x45b   :  { %v8532_v27 = vadd.f32 %v3178_v15, %v2633_v52  ;;  %3016 = vperm.xlu1 %4997, %v10854_v35   ;;  %4876 = vmatprep.subr.mxu1 %v3763_v47  ;;  %10950 = vst [vmem:[#allocation41_spill] sm:$0xff] %v8542_v18  ;;  %v8547_v52 = vld [vmem:[%s9830_s0 + $0x28] sm:$0xff]  ;;  %v8569_v59 = vld [vmem:[%s9830_s0 + $0x130] sm:$0xff] }
 0x45c   :  { %v2572_v1 = vpop.permute.xlu1 %2571  ;;  %4877 = vmatpush3.msra.mxu1 %v3763_v47  ;;  %v1529_v35 = vmul.f32 %v8547_v52, %v10951_v53  ;;  %v8554_v15 = vld [vmem:[%s9830_s0 + $0x128] sm:$0xff]  ;;  %v10952_v47 = vld [vmem:[#allocation10_spill] sm:$0xff]  ;;  %v10953_v53 = vld [vmem:[#allocation168_spill] sm:$0xff] }
 0x45d   :  { %10948 = vst [vmem:[#allocation11_spill] sm:$0xff] %v8532_v27  ;;  %v2619_v8 = vmul.f32 %v8554_v15, %v2572_v1  ;;  %4826 = vmatmul.mubr.msk.f32.gmra.mxu1 %vm97_vm0, %v8532_v27  ;;  %v1530_v40 = vmul.f32 %v8562_v0, %v10952_v47  ;;  %v2620_v22 = vmul.f32 %v8569_v59, %v10953_v53  ;;  %v10954_v47 = vld [vmem:[#allocation129_spill] sm:$0xff]  ;;  %v8586_v53 = vld [vmem:[%s9830_s0 + $0x1a8] sm:$0xff] }
 0x45e   :  { %4828 = vmatprep.mubr.msk.f32.mxu1 %vm97_vm0, %v8542_v18  ;;  %v2074_v1 = vadd.f32 %v2058_v61, %v1529_v35  ;;  %v3181_v24 = vmul.f32 %v8579_v3, %v10954_v47  ;;  %v8611_v47 = vld [vmem:[%s9830_s0 + $0x38] sm:$0xff] }
 0x45f   :  { %3026 = vperm.xlu1 %4997, %v10862_v9   ;;  %v2075_v27 = vadd.f32 %v2059_v14, %v1530_v40  ;;  %v8592_v9 = vld [vmem:[%s9830_s0 + $0xb8] sm:$0xff]  ;;  %v10956_v14 = vld [vmem:[#allocation86_spill] sm:$0xff]  ;;  %10960 = vst [vmem:[#allocation189_spill] sm:$0xff] %v8611_v47 }
 0x460   :  { %v3133_v12 = vpop.permute.xlu1 %3132  ;;  %v2635_v60 = vadd.f32 %v2619_v8, %v2074_v1  ;;  %10955 = vst [vmem:[#allocation186_spill] sm:$0xff] %v8592_v9  ;;  %v2060_v40 = vmul.f32 %v8592_v9, %v10956_v14  ;;  %v8602_v8 = vld [vmem:[%s9830_s0 + $0xc0] sm:$0xff]  ;;  %v10964_v9 = vld [vmem:[#allocation172_spill] sm:$0xff] }
 0x461   :  { %v3180_v61 = vmul.f32 %v8586_v53, %v3133_v12  ;;  %v2636_v35 = vadd.f32 %v2620_v22, %v2075_v27  ;;  %v10958_v1 = vld [vmem:[#allocation110_spill] sm:$0xff] }
 0x462   :  { %v2061_v22 = vmul.f32 %v8602_v8, %v10958_v1 }
 0x463   :  { %v8596_v18 = vadd.f32 %v3180_v61, %v2635_v60  ;;  %3036 = vperm.xlu1 %4997, %v10871_v54   ;;  %v8606_v12 = vadd.f32 %v3181_v24, %v2636_v35  ;;  %v10961_v60 = vld [vmem:[#allocation46_spill] sm:$0xff]  ;;  %v8618_v54 = vld [vmem:[%s9830_s0 + $0x138] sm:$0xff]  ;;  %v10963_v35 = vld [vmem:[#allocation127_spill] sm:$0xff] }
 0x464   :  { %v2580_v27 = vpop.permute.xlu1 %2579  ;;  %v1531_v61 = vmul.f32 %v8611_v47, %v10961_v60  ;;  %10962 = vst [vmem:[#allocation126_spill] sm:$0xff] %v8618_v54  ;;  %v8626_v24 = vld [vmem:[%s9830_s0 + $0x40] sm:$0xff] }
 0x465   :  { %10957 = vst [vmem:[#allocation43_spill] sm:$0xff] %v8596_v18  ;;  %10959 = vst [vmem:[#allocation148_spill] sm:$0xff] %v8606_v12  ;;  %v2621_v14 = vmul.f32 %v8618_v54, %v2580_v27  ;;  %4829 = vmatmul.mubr.msk.f32.gmra.mxu1 %vm97_vm0, %v8596_v18  ;;  %v1532_v1 = vmul.f32 %v8626_v24, %v10963_v35  ;;  %v8633_v60 = vld [vmem:[%s9830_s0 + $0x140] sm:$0xff]  ;;  %v10965_v35 = vld [vmem:[#allocation175_spill] sm:$0xff] }
 0x466   :  { %v2622_v47 = vmul.f32 %v8633_v60, %v10964_v9  ;;  %4831 = vmatprep.mubr.msk.f32.mxu1 %vm97_vm0, %v8606_v12  ;;  %v2076_v27 = vadd.f32 %v2060_v40, %v1531_v61  ;;  %v8643_v54 = vld [vmem:[%s9830_s0 + $0x1c0] sm:$0xff]  ;;  %v8650_v9 = vld [vmem:[%s9830_s0 + $0x1b8] sm:$0xff] }
 0x467   :  { %3046 = vperm.xlu1 %4997, %v10882_v48   ;;  %v2077_v18 = vadd.f32 %v2061_v22, %v1532_v1  ;;  %v3183_v37 = vmul.f32 %v8643_v54, %v10965_v35  ;;  %10966 = vst [vmem:[#allocation45_spill] sm:$0xff] %v8650_v9  ;;  %v5511_v48 = vld [vmem:[%s9830_s0 + $0xc8] sm:$0xff]  ;;  %v10967_v22 = vld [vmem:[#allocation165_spill] sm:$0xff] }
 0x468   :  { %v3141_v51 = vpop.permute.xlu1 %3140  ;;  %v2637_v20 = vadd.f32 %v2621_v14, %v2076_v27  ;;  %v2062_v1 = vmul.f32 %v5511_v48, %v10967_v22  ;;  %v10969_v35 = vld [vmem:[#allocation133_spill] sm:$0xff]  ;;  %v8671_v48 = vld [vmem:[%s9830_s0 + $0x148] sm:$0xff] }
 0x469   :  { %v3182_v40 = vmul.f32 %v8650_v9, %v3141_v51  ;;  %v2638_v61 = vadd.f32 %v2622_v47, %v2077_v18  ;;  %v2063_v14 = vmul.f32 %v8300_v42, %v10969_v35  ;;  %v5512_v51 = vld [vmem:[%s9830_s0 + $0x48] sm:$0xff]  ;;  %v10971_v18 = vld [vmem:[#allocation124_spill] sm:$0xff]  ;;  %10972 = vst [vmem:[#allocation156_spill] sm:$0xff] %v8671_v48 }
 0x46a   :  { %v1533_v47 = vmul.f32 %v5512_v51, %v10971_v18  ;;  %v10975_v51 = vld [vmem:[#allocation131_spill] sm:$0xff] }
 0x46b   :  { %v8657_v12 = vadd.f32 %v3182_v40, %v2637_v20  ;;  %3056 = vperm.xlu1 %4997, %v10892_v44   ;;  %v8662_v27 = vadd.f32 %v3183_v37, %v2638_v61  ;;  %v10973_v44 = vld [vmem:[#allocation28_spill] sm:$0xff]  ;;  %v10974_v40 = vld [vmem:[#allocation123_spill] sm:$0xff]  ;;  %v3185_v18 = vmul.f32 %v8322_v19, %v10975_v51 }
 0x46c   :  { %v2588_v62 = vpop.permute.xlu1 %2587  ;;  %v1534_v37 = vmul.f32 %v8293_v58, %v10973_v44  ;;  %v2624_v61 = vmul.f32 %v8308_v39, %v10974_v40  ;;  %v2078_v22 = vadd.f32 %v2062_v1, %v1533_v47  ;;  %v5515_v1 = vld [vmem:[%s9830_s0 + $0xd8] sm:$0xff] }
 0x46d   :  { %10968 = vst [vmem:[#allocation190_spill] sm:$0xff] %v8657_v12  ;;  %10970 = vst [vmem:[#allocation47_spill] sm:$0xff] %v8662_v27  ;;  %v2623_v20 = vmul.f32 %v8671_v48, %v2588_v62  ;;  %4832 = vmatmul.mubr.msk.f32.gmra.mxu1 %vm97_vm0, %v8657_v12  ;;  %v8688_v12 = vld [vmem:[%s9830_s0 + $0x1c8] sm:$0xff]  ;;  %v10977_v47 = vld [vmem:[#allocation65_spill] sm:$0xff] }
 0x46e   :  { %4834 = vmatprep.mubr.msk.f32.mxu1 %vm97_vm0, %v8662_v27  ;;  %v2079_v35 = vadd.f32 %v2063_v14, %v1534_v37  ;;  %10976 = vst [vmem:[#allocation192_spill] sm:$0xff] %v8688_v12  ;;  %v10979_v37 = vld [vmem:[#allocation134_spill] sm:$0xff]  ;;  %v8781_v48 = vld [vmem:[%s9830_s0 + $0x1e8] sm:$0xff] }
 0x46f   :  { %3066 = vperm.xlu1 %4997, %v10895_v36   ;;  %v2639_v9 = vadd.f32 %v2623_v20, %v2078_v22  ;;  %v2064_v36 = vmul.f32 %v5515_v1, %v10977_v47  ;;  %v2065_v20 = vmul.f32 %v8329_v33, %v10979_v37  ;;  %v8709_v1 = vld [vmem:[%s9830_s0 + $0x158] sm:$0xff]  ;;  %10996 = vst [vmem:[#allocation79_spill] sm:$0xff] %v8781_v48 }
 0x470   :  { %v3149_v62 = vpop.permute.xlu1 %3148  ;;  %v2640_v40 = vadd.f32 %v2624_v61, %v2079_v35  ;;  %v5516_v61 = vld [vmem:[%s9830_s0 + $0x58] sm:$0xff]  ;;  %10982 = vst [vmem:[#allocation158_spill] sm:$0xff] %v8709_v1 }
 0x471   :  { %v3184_v44 = vmul.f32 %v8688_v12, %v3149_v62  ;;  %v10981_v35 = vld [vmem:[#allocation77_spill] sm:$0xff] }
 0x472   :  { %v8700_v22 = vadd.f32 %v3185_v18, %v2640_v40  ;;  %v1535_v62 = vmul.f32 %v5516_v61, %v10981_v35  ;;  %v10985_v61 = vld [vmem:[#allocation184_spill] sm:$0xff] }
 0x473   :  { %v8695_v14 = vadd.f32 %v3184_v44, %v2639_v9  ;;  %3071 = vperm.xlu1 %4997, %v10935_v41   ;;  %v10983_v41 = vld [vmem:[#allocation12_spill] sm:$0xff]  ;;  %v10984_v44 = vld [vmem:[#allocation170_spill] sm:$0xff]  ;;  %v3187_v35 = vmul.f32 %v8347_v13, %v10985_v61 }
 0x474   :  { %10980 = vst [vmem:[#allocation193_spill] sm:$0xff] %v8700_v22  ;;  %v2596_v51 = vpop.permute.xlu1 %2595  ;;  %v1536_v18 = vmul.f32 %v8315_v5, %v10983_v41  ;;  %v2626_v40 = vmul.f32 %v8336_v21, %v10984_v44  ;;  %v2080_v47 = vadd.f32 %v2064_v36, %v1535_v62  ;;  %v5519_v44 = vld [vmem:[%s9830_s0 + $0xe8] sm:$0xff]  ;;  %v8737_v62 = vld [vmem:[%s9830_s0 + $0xf0] sm:$0xff] }
 0x475   :  { %10978 = vst [vmem:[#allocation49_spill] sm:$0xff] %v8695_v14  ;;  %v2625_v9 = vmul.f32 %v8709_v1, %v2596_v51  ;;  %4835 = vmatmul.mubr.msk.f32.gmra.mxu1 %vm97_vm0, %v8695_v14  ;;  %v8725_v51 = vld [vmem:[%s9830_s0 + $0x1d8] sm:$0xff] }
 0x476   :  { %4837 = vmatprep.mubr.msk.f32.mxu1 %vm97_vm0, %v8700_v22  ;;  %v2081_v37 = vadd.f32 %v2065_v20, %v1536_v18  ;;  %10986 = vst [vmem:[#allocation174_spill] sm:$0xff] %v8725_v51  ;;  %v10987_v22 = vld [vmem:[#allocation183_spill] sm:$0xff] }
 0x477   :  { %v2641_v12 = vadd.f32 %v2625_v9, %v2080_v47  ;;  %v2066_v36 = vmul.f32 %v5519_v44, %v10987_v22  ;;  %v10989_v9 = vld [vmem:[#allocation136_spill] sm:$0xff] }
 0x478   :  { %v3157_v27 = vpop.permute.xlu1 %3156  ;;  %v2642_v14 = vadd.f32 %v2626_v40, %v2081_v37  ;;  %v2067_v18 = vmul.f32 %v8737_v62, %v10989_v9  ;;  %v5521_v40 = vld [vmem:[%s9830_s0 + $0x68] sm:$0xff]  ;;  %v10991_v37 = vld [vmem:[#allocation180_spill] sm:$0xff]  ;;  %v10994_v9 = vld [vmem:[#allocation25_spill] sm:$0xff] }
 0x479   :  { %v3186_v41 = vmul.f32 %v8725_v51, %v3157_v27  ;;  %v1537_v61 = vmul.f32 %v5521_v40, %v10991_v37  ;;  %v8765_v44 = vld [vmem:[%s9830_s0 + $0x170] sm:$0xff] }
 0x47a   :  { %v8741_v47 = vadd.f32 %v3187_v35, %v2642_v14  ;;  %v8758_v14 = vld [vmem:[%s9830_s0 + $0x70] sm:$0xff]  ;;  %v2628_v40 = vmul.f32 %v8765_v44, %v10994_v9 }
 0x47b   :  { %v8732_v20 = vadd.f32 %v3186_v41, %v2641_v12  ;;  %v8750_v12 = vld [vmem:[%s9830_s0 + $0x168] sm:$0xff]  ;;  %v10993_v35 = vld [vmem:[#allocation104_spill] sm:$0xff] }
 0x47c   :  { %10990 = vst [vmem:[#allocation178_spill] sm:$0xff] %v8741_v47  ;;  %v2604_v27 = vpop.permute.xlu1 %2603  ;;  %10992 = vst [vmem:[#allocation60_spill] sm:$0xff] %v8750_v12  ;;  %v1538_v41 = vmul.f32 %v8758_v14, %v10993_v35  ;;  %v10995_v51 = vld [vmem:[#allocation152_spill] sm:$0xff] }
 0x47d   :  { %10988 = vst [vmem:[#allocation177_spill] sm:$0xff] %v8732_v20  ;;  %v2627_v22 = vmul.f32 %v8750_v12, %v2604_v27  ;;  %4838 = vmatmul.mubr.msk.f32.gmra.mxu1 %vm97_vm0, %v8732_v20  ;;  %v2082_v27 = vadd.f32 %v2066_v36, %v1537_v61  ;;  %v8774_v20 = vld [vmem:[%s9830_s0 + $0x1f0] sm:$0xff]  ;;  %v5527_v36 = vld [vmem:[%s9830_s0 + $0xf8] sm:$0xff] }
 0x47e   :  { %4840 = vmatprep.mubr.msk.f32.mxu1 %vm97_vm0, %v8741_v47  ;;  %v2083_v37 = vadd.f32 %v2067_v18, %v1538_v41  ;;  %v3189_v35 = vmul.f32 %v8774_v20, %v10995_v51  ;;  %v2068_v18 = vmul.f32 %v5527_v36, %v7994_v31 }
 0x47f   :  { %v2643_v1 = vadd.f32 %v2627_v22, %v2082_v27  ;;  %v5528_v22 = vld [vmem:[%s9830_s0 + $0x78] sm:$0xff] }
 0x480   :  { %v3165_v12 = vpop.permute.xlu1 %3164  ;;  %v2644_v47 = vadd.f32 %v2628_v40, %v2083_v37  ;;  %v1539_v27 = vmul.f32 %v5528_v22, %v7984_v11  ;;  %v5530_v37 = vld [vmem:[%s9830_s0 + $0x1f8] sm:$0xff]  ;;  %v10999_v11 = vld [vmem:[#allocation15_spill] sm:$0xff] }
 0x481   :  { %v3188_v9 = vmul.f32 %v8781_v48, %v3165_v12  ;;  %v5529_v12 = vld [vmem:[%s9830_s0 + $0x178] sm:$0xff] }
 0x482   :  { %v8790_v41 = vadd.f32 %v3189_v35, %v2644_v47  ;;  %v2084_v31 = vadd.f32 %v2068_v18, %v1539_v27  ;;  %v11003_v27 = vld [vmem:[#allocation54_spill] sm:$0xff] }
 0x483   :  { %v8788_v61 = vadd.f32 %v3188_v9, %v2643_v1  ;;  %v2150_v9 = vmul.f32 %v8223_v38, %v10999_v11 }
 0x484   :  { %10998 = vst [vmem:[#allocation92_spill] sm:$0xff] %v8790_v41  ;;  %v2612_v51 = vpop.permute.xlu1 %2611 }
 0x485   :  { %10997 = vst [vmem:[#allocation21_spill] sm:$0xff] %v8788_v61  ;;  %v2629_v40 = vmul.f32 %v5529_v12, %v2612_v51  ;;  %4841 = vmatmul.mubr.msk.f32.gmra.mxu1 %vm97_vm0, %v8788_v61  ;;  %v11001_v51 = vld [vmem:[#allocation67_spill] sm:$0xff] }
 0x486   :  { %4843 = vmatprep.mubr.msk.f32.mxu1 %vm97_vm0, %v8790_v41  ;;  %v2149_v22 = vmul.f32 %v7971_v46, %v11001_v51  ;;  %v11002_v12 = vld [vmem:[#allocation103_spill] sm:$0xff] }
 0x487   :  { %v2645_v47 = vadd.f32 %v2629_v40, %v2084_v31  ;;  %v1605_v61 = vmul.f32 %v8214_v45, %v11002_v12  ;;  %v1604_v40 = vmul.f32 %v10927_v63, %v11003_v27  ;;  %v11004_v31 = vld [vmem:[#allocation84_spill] sm:$0xff]  ;;  %v11005_v45 = vld [vmem:[#allocation153_spill] sm:$0xff]  ;;  %v11007_v63 = vld [vmem:[#allocation78_spill] sm:$0xff] }
 0x488   :  { %v3173_v1 = vpop.permute.xlu1 %3172  ;;  %v3272_v12 = vmul.f32 %v8245_v43, %v11005_v45  ;;  %v2152_v27 = vmul.f32 %v8454_v6, %v11007_v63  ;;  %v11010_v43 = vld [vmem:[#allocation51_spill] sm:$0xff] }
 0x489   :  { %v3190_v35 = vmul.f32 %v5530_v37, %v3173_v1  ;;  %v2710_v1 = vmul.f32 %v8400_v4, %v11004_v31  ;;  %v2165_v37 = vadd.f32 %v2149_v22, %v1604_v40 }
 0x48b   :  { %v8808_v36 = vadd.f32 %v3190_v35, %v2645_v47  ;;  %v2166_v47 = vadd.f32 %v2150_v9, %v1605_v61  ;;  %v2726_v46 = vadd.f32 %v2710_v1, %v2165_v37  ;;  %v11009_v61 = vld [vmem:[#allocation111_spill] sm:$0xff]  ;;  %v11012_v1 = vld [vmem:[#allocation161_spill] sm:$0xff] }
 0x48c   :  { %v1606_v9 = vmul.f32 %v8426_v32, %v11009_v61  ;;  %v2763_v61 = vpop.xlane.xlu0 %2762 }
 0x48d   :  { %11000 = vst [vmem:[#allocation135_spill] sm:$0xff] %v8808_v36  ;;  %4844 = vmatmul.mubr.msk.f32.gmra.mxu1 %vm97_vm0, %v8808_v36  ;;  %v2652_v18 = vpop.permute.xlu1 %2651  ;;  %v11006_v36 = vld [vmem:[#allocation120_spill] sm:$0xff] }
 0x48e   :  { %v2711_v38 = vmul.f32 %v8230_v30, %v2652_v18  ;;  %v2151_v41 = vmul.f32 %v8409_v55, %v11006_v36  ;;  %v2758_v18 = vsel %vm1123_vm1, %v11010_v43, -inf  ;;  %v11011_v36 = vld [vmem:[#allocation163_spill] sm:$0xff]  ;;  %v11024_v43 = vld [vmem:[#allocation64_spill] sm:$0xff] }
 0x48f   :  { %v1607_v40 = vmul.f32 %v8476_v57, %v11011_v36  ;;  %v11015_v36 = vld [vmem:[#allocation66_spill] sm:$0xff] }
 0x490   :  { %v2727_v35 = vadd.f32 %v2711_v38, %v2166_v47  ;;  %v2713_v38 = vmul.f32 %v8483_v2, %v11012_v1  ;;  %v2167_v47 = vadd.f32 %v2151_v41, %v1606_v9  ;;  %v11017_v41 = vld [vmem:[#allocation87_spill] sm:$0xff] }
 0x491   :  { %v3209_v11 = vpop.permute.xlu1 %3208  ;;  %v2168_v37 = vadd.f32 %v2152_v27, %v1607_v40  ;;  %v2154_v27 = vmul.f32 %v8528_v17, %v11017_v41  ;;  %v11023_v41 = vld [vmem:[#allocation171_spill] sm:$0xff] }
 0x492   :  { %v3271_v51 = vmul.f32 %v8420_v50, %v3209_v11  ;;  %v8830_v31 = vadd.f32 %v3272_v12, %v2727_v35  ;;  %v11013_v35 = vld [vmem:[#allocation167_spill] sm:$0xff]  ;;  %v11014_v12 = vld [vmem:[#allocation52_spill] sm:$0xff] }
 0x493   :  { %v3274_v11 = vmul.f32 %v8522_v28, %v11013_v35  ;;  %v2767_v63 = vsel %vm1123_vm1, %v11014_v12, -inf  ;;  %v11019_v35 = vld [vmem:[#allocation50_spill] sm:$0xff] }
 0x494   :  { %v8826_v48 = vadd.f32 %v3271_v51, %v2726_v46  ;;  %11008 = vst [vmem:[#allocation138_spill] sm:$0xff] %v8830_v31 }
 0x495   :  { %v2656_v30 = vpop.permute.xlu1 %2655 }
 0x496   :  { %v2712_v22 = vmul.f32 %v8433_v16, %v2656_v30  ;;  %4846 = vmatprep.mubr.msk.f32.mxu1 %vm97_vm0, %v8826_v48  ;;  %v2729_v30 = vadd.f32 %v2713_v38, %v2168_v37  ;;  %v11020_v37 = vld [vmem:[#allocation58_spill] sm:$0xff] }
 0x497   :  { %2759 = vmax.xlane.f32.xlu1 %v2758_v18  ;;  %4847 = vmatmul.mubr.msk.f32.gmra.mxu1 %vm97_vm0, %v8830_v31  ;;  %v2153_v18 = vmul.f32 %v8464_v7, %v11015_v36  ;;  %v11022_v36 = vld [vmem:[#allocation169_spill] sm:$0xff] }
 0x498   :  { %v2728_v51 = vadd.f32 %v2712_v22, %v2167_v47  ;;  %v8856_v9 = vadd.f32 %v3274_v11, %v2729_v30  ;;  %v11018_v22 = vld [vmem:[#allocation42_spill] sm:$0xff]  ;;  %v2715_v11 = vmul.f32 %v8554_v15, %v11022_v36  ;;  %v11025_v36 = vld [vmem:[#allocation121_spill] sm:$0xff] }
 0x499   :  { %v3217_v46 = vpop.permute.xlu1 %3216  ;;  %v1608_v47 = vmul.f32 %v8491_v26, %v11018_v22 }
 0x49a   :  { %v3273_v45 = vmul.f32 %v8443_v25, %v3217_v46  ;;  %v2807_v46 = vsub.f32 %v11019_v35, %v2763_v61 }
 0x49b   :  { %2768 = vmax.xlane.f32.xlu1 %v2767_v63  ;;  %v2169_v30 = vadd.f32 %v2153_v18, %v1608_v47  ;;  %v11026_v47 = vld [vmem:[#allocation48_spill] sm:$0xff] }
 0x49c   :  { %v8852_v1 = vadd.f32 %v3273_v45, %v2728_v51  ;;  %v2773_v51 = vsel %vm1123_vm1, %v11020_v37, -inf  ;;  %v11021_v45 = vld [vmem:[#allocation73_spill] sm:$0xff]  ;;  %v2824_v35 = vmul.f32 1.442695, %v2807_v46 }
 0x49d   :  { %v2664_v40 = vpop.permute.xlu1 %2663  ;;  %v1609_v63 = vmul.f32 %v8547_v52, %v11021_v45  ;;  %v2779_v45 = vsel %vm1123_vm1, %v11024_v43, -inf }
 0x49e   :  { %11016 = vst [vmem:[#allocation140_spill] sm:$0xff] %v8852_v1  ;;  %v2714_v38 = vmul.f32 %v8498_v23, %v2664_v40  ;;  %4849 = vmatprep.mubr.msk.f32.mxu1 %vm97_vm0, %v8852_v1  ;;  %v3276_v40 = vmul.f32 %v8586_v53, %v11023_v41  ;;  %5383 = vpow2.f32 %v2824_v35  ;;  %v11029_v41 = vld [vmem:[#allocation166_spill] sm:$0xff] }
 0x49f   :  { %2774 = vmax.xlane.f32.xlu1 %v2773_v51  ;;  %4850 = vmatmul.mubr.msk.f32.gmra.mxu1 %vm97_vm0, %v8856_v9  ;;  %v2170_v61 = vadd.f32 %v2154_v27, %v1609_v63  ;;  %v2155_v51 = vmul.f32 %v8538_v56, %v11025_v36  ;;  %v1610_v63 = vmul.f32 %v8562_v0, %v11026_v47  ;;  %v11030_v36 = vld [vmem:[#allocation162_spill] sm:$0xff] }
 0x4a0   :  { %v2730_v12 = vadd.f32 %v2714_v38, %v2169_v30  ;;  %v11027_v38 = vld [vmem:[#allocation70_spill] sm:$0xff] }
 0x4a1   :  { %v3225_v22 = vpop.permute.xlu1 %3224  ;;  %v2731_v1 = vadd.f32 %v2715_v11, %v2170_v61  ;;  %v2785_v11 = vsel %vm1123_vm1, %v11027_v38, -inf  ;;  %v11028_v61 = vld [vmem:[#allocation83_spill] sm:$0xff] }
 0x4a2   :  { %v3275_v37 = vmul.f32 %v8512_v49, %v3225_v22  ;;  %v2791_v35 = vsel %vm1123_vm1, %v11028_v61, -inf }
 0x4a3   :  { %2780 = vmax.xlane.f32.xlu1 %v2779_v45  ;;  %v8881_v18 = vadd.f32 %v3276_v40, %v2731_v1  ;;  %v2157_v40 = vmul.f32 %v8602_v8, %v11029_v41 }
 0x4a4   :  { %v8879_v31 = vadd.f32 %v3275_v37, %v2730_v12  ;;  %v2171_v12 = vadd.f32 %v2155_v51, %v1610_v63  ;;  %v11031_v51 = vld [vmem:[#allocation91_spill] sm:$0xff] }
 0x4a5   :  { %v2672_v27 = vpop.permute.xlu1 %2671  ;;  %v2797_v63 = vsel %vm1123_vm1, %v11031_v51, -inf  ;;  %v11035_v51 = vld [vmem:[#allocation71_spill] sm:$0xff] }
 0x4a6   :  { %v2716_v46 = vmul.f32 %v8569_v59, %v2672_v27  ;;  %4852 = vmatprep.mubr.msk.f32.mxu1 %vm97_vm0, %v8879_v31  ;;  %v1612_v27 = vmul.f32 %v8626_v24, %v11030_v36  ;;  %v1614_v38 = vmul.f32 %v8293_v58, %v11035_v51 }
 0x4a7   :  { %2786 = vmax.xlane.f32.xlu1 %v2785_v11  ;;  %4853 = vmatmul.mubr.msk.f32.gmra.mxu1 %vm97_vm0, %v8881_v18 }
 0x4a8   :  { %v2732_v37 = vadd.f32 %v2716_v46, %v2171_v12  ;;  %v11032_v46 = vld [vmem:[#allocation3_spill] sm:$0xff]  ;;  %v2173_v11 = vadd.f32 %v2157_v40, %v1612_v27 }
 0x4a9   :  { %v3233_v1 = vpop.permute.xlu1 %3232 }
 0x4aa   :  { %v3277_v30 = vmul.f32 %v8579_v3, %v3233_v1 }
 0x4ab   :  { %2792 = vmax.xlane.f32.xlu1 %v2791_v35  ;;  %v8911_v41 = vpop.eup %5383 }
 0x4ac   :  { %v8897_v22 = vadd.f32 %v3277_v30, %v2732_v37  ;;  %v11033_v30 = vld [vmem:[#allocation106_spill] sm:$0xff]  ;;  %v2857_v27 = vsel %vm1123_vm1, %v8911_v41, 0.0 }
 0x4ad   :  { %v2680_v45 = vpop.permute.xlu1 %2679  ;;  %v2803_v35 = vsel %vm1123_vm1, %v11033_v30, -inf }
 0x4ae   :  { %v2718_v47 = vmul.f32 %v8633_v60, %v2680_v45  ;;  %4855 = vmatprep.mubr.msk.f32.mxu1 %vm97_vm0, %v8897_v22  ;;  %v11034_v45 = vld [vmem:[#allocation93_spill] sm:$0xff] }
 0x4af   :  { %2798 = vmax.xlane.f32.xlu1 %v2797_v63  ;;  %4856 = vmatmul.mubr.msk.f32.gmra.mxu1 %vm97_vm0, %v11032_v46  ;;  %v2159_v36 = vmul.f32 %v8300_v42, %v11034_v45 }
 0x4b0   :  { %v2734_v1 = vadd.f32 %v2718_v47, %v2173_v11  ;;  %v11036_v47 = vld [vmem:[#allocation9_spill] sm:$0xff] }
 0x4b1   :  { %v3241_v12 = vpop.permute.xlu1 %3240  ;;  %v2175_v11 = vadd.f32 %v2159_v36, %v1614_v38 }
 0x4b2   :  { %v3279_v37 = vmul.f32 %v8643_v54, %v3241_v12 }
 0x4b3   :  { %2804 = vmax.xlane.f32.xlu1 %v2803_v35  ;;  %v11038_v35 = vld [vmem:[#allocation185_spill] sm:$0xff] }
 0x4b4   :  { %v8915_v61 = vadd.f32 %v3279_v37, %v2734_v1  ;;  %v11037_v37 = vld [vmem:[#allocation188_spill] sm:$0xff]  ;;  %v1616_v45 = vmul.f32 %v8315_v5, %v11038_v35  ;;  %v1618_v5 = vmul.f32 %v8758_v14, %v8009_v10  ;;  %v11041_v35 = vld [vmem:[#allocation145_spill] sm:$0xff] }
 0x4b5   :  { %v2688_v63 = vpop.permute.xlu1 %2687  ;;  %v2161_v58 = vmul.f32 %v8329_v33, %v11037_v37  ;;  %v2163_v33 = vmul.f32 %v8737_v62, %v8014_v29  ;;  %v2518_v29 = vmul.f32 %v8400_v4, %v8360_v34  ;;  %v1959_v10 = vmul.f32 %v8409_v55, %v11041_v35  ;;  %v11045_v34 = vld [vmem:[#allocation194_spill] sm:$0xff]  ;;  %v11046_v4 = vld [vmem:[#allocation139_spill] sm:$0xff] }
 0x4b6   :  { %v2720_v40 = vmul.f32 %v8308_v39, %v2688_v63  ;;  %4858 = vmatprep.mubr.msk.f32.mxu1 %vm97_vm0, %v8915_v61  ;;  %v1961_v55 = vmul.f32 %v8464_v7, %v11046_v4 }
 0x4b7   :  { %2858 = vadd.xlane.f32.xlu1 %v2857_v27  ;;  %4859 = vmatmul.mubr.msk.f32.gmra.mxu1 %vm97_vm0, %v11036_v47  ;;  %v11039_v27 = vld [vmem:[#allocation187_spill] sm:$0xff]  ;;  %v2177_v38 = vadd.f32 %v2161_v58, %v1616_v45 }
 0x4b8   :  { %v2736_v12 = vadd.f32 %v2720_v40, %v2175_v11 }
 0x4b9   :  { %v3249_v42 = vpop.permute.xlu1 %3248 }
 0x4ba   :  { %v3281_v1 = vmul.f32 %v8322_v19, %v3249_v42 }
 0x4bc   :  { %v8929_v51 = vadd.f32 %v3281_v1, %v2736_v12  ;;  %v11040_v12 = vld [vmem:[#allocation191_spill] sm:$0xff]  ;;  %v2179_v1 = vadd.f32 %v2163_v33, %v1618_v5 }
 0x4bd   :  { %v2696_v39 = vpop.permute.xlu1 %2695 }
 0x4be   :  { %v2722_v63 = vmul.f32 %v8336_v21, %v2696_v39  ;;  %4861 = vmatprep.mubr.msk.f32.mxu1 %vm97_vm0, %v8929_v51 }
 0x4bf   :  { %4862 = vmatmul.mubr.msk.f32.gmra.mxu1 %vm97_vm0, %v11039_v27 }
 0x4c0   :  { %v2738_v19 = vadd.f32 %v2722_v63, %v2177_v38  ;;  %v11042_v63 = vld [vmem:[#allocation105_spill] sm:$0xff] }
 0x4c1   :  { %v3257_v36 = vpop.permute.xlu1 %3256  ;;  %v1446_v38 = vmul.f32 %v8426_v32, %v11042_v63  ;;  %v11051_v63 = vld [vmem:[#allocation176_spill] sm:$0xff] }
 0x4c2   :  { %v3283_v40 = vmul.f32 %v8347_v13, %v3257_v36  ;;  %v11043_v36 = vld [vmem:[#allocation80_spill] sm:$0xff] }
 0x4c3   :  { %v1975_v5 = vadd.f32 %v1959_v10, %v1446_v38  ;;  %v11052_v10 = vld [vmem:[#allocation20_spill] sm:$0xff]  ;;  %v11053_v38 = vld [vmem:[#allocation137_spill] sm:$0xff] }
 0x4c4   :  { %v8941_v11 = vadd.f32 %v3283_v40, %v2738_v19  ;;  %v2534_v19 = vadd.f32 %v2518_v29, %v11043_v36  ;;  %v11044_v40 = vld [vmem:[#allocation118_spill] sm:$0xff]  ;;  %v2521_v36 = vmul.f32 %v8483_v2, %v11051_v63 }
 0x4c5   :  { %v2704_v42 = vpop.permute.xlu1 %2703  ;;  %v2520_v33 = vmul.f32 %v8433_v16, %v11044_v40  ;;  %v11050_v16 = vld [vmem:[#allocation30_spill] sm:$0xff] }
 0x4c6   :  { %v2724_v21 = vmul.f32 %v8765_v44, %v2704_v42  ;;  %4864 = vmatprep.mubr.msk.f32.mxu1 %vm97_vm0, %v8941_v11 }
 0x4c7   :  { %4865 = vmatmul.mubr.msk.f32.gmra.mxu1 %vm97_vm0, %v11040_v12 }
 0x4c8   :  { %v2740_v13 = vadd.f32 %v2724_v21, %v2179_v1  ;;  %v11047_v21 = vld [vmem:[#allocation147_spill] sm:$0xff] }
 0x4c9   :  { %v3265_v37 = vpop.permute.xlu1 %3264  ;;  %v1960_v1 = vmul.f32 %v8454_v6, %v11047_v21 }
 0x4ca   :  { %v3285_v58 = vmul.f32 %v8774_v20, %v3265_v37 }
 0x4cc   :  { %v8953_v39 = vadd.f32 %v3285_v58, %v2740_v13  ;;  %v11048_v13 = vld [vmem:[#allocation95_spill] sm:$0xff]  ;;  %v11049_v58 = vld [vmem:[#allocation62_spill] sm:$0xff] }
 0x4cd   :  { %v1447_v32 = vmul.f32 %v8476_v57, %v11048_v13  ;;  %v1448_v29 = vmul.f32 %v8491_v26, %v11049_v58  ;;  %v1963_v57 = vmul.f32 %v8538_v56, %v11052_v10  ;;  %v11066_v10 = vld [vmem:[#allocation119_spill] sm:$0xff] }
 0x4ce   :  { %4867 = vmatprep.mubr.msk.f32.mxu1 %vm97_vm0, %v8953_v39  ;;  %v3002_v45 = vpop.permute.xlu1 %3001 }
 0x4cf   :  { %v3079_v42 = vmul.f32 %v8420_v50, %v3002_v45  ;;  %4868 = vmatmul.mubr.msk.f32.gmra.mxu1 %vm97_vm0, %v11045_v34  ;;  %v2522_v50 = vmul.f32 %v8498_v23, %v11050_v16  ;;  %v2536_v45 = vadd.f32 %v2520_v33, %v1975_v5  ;;  %v1977_v6 = vadd.f32 %v1961_v55, %v1448_v29  ;;  %v11054_v23 = vld [vmem:[#allocation149_spill] sm:$0xff]  ;;  %v11056_v33 = vld [vmem:[#allocation128_spill] sm:$0xff]  ;;  %v11057_v55 = vld [vmem:[#allocation182_spill] sm:$0xff] }
 0x4d0   :  { %v1976_v26 = vadd.f32 %v1960_v1, %v1447_v32  ;;  %v1962_v2 = vmul.f32 %v8528_v17, %v11054_v23  ;;  %v2524_v56 = vmul.f32 %v8569_v59, %v11057_v55  ;;  %v11059_v17 = vld [vmem:[#allocation197_spill] sm:$0xff]  ;;  %v11061_v29 = vld [vmem:[#allocation74_spill] sm:$0xff] }
 0x4d1   :  { %v3095_v37 = vadd.f32 %v3079_v42, %v2534_v19  ;;  %v1450_v42 = vmul.f32 %v8562_v0, %v11056_v33  ;;  %v2538_v4 = vadd.f32 %v2522_v50, %v1977_v6  ;;  %v11060_v0 = vld [vmem:[#allocation22_spill] sm:$0xff]  ;;  %v11062_v59 = vld [vmem:[#allocation189_spill] sm:$0xff] }
 0x4d2   :  { %v3012_v35 = vpop.permute.xlu1 %3011  ;;  %v2537_v21 = vadd.f32 %v2521_v36, %v1976_v26  ;;  %v1965_v58 = vmul.f32 %v8602_v8, %v11060_v0  ;;  %v1451_v16 = vmul.f32 %v11062_v59, %v11061_v29  ;;  %v11067_v26 = vld [vmem:[#allocation32_spill] sm:$0xff]  ;;  %v11068_v8 = vld [vmem:[#allocation126_spill] sm:$0xff] }
 0x4d3   :  { %v3081_v7 = vmul.f32 %v8443_v25, %v3012_v35  ;;  %4798 = vmatprep.mubr.msk.f32.mxu0 %vm97_vm0, %v3095_v37  ;;  %4878 = vmatprep.mubr.msk.f32.mxu1 %vm97_vm0, %v3095_v37  ;;  %v11055_v25 = vld [vmem:[#allocation6_spill] sm:$0xff]  ;;  %v11058_v37 = vld [vmem:[#allocation72_spill] sm:$0xff]  ;;  %v1979_v32 = vadd.f32 %v1963_v57, %v1450_v42  ;;  %v11063_v35 = vld [vmem:[#allocation157_spill] sm:$0xff]  ;;  %v2525_v23 = vmul.f32 %v11068_v8, %v11067_v26 }
 0x4d4   :  { %4799 = vmatmul.mubr.msk.f32.vlgmr.msra.gmra.mxu0 %vm97_vm0, %v11053_v38  ;;  %4879 = vmatmul.mubr.msk.f32.vlgmr.msra.gmra.mxu1 %vm97_vm0, %v11053_v38  ;;  %v1449_v40 = vmul.f32 %v8547_v52, %v11055_v25  ;;  %v2523_v13 = vmul.f32 %v8554_v15, %v11058_v37  ;;  %v3083_v52 = vmul.f32 %v8512_v49, %v11059_v17  ;;  %v11076_v29 = vld [vmem:[#allocation158_spill] sm:$0xff] }
 0x4d5   :  { %v3097_v19 = vadd.f32 %v3081_v7, %v2536_v45  ;;  %v11064_v45 = vld [vmem:[#allocation186_spill] sm:$0xff]  ;;  %v2540_v6 = vadd.f32 %v2524_v56, %v1979_v32  ;;  %v2526_v49 = vmul.f32 %v8633_v60, %v11066_v10  ;;  %v11070_v56 = vld [vmem:[#allocation35_spill] sm:$0xff] }
 0x4d6   :  { %v3017_v5 = vpop.permute.xlu1 %3016  ;;  %v1978_v50 = vadd.f32 %v1962_v2, %v1449_v40  ;;  %v1964_v15 = vmul.f32 %v11064_v45, %v11063_v35  ;;  %v3099_v7 = vadd.f32 %v3083_v52, %v2538_v4  ;;  %v11069_v2 = vld [vmem:[#allocation198_spill] sm:$0xff]  ;;  %v11074_v32 = vld [vmem:[#allocation195_spill] sm:$0xff]  ;;  %v11078_v35 = vld [vmem:[#allocation24_spill] sm:$0xff] }
 0x4d7   :  { %v3082_v1 = vmul.f32 %v8522_v28, %v3017_v5  ;;  %4801 = vmatprep.mubr.msk.f32.mxu0 %vm97_vm0, %v3097_v19  ;;  %4881 = vmatprep.mubr.msk.f32.mxu1 %vm97_vm0, %v3097_v19  ;;  %v11065_v28 = vld [vmem:[#allocation181_spill] sm:$0xff]  ;;  %v3085_v25 = vmul.f32 %v8579_v3, %v11069_v2  ;;  %v1971_v45 = vmul.f32 %v8737_v62, %v11078_v35  ;;  %v11082_v10 = vld [vmem:[#allocation174_spill] sm:$0xff] }
 0x4d8   :  { %v1452_v36 = vmul.f32 %v8626_v24, %v11065_v28  ;;  %v2539_v38 = vadd.f32 %v2523_v13, %v1978_v50  ;;  %v1980_v60 = vadd.f32 %v1964_v15, %v1451_v16  ;;  %v11073_v3 = vld [vmem:[#allocation85_spill] sm:$0xff]  ;;  %v11077_v16 = vld [vmem:[#allocation192_spill] sm:$0xff] }
 0x4d9   :  { %v3098_v63 = vadd.f32 %v3082_v1, %v2537_v21  ;;  %v3101_v33 = vadd.f32 %v3085_v25, %v2540_v6  ;;  %v11072_v21 = vld [vmem:[#allocation45_spill] sm:$0xff]  ;;  %v3087_v13 = vmul.f32 %v8643_v54, %v11073_v3  ;;  %v11086_v25 = vld [vmem:[#allocation79_spill] sm:$0xff] }
 0x4da   :  { %v3027_v57 = vpop.permute.xlu1 %3026  ;;  %v1981_v24 = vadd.f32 %v1965_v58, %v1452_v36  ;;  %v2541_v55 = vadd.f32 %v2525_v23, %v1980_v60  ;;  %v11075_v58 = vld [vmem:[#allocation144_spill] sm:$0xff]  ;;  %v11080_v36 = vld [vmem:[#allocation37_spill] sm:$0xff]  ;;  %v11087_v60 = vld [vmem:[#allocation75_spill] sm:$0xff] }
 0x4db   :  { %v3084_v19 = vmul.f32 %v8586_v53, %v3027_v57  ;;  %4802 = vmatmul.mubr.msk.f32.gmra.mxu0 %vm97_vm0, %v3098_v63  ;;  %4882 = vmatmul.mubr.msk.f32.gmra.mxu1 %vm97_vm0, %v3098_v63  ;;  %v11071_v53 = vld [vmem:[#allocation156_spill] sm:$0xff]  ;;  %v2529_v59 = vmul.f32 %v11076_v29, %v11075_v58  ;;  %v11079_v63 = vld [vmem:[#allocation179_spill] sm:$0xff]  ;;  %v11083_v57 = vld [vmem:[#allocation173_spill] sm:$0xff]  ;;  %v2766_v29 = vpop.xlane.xlu0 %2765 }
 0x4dc   :  { %4804 = vmatprep.mubr.msk.f32.mxu0 %vm97_vm0, %v3099_v7  ;;  %4884 = vmatprep.mubr.msk.f32.mxu1 %vm97_vm0, %v3099_v7  ;;  %v2542_v42 = vadd.f32 %v2526_v49, %v1981_v24  ;;  %v2527_v5 = vmul.f32 %v11071_v53, %v11070_v56  ;;  %v11081_v7 = vld [vmem:[#allocation60_spill] sm:$0xff]  ;;  %v11095_v3 = vld [vmem:[#allocation43_spill] sm:$0xff]  ;;  %v11102_v58 = vld [vmem:[#allocation178_spill] sm:$0xff] }
 0x4dd   :  { %v3100_v40 = vadd.f32 %v3084_v19, %v2539_v38  ;;  %v2545_v28 = vadd.f32 %v2529_v59, %v11079_v63  ;;  %v2531_v6 = vmul.f32 %v11081_v7, %v11080_v36  ;;  %v11084_v38 = vld [vmem:[#allocation5_spill] sm:$0xff]  ;;  %v11085_v19 = vld [vmem:[#allocation196_spill] sm:$0xff]  ;;  %v11106_v36 = vld [vmem:[#allocation138_spill] sm:$0xff] }
 0x4de   :  { %v3037_v4 = vpop.permute.xlu1 %3036  ;;  %v3103_v17 = vadd.f32 %v3087_v13, %v2542_v42  ;;  %v2543_v0 = vadd.f32 %v2527_v5, %v11074_v32  ;;  %v1458_v62 = vmul.f32 %v8758_v14, %v11084_v38  ;;  %v11089_v53 = vld [vmem:[#allocation44_spill] sm:$0xff]  ;;  %v11091_v5 = vld [vmem:[#allocation39_spill] sm:$0xff]  ;;  %v11100_v32 = vld [vmem:[#allocation193_spill] sm:$0xff] }
 0x4df   :  { %v3086_v37 = vmul.f32 %v11072_v21, %v3037_v4  ;;  %4805 = vmatmul.mubr.msk.f32.gmra.mxu0 %vm97_vm0, %v3100_v40  ;;  %4885 = vmatmul.mubr.msk.f32.gmra.mxu1 %vm97_vm0, %v3100_v40  ;;  %v2547_v2 = vadd.f32 %v2531_v6, %v11085_v19  ;;  %v11088_v40 = vld [vmem:[#allocation29_spill] sm:$0xff]  ;;  %v11093_v21 = vld [vmem:[#allocation11_spill] sm:$0xff]  ;;  %v11096_v13 = vld [vmem:[#allocation148_spill] sm:$0xff] }
 0x4e0   :  { %4807 = vmatprep.mubr.msk.f32.mxu0 %vm97_vm0, %v3101_v33  ;;  %4887 = vmatprep.mubr.msk.f32.mxu1 %vm97_vm0, %v3101_v33  ;;  %v1987_v23 = vadd.f32 %v1971_v45, %v1458_v62  ;;  %v2532_v14 = vmul.f32 %v8765_v44, %v11088_v40  ;;  %v11090_v44 = vld [vmem:[#allocation23_spill] sm:$0xff]  ;;  %v11103_v59 = vld [vmem:[#allocation21_spill] sm:$0xff]  ;;  %v2772_v45 = vpop.xlane.xlu0 %2771  ;;  %v11107_v7 = vld [vmem:[#allocation140_spill] sm:$0xff] }
 0x4e1   :  { %v3102_v1 = vadd.f32 %v3086_v37, %v2541_v55  ;;  %v11094_v37 = vld [vmem:[#allocation41_spill] sm:$0xff] }
 0x4e2   :  { %v3047_v52 = vpop.permute.xlu1 %3046  ;;  %v2548_v4 = vadd.f32 %v2532_v14, %v1987_v23  ;;  %v11110_v19 = vld [vmem:[#allocation61_spill] sm:$0xff] }
 0x4e3   :  { %v3088_v50 = vmul.f32 %v11077_v16, %v3047_v52  ;;  %4808 = vmatmul.mubr.msk.f32.gmra.mxu0 %vm97_vm0, %v3102_v1  ;;  %4888 = vmatmul.mubr.msk.f32.gmra.mxu1 %vm97_vm0, %v3102_v1  ;;  %v11097_v1 = vld [vmem:[#allocation190_spill] sm:$0xff]  ;;  %v11099_v52 = vld [vmem:[#allocation49_spill] sm:$0xff]  ;;  %v11104_v16 = vld [vmem:[#allocation92_spill] sm:$0xff] }
 0x4e4   :  { %4810 = vmatprep.mubr.msk.f32.mxu0 %vm97_vm0, %v3103_v17  ;;  %4890 = vmatprep.mubr.msk.f32.mxu1 %vm97_vm0, %v3103_v17  ;;  %v11098_v17 = vld [vmem:[#allocation47_spill] sm:$0xff] }
 0x4e5   :  { %v3104_v54 = vadd.f32 %v3088_v50, %v2543_v0  ;;  %v11101_v0 = vld [vmem:[#allocation177_spill] sm:$0xff]  ;;  %v9105_v50 = vld [vmem:[%s9834_s3] ss:$0 sm:$0xff] }
 0x4e6   :  { %v3057_v15 = vpop.permute.xlu1 %3056 }
 0x4e7   :  { %v3090_v49 = vmul.f32 %v11082_v10, %v3057_v15  ;;  %4811 = vmatmul.mubr.msk.f32.gmra.mxu0 %vm97_vm0, %v3104_v54  ;;  %4891 = vmatmul.mubr.msk.f32.gmra.mxu1 %vm97_vm0, %v3104_v54  ;;  %v11105_v54 = vld [vmem:[#allocation135_spill] sm:$0xff] }
 0x4e8   :  { %4813 = vmatprep.mubr.msk.f32.mxu0 %vm97_vm0, %v11083_v57  ;;  %4893 = vmatprep.mubr.msk.f32.mxu1 %vm97_vm0, %v11083_v57 }
 0x4e9   :  { %v3106_v26 = vadd.f32 %v3090_v49, %v2545_v28  ;;  %v11108_v49 = vld [vmem:[#allocation55_spill] sm:$0xff] }
 0x4ea   :  { %v3067_v8 = vpop.permute.xlu1 %3066  ;;  %v2808_v57 = vsub.f32 %v11108_v49, %v2766_v29  ;;  %v11116_v29 = vld [vmem:[#allocation70_spill] sm:$0xff] }
 0x4eb   :  { %v3092_v24 = vmul.f32 %v11086_v25, %v3067_v8  ;;  %4814 = vmatmul.mubr.msk.f32.gmra.mxu0 %vm97_vm0, %v3106_v26  ;;  %4894 = vmatmul.mubr.msk.f32.gmra.mxu1 %vm97_vm0, %v3106_v26  ;;  %v11109_v26 = vld [vmem:[#allocation51_spill] sm:$0xff] }
 0x4ec   :  { %4816 = vmatprep.mubr.msk.f32.mxu0 %vm97_vm0, %v11087_v60  ;;  %4896 = vmatprep.mubr.msk.f32.mxu1 %vm97_vm0, %v11087_v60  ;;  %v2826_v23 = vmul.f32 1.442695, %v2808_v57 }
 0x4ed   :  { %v3108_v33 = vadd.f32 %v3092_v24, %v2547_v2  ;;  %v2810_v2 = vsub.f32 %v11110_v19, %v2772_v45  ;;  %v11111_v24 = vld [vmem:[#allocation52_spill] sm:$0xff] }
 0x4ee   :  { %v3072_v42 = vpop.permute.xlu1 %3071 }
 0x4ef   :  { %v3093_v55 = vmul.f32 %v8774_v20, %v3072_v42  ;;  %4817 = vmatmul.mubr.msk.f32.gmra.mxu0 %vm97_vm0, %v3108_v33  ;;  %4897 = vmatmul.mubr.msk.f32.gmra.mxu1 %vm97_vm0, %v3108_v33  ;;  %v11092_v20 = vld [vmem:[#allocation146_spill] sm:$0xff]  ;;  %v2830_v14 = vmul.f32 1.442695, %v2810_v2  ;;  %v11112_v33 = vld [vmem:[#allocation68_spill] sm:$0xff] }
 0x4f1   :  { %v3109_v56 = vadd.f32 %v3093_v55, %v2548_v4 }
 0x4f3   :  { %4819 = vmatprep.mubr.msk.f32.mxu0 %vm97_vm0, %v3109_v56  ;;  %4899 = vmatprep.mubr.msk.f32.mxu1 %vm97_vm0, %v3109_v56 }
 0x4f4   :  { %4820 = vmatmul.mubr.msk.f32.gmra.mxu0 %vm97_vm0, %v11089_v53  ;;  %4900 = vmatmul.mubr.msk.f32.gmra.mxu1 %vm97_vm0, %v11089_v53  ;;  %v11113_v53 = vld [vmem:[#allocation58_spill] sm:$0xff] }
 0x4f5   :  { %4902 = vmatprep.mubr.msk.f32.mxu1 %vm97_vm0, %v11090_v44 }
 0x4f8   :  { %4903 = vmatmul.mubr.msk.f32.gmra.mxu1 %vm97_vm0, %v11091_v5 }
 0x4f9   :  { %4905 = vmatprep.mubr.msk.f32.mxu1 %vm97_vm0, %v11092_v20  ;;  %v11114_v20 = vld [vmem:[#allocation76_spill] sm:$0xff] }
 0x4fc   :  { %4906 = vmatmul.mubr.msk.f32.gmra.mxu1 %vm97_vm0, %v11093_v21 }
 0x4fd   :  { %4908 = vmatprep.mubr.msk.f32.mxu1 %vm97_vm0, %v11094_v37 }
 0x500   :  { %4909 = vmatmul.mubr.msk.f32.gmra.mxu1 %vm97_vm0, %v11095_v3 }
 0x501   :  { %4911 = vmatprep.mubr.msk.f32.mxu1 %vm97_vm0, %v11096_v13 }
 0x504   :  { %4912 = vmatmul.mubr.msk.f32.gmra.mxu1 %vm97_vm0, %v11097_v1 }
 0x505   :  { %4914 = vmatprep.mubr.msk.f32.mxu1 %vm97_vm0, %v11098_v17 }
 0x508   :  { %4915 = vmatmul.mubr.msk.f32.gmra.mxu1 %vm97_vm0, %v11099_v52 }
 0x509   :  { %4917 = vmatprep.mubr.msk.f32.mxu1 %vm97_vm0, %v11100_v32 }
 0x50c   :  { %4918 = vmatmul.mubr.msk.f32.gmra.mxu1 %vm97_vm0, %v11101_v0 }
 0x50d   :  { %4920 = vmatprep.mubr.msk.f32.mxu1 %vm97_vm0, %v11102_v58 }
 0x510   :  { %4921 = vmatmul.mubr.msk.f32.gmra.mxu1 %vm97_vm0, %v11103_v59 }
 0x511   :  { %4923 = vmatprep.mubr.msk.f32.mxu1 %vm97_vm0, %v11104_v16 }
 0x514   :  { %4924 = vmatmul.mubr.msk.f32.gmra.mxu1 %vm97_vm0, %v11105_v54 }
 0x515   :  { %v4824_v35 = vpop.f32.mrf.mxu1  ;;  %4926 = vmatprep.mubr.msk.f32.mxu1 %vm97_vm0, %v8826_v48  ;;  %v2778_v48 = vpop.xlane.xlu0 %2777 }
 0x516   :  { %v3610_v15 = vadd.f32 %v4824_v35, %v9105_v50  ;;  %v2812_v42 = vsub.f32 %v11112_v33, %v2778_v48  ;;  %v11117_v35 = vld [vmem:[#allocation97_spill] sm:$0xff] }
 0x517   :  { %v3604_v63 = vpop.f32.mrf.mxu1 }
 0x518   :  { %4451 = vst.msk [vmem:[%s9835_s6 + $0x88] sm:$0xff] %vm97_vm0, %v3610_v15  ;;  %v3605_v28 = vadd.f32 %v9105_v50, %v3604_v63  ;;  %4927 = vmatmul.mubr.msk.f32.gmra.mxu1 %vm97_vm0, %v11106_v36  ;;  %v2834_v5 = vmul.f32 1.442695, %v2812_v42  ;;  %v11118_v36 = vld [vmem:[#allocation83_spill] sm:$0xff] }
 0x519   :  { %4929 = vmatprep.mubr.msk.f32.mxu1 %vm97_vm0, %v11107_v7 }
 0x51a   :  { %4450 = vst.msk [vmem:[%s9835_s6 + $0x80] sm:$0xff] %vm97_vm0, %v3605_v28 }
 0x51c   :  { %4930 = vmatmul.mubr.msk.f32.gmra.mxu1 %vm97_vm0, %v8856_v9 }
 0x51d   :  { %v4827_v6 = vpop.f32.mrf.mxu1  ;;  %4932 = vmatprep.mubr.msk.f32.mxu1 %vm97_vm0, %v8879_v31  ;;  %v2784_v31 = vpop.xlane.xlu0 %2783 }
 0x51e   :  { %v3620_v10 = vadd.f32 %v4827_v6, %v9105_v50  ;;  %v2814_v21 = vsub.f32 %v11114_v20, %v2784_v31 }
 0x51f   :  { %v3614_v38 = vpop.f32.mrf.mxu1 }
 0x520   :  { %4453 = vst.msk [vmem:[%s9835_s6 + $0x98] sm:$0xff] %vm97_vm0, %v3620_v10  ;;  %v3615_v62 = vadd.f32 %v9105_v50, %v3614_v38  ;;  %4933 = vmatmul.mubr.msk.f32.gmra.mxu1 %vm97_vm0, %v8881_v18  ;;  %v2760_v9 = vpop.xlane.xlu1 %2759  ;;  %v2838_v32 = vmul.f32 1.442695, %v2814_v21  ;;  %v11119_v38 = vld [vmem:[#allocation109_spill] sm:$0xff] }
 0x521   :  { %v2806_v8 = vsub.f32 %v11109_v26, %v2760_v9  ;;  %4935 = vmatprep.mubr.msk.f32.mxu1 %vm97_vm0, %v8897_v22  ;;  %v2790_v56 = vpop.xlane.xlu0 %2789 }
 0x522   :  { %4452 = vst.msk [vmem:[%s9835_s6 + $0x90] sm:$0xff] %vm97_vm0, %v3615_v62 }
 0x523   :  { %v2822_v25 = vmul.f32 1.442695, %v2806_v8 }
 0x524   :  { %4936 = vmatmul.mubr.msk.f32.gmra.mxu1 %vm97_vm0, %v11032_v46  ;;  %v2769_v18 = vpop.xlane.xlu1 %2768 }
 0x525   :  { %5385 = vpow2.f32 %v2822_v25  ;;  %v2809_v60 = vsub.f32 %v11111_v24, %v2769_v18  ;;  %v4830_v40 = vpop.f32.mrf.mxu1  ;;  %4938 = vmatprep.mubr.msk.f32.mxu1 %vm97_vm0, %v8915_v61  ;;  %v2796_v17 = vpop.xlane.xlu0 %2795  ;;  %v11120_v18 = vld [vmem:[#allocation91_spill] sm:$0xff] }
 0x526   :  { %v3630_v22 = vadd.f32 %v4830_v40, %v9105_v50  ;;  %5387 = vpow2.f32 %v2826_v23  ;;  %v2818_v45 = vsub.f32 %v11117_v35, %v2796_v17 }
 0x527   :  { %v2828_v4 = vmul.f32 1.442695, %v2809_v60  ;;  %v3624_v55 = vpop.f32.mrf.mxu1 }
 0x528   :  { %4455 = vst.msk [vmem:[%s9835_s6 + $0xa8] sm:$0xff] %vm97_vm0, %v3630_v22  ;;  %v3625_v46 = vadd.f32 %v9105_v50, %v3624_v55  ;;  %4939 = vmatmul.mubr.msk.f32.gmra.mxu1 %vm97_vm0, %v11036_v47  ;;  %v2775_v61 = vpop.xlane.xlu1 %2774  ;;  %v2846_v10 = vmul.f32 1.442695, %v2818_v45 }
 0x529   :  { %5389 = vpow2.f32 %v2828_v4  ;;  %v2811_v44 = vsub.f32 %v11113_v53, %v2775_v61  ;;  %4941 = vmatprep.mubr.msk.f32.mxu1 %vm97_vm0, %v8929_v51  ;;  %v11115_v51 = vld [vmem:[#allocation89_spill] sm:$0xff]  ;;  %v2802_v28 = vpop.xlane.xlu0 %2801 }
 0x52a   :  { %4454 = vst.msk [vmem:[%s9835_s6 + $0xa0] sm:$0xff] %vm97_vm0, %v3625_v46  ;;  %5391 = vpow2.f32 %v2830_v14  ;;  %v2816_v1 = vsub.f32 %v11115_v51, %v2790_v56  ;;  %v2820_v62 = vsub.f32 %v11119_v38, %v2802_v28 }
 0x52b   :  { %v2832_v37 = vmul.f32 1.442695, %v2811_v44 }
 0x52c   :  { %4942 = vmatmul.mubr.msk.f32.gmra.mxu1 %vm97_vm0, %v11039_v27  ;;  %v2781_v47 = vpop.xlane.xlu1 %2780  ;;  %v2842_v54 = vmul.f32 1.442695, %v2816_v1  ;;  %v2850_v22 = vmul.f32 1.442695, %v2820_v62 }
 0x52d   :  { %5393 = vpow2.f32 %v2832_v37  ;;  %v2813_v3 = vsub.f32 %v11024_v43, %v2781_v47  ;;  %v4833_v13 = vpop.f32.mrf.mxu1  ;;  %4944 = vmatprep.mubr.msk.f32.mxu1 %vm97_vm0, %v8941_v11 }
 0x52e   :  { %v3640_v52 = vadd.f32 %v4833_v13, %v9105_v50  ;;  %5395 = vpow2.f32 %v2834_v5 }
 0x52f   :  { %v2836_v0 = vmul.f32 1.442695, %v2813_v3  ;;  %v3634_v58 = vpop.f32.mrf.mxu1 }
 0x530   :  { %4457 = vst.msk [vmem:[%s9835_s6 + $0xb8] sm:$0xff] %vm97_vm0, %v3640_v52  ;;  %v3635_v27 = vadd.f32 %v9105_v50, %v3634_v58  ;;  %4945 = vmatmul.mubr.msk.f32.gmra.mxu1 %vm97_vm0, %v11040_v12  ;;  %v2787_v11 = vpop.xlane.xlu1 %2786 }
 0x531   :  { %5397 = vpow2.f32 %v2836_v0  ;;  %v2815_v59 = vsub.f32 %v11116_v29, %v2787_v11  ;;  %4947 = vmatprep.mubr.msk.f32.mxu1 %vm97_vm0, %v8953_v39 }
 0x532   :  { %v9185_v16 = vpop.eup %5385  ;;  %4456 = vst.msk [vmem:[%s9835_s6 + $0xb0] sm:$0xff] %vm97_vm0, %v3635_v27  ;;  %5399 = vpow2.f32 %v2838_v32 }
 0x533   :  { %v2840_v15 = vmul.f32 1.442695, %v2815_v59  ;;  %v2854_v12 = vsel %vm1123_vm1, %v9185_v16, 0.0  ;;  %v9194_v63 = vpop.eup %5387 }
 0x534   :  { %4948 = vmatmul.mubr.msk.f32.gmra.mxu1 %vm97_vm0, %v11045_v34  ;;  %2855 = vadd.xlane.f32.xlu0 %v2854_v12  ;;  %v2793_v39 = vpop.xlane.xlu1 %2792  ;;  %v2860_v31 = vsel %vm1123_vm1, %v9194_v63, 0.0 }
 0x535   :  { %5401 = vpow2.f32 %v2840_v15  ;;  %v2817_v7 = vsub.f32 %v11118_v36, %v2793_v39  ;;  %v4836_v48 = vpop.f32.mrf.mxu1 }
 0x536   :  { %v9199_v6 = vpop.eup %5389  ;;  %5403 = vpow2.f32 %v2842_v54  ;;  %v3650_v57 = vadd.f32 %v4836_v48, %v9105_v50 }
 0x537   :  { %v2844_v9 = vmul.f32 1.442695, %v2817_v7  ;;  %v3644_v8 = vpop.f32.mrf.mxu1  ;;  %v2863_v34 = vsel %vm1123_vm1, %v9199_v6, 0.0  ;;  %v9207_v23 = vpop.eup %5391 }
 0x538   :  { %4459 = vst.msk [vmem:[%s9835_s6 + $0xc8] sm:$0xff] %vm97_vm0, %v3650_v57  ;;  %v3645_v2 = vadd.f32 %v9105_v50, %v3644_v8  ;;  %2861 = vadd.xlane.f32.xlu0 %v2860_v31  ;;  %2864 = vadd.xlane.f32.xlu1 %v2863_v34  ;;  %v2799_v25 = vpop.xlane.xlu1 %2798  ;;  %v2866_v42 = vsel %vm1123_vm1, %v9207_v23, 0.0  ;;  %v11122_v8 = vld [vmem:[#allocation50_spill] sm:$0xff] }
 0x539   :  { %5405 = vpow2.f32 %v2844_v9  ;;  %v2819_v60 = vsub.f32 %v11120_v18, %v2799_v25  ;;  %v11121_v9 = vld [vmem:[#allocation112_spill] sm:$0xff] }
 0x53a   :  { %v9215_v40 = vpop.eup %5393  ;;  %5407 = vpow2.f32 %v2846_v10  ;;  %4458 = vst.msk [vmem:[%s9835_s6 + $0xc0] sm:$0xff] %vm97_vm0, %v3645_v2  ;;  %v2935_v31 = vsub.f32 %v11122_v8, %v11121_v9 }
 0x53b   :  { %v2848_v14 = vmul.f32 1.442695, %v2819_v60  ;;  %v2869_v4 = vsel %vm1123_vm1, %v9215_v40, 0.0  ;;  %v9225_v55 = vpop.eup %5395 }
 0x53c   :  { %2867 = vadd.xlane.f32.xlu0 %v2866_v42  ;;  %2870 = vadd.xlane.f32.xlu1 %v2869_v4  ;;  %v2805_v56 = vpop.xlane.xlu1 %2804  ;;  %v2872_v47 = vsel %vm1123_vm1, %v9225_v55, 0.0 }
 0x53d   :  { %5409 = vpow2.f32 %v2848_v14  ;;  %v2821_v46 = vsub.f32 %v11033_v30, %v2805_v56  ;;  %v4839_v61 = vpop.f32.mrf.mxu1  ;;  %v11123_v14 = vld [vmem:[#allocation113_spill] sm:$0xff] }
 0x53e   :  { %v9228_v44 = vpop.eup %5397  ;;  %v3660_v5 = vadd.f32 %v4839_v61, %v9105_v50  ;;  %5411 = vpow2.f32 %v2850_v22  ;;  %v2951_v42 = vmul.f32 %v11123_v14, %v2935_v31 }
 0x53f   :  { %v2852_v21 = vmul.f32 1.442695, %v2821_v46  ;;  %v3654_v37 = vpop.f32.mrf.mxu1  ;;  %v2875_v3 = vsel %vm1123_vm1, %v9228_v44, 0.0  ;;  %v9235_v13 = vpop.eup %5399 }
 0x540   :  { %4461 = vst.msk [vmem:[%s9835_s6 + $0xd8] sm:$0xff] %vm97_vm0, %v3660_v5  ;;  %v3655_v1 = vadd.f32 %v9105_v50, %v3654_v37  ;;  %2873 = vadd.xlane.f32.xlu0 %v2872_v47  ;;  %2876 = vadd.xlane.f32.xlu1 %v2875_v3  ;;  %v2859_v17 = vpop.xlane.xlu1 %2858  ;;  %v2878_v0 = vsel %vm1123_vm1, %v9235_v13, 0.0 }
 0x541   :  { %5413 = vpow2.f32 %v2852_v21 }
 0x542   :  { %v9242_v52 = vpop.eup %5401  ;;  %4460 = vst.msk [vmem:[%s9835_s6 + $0xd0] sm:$0xff] %vm97_vm0, %v3655_v1  ;;  %5415 = vrcp.f32 %v2859_v17 }
 0x543   :  { %v9248_v32 = vpop.eup %5403  ;;  %v2881_v58 = vsel %vm1123_vm1, %v9242_v52, 0.0 }
 0x544   :  { %2879 = vadd.xlane.f32.xlu0 %v2878_v0  ;;  %2882 = vadd.xlane.f32.xlu1 %v2881_v58  ;;  %v2884_v15 = vsel %vm1123_vm1, %v9248_v32, 0.0 }
 0x545   :  { %v4842_v27 = vpop.f32.mrf.mxu1 }
 0x546   :  { %v9254_v11 = vpop.eup %5405  ;;  %v3670_v59 = vadd.f32 %v4842_v27, %v9105_v50 }
 0x547   :  { %v9257_v54 = vpop.eup %5407  ;;  %v3664_v45 = vpop.f32.mrf.mxu1  ;;  %v2887_v12 = vsel %vm1123_vm1, %v9254_v11, 0.0 }
 0x548   :  { %4463 = vst.msk [vmem:[%s9835_s6 + $0xe8] sm:$0xff] %vm97_vm0, %v3670_v59  ;;  %v3665_v28 = vadd.f32 %v9105_v50, %v3664_v45  ;;  %2885 = vadd.xlane.f32.xlu0 %v2884_v15  ;;  %2888 = vadd.xlane.f32.xlu1 %v2887_v12  ;;  %v2890_v7 = vsel %vm1123_vm1, %v9257_v54, 0.0 }
 0x54a   :  { %v9268_v39 = vpop.eup %5409  ;;  %4462 = vst.msk [vmem:[%s9835_s6 + $0xe0] sm:$0xff] %vm97_vm0, %v3665_v28 }
 0x54b   :  { %v2893_v48 = vsel %vm1123_vm1, %v9268_v39, 0.0  ;;  %v9278_v10 = vpop.eup %5411 }
 0x54c   :  { %2891 = vadd.xlane.f32.xlu0 %v2890_v7  ;;  %2894 = vadd.xlane.f32.xlu1 %v2893_v48  ;;  %v2896_v60 = vsel %vm1123_vm1, %v9278_v10, 0.0 }
 0x54d   :  { %v4845_v57 = vpop.f32.mrf.mxu1 }
 0x54e   :  { %v9280_v62 = vpop.eup %5413  ;;  %v3680_v34 = vadd.f32 %v4845_v57, %v9105_v50 }
 0x54f   :  { %v5416_v2 = vpop.eup %5415  ;;  %v3674_v25 = vpop.f32.mrf.mxu1  ;;  %v2899_v22 = vsel %vm1123_vm1, %v9280_v62, 0.0 }
 0x550   :  { %v2905_v4 = vmul.f32 %v5416_v2, %v8911_v41  ;;  %4465 = vst.msk [vmem:[%s9835_s6 + $0xf8] sm:$0xff] %vm97_vm0, %v3680_v34  ;;  %v3675_v56 = vadd.f32 %v9105_v50, %v3674_v25  ;;  %2897 = vadd.xlane.f32.xlu0 %v2896_v60  ;;  %2900 = vadd.xlane.f32.xlu1 %v2899_v22 }
 0x552   :  { %v2967_v46 = vmul.f32 %v2951_v42, %v2905_v4  ;;  %4464 = vst.msk [vmem:[%s9835_s6 + $0xf0] sm:$0xff] %vm97_vm0, %v3675_v56 }
 0x554   :  { %4337 = vst.msk [vmem:[%s9831_s8 + $0x188] sm:$0xff] %vm1123_vm1, %v2967_v46  ;;  %v9383_v46 = vld [vmem:[%s9836_s5] ss:$0 sm:$0xff] }
 0x557   :  { %v4848_v41 = vpop.f32.mrf.mxu1 }
 0x558   :  { %v3690_v61 = vadd.f32 %v4848_v41, %v9105_v50 }
 0x559   :  { %v3684_v5 = vpop.f32.mrf.mxu1 }
 0x55a   :  { %4483 = vst.msk [vmem:[%s9835_s6 + $0x108] sm:$0xff] %vm97_vm0, %v3690_v61  ;;  %v3685_v21 = vadd.f32 %v9105_v50, %v3684_v5 }
 0x55c   :  { %4482 = vst.msk [vmem:[%s9835_s6 + $0x100] sm:$0xff] %vm97_vm0, %v3685_v21 }
 0x55f   :  { %v4851_v37 = vpop.f32.mrf.mxu1 }
 0x560   :  { %v3700_v47 = vadd.f32 %v4851_v37, %v9105_v50 }
 0x561   :  { %v3694_v3 = vpop.f32.mrf.mxu1 }
 0x562   :  { %4485 = vst.msk [vmem:[%s9835_s6 + $0x118] sm:$0xff] %vm97_vm0, %v3700_v47  ;;  %v3695_v1 = vadd.f32 %v9105_v50, %v3694_v3 }
 0x564   :  { %4484 = vst.msk [vmem:[%s9835_s6 + $0x110] sm:$0xff] %vm97_vm0, %v3695_v1 }
 0x567   :  { %v4854_v17 = vpop.f32.mrf.mxu1 }
 0x568   :  { %v3710_v0 = vadd.f32 %v4854_v17, %v9105_v50 }
 0x569   :  { %v3704_v58 = vpop.f32.mrf.mxu1 }
 0x56a   :  { %4487 = vst.msk [vmem:[%s9835_s6 + $0x128] sm:$0xff] %vm97_vm0, %v3710_v0  ;;  %v3705_v27 = vadd.f32 %v9105_v50, %v3704_v58 }
 0x56c   :  { %4486 = vst.msk [vmem:[%s9835_s6 + $0x120] sm:$0xff] %vm97_vm0, %v3705_v27 }
 0x56f   :  { %v4857_v59 = vpop.f32.mrf.mxu1 }
 0x570   :  { %v3720_v45 = vadd.f32 %v4857_v59, %v9105_v50 }
 0x571   :  { %v3714_v15 = vpop.f32.mrf.mxu1 }
 0x572   :  { %4489 = vst.msk [vmem:[%s9835_s6 + $0x138] sm:$0xff] %vm97_vm0, %v3720_v45  ;;  %v3715_v12 = vadd.f32 %v9105_v50, %v3714_v15 }
 0x574   :  { %4488 = vst.msk [vmem:[%s9835_s6 + $0x130] sm:$0xff] %vm97_vm0, %v3715_v12 }
 0x577   :  { %v4860_v28 = vpop.f32.mrf.mxu1 }
 0x578   :  { %v3730_v7 = vadd.f32 %v4860_v28, %v9105_v50 }
 0x579   :  { %v3724_v48 = vpop.f32.mrf.mxu1 }
 0x57a   :  { %4491 = vst.msk [vmem:[%s9835_s6 + $0x148] sm:$0xff] %vm97_vm0, %v3730_v7  ;;  %v3725_v57 = vadd.f32 %v9105_v50, %v3724_v48 }
 0x57c   :  { %4490 = vst.msk [vmem:[%s9835_s6 + $0x140] sm:$0xff] %vm97_vm0, %v3725_v57 }
 0x57f   :  { %v4863_v9 = vpop.f32.mrf.mxu1 }
 0x580   :  { %v3740_v8 = vadd.f32 %v4863_v9, %v9105_v50 }
 0x581   :  { %v3734_v31 = vpop.f32.mrf.mxu1 }
 0x582   :  { %4493 = vst.msk [vmem:[%s9835_s6 + $0x158] sm:$0xff] %vm97_vm0, %v3740_v8  ;;  %v3735_v34 = vadd.f32 %v9105_v50, %v3734_v31 }
 0x584   :  { %4492 = vst.msk [vmem:[%s9835_s6 + $0x150] sm:$0xff] %vm97_vm0, %v3735_v34 }
 0x587   :  { %v4866_v2 = vpop.f32.mrf.mxu1 }
 0x588   :  { %v3750_v25 = vadd.f32 %v4866_v2, %v9105_v50 }
 0x589   :  { %v3744_v60 = vpop.f32.mrf.mxu1 }
 0x58a   :  { %4495 = vst.msk [vmem:[%s9835_s6 + $0x168] sm:$0xff] %vm97_vm0, %v3750_v25  ;;  %v3745_v22 = vadd.f32 %v9105_v50, %v3744_v60 }
 0x58c   :  { %4494 = vst.msk [vmem:[%s9835_s6 + $0x160] sm:$0xff] %vm97_vm0, %v3745_v22 }
 0x58f   :  { %v4869_v14 = vpop.f32.mrf.mxu1 }
 0x590   :  { %v3760_v42 = vadd.f32 %v4869_v14, %v9105_v50 }
 0x591   :  { %v3754_v4 = vpop.f32.mrf.mxu1 }
 0x592   :  { %4497 = vst.msk [vmem:[%s9835_s6 + $0x178] sm:$0xff] %vm97_vm0, %v3760_v42  ;;  %v3755_v56 = vadd.f32 %v9105_v50, %v3754_v4 }
 0x594   :  { %4496 = vst.msk [vmem:[%s9835_s6 + $0x170] sm:$0xff] %vm97_vm0, %v3755_v56  ;;  %v4800_v41 = vpop.f32.mrf.mxu0  ;;  %v4880_v61 = vpop.f32.mrf.mxu1 }
 0x595   :  { %v3530_v5 = vadd.f32 %v4800_v41, %v9105_v50  ;;  %v3846_v21 = vadd.f32 %v4880_v61, %v9383_v46 }
 0x596   :  { %v3524_v37 = vpop.f32.mrf.mxu0  ;;  %v3840_v47 = vpop.f32.mrf.mxu1 }
 0x597   :  { %4080 = vst.msk [vmem:[%s9835_s6 + $0x8] sm:$0xff] %vm97_vm0, %v3530_v5  ;;  %v3525_v3 = vadd.f32 %v9105_v50, %v3524_v37  ;;  %v3841_v1 = vadd.f32 %v9383_v46, %v3840_v47 }
 0x598   :  { %4097 = vst.msk [vmem:[%s9837_s7 + $0x8] sm:$0xff] %vm4095_vm2, %v3846_v21 }
 0x599   :  { %4079 = vst.msk [vmem:[%s9835_s6] sm:$0xff] %vm97_vm0, %v3525_v3 }
 0x59a   :  { %4096 = vst.msk [vmem:[%s9837_s7] sm:$0xff] %vm4095_vm2, %v3841_v1 }
 0x59b   :  { %v4803_v17 = vpop.f32.mrf.mxu0  ;;  %v4883_v0 = vpop.f32.mrf.mxu1 }
 0x59c   :  { %v3540_v58 = vadd.f32 %v4803_v17, %v9105_v50  ;;  %v3856_v27 = vadd.f32 %v4883_v0, %v9383_v46 }
 0x59d   :  { %v3534_v59 = vpop.f32.mrf.mxu0  ;;  %v3850_v45 = vpop.f32.mrf.mxu1 }
 0x59e   :  { %4082 = vst.msk [vmem:[%s9835_s6 + $0x18] sm:$0xff] %vm97_vm0, %v3540_v58  ;;  %v3535_v15 = vadd.f32 %v9105_v50, %v3534_v59  ;;  %v3851_v12 = vadd.f32 %v9383_v46, %v3850_v45 }
 0x59f   :  { %4099 = vst.msk [vmem:[%s9837_s7 + $0x18] sm:$0xff] %vm4095_vm2, %v3856_v27  ;;  %v4806_v28 = vpop.f32.mrf.mxu0  ;;  %v4886_v7 = vpop.f32.mrf.mxu1 }
 0x5a0   :  { %4081 = vst.msk [vmem:[%s9835_s6 + $0x10] sm:$0xff] %vm97_vm0, %v3535_v15  ;;  %v3550_v48 = vadd.f32 %v4806_v28, %v9105_v50  ;;  %v3866_v57 = vadd.f32 %v4886_v7, %v9383_v46 }
 0x5a1   :  { %4098 = vst.msk [vmem:[%s9837_s7 + $0x10] sm:$0xff] %vm4095_vm2, %v3851_v12  ;;  %v3544_v9 = vpop.f32.mrf.mxu0  ;;  %v3860_v8 = vpop.f32.mrf.mxu1 }
 0x5a2   :  { %4084 = vst.msk [vmem:[%s9835_s6 + $0x28] sm:$0xff] %vm97_vm0, %v3550_v48  ;;  %v3545_v31 = vadd.f32 %v9105_v50, %v3544_v9  ;;  %v3861_v34 = vadd.f32 %v9383_v46, %v3860_v8 }
 0x5a3   :  { %4101 = vst.msk [vmem:[%s9837_s7 + $0x28] sm:$0xff] %vm4095_vm2, %v3866_v57  ;;  %v4809_v2 = vpop.f32.mrf.mxu0  ;;  %v4889_v25 = vpop.f32.mrf.mxu1 }
 0x5a4   :  { %4083 = vst.msk [vmem:[%s9835_s6 + $0x20] sm:$0xff] %vm97_vm0, %v3545_v31  ;;  %v3560_v60 = vadd.f32 %v4809_v2, %v9105_v50  ;;  %v3876_v22 = vadd.f32 %v4889_v25, %v9383_v46 }
 0x5a5   :  { %4100 = vst.msk [vmem:[%s9837_s7 + $0x20] sm:$0xff] %vm4095_vm2, %v3861_v34  ;;  %v3554_v14 = vpop.f32.mrf.mxu0  ;;  %v3870_v42 = vpop.f32.mrf.mxu1 }
 0x5a6   :  { %4086 = vst.msk [vmem:[%s9835_s6 + $0x38] sm:$0xff] %vm97_vm0, %v3560_v60  ;;  %v3555_v4 = vadd.f32 %v9105_v50, %v3554_v14  ;;  %v3871_v56 = vadd.f32 %v9383_v46, %v3870_v42 }
 0x5a7   :  { %4103 = vst.msk [vmem:[%s9837_s7 + $0x38] sm:$0xff] %vm4095_vm2, %v3876_v22  ;;  %v4812_v41 = vpop.f32.mrf.mxu0  ;;  %v4892_v61 = vpop.f32.mrf.mxu1 }
 0x5a8   :  { %4085 = vst.msk [vmem:[%s9835_s6 + $0x30] sm:$0xff] %vm97_vm0, %v3555_v4  ;;  %v3570_v5 = vadd.f32 %v4812_v41, %v9105_v50  ;;  %v3886_v21 = vadd.f32 %v4892_v61, %v9383_v46 }
 0x5a9   :  { %4102 = vst.msk [vmem:[%s9837_s7 + $0x30] sm:$0xff] %vm4095_vm2, %v3871_v56  ;;  %v3564_v37 = vpop.f32.mrf.mxu0  ;;  %v3880_v47 = vpop.f32.mrf.mxu1 }
 0x5aa   :  { %4088 = vst.msk [vmem:[%s9835_s6 + $0x48] sm:$0xff] %vm97_vm0, %v3570_v5  ;;  %v3565_v3 = vadd.f32 %v9105_v50, %v3564_v37  ;;  %v3881_v1 = vadd.f32 %v9383_v46, %v3880_v47 }
 0x5ab   :  { %4105 = vst.msk [vmem:[%s9837_s7 + $0x48] sm:$0xff] %vm4095_vm2, %v3886_v21  ;;  %v4815_v17 = vpop.f32.mrf.mxu0  ;;  %v4895_v0 = vpop.f32.mrf.mxu1 }
 0x5ac   :  { %4087 = vst.msk [vmem:[%s9835_s6 + $0x40] sm:$0xff] %vm97_vm0, %v3565_v3  ;;  %v3580_v58 = vadd.f32 %v4815_v17, %v9105_v50  ;;  %v3896_v27 = vadd.f32 %v4895_v0, %v9383_v46 }
 0x5ad   :  { %4104 = vst.msk [vmem:[%s9837_s7 + $0x40] sm:$0xff] %vm4095_vm2, %v3881_v1  ;;  %v3574_v59 = vpop.f32.mrf.mxu0  ;;  %v3890_v45 = vpop.f32.mrf.mxu1 }
 0x5ae   :  { %4090 = vst.msk [vmem:[%s9835_s6 + $0x58] sm:$0xff] %vm97_vm0, %v3580_v58  ;;  %v3575_v15 = vadd.f32 %v9105_v50, %v3574_v59  ;;  %v3891_v12 = vadd.f32 %v9383_v46, %v3890_v45 }
 0x5af   :  { %4107 = vst.msk [vmem:[%s9837_s7 + $0x58] sm:$0xff] %vm4095_vm2, %v3896_v27  ;;  %v4818_v28 = vpop.f32.mrf.mxu0  ;;  %v4898_v7 = vpop.f32.mrf.mxu1 }
 0x5b0   :  { %4089 = vst.msk [vmem:[%s9835_s6 + $0x50] sm:$0xff] %vm97_vm0, %v3575_v15  ;;  %v3590_v48 = vadd.f32 %v4818_v28, %v9105_v50  ;;  %v3906_v57 = vadd.f32 %v4898_v7, %v9383_v46 }
 0x5b1   :  { %4106 = vst.msk [vmem:[%s9837_s7 + $0x50] sm:$0xff] %vm4095_vm2, %v3891_v12  ;;  %v3584_v9 = vpop.f32.mrf.mxu0  ;;  %v3900_v8 = vpop.f32.mrf.mxu1 }
 0x5b2   :  { %4092 = vst.msk [vmem:[%s9835_s6 + $0x68] sm:$0xff] %vm97_vm0, %v3590_v48  ;;  %v3585_v31 = vadd.f32 %v9105_v50, %v3584_v9  ;;  %v3901_v34 = vadd.f32 %v9383_v46, %v3900_v8 }
 0x5b3   :  { %4109 = vst.msk [vmem:[%s9837_s7 + $0x68] sm:$0xff] %vm4095_vm2, %v3906_v57 }
 0x5b4   :  { %4091 = vst.msk [vmem:[%s9835_s6 + $0x60] sm:$0xff] %vm97_vm0, %v3585_v31  ;;  %v4821_v2 = vpop.f32.mrf.mxu0  ;;  %v4901_v25 = vpop.f32.mrf.mxu1 }
 0x5b5   :  { %4108 = vst.msk [vmem:[%s9837_s7 + $0x60] sm:$0xff] %vm4095_vm2, %v3901_v34  ;;  %v3600_v60 = vadd.f32 %v4821_v2, %v9105_v50  ;;  %v3916_v22 = vadd.f32 %v4901_v25, %v9383_v46  ;;  %v11124_v2 = vld [vmem:[#allocation19_spill] sm:$0xff] }
 0x5b6   :  { %v3594_v14 = vpop.f32.mrf.mxu0  ;;  %v3910_v42 = vpop.f32.mrf.mxu1  ;;  %v2934_v25 = vsub.f32 %v11109_v26, %v11124_v2 }
 0x5b7   :  { %4094 = vst.msk [vmem:[%s9835_s6 + $0x78] sm:$0xff] %vm97_vm0, %v3600_v60  ;;  %v3595_v4 = vadd.f32 %v9105_v50, %v3594_v14  ;;  %v3911_v56 = vadd.f32 %v9383_v46, %v3910_v42  ;;  %v11125_v42 = vld [vmem:[#allocation63_spill] sm:$0xff] }
 0x5b8   :  { %4111 = vst.msk [vmem:[%s9837_s7 + $0x78] sm:$0xff] %vm4095_vm2, %v3916_v22  ;;  %v4904_v41 = vpop.f32.mrf.mxu1 }
 0x5b9   :  { %4093 = vst.msk [vmem:[%s9835_s6 + $0x70] sm:$0xff] %vm97_vm0, %v3595_v4  ;;  %v3926_v61 = vadd.f32 %v4904_v41, %v9383_v46  ;;  %v2950_v4 = vmul.f32 %v11125_v42, %v2934_v25 }
 0x5ba   :  { %4110 = vst.msk [vmem:[%s9837_s7 + $0x70] sm:$0xff] %vm4095_vm2, %v3911_v56  ;;  %v3920_v5 = vpop.f32.mrf.mxu1 }
 0x5bb   :  { %4467 = vst.msk [vmem:[%s9837_s7 + $0x88] sm:$0xff] %vm4095_vm2, %v3926_v61  ;;  %v3921_v50 = vadd.f32 %v9383_v46, %v3920_v5 }
 0x5bc   :  { %v4907_v21 = vpop.f32.mrf.mxu1 }
 0x5bd   :  { %4466 = vst.msk [vmem:[%s9837_s7 + $0x80] sm:$0xff] %vm4095_vm2, %v3921_v50  ;;  %v3936_v37 = vadd.f32 %v4907_v21, %v9383_v46  ;;  %v2856_v47 = vpop.xlane.xlu0 %2855  ;;  %v11126_v50 = vld [vmem:[#allocation90_spill] sm:$0xff] }
 0x5be   :  { %5417 = vrcp.f32 %v2856_v47  ;;  %v3930_v3 = vpop.f32.mrf.mxu1  ;;  %v2936_v21 = vsub.f32 %v11108_v49, %v11126_v50 }
 0x5bf   :  { %4469 = vst.msk [vmem:[%s9837_s7 + $0x98] sm:$0xff] %vm4095_vm2, %v3936_v37  ;;  %v3931_v1 = vadd.f32 %v9383_v46, %v3930_v3 }
 0x5c0   :  { %v4910_v17 = vpop.f32.mrf.mxu1 }
 0x5c1   :  { %4468 = vst.msk [vmem:[%s9837_s7 + $0x90] sm:$0xff] %vm4095_vm2, %v3931_v1  ;;  %v3946_v0 = vadd.f32 %v4910_v17, %v9383_v46  ;;  %v2862_v58 = vpop.xlane.xlu0 %2861  ;;  %v2865_v27 = vpop.xlane.xlu1 %2864  ;;  %v11127_v1 = vld [vmem:[#allocation82_spill] sm:$0xff] }
 0x5c2   :  { %5419 = vrcp.f32 %v2862_v58  ;;  %v3940_v59 = vpop.f32.mrf.mxu1  ;;  %v11128_v58 = vld [vmem:[#allocation13_spill] sm:$0xff] }
 0x5c3   :  { %4471 = vst.msk [vmem:[%s9837_s7 + $0xa8] sm:$0xff] %vm4095_vm2, %v3946_v0  ;;  %5421 = vrcp.f32 %v2865_v27  ;;  %v3941_v45 = vadd.f32 %v9383_v46, %v3940_v59  ;;  %v2952_v27 = vmul.f32 %v11128_v58, %v2936_v21 }
 0x5c4   :  { %v4913_v15 = vpop.f32.mrf.mxu1 }
 0x5c5   :  { %4470 = vst.msk [vmem:[%s9837_s7 + $0xa0] sm:$0xff] %vm4095_vm2, %v3941_v45  ;;  %v3956_v12 = vadd.f32 %v4913_v15, %v9383_v46  ;;  %v2868_v28 = vpop.xlane.xlu0 %2867  ;;  %v2871_v7 = vpop.xlane.xlu1 %2870 }
 0x5c6   :  { %5423 = vrcp.f32 %v2868_v28  ;;  %v3950_v48 = vpop.f32.mrf.mxu1 }
 0x5c7   :  { %4473 = vst.msk [vmem:[%s9837_s7 + $0xb8] sm:$0xff] %vm4095_vm2, %v3956_v12  ;;  %5425 = vrcp.f32 %v2871_v7  ;;  %v3951_v57 = vadd.f32 %v9383_v46, %v3950_v48  ;;  %v11130_v48 = vld [vmem:[#allocation100_spill] sm:$0xff] }
 0x5c8   :  { %v4916_v9 = vpop.f32.mrf.mxu1 }
 0x5c9   :  { %4472 = vst.msk [vmem:[%s9837_s7 + $0xb0] sm:$0xff] %vm4095_vm2, %v3951_v57  ;;  %v3966_v8 = vadd.f32 %v4916_v9, %v9383_v46  ;;  %v2874_v31 = vpop.xlane.xlu0 %2873  ;;  %v2877_v34 = vpop.xlane.xlu1 %2876  ;;  %v2938_v57 = vsub.f32 %v11110_v19, %v11130_v48 }
 0x5ca   :  { %5427 = vrcp.f32 %v2874_v31  ;;  %v3960_v60 = vpop.f32.mrf.mxu1  ;;  %v11131_v31 = vld [vmem:[#allocation116_spill] sm:$0xff] }
 0x5cb   :  { %v5418_v22 = vpop.eup %5417  ;;  %4475 = vst.msk [vmem:[%s9837_s7 + $0xc8] sm:$0xff] %vm4095_vm2, %v3966_v8  ;;  %5429 = vrcp.f32 %v2877_v34  ;;  %v3961_v14 = vadd.f32 %v9383_v46, %v3960_v60  ;;  %v2939_v34 = vsub.f32 %v11113_v53, %v11131_v31  ;;  %v11132_v60 = vld [vmem:[#allocation69_spill] sm:$0xff] }
 0x5cc   :  { %v2903_v56 = vmul.f32 %v5418_v22, %v9185_v16  ;;  %v4919_v41 = vpop.f32.mrf.mxu1  ;;  %v2937_v16 = vsub.f32 %v11111_v24, %v11127_v1  ;;  %v11129_v24 = vld [vmem:[#allocation18_spill] sm:$0xff]  ;;  %v2954_v22 = vmul.f32 %v11132_v60, %v2938_v57  ;;  %v11141_v31 = vld [vmem:[#allocation53_spill] sm:$0xff] }
 0x5cd   :  { %4474 = vst.msk [vmem:[%s9837_s7 + $0xc0] sm:$0xff] %vm4095_vm2, %v3961_v14  ;;  %v3976_v26 = vadd.f32 %v4919_v41, %v9383_v46  ;;  %v2880_v61 = vpop.xlane.xlu0 %2879  ;;  %v2883_v5 = vpop.xlane.xlu1 %2882  ;;  %v11133_v14 = vld [vmem:[#allocation4_spill] sm:$0xff] }
 0x5ce   :  { %v2966_v37 = vmul.f32 %v2950_v4, %v2903_v56  ;;  %5431 = vrcp.f32 %v2880_v61  ;;  %v3970_v47 = vpop.f32.mrf.mxu1  ;;  %v2953_v45 = vmul.f32 %v11129_v24, %v2937_v16  ;;  %v2955_v42 = vmul.f32 %v11133_v14, %v2939_v34  ;;  %v11136_v16 = vld [vmem:[#allocation31_spill] sm:$0xff] }
 0x5cf   :  { %v5420_v3 = vpop.eup %5419  ;;  %4477 = vst.msk [vmem:[%s9837_s7 + $0xd8] sm:$0xff] %vm4095_vm2, %v3976_v26  ;;  %5433 = vrcp.f32 %v2883_v5  ;;  %v3971_v17 = vadd.f32 %v9383_v46, %v3970_v47 }
 0x5d0   :  { %v5422_v0 = vpop.eup %5421  ;;  %4336 = vst.msk [vmem:[%s9831_s8 + $0x180] sm:$0xff] %vm1123_vm1, %v2966_v37  ;;  %v2907_v49 = vmul.f32 %v5420_v3, %v9194_v63  ;;  %v4922_v59 = vpop.f32.mrf.mxu1  ;;  %v11135_v37 = vld [vmem:[#allocation125_spill] sm:$0xff] }
 0x5d1   :  { %v2909_v15 = vmul.f32 %v5422_v0, %v9199_v6  ;;  %4476 = vst.msk [vmem:[%s9837_s7 + $0xd0] sm:$0xff] %vm4095_vm2, %v3971_v17  ;;  %v3986_v12 = vadd.f32 %v4922_v59, %v9383_v46  ;;  %v2886_v28 = vpop.xlane.xlu0 %2885  ;;  %v2889_v7 = vpop.xlane.xlu1 %2888  ;;  %v2941_v47 = vsub.f32 %v11024_v43, %v11135_v37  ;;  %v11137_v0 = vld [vmem:[#allocation36_spill] sm:$0xff] }
 0x5d2   :  { %v2968_v9 = vmul.f32 %v2952_v27, %v2907_v49  ;;  %5435 = vrcp.f32 %v2886_v28  ;;  %v3980_v63 = vpop.f32.mrf.mxu1 }
 0x5d3   :  { %v5424_v8 = vpop.eup %5423  ;;  %v2969_v6 = vmul.f32 %v2953_v45, %v2909_v15  ;;  %4479 = vst.msk [vmem:[%s9837_s7 + $0xe8] sm:$0xff] %vm4095_vm2, %v3986_v12  ;;  %5437 = vrcp.f32 %v2889_v7  ;;  %v3981_v2 = vadd.f32 %v9383_v46, %v3980_v63  ;;  %v2957_v58 = vmul.f32 %v11137_v0, %v2941_v47  ;;  %v11139_v7 = vld [vmem:[#allocation56_spill] sm:$0xff]  ;;  %v11140_v63 = vld [vmem:[#allocation81_spill] sm:$0xff] }
 0x5d4   :  { %v5426_v25 = vpop.eup %5425  ;;  %4338 = vst.msk [vmem:[%s9831_s8 + $0x190] sm:$0xff] %vm1123_vm1, %v2968_v9  ;;  %v2911_v19 = vmul.f32 %v5424_v8, %v9207_v23  ;;  %v4925_v53 = vpop.f32.mrf.mxu1  ;;  %v11134_v23 = vld [vmem:[#allocation7_spill] sm:$0xff]  ;;  %v2943_v48 = vsub.f32 %v11116_v29, %v11139_v7 }
 0x5d5   :  { %4339 = vst.msk [vmem:[%s9831_s8 + $0x198] sm:$0xff] %vm1123_vm1, %v2969_v6  ;;  %v2913_v4 = vmul.f32 %v5426_v25, %v9215_v40  ;;  %v3996_v56 = vadd.f32 %v4925_v53, %v9383_v46  ;;  %v2892_v41 = vpop.xlane.xlu0 %2891  ;;  %v2895_v26 = vpop.xlane.xlu1 %2894  ;;  %v2940_v61 = vsub.f32 %v11112_v33, %v11134_v23  ;;  %v11142_v25 = vld [vmem:[#allocation88_spill] sm:$0xff]  ;;  %v11152_v7 = vld [vmem:[#allocation107_spill] sm:$0xff] }
 0x5d6   :  { %4478 = vst.msk [vmem:[%s9837_s7 + $0xe0] sm:$0xff] %vm4095_vm2, %v3981_v2  ;;  %v2970_v5 = vmul.f32 %v2954_v22, %v2911_v19  ;;  %5439 = vrcp.f32 %v2892_v41  ;;  %v3990_v50 = vpop.f32.mrf.mxu1  ;;  %v2959_v34 = vmul.f32 %v11141_v31, %v2943_v48  ;;  %v11143_v53 = vld [vmem:[#allocation108_spill] sm:$0xff] }
 0x5d7   :  { %v5428_v21 = vpop.eup %5427  ;;  %v2971_v40 = vmul.f32 %v2955_v42, %v2913_v4  ;;  %4481 = vst.msk [vmem:[%s9837_s7 + $0xf8] sm:$0xff] %vm4095_vm2, %v3996_v56  ;;  %5441 = vrcp.f32 %v2895_v26  ;;  %v3991_v3 = vadd.f32 %v9383_v46, %v3990_v50  ;;  %v2956_v17 = vmul.f32 %v11136_v16, %v2940_v61  ;;  %v11144_v56 = vld [vmem:[#allocation94_spill] sm:$0xff]  ;;  %v11146_v50 = vld [vmem:[#allocation27_spill] sm:$0xff] }
 0x5d8   :  { %v5430_v1 = vpop.eup %5429  ;;  %4340 = vst.msk [vmem:[%s9831_s8 + $0x1a0] sm:$0xff] %vm1123_vm1, %v2970_v5  ;;  %v2915_v33 = vmul.f32 %v5428_v21, %v9225_v55  ;;  %v4928_v43 = vpop.f32.mrf.mxu1  ;;  %v11138_v55 = vld [vmem:[#allocation99_spill] sm:$0xff]  ;;  %v2945_v14 = vsub.f32 %v11118_v36, %v11143_v53  ;;  %v11145_v36 = vld [vmem:[#allocation122_spill] sm:$0xff] }
 0x5d9   :  { %4341 = vst.msk [vmem:[%s9831_s8 + $0x1a8] sm:$0xff] %vm1123_vm1, %v2971_v40  ;;  %v2917_v27 = vmul.f32 %v5430_v1, %v9228_v44  ;;  %v4006_v49 = vadd.f32 %v4928_v43, %v9383_v46  ;;  %v2898_v59 = vpop.xlane.xlu0 %2897  ;;  %v2901_v24 = vpop.xlane.xlu1 %2900  ;;  %v2942_v45 = vsub.f32 %v11114_v20, %v11138_v55  ;;  %v11147_v40 = vld [vmem:[#allocation114_spill] sm:$0xff] }
 0x5da   :  { %4480 = vst.msk [vmem:[%s9837_s7 + $0xf0] sm:$0xff] %vm4095_vm2, %v3991_v3  ;;  %v2972_v15 = vmul.f32 %v2956_v17, %v2915_v33  ;;  %5443 = vrcp.f32 %v2898_v59  ;;  %v4000_v12 = vpop.f32.mrf.mxu1  ;;  %v2961_v23 = vmul.f32 %v11145_v36, %v2945_v14  ;;  %v2947_v3 = vsub.f32 %v11120_v18, %v11147_v40  ;;  %v11148_v17 = vld [vmem:[#allocation17_spill] sm:$0xff] }
 0x5db   :  { %v5432_v28 = vpop.eup %5431  ;;  %v2973_v44 = vmul.f32 %v2957_v58, %v2917_v27  ;;  %4499 = vst.msk [vmem:[%s9837_s7 + $0x108] sm:$0xff] %vm4095_vm2, %v4006_v49  ;;  %5445 = vrcp.f32 %v2901_v24  ;;  %v4001_v57 = vadd.f32 %v9383_v46, %v4000_v12  ;;  %v2958_v8 = vmul.f32 %v11140_v63, %v2942_v45  ;;  %v11149_v18 = vld [vmem:[#allocation57_spill] sm:$0xff]  ;;  %v11150_v49 = vld [vmem:[#allocation96_spill] sm:$0xff]  ;;  %v11151_v45 = vld [vmem:[#allocation115_spill] sm:$0xff] }
 0x5dc   :  { %v5434_v9 = vpop.eup %5433  ;;  %4342 = vst.msk [vmem:[%s9831_s8 + $0x1b0] sm:$0xff] %vm1123_vm1, %v2972_v15  ;;  %v2919_v20 = vmul.f32 %v5432_v28, %v9235_v13  ;;  %v4931_v29 = vpop.f32.mrf.mxu1  ;;  %v2944_v13 = vsub.f32 %v11115_v51, %v11142_v25  ;;  %v2963_v0 = vmul.f32 %v11149_v18, %v2947_v3  ;;  %v2949_v15 = vsub.f32 %v11033_v30, %v11151_v45  ;;  %v11153_v30 = vld [vmem:[#allocation14_spill] sm:$0xff] }
 0x5dd   :  { %4343 = vst.msk [vmem:[%s9831_s8 + $0x1b8] sm:$0xff] %vm1123_vm1, %v2973_v44  ;;  %v2921_v6 = vmul.f32 %v5434_v9, %v9242_v52  ;;  %v4016_v2 = vadd.f32 %v4931_v29, %v9383_v46 }
 0x5de   :  { %4498 = vst.msk [vmem:[%s9837_s7 + $0x100] sm:$0xff] %vm4095_vm2, %v4001_v57  ;;  %v2974_v60 = vmul.f32 %v2958_v8, %v2919_v20  ;;  %v4010_v22 = vpop.f32.mrf.mxu1  ;;  %v2960_v41 = vmul.f32 %v11144_v56, %v2944_v13  ;;  %v2965_v57 = vmul.f32 %v11153_v30, %v2949_v15 }
 0x5df   :  { %v5436_v19 = vpop.eup %5435  ;;  %v2975_v42 = vmul.f32 %v2959_v34, %v2921_v6  ;;  %4501 = vst.msk [vmem:[%s9837_s7 + $0x118] sm:$0xff] %vm4095_vm2, %v4016_v2  ;;  %v4011_v52 = vadd.f32 %v9383_v46, %v4010_v22 }
 0x5e0   :  { %v5438_v4 = vpop.eup %5437  ;;  %4344 = vst.msk [vmem:[%s9831_s8 + $0x1c0] sm:$0xff] %vm1123_vm1, %v2974_v60  ;;  %v2923_v51 = vmul.f32 %v5436_v19, %v9248_v32  ;;  %v4934_v26 = vpop.f32.mrf.mxu1  ;;  %v2946_v32 = vsub.f32 %v11117_v35, %v11146_v50 }
 0x5e1   :  { %4345 = vst.msk [vmem:[%s9831_s8 + $0x1c8] sm:$0xff] %vm1123_vm1, %v2975_v42  ;;  %v2925_v61 = vmul.f32 %v5438_v4, %v9254_v11  ;;  %v4026_v5 = vadd.f32 %v4934_v26, %v9383_v46 }
 0x5e2   :  { %4500 = vst.msk [vmem:[%s9837_s7 + $0x110] sm:$0xff] %vm4095_vm2, %v4011_v52  ;;  %v2976_v21 = vmul.f32 %v2960_v41, %v2923_v51  ;;  %v4020_v37 = vpop.f32.mrf.mxu1  ;;  %v2962_v33 = vmul.f32 %v11148_v17, %v2946_v32 }
 0x5e3   :  { %v5440_v47 = vpop.eup %5439  ;;  %v2977_v1 = vmul.f32 %v2961_v23, %v2925_v61  ;;  %4503 = vst.msk [vmem:[%s9837_s7 + $0x128] sm:$0xff] %vm4095_vm2, %v4026_v5  ;;  %v4021_v11 = vadd.f32 %v9383_v46, %v4020_v37 }
 0x5e4   :  { %v5442_v16 = vpop.eup %5441  ;;  %4346 = vst.msk [vmem:[%s9831_s8 + $0x1d0] sm:$0xff] %vm1123_vm1, %v2976_v21  ;;  %v2927_v35 = vmul.f32 %v5440_v47, %v9257_v54  ;;  %v4937_v43 = vpop.f32.mrf.mxu1  ;;  %v2948_v54 = vsub.f32 %v11119_v38, %v11150_v49 }
 0x5e5   :  { %4347 = vst.msk [vmem:[%s9831_s8 + $0x1d8] sm:$0xff] %vm1123_vm1, %v2977_v1  ;;  %v2929_v58 = vmul.f32 %v5442_v16, %v9268_v39  ;;  %v4036_v27 = vadd.f32 %v4937_v43, %v9383_v46 }
 0x5e6   :  { %4502 = vst.msk [vmem:[%s9837_s7 + $0x120] sm:$0xff] %vm4095_vm2, %v4021_v11  ;;  %v2978_v59 = vmul.f32 %v2962_v33, %v2927_v35  ;;  %v4030_v24 = vpop.f32.mrf.mxu1  ;;  %v2964_v48 = vmul.f32 %v11152_v7, %v2948_v54 }
 0x5e7   :  { %v5444_v55 = vpop.eup %5443  ;;  %v2979_v12 = vmul.f32 %v2963_v0, %v2929_v58  ;;  %4505 = vst.msk [vmem:[%s9837_s7 + $0x138] sm:$0xff] %vm4095_vm2, %v4036_v27  ;;  %v4031_v39 = vadd.f32 %v9383_v46, %v4030_v24 }
 0x5e8   :  { %v5446_v28 = vpop.eup %5445  ;;  %4348 = vst.msk [vmem:[%s9831_s8 + $0x1e0] sm:$0xff] %vm1123_vm1, %v2978_v59  ;;  %v2931_v38 = vmul.f32 %v5444_v55, %v9278_v10  ;;  %v4940_v44 = vpop.f32.mrf.mxu1 }
 0x5e9   :  { %4349 = vst.msk [vmem:[%s9831_s8 + $0x1e8] sm:$0xff] %vm1123_vm1, %v2979_v12  ;;  %v2933_v9 = vmul.f32 %v5446_v28, %v9280_v62  ;;  %v4046_v63 = vadd.f32 %v4940_v44, %v9383_v46 }
 0x5ea   :  { %4504 = vst.msk [vmem:[%s9837_s7 + $0x130] sm:$0xff] %vm4095_vm2, %v4031_v39  ;;  %v2980_v8 = vmul.f32 %v2964_v48, %v2931_v38  ;;  %v4040_v20 = vpop.f32.mrf.mxu1 }
 0x5eb   :  { %v2981_v10 = vmul.f32 %v2965_v57, %v2933_v9  ;;  %4507 = vst.msk [vmem:[%s9837_s7 + $0x148] sm:$0xff] %vm4095_vm2, %v4046_v63  ;;  %v4041_v29 = vadd.f32 %v9383_v46, %v4040_v20 }
 0x5ec   :  { %4350 = vst.msk [vmem:[%s9831_s8 + $0x1f0] sm:$0xff] %vm1123_vm1, %v2980_v8  ;;  %v4943_v62 = vpop.f32.mrf.mxu1 }
 0x5ed   :  { %4351 = vst.msk [vmem:[%s9831_s8 + $0x1f8] sm:$0xff] %vm1123_vm1, %v2981_v10  ;;  %v4056_v31 = vadd.f32 %v4943_v62, %v9383_v46 }
 0x5ee   :  { %4506 = vst.msk [vmem:[%s9837_s7 + $0x140] sm:$0xff] %vm4095_vm2, %v4041_v29  ;;  %v4050_v34 = vpop.f32.mrf.mxu1 }
 0x5ef   :  { %4509 = vst.msk [vmem:[%s9837_s7 + $0x158] sm:$0xff] %vm4095_vm2, %v4056_v31  ;;  %v4051_v6 = vadd.f32 %v9383_v46, %v4050_v34 }
 0x5f0   :  { %v4946_v2 = vpop.f32.mrf.mxu1 }
 0x5f1   :  { %4508 = vst.msk [vmem:[%s9837_s7 + $0x150] sm:$0xff] %vm4095_vm2, %v4051_v6  ;;  %v4066_v25 = vadd.f32 %v4946_v2, %v9383_v46 }
 0x5f2   :  { %v4060_v13 = vpop.f32.mrf.mxu1 }
 0x5f3   :  { %4511 = vst.msk [vmem:[%s9837_s7 + $0x168] sm:$0xff] %vm4095_vm2, %v4066_v25  ;;  %v4061_v60 = vadd.f32 %v9383_v46, %v4060_v13 }
 0x5f4   :  { %v4949_v22 = vpop.f32.mrf.mxu1 }
 0x5f5   :  { %4510 = vst.msk [vmem:[%s9837_s7 + $0x160] sm:$0xff] %vm4095_vm2, %v4061_v60  ;;  %v4076_v19 = vadd.f32 %v4949_v22, %v9383_v46 }
 0x5f6   :  { %v4070_v53 = vpop.f32.mrf.mxu1 }
 0x5f7   :  { %4513 = vst.msk [vmem:[%s9837_s7 + $0x178] sm:$0xff] %vm4095_vm2, %v4076_v19  ;;  %v4071_v14 = vadd.f32 %v9383_v46, %v4070_v53 }
 0x5f9   :  { %4512 = vst.msk [vmem:[%s9837_s7 + $0x170] sm:$0xff] %vm4095_vm2, %v4071_v14 }

</bundles_post_ra>
